<compile_context>
chip_gen: v5e
topology: v5e:2x2
jax: 0.10.0
libtpu: 0.0.40
codegen_flags: <defaults>
</compile_context>

<pallas_src>
import functools
import math

import jax
import jax.numpy as jnp
from jax import lax
from jax.experimental import pallas as pl
from jax.experimental.pallas import tpu as pltpu

_SQRT_HALF = 0.7071067811865476
_SQRT_2_OVER_PI = 0.7978845608028654
_GN_EPS = 1e-5                  # torch.nn.GroupNorm default
_NUM_GROUPS = 4
_INV_1414 = 1.0 / 1.414
_SUBLANE_BF16 = 16              # bf16 sublane tile -> per-tap channel stride
_VMEM_GROW_BUDGET = 12 << 20    # grow samples-per-step while estimate stays under this


def _gelu(x):
    # tanh-approx GELU: transcendental goes to the otherwise-idle EUP slot.
    # |err| vs the exact erf GELU < ~3e-3 (documented intentional deviation).
    return 0.5 * x * (1.0 + jnp.tanh(_SQRT_2_OVER_PI * (x + 0.044715 * x * x * x)))


def _gn_gelu(y, selm, m_t, gmat, gamma, beta, B):
    """GroupNorm(4, C) + GELU on a (C, B*L) slab holding B samples along lanes.

    selm (B*L, B) selects each sample's valid pixels (wrap-around garbage columns
    carry weight 0), m_t (B, B*L) is its transpose.  gmat (C, C) mixes channels
    into groups and carries 1/(cpg*H*W), applied AFTER the lane reduction.
    """
    s1 = jnp.dot(y, selm, preferred_element_type=jnp.float32)         # (C, B)
    s2 = jnp.dot(y * y, selm, preferred_element_type=jnp.float32)     # (C, B)
    # one (C, C) @ (C, 2B) matmul for both group sums (fused per review)
    g = jnp.dot(gmat, jnp.concatenate([s1, s2], axis=1),
                preferred_element_type=jnp.float32)                   # (C, 2B)
    gmean, gmsq = g[:, :B], g[:, B:]
    # NOTE: single-pass E[y^2]-mean^2 variance (biased, matching torch GroupNorm);
    # adequate at 3e-2 tolerance - switch to two-pass if tolerances tighten.
    var = gmsq - gmean * gmean
    inv = lax.rsqrt(var + _GN_EPS)
    scale = gamma * inv                                               # (C, B)
    shift = beta - gmean * scale                                      # (C, B)
    # Broadcast per-sample scale/shift over lanes with tiny MXU matmuls.  m_t folds
    # the valid-pixel mask, so garbage columns come out exactly gelu(0) == 0 and no
    # extra masking is needed before the stage-2 re-pad.
    scale_f = jnp.dot(scale, m_t, preferred_element_type=jnp.float32)  # (C, B*L)
    shift_f = jnp.dot(shift, m_t, preferred_element_type=jnp.float32)
    return _gelu(y * scale_f + shift_f)


def _fused_kernel(x_ref, w1_ref, w2_ref, pvec_ref, gmat_ref, selm_ref, mt_ref,
                  out_ref, xp2_ref, col1_ref, col2_ref,
                  *, H, W, Cin, Cout, B, is_res, same_channels):
    Wp = W + 2
    L = H * Wp                      # flattened output columns per sample
    Pp = (H + 2) * Wp + 2           # per-sample padded flat length (+2 tap overhang)
    Cp1 = col1_ref.shape[0] // 9    # per-tap (sublane-tile padded) channel stride
    Cp2 = col2_ref.shape[0] // 9

    # One-time init of persistent scratch: col pad rows / xp2 borders must be zero;
    # the data rows / interior are fully rewritten every step, so borders stay zero.
    @pl.when(pl.program_id(0) == 0)
    def _():
        col1_ref[...] = jnp.zeros(col1_ref.shape, col1_ref.dtype)
        col2_ref[...] = jnp.zeros(col2_ref.shape, col2_ref.dtype)
        xp2_ref[...] = jnp.zeros(xp2_ref.shape, xp2_ref.dtype)

    pv = pvec_ref[...]                                   # packed (Cout, 8) params
    b1, g1, be1 = pv[:, 0:1], pv[:, 1:2], pv[:, 2:3]
    b2, g2, be2 = pv[:, 3:4], pv[:, 4:5], pv[:, 5:6]
    gmat = gmat_ref[...]
    selm = selm_ref[...]
    m_t = mt_ref[...]

    # ---- stage 1: im2col (bf16 cast fused into the tap copies) + one MXU matmul ----
    for dh in range(3):
        for dw in range(3):
            k = dh * 3 + dw
            off = dh * Wp + dw
            tap = jnp.concatenate(
                [x_ref[b, :, off:off + L] for b in range(B)], axis=1)   # (Cin, B*L) f32
            col1_ref[k * Cp1:k * Cp1 + Cin, :] = tap.astype(jnp.bfloat16)
    y1 = jnp.dot(w1_ref[...], col1_ref[...],
                 preferred_element_type=jnp.float32) + b1               # (Cout, B*L)
    x1 = _gn_gelu(y1, selm, m_t, gmat, g1, be1, B)       # f32, garbage columns == 0

    # ---- re-pad x1 in VMEM: interior stores only (borders stay zero from init) ----
    x1_bf = x1.astype(jnp.bfloat16)
    for b in range(B):
        xp2_ref[:, b * Pp + Wp + 1:b * Pp + Wp + 1 + L] = x1_bf[:, b * L:(b + 1) * L]

    # ---- stage 2 ----
    for dh in range(3):
        for dw in range(3):
            k = dh * 3 + dw
            off = dh * Wp + dw
            tap = jnp.concatenate(
                [xp2_ref[:, b * Pp + off:b * Pp + off + L] for b in range(B)], axis=1)
            col2_ref[k * Cp2:k * Cp2 + Cout, :] = tap
    y2 = jnp.dot(w2_ref[...], col2_ref[...],
                 preferred_element_type=jnp.float32) + b2
    x2 = _gn_gelu(y2, selm, m_t, gmat, g2, be2, B)

    if is_res:
        if same_channels:
            # exact f32 residual read straight from the f32 input block
            res = jnp.concatenate(
                [x_ref[b, :, Wp + 1:Wp + 1 + L] for b in range(B)], axis=1)
        else:
            res = x1
        x2 = (res + x2) * _INV_1414

    out_ref[0] = x2                                      # lane-dense (Cout, B*L) store


@functools.partial(jax.jit, static_argnames=("is_res",))
def residual_conv_block(x_nchw, params, *, is_res):
    """Forward pass of ResidualConvBlock. x_nchw: (N, Cin, H, W) float32."""
    N, Cin, H, W = x_nchw.shape
    Cout = params["w1"].shape[-1]
    assert Cout % _NUM_GROUPS == 0
    same_channels = (Cin == Cout)
    Hp, Wp = H + 2, W + 2
    L = H * Wp
    Pp = Hp * Wp + 2
    Cp1 = -(-Cin // _SUBLANE_BF16) * _SUBLANE_BF16
    Cp2 = -(-Cout // _SUBLANE_BF16) * _SUBLANE_BF16

    # Samples per grid step: smallest B with (B*L) % 128 == 0 gives lane-dense
    # matmul/output; grow in multiples of that while the VMEM estimate stays small.
    B0 = 128 // math.gcd(L, 128)

    def est_vmem(b):
        bl = b * L
        return (2 * b * Cin * Pp * 4 + 2 * Cout * bl * 4          # in/out blocks (2x)
                + 9 * (Cp1 + Cp2) * bl * 2 + Cout * b * Pp * 2    # col1, col2, xp2
                + 4 * bl * b * 4                                  # selm + mT (2x)
                + 2 * (9 * (Cp1 + Cp2) * Cout * 2 + Cout * 8 * 4 + Cout * Cout * 4))

    kmax = max(1, -(-N // B0))
    k = 1
    while k < kmax and est_vmem(B0 * (k + 1)) <= _VMEM_GROW_BUDGET:
        k += 1
    B = B0 * k
    n_steps = -(-N // B)
    N_pad = n_steps * B
    BL = B * L
    # TODO(synk): for large H*W*C add a spatial row-tile grid axis (with halo) and
    # re-derive the tile per generation (v7x: 64 MiB physical VMEM); optionally use
    # the 9-tap MRB-accumulated matmul on v7x to drop the col buffers entirely.
    vmem_limit = int(min(max(est_vmem(B) + (8 << 20), 32 << 20), 100 << 20))

    # Padded, flattened f32 input (no XLA bf16 cast pass; cast happens in-kernel).
    xpad = jnp.pad(x_nchw, ((0, N_pad - N), (0, 0), (1, 1), (1, 1)))
    xflat = jnp.pad(xpad.reshape(N_pad, Cin, Hp * Wp), ((0, 0), (0, 0), (0, 2)))
    xflat = xflat.astype(jnp.float32)

    # Conv weights -> (Cout, 9*Cpad) bf16 im2col layout, per-tap channel stride
    # padded to the bf16 sublane tile; pad columns are zero.
    def pack_w(w, cin, cpad):
        wt = jnp.transpose(w.astype(jnp.float32), (3, 0, 1, 2)).reshape(Cout, 9, cin)
        full = jnp.zeros((Cout, 9, cpad), jnp.float32).at[:, :, :cin].set(wt)
        return full.reshape(Cout, 9 * cpad).astype(jnp.bfloat16)

    w1 = pack_w(params["w1"], Cin, Cp1)
    w2 = pack_w(params["w2"], Cout, Cp2)

    # GN/bias vectors packed into one (Cout, 8) block (1 DMA / 1 VMEM tile, not 6).
    z = jnp.zeros((Cout,), jnp.float32)
    pvec = jnp.stack([params["b1"], params["g1"], params["be1"],
                      params["b2"], params["g2"], params["be2"], z, z],
                     axis=1).astype(jnp.float32)

    cpg = Cout // _NUM_GROUPS
    gidx = jnp.arange(Cout) // cpg
    gmat = (gidx[:, None] == gidx[None, :]).astype(jnp.float32) / float(cpg * H * W)

    # Per-sample selector with the valid-pixel mask folded in: selm for the GN sums,
    # its transpose for the broadcast-back matmuls.
    j = jnp.arange(BL)
    valid = ((j % L) % Wp < W).astype(jnp.float32)
    samp = j // L
    selm = (samp[:, None] == jnp.arange(B)[None, :]).astype(jnp.float32) * valid[:, None]
    m_t = selm.T

    kern = functools.partial(_fused_kernel, H=H, W=W, Cin=Cin, Cout=Cout, B=B,
                             is_res=is_res, same_channels=same_channels)

    out_flat = pl.pallas_call(
        kern,
        out_shape=jax.ShapeDtypeStruct((n_steps, Cout, BL), jnp.float32),
        grid=(n_steps,),
        in_specs=[
            pl.BlockSpec((B, Cin, Pp), lambda n: (n, 0, 0)),        # f32 padded input
            pl.BlockSpec((Cout, 9 * Cp1), lambda n: (0, 0)),        # w1
            pl.BlockSpec((Cout, 9 * Cp2), lambda n: (0, 0)),        # w2
            pl.BlockSpec((Cout, 8), lambda n: (0, 0)),              # packed b/g/beta
            pl.BlockSpec((Cout, Cout), lambda n: (0, 0)),           # gmat
            pl.BlockSpec((BL, B), lambda n: (0, 0)),                # selm
            pl.BlockSpec((B, BL), lambda n: (0, 0)),                # selm^T
        ],
        out_specs=pl.BlockSpec((1, Cout, BL), lambda n: (n, 0, 0)),
        scratch_shapes=[
            pltpu.VMEM((Cout, B * Pp), jnp.bfloat16),    # padded x1 (stays in VMEM)
            pltpu.VMEM((9 * Cp1, BL), jnp.bfloat16),     # im2col stage 1
            pltpu.VMEM((9 * Cp2, BL), jnp.bfloat16),     # im2col stage 2
        ],
        compiler_params=pltpu.CompilerParams(
            # "arbitrary": the one-time persistent-scratch init (program_id == 0)
            # must run on the (single) core that owns the whole grid.
            # TODO(synk): on v7x (2 TCs) split the batch across cores at the XLA
            # level (or re-zero the col pad rows per step) and mark this parallel.
            dimension_semantics=("arbitrary",),
            vmem_limit_bytes=vmem_limit),
    )(xflat, w1, w2, pvec, gmat, selm, m_t)

    # Strip wrap-around garbage columns / batch padding.
    # TODO(synk): in a real model keep this slice inside the consumer's jit so XLA
    # fuses it instead of doing a separate HBM pass after this tiny kernel.
    out = out_flat.reshape(n_steps, Cout, B, H, Wp).transpose(0, 2, 1, 3, 4)
    return out.reshape(N_pad, Cout, H, Wp)[:N, :, :, :W]


def _reference(x_nchw, params, *, is_res):
    """Pure-JAX reference matching the PyTorch module (NCHW, exact GELU, f32)."""
    def conv_gn_gelu(x, w, b, gamma, beta):
        w_oihw = jnp.transpose(w, (3, 2, 0, 1))
        y = lax.conv_general_dilated(
            x, w_oihw, window_strides=(1, 1), padding=((1, 1), (1, 1)),
            dimension_numbers=("NCHW", "OIHW", "NCHW"))
        y = y + b.reshape(1, -1, 1, 1)
        N, C, H, W = y.shape
        yg = y.reshape(N, _NUM_GROUPS, C // _NUM_GROUPS, H, W)
        mean = yg.mean(axis=(2, 3, 4), keepdims=True)
        var = yg.var(axis=(2, 3, 4), keepdims=True)
        yn = ((yg - mean) / jnp.sqrt(var + _GN_EPS)).reshape(N, C, H, W)
        yn = yn * gamma.reshape(1, -1, 1, 1) + beta.reshape(1, -1, 1, 1)
        return 0.5 * yn * (1.0 + lax.erf(yn * _SQRT_HALF))

    x1 = conv_gn_gelu(x_nchw, params["w1"], params["b1"], params["g1"], params["be1"])
    x2 = conv_gn_gelu(x1, params["w2"], params["b2"], params["g2"], params["be2"])
    if is_res:
        same = x_nchw.shape[1] == x2.shape[1]
        return ((x_nchw if same else x1) + x2) / 1.414
    return x2


if __name__ == "__main__":
    def make_params(key, cin, cout):
        ks = jax.random.split(key, 8)
        return {
            "w1": 0.2 * jax.random.normal(ks[0], (3, 3, cin, cout), jnp.float32),
            "b1": 0.05 * jax.random.normal(ks[1], (cout,), jnp.float32),
            "g1": 1.0 + 0.1 * jax.random.normal(ks[2], (cout,), jnp.float32),
            "be1": 0.05 * jax.random.normal(ks[3], (cout,), jnp.float32),
            "w2": 0.2 * jax.random.normal(ks[4], (3, 3, cout, cout), jnp.float32),
            "b2": 0.05 * jax.random.normal(ks[5], (cout,), jnp.float32),
            "g2": 1.0 + 0.1 * jax.random.normal(ks[6], (cout,), jnp.float32),
            "be2": 0.05 * jax.random.normal(ks[7], (cout,), jnp.float32),
        }

    key = jax.random.PRNGKey(0)
    N, H, W = 2, 16, 16
    configs = [
        (4, 8, True),    # in != out: residual uses x1
        (8, 8, True),    # in == out: residual uses the (exact f32) input
        (4, 8, False),   # no residual
    ]
    for idx, (cin, cout, is_res) in enumerate(configs):
        kp, kx, key = jax.random.split(key, 3)
        params = make_params(kp, cin, cout)
        x = jax.random.normal(kx, (N, cin, H, W), jnp.float32)

        out = jax.block_until_ready(residual_conv_block(x, params, is_res=is_res))
        ref = _reference(x, params, is_res=is_res)
        assert out.shape == ref.shape == (N, cout, H, W)
        max_err = float(jnp.max(jnp.abs(out - ref)))
        # bf16 MXU conv inputs + tanh-approx GELU -> small, bounded deviation.
        assert jnp.allclose(out, ref, atol=3e-2, rtol=3e-2), (
            f"config {idx} (cin={cin}, cout={cout}, is_res={is_res}): "
            f"max_abs_err={max_err}")
    print("KERNEL_OK")
</pallas_src>

<mosaic_0001>
module attributes {stable_mosaic.version = 11 : i64} {
  func.func @_fused_kernel(%arg0: i32, %arg1: memref<4x4x326xf32, #tpu.memory_space<vmem>>, %arg2: memref<8x144xbf16, #tpu.memory_space<vmem>>, %arg3: memref<8x144xbf16, #tpu.memory_space<vmem>>, %arg4: memref<8x8xf32, #tpu.memory_space<vmem>>, %arg5: memref<8x8xf32, #tpu.memory_space<vmem>>, %arg6: memref<1152x4xf32, #tpu.memory_space<vmem>>, %arg7: memref<4x1152xf32, #tpu.memory_space<vmem>>, %arg8: memref<1x8x1152xf32, #tpu.memory_space<vmem>>, %arg9: memref<8x1304xbf16, #tpu.memory_space<vmem>>, %arg10: memref<144x1152xbf16, #tpu.memory_space<vmem>>, %arg11: memref<144x1152xbf16, #tpu.memory_space<vmem>>) attributes {dimension_semantics = [#tpu.dimension_semantics<arbitrary>], iteration_bounds = array<i64: 1>, scalar_prefetch = 0 : i64, scratch_operands = 3 : i64, tpu.core_type = #tpu.core_type<tc>, window_params = [{transform_indices = @transform_0, window_bounds = array<i64: 4, 4, 326>}, {pipeline_mode = #tpu.pipeline_mode<synchronous>, transform_indices = @transform_1, window_bounds = array<i64: 8, 144>}, {pipeline_mode = #tpu.pipeline_mode<synchronous>, transform_indices = @transform_2, window_bounds = array<i64: 8, 144>}, {pipeline_mode = #tpu.pipeline_mode<synchronous>, transform_indices = @transform_3, window_bounds = array<i64: 8, 8>}, {pipeline_mode = #tpu.pipeline_mode<synchronous>, transform_indices = @transform_4, window_bounds = array<i64: 8, 8>}, {pipeline_mode = #tpu.pipeline_mode<synchronous>, transform_indices = @transform_5, window_bounds = array<i64: 1152, 4>}, {pipeline_mode = #tpu.pipeline_mode<synchronous>, transform_indices = @transform_6, window_bounds = array<i64: 4, 1152>}, {transform_indices = @transform_7, window_bounds = array<i64: 1, 8, 1152>}]} {
    %c0_i32 = arith.constant 0 : i32
    %0 = arith.cmpi eq, %arg0, %c0_i32 : i32
    %1 = arith.extui %0 : i1 to i32
    %c0_i32_0 = arith.constant 0 : i32
    %2 = arith.cmpi ne, %1, %c0_i32_0 : i32
    scf.if %2 {
      %cst_221 = arith.constant 0.000000e+00 : bf16
      %259 = vector.broadcast %cst_221 : bf16 to vector<144x1152xbf16>
      %c0_222 = arith.constant 0 : index
      %c0_223 = arith.constant 0 : index
      %260 = vector.load %arg10[%c0_222, %c0_223] : memref<144x1152xbf16, #tpu.memory_space<vmem>>, vector<144x1152xbf16>
      tpu.vector_store %arg10[%c0_222, %c0_223], %259 {strides = array<i32>} : memref<144x1152xbf16, #tpu.memory_space<vmem>>, vector<144x1152xbf16>,
      %cst_224 = arith.constant 0.000000e+00 : bf16
      %261 = vector.broadcast %cst_224 : bf16 to vector<144x1152xbf16>
      %c0_225 = arith.constant 0 : index
      %c0_226 = arith.constant 0 : index
      %262 = vector.load %arg11[%c0_225, %c0_226] : memref<144x1152xbf16, #tpu.memory_space<vmem>>, vector<144x1152xbf16>
      tpu.vector_store %arg11[%c0_225, %c0_226], %261 {strides = array<i32>} : memref<144x1152xbf16, #tpu.memory_space<vmem>>, vector<144x1152xbf16>,
      %cst_227 = arith.constant 0.000000e+00 : bf16
      %263 = vector.broadcast %cst_227 : bf16 to vector<8x1304xbf16>
      %c0_228 = arith.constant 0 : index
      %c0_229 = arith.constant 0 : index
      %264 = vector.load %arg9[%c0_228, %c0_229] : memref<8x1304xbf16, #tpu.memory_space<vmem>>, vector<8x1304xbf16>
      tpu.vector_store %arg9[%c0_228, %c0_229], %263 {strides = array<i32>} : memref<8x1304xbf16, #tpu.memory_space<vmem>>, vector<8x1304xbf16>,
    } else {
    }
    %c0 = arith.constant 0 : index
    %c0_1 = arith.constant 0 : index
    %3 = vector.load %arg4[%c0, %c0_1] : memref<8x8xf32, #tpu.memory_space<vmem>>, vector<8x8xf32>
    %4 = vector.extract_strided_slice %3 {offsets = [0, 0], sizes = [8, 1], strides = [1, 1]} : vector<8x8xf32> to vector<8x1xf32>
    %5 = vector.extract_strided_slice %3 {offsets = [0, 1], sizes = [8, 1], strides = [1, 1]} : vector<8x8xf32> to vector<8x1xf32>
    %6 = vector.extract_strided_slice %3 {offsets = [0, 2], sizes = [8, 1], strides = [1, 1]} : vector<8x8xf32> to vector<8x1xf32>
    %7 = vector.extract_strided_slice %3 {offsets = [0, 3], sizes = [8, 1], strides = [1, 1]} : vector<8x8xf32> to vector<8x1xf32>
    %8 = vector.extract_strided_slice %3 {offsets = [0, 4], sizes = [8, 1], strides = [1, 1]} : vector<8x8xf32> to vector<8x1xf32>
    %9 = vector.extract_strided_slice %3 {offsets = [0, 5], sizes = [8, 1], strides = [1, 1]} : vector<8x8xf32> to vector<8x1xf32>
    %c0_2 = arith.constant 0 : index
    %c0_3 = arith.constant 0 : index
    %10 = vector.load %arg5[%c0_2, %c0_3] : memref<8x8xf32, #tpu.memory_space<vmem>>, vector<8x8xf32>
    %c0_4 = arith.constant 0 : index
    %c0_5 = arith.constant 0 : index
    %11 = vector.load %arg6[%c0_4, %c0_5] : memref<1152x4xf32, #tpu.memory_space<vmem>>, vector<1152x4xf32>
    %c0_6 = arith.constant 0 : index
    %c0_7 = arith.constant 0 : index
    %12 = vector.load %arg7[%c0_6, %c0_7] : memref<4x1152xf32, #tpu.memory_space<vmem>>, vector<4x1152xf32>
    %c0_8 = arith.constant 0 : index
    %c0_9 = arith.constant 0 : index
    %c0_10 = arith.constant 0 : index
    %13 = vector.load %arg1[%c0_8, %c0_9, %c0_10] : memref<4x4x326xf32, #tpu.memory_space<vmem>>, vector<1x4x288xf32>
    %14 = vector.shape_cast %13 : vector<1x4x288xf32> to vector<4x288xf32>
    %c1 = arith.constant 1 : index
    %c0_11 = arith.constant 0 : index
    %c0_12 = arith.constant 0 : index
    %15 = vector.load %arg1[%c1, %c0_11, %c0_12] : memref<4x4x326xf32, #tpu.memory_space<vmem>>, vector<1x4x288xf32>
    %16 = vector.shape_cast %15 : vector<1x4x288xf32> to vector<4x288xf32>
    %c2 = arith.constant 2 : index
    %c0_13 = arith.constant 0 : index
    %c0_14 = arith.constant 0 : index
    %17 = vector.load %arg1[%c2, %c0_13, %c0_14] : memref<4x4x326xf32, #tpu.memory_space<vmem>>, vector<1x4x288xf32>
    %18 = vector.shape_cast %17 : vector<1x4x288xf32> to vector<4x288xf32>
    %c3 = arith.constant 3 : index
    %c0_15 = arith.constant 0 : index
    %c0_16 = arith.constant 0 : index
    %19 = vector.load %arg1[%c3, %c0_15, %c0_16] : memref<4x4x326xf32, #tpu.memory_space<vmem>>, vector<1x4x288xf32>
    %20 = vector.shape_cast %19 : vector<1x4x288xf32> to vector<4x288xf32>
    %21 = tpu.concatenate %14, %16, %18, %20 in 1 : vector<4x288xf32>, vector<4x288xf32>, vector<4x288xf32>, vector<4x288xf32> -> vector<4x1152xf32>
    %22 = arith.truncf %21 : vector<4x1152xf32> to vector<4x1152xbf16>
    %c0_17 = arith.constant 0 : index
    %c0_18 = arith.constant 0 : index
    %23 = vector.load %arg10[%c0_17, %c0_18] : memref<144x1152xbf16, #tpu.memory_space<vmem>>, vector<4x1152xbf16>
    tpu.vector_store %arg10[%c0_17, %c0_18], %22 {strides = array<i32>} : memref<144x1152xbf16, #tpu.memory_space<vmem>>, vector<4x1152xbf16>,
    %c0_19 = arith.constant 0 : index
    %c0_20 = arith.constant 0 : index
    %c1_21 = arith.constant 1 : index
    %24 = vector.load %arg1[%c0_19, %c0_20, %c1_21] : memref<4x4x326xf32, #tpu.memory_space<vmem>>, vector<1x4x288xf32>
    %25 = vector.shape_cast %24 : vector<1x4x288xf32> to vector<4x288xf32>
    %c1_22 = arith.constant 1 : index
    %c0_23 = arith.constant 0 : index
    %c1_24 = arith.constant 1 : index
    %26 = vector.load %arg1[%c1_22, %c0_23, %c1_24] : memref<4x4x326xf32, #tpu.memory_space<vmem>>, vector<1x4x288xf32>
    %27 = vector.shape_cast %26 : vector<1x4x288xf32> to vector<4x288xf32>
    %c2_25 = arith.constant 2 : index
    %c0_26 = arith.constant 0 : index
    %c1_27 = arith.constant 1 : index
    %28 = vector.load %arg1[%c2_25, %c0_26, %c1_27] : memref<4x4x326xf32, #tpu.memory_space<vmem>>, vector<1x4x288xf32>
    %29 = vector.shape_cast %28 : vector<1x4x288xf32> to vector<4x288xf32>
    %c3_28 = arith.constant 3 : index
    %c0_29 = arith.constant 0 : index
    %c1_30 = arith.constant 1 : index
    %30 = vector.load %arg1[%c3_28, %c0_29, %c1_30] : memref<4x4x326xf32, #tpu.memory_space<vmem>>, vector<1x4x288xf32>
    %31 = vector.shape_cast %30 : vector<1x4x288xf32> to vector<4x288xf32>
    %32 = tpu.concatenate %25, %27, %29, %31 in 1 : vector<4x288xf32>, vector<4x288xf32>, vector<4x288xf32>, vector<4x288xf32> -> vector<4x1152xf32>
    %33 = arith.truncf %32 : vector<4x1152xf32> to vector<4x1152xbf16>
    %c16 = arith.constant 16 : index
    %c0_31 = arith.constant 0 : index
    %34 = vector.load %arg10[%c16, %c0_31] : memref<144x1152xbf16, #tpu.memory_space<vmem>>, vector<4x1152xbf16>
    tpu.vector_store %arg10[%c16, %c0_31], %33 {strides = array<i32>} : memref<144x1152xbf16, #tpu.memory_space<vmem>>, vector<4x1152xbf16>,
    %c0_32 = arith.constant 0 : index
    %c0_33 = arith.constant 0 : index
    %c2_34 = arith.constant 2 : index
    %35 = vector.load %arg1[%c0_32, %c0_33, %c2_34] : memref<4x4x326xf32, #tpu.memory_space<vmem>>, vector<1x4x288xf32>
    %36 = vector.shape_cast %35 : vector<1x4x288xf32> to vector<4x288xf32>
    %c1_35 = arith.constant 1 : index
    %c0_36 = arith.constant 0 : index
    %c2_37 = arith.constant 2 : index
    %37 = vector.load %arg1[%c1_35, %c0_36, %c2_37] : memref<4x4x326xf32, #tpu.memory_space<vmem>>, vector<1x4x288xf32>
    %38 = vector.shape_cast %37 : vector<1x4x288xf32> to vector<4x288xf32>
    %c2_38 = arith.constant 2 : index
    %c0_39 = arith.constant 0 : index
    %c2_40 = arith.constant 2 : index
    %39 = vector.load %arg1[%c2_38, %c0_39, %c2_40] : memref<4x4x326xf32, #tpu.memory_space<vmem>>, vector<1x4x288xf32>
    %40 = vector.shape_cast %39 : vector<1x4x288xf32> to vector<4x288xf32>
    %c3_41 = arith.constant 3 : index
    %c0_42 = arith.constant 0 : index
    %c2_43 = arith.constant 2 : index
    %41 = vector.load %arg1[%c3_41, %c0_42, %c2_43] : memref<4x4x326xf32, #tpu.memory_space<vmem>>, vector<1x4x288xf32>
    %42 = vector.shape_cast %41 : vector<1x4x288xf32> to vector<4x288xf32>
    %43 = tpu.concatenate %36, %38, %40, %42 in 1 : vector<4x288xf32>, vector<4x288xf32>, vector<4x288xf32>, vector<4x288xf32> -> vector<4x1152xf32>
    %44 = arith.truncf %43 : vector<4x1152xf32> to vector<4x1152xbf16>
    %c32 = arith.constant 32 : index
    %c0_44 = arith.constant 0 : index
    %45 = vector.load %arg10[%c32, %c0_44] : memref<144x1152xbf16, #tpu.memory_space<vmem>>, vector<4x1152xbf16>
    tpu.vector_store %arg10[%c32, %c0_44], %44 {strides = array<i32>} : memref<144x1152xbf16, #tpu.memory_space<vmem>>, vector<4x1152xbf16>,
    %c0_45 = arith.constant 0 : index
    %c0_46 = arith.constant 0 : index
    %c18 = arith.constant 18 : index
    %46 = vector.load %arg1[%c0_45, %c0_46, %c18] : memref<4x4x326xf32, #tpu.memory_space<vmem>>, vector<1x4x288xf32>
    %47 = vector.shape_cast %46 : vector<1x4x288xf32> to vector<4x288xf32>
    %c1_47 = arith.constant 1 : index
    %c0_48 = arith.constant 0 : index
    %c18_49 = arith.constant 18 : index
    %48 = vector.load %arg1[%c1_47, %c0_48, %c18_49] : memref<4x4x326xf32, #tpu.memory_space<vmem>>, vector<1x4x288xf32>
    %49 = vector.shape_cast %48 : vector<1x4x288xf32> to vector<4x288xf32>
    %c2_50 = arith.constant 2 : index
    %c0_51 = arith.constant 0 : index
    %c18_52 = arith.constant 18 : index
    %50 = vector.load %arg1[%c2_50, %c0_51, %c18_52] : memref<4x4x326xf32, #tpu.memory_space<vmem>>, vector<1x4x288xf32>
    %51 = vector.shape_cast %50 : vector<1x4x288xf32> to vector<4x288xf32>
    %c3_53 = arith.constant 3 : index
    %c0_54 = arith.constant 0 : index
    %c18_55 = arith.constant 18 : index
    %52 = vector.load %arg1[%c3_53, %c0_54, %c18_55] : memref<4x4x326xf32, #tpu.memory_space<vmem>>, vector<1x4x288xf32>
    %53 = vector.shape_cast %52 : vector<1x4x288xf32> to vector<4x288xf32>
    %54 = tpu.concatenate %47, %49, %51, %53 in 1 : vector<4x288xf32>, vector<4x288xf32>, vector<4x288xf32>, vector<4x288xf32> -> vector<4x1152xf32>
    %55 = arith.truncf %54 : vector<4x1152xf32> to vector<4x1152xbf16>
    %c48 = arith.constant 48 : index
    %c0_56 = arith.constant 0 : index
    %56 = vector.load %arg10[%c48, %c0_56] : memref<144x1152xbf16, #tpu.memory_space<vmem>>, vector<4x1152xbf16>
    tpu.vector_store %arg10[%c48, %c0_56], %55 {strides = array<i32>} : memref<144x1152xbf16, #tpu.memory_space<vmem>>, vector<4x1152xbf16>,
    %c0_57 = arith.constant 0 : index
    %c0_58 = arith.constant 0 : index
    %c19 = arith.constant 19 : index
    %57 = vector.load %arg1[%c0_57, %c0_58, %c19] : memref<4x4x326xf32, #tpu.memory_space<vmem>>, vector<1x4x288xf32>
    %58 = vector.shape_cast %57 : vector<1x4x288xf32> to vector<4x288xf32>
    %c1_59 = arith.constant 1 : index
    %c0_60 = arith.constant 0 : index
    %c19_61 = arith.constant 19 : index
    %59 = vector.load %arg1[%c1_59, %c0_60, %c19_61] : memref<4x4x326xf32, #tpu.memory_space<vmem>>, vector<1x4x288xf32>
    %60 = vector.shape_cast %59 : vector<1x4x288xf32> to vector<4x288xf32>
    %c2_62 = arith.constant 2 : index
    %c0_63 = arith.constant 0 : index
    %c19_64 = arith.constant 19 : index
    %61 = vector.load %arg1[%c2_62, %c0_63, %c19_64] : memref<4x4x326xf32, #tpu.memory_space<vmem>>, vector<1x4x288xf32>
    %62 = vector.shape_cast %61 : vector<1x4x288xf32> to vector<4x288xf32>
    %c3_65 = arith.constant 3 : index
    %c0_66 = arith.constant 0 : index
    %c19_67 = arith.constant 19 : index
    %63 = vector.load %arg1[%c3_65, %c0_66, %c19_67] : memref<4x4x326xf32, #tpu.memory_space<vmem>>, vector<1x4x288xf32>
    %64 = vector.shape_cast %63 : vector<1x4x288xf32> to vector<4x288xf32>
    %65 = tpu.concatenate %58, %60, %62, %64 in 1 : vector<4x288xf32>, vector<4x288xf32>, vector<4x288xf32>, vector<4x288xf32> -> vector<4x1152xf32>
    %66 = arith.truncf %65 : vector<4x1152xf32> to vector<4x1152xbf16>
    %c64 = arith.constant 64 : index
    %c0_68 = arith.constant 0 : index
    %67 = vector.load %arg10[%c64, %c0_68] : memref<144x1152xbf16, #tpu.memory_space<vmem>>, vector<4x1152xbf16>
    tpu.vector_store %arg10[%c64, %c0_68], %66 {strides = array<i32>} : memref<144x1152xbf16, #tpu.memory_space<vmem>>, vector<4x1152xbf16>,
    %c0_69 = arith.constant 0 : index
    %c0_70 = arith.constant 0 : index
    %c20 = arith.constant 20 : index
    %68 = vector.load %arg1[%c0_69, %c0_70, %c20] : memref<4x4x326xf32, #tpu.memory_space<vmem>>, vector<1x4x288xf32>
    %69 = vector.shape_cast %68 : vector<1x4x288xf32> to vector<4x288xf32>
    %c1_71 = arith.constant 1 : index
    %c0_72 = arith.constant 0 : index
    %c20_73 = arith.constant 20 : index
    %70 = vector.load %arg1[%c1_71, %c0_72, %c20_73] : memref<4x4x326xf32, #tpu.memory_space<vmem>>, vector<1x4x288xf32>
    %71 = vector.shape_cast %70 : vector<1x4x288xf32> to vector<4x288xf32>
    %c2_74 = arith.constant 2 : index
    %c0_75 = arith.constant 0 : index
    %c20_76 = arith.constant 20 : index
    %72 = vector.load %arg1[%c2_74, %c0_75, %c20_76] : memref<4x4x326xf32, #tpu.memory_space<vmem>>, vector<1x4x288xf32>
    %73 = vector.shape_cast %72 : vector<1x4x288xf32> to vector<4x288xf32>
    %c3_77 = arith.constant 3 : index
    %c0_78 = arith.constant 0 : index
    %c20_79 = arith.constant 20 : index
    %74 = vector.load %arg1[%c3_77, %c0_78, %c20_79] : memref<4x4x326xf32, #tpu.memory_space<vmem>>, vector<1x4x288xf32>
    %75 = vector.shape_cast %74 : vector<1x4x288xf32> to vector<4x288xf32>
    %76 = tpu.concatenate %69, %71, %73, %75 in 1 : vector<4x288xf32>, vector<4x288xf32>, vector<4x288xf32>, vector<4x288xf32> -> vector<4x1152xf32>
    %77 = arith.truncf %76 : vector<4x1152xf32> to vector<4x1152xbf16>
    %c80 = arith.constant 80 : index
    %c0_80 = arith.constant 0 : index
    %78 = vector.load %arg10[%c80, %c0_80] : memref<144x1152xbf16, #tpu.memory_space<vmem>>, vector<4x1152xbf16>
    tpu.vector_store %arg10[%c80, %c0_80], %77 {strides = array<i32>} : memref<144x1152xbf16, #tpu.memory_space<vmem>>, vector<4x1152xbf16>,
    %c0_81 = arith.constant 0 : index
    %c0_82 = arith.constant 0 : index
    %c36 = arith.constant 36 : index
    %79 = vector.load %arg1[%c0_81, %c0_82, %c36] : memref<4x4x326xf32, #tpu.memory_space<vmem>>, vector<1x4x288xf32>
    %80 = vector.shape_cast %79 : vector<1x4x288xf32> to vector<4x288xf32>
    %c1_83 = arith.constant 1 : index
    %c0_84 = arith.constant 0 : index
    %c36_85 = arith.constant 36 : index
    %81 = vector.load %arg1[%c1_83, %c0_84, %c36_85] : memref<4x4x326xf32, #tpu.memory_space<vmem>>, vector<1x4x288xf32>
    %82 = vector.shape_cast %81 : vector<1x4x288xf32> to vector<4x288xf32>
    %c2_86 = arith.constant 2 : index
    %c0_87 = arith.constant 0 : index
    %c36_88 = arith.constant 36 : index
    %83 = vector.load %arg1[%c2_86, %c0_87, %c36_88] : memref<4x4x326xf32, #tpu.memory_space<vmem>>, vector<1x4x288xf32>
    %84 = vector.shape_cast %83 : vector<1x4x288xf32> to vector<4x288xf32>
    %c3_89 = arith.constant 3 : index
    %c0_90 = arith.constant 0 : index
    %c36_91 = arith.constant 36 : index
    %85 = vector.load %arg1[%c3_89, %c0_90, %c36_91] : memref<4x4x326xf32, #tpu.memory_space<vmem>>, vector<1x4x288xf32>
    %86 = vector.shape_cast %85 : vector<1x4x288xf32> to vector<4x288xf32>
    %87 = tpu.concatenate %80, %82, %84, %86 in 1 : vector<4x288xf32>, vector<4x288xf32>, vector<4x288xf32>, vector<4x288xf32> -> vector<4x1152xf32>
    %88 = arith.truncf %87 : vector<4x1152xf32> to vector<4x1152xbf16>
    %c96 = arith.constant 96 : index
    %c0_92 = arith.constant 0 : index
    %89 = vector.load %arg10[%c96, %c0_92] : memref<144x1152xbf16, #tpu.memory_space<vmem>>, vector<4x1152xbf16>
    tpu.vector_store %arg10[%c96, %c0_92], %88 {strides = array<i32>} : memref<144x1152xbf16, #tpu.memory_space<vmem>>, vector<4x1152xbf16>,
    %c0_93 = arith.constant 0 : index
    %c0_94 = arith.constant 0 : index
    %c37 = arith.constant 37 : index
    %90 = vector.load %arg1[%c0_93, %c0_94, %c37] : memref<4x4x326xf32, #tpu.memory_space<vmem>>, vector<1x4x288xf32>
    %91 = vector.shape_cast %90 : vector<1x4x288xf32> to vector<4x288xf32>
    %c1_95 = arith.constant 1 : index
    %c0_96 = arith.constant 0 : index
    %c37_97 = arith.constant 37 : index
    %92 = vector.load %arg1[%c1_95, %c0_96, %c37_97] : memref<4x4x326xf32, #tpu.memory_space<vmem>>, vector<1x4x288xf32>
    %93 = vector.shape_cast %92 : vector<1x4x288xf32> to vector<4x288xf32>
    %c2_98 = arith.constant 2 : index
    %c0_99 = arith.constant 0 : index
    %c37_100 = arith.constant 37 : index
    %94 = vector.load %arg1[%c2_98, %c0_99, %c37_100] : memref<4x4x326xf32, #tpu.memory_space<vmem>>, vector<1x4x288xf32>
    %95 = vector.shape_cast %94 : vector<1x4x288xf32> to vector<4x288xf32>
    %c3_101 = arith.constant 3 : index
    %c0_102 = arith.constant 0 : index
    %c37_103 = arith.constant 37 : index
    %96 = vector.load %arg1[%c3_101, %c0_102, %c37_103] : memref<4x4x326xf32, #tpu.memory_space<vmem>>, vector<1x4x288xf32>
    %97 = vector.shape_cast %96 : vector<1x4x288xf32> to vector<4x288xf32>
    %98 = tpu.concatenate %91, %93, %95, %97 in 1 : vector<4x288xf32>, vector<4x288xf32>, vector<4x288xf32>, vector<4x288xf32> -> vector<4x1152xf32>
    %99 = arith.truncf %98 : vector<4x1152xf32> to vector<4x1152xbf16>
    %c112 = arith.constant 112 : index
    %c0_104 = arith.constant 0 : index
    %100 = vector.load %arg10[%c112, %c0_104] : memref<144x1152xbf16, #tpu.memory_space<vmem>>, vector<4x1152xbf16>
    tpu.vector_store %arg10[%c112, %c0_104], %99 {strides = array<i32>} : memref<144x1152xbf16, #tpu.memory_space<vmem>>, vector<4x1152xbf16>,
    %c0_105 = arith.constant 0 : index
    %c0_106 = arith.constant 0 : index
    %c38 = arith.constant 38 : index
    %101 = vector.load %arg1[%c0_105, %c0_106, %c38] : memref<4x4x326xf32, #tpu.memory_space<vmem>>, vector<1x4x288xf32>
    %102 = vector.shape_cast %101 : vector<1x4x288xf32> to vector<4x288xf32>
    %c1_107 = arith.constant 1 : index
    %c0_108 = arith.constant 0 : index
    %c38_109 = arith.constant 38 : index
    %103 = vector.load %arg1[%c1_107, %c0_108, %c38_109] : memref<4x4x326xf32, #tpu.memory_space<vmem>>, vector<1x4x288xf32>
    %104 = vector.shape_cast %103 : vector<1x4x288xf32> to vector<4x288xf32>
    %c2_110 = arith.constant 2 : index
    %c0_111 = arith.constant 0 : index
    %c38_112 = arith.constant 38 : index
    %105 = vector.load %arg1[%c2_110, %c0_111, %c38_112] : memref<4x4x326xf32, #tpu.memory_space<vmem>>, vector<1x4x288xf32>
    %106 = vector.shape_cast %105 : vector<1x4x288xf32> to vector<4x288xf32>
    %c3_113 = arith.constant 3 : index
    %c0_114 = arith.constant 0 : index
    %c38_115 = arith.constant 38 : index
    %107 = vector.load %arg1[%c3_113, %c0_114, %c38_115] : memref<4x4x326xf32, #tpu.memory_space<vmem>>, vector<1x4x288xf32>
    %108 = vector.shape_cast %107 : vector<1x4x288xf32> to vector<4x288xf32>
    %109 = tpu.concatenate %102, %104, %106, %108 in 1 : vector<4x288xf32>, vector<4x288xf32>, vector<4x288xf32>, vector<4x288xf32> -> vector<4x1152xf32>
    %110 = arith.truncf %109 : vector<4x1152xf32> to vector<4x1152xbf16>
    %c128 = arith.constant 128 : index
    %c0_116 = arith.constant 0 : index
    %111 = vector.load %arg10[%c128, %c0_116] : memref<144x1152xbf16, #tpu.memory_space<vmem>>, vector<4x1152xbf16>
    tpu.vector_store %arg10[%c128, %c0_116], %110 {strides = array<i32>} : memref<144x1152xbf16, #tpu.memory_space<vmem>>, vector<4x1152xbf16>,
    %c0_117 = arith.constant 0 : index
    %c0_118 = arith.constant 0 : index
    %112 = vector.load %arg2[%c0_117, %c0_118] : memref<8x144xbf16, #tpu.memory_space<vmem>>, vector<8x144xbf16>
    %c0_119 = arith.constant 0 : index
    %c0_120 = arith.constant 0 : index
    %113 = vector.load %arg10[%c0_119, %c0_120] : memref<144x1152xbf16, #tpu.memory_space<vmem>>, vector<144x1152xbf16>
    %cst = arith.constant dense<0.000000e+00> : vector<8x1152xf32>
    %114 = tpu.matmul %112, %113, %cst {dimension_numbers = #tpu.dot_dimension_numbers<[1], [0], [0], [1], [0, 0, 1, 1], [], []>} : vector<8x144xbf16>, vector<144x1152xbf16>, vector<8x1152xf32> -> vector<8x1152xf32>
    %115 = vector.broadcast %4 : vector<8x1xf32> to vector<8x1152xf32>
    %116 = arith.addf %114, %115 : vector<8x1152xf32>
    %cst_121 = arith.constant dense<0.000000e+00> : vector<8x4xf32>
    %117 = tpu.matmul %116, %11, %cst_121 {dimension_numbers = #tpu.dot_dimension_numbers<[1], [0], [0], [1], [0, 0, 1, 1], [], []>} : vector<8x1152xf32>, vector<1152x4xf32>, vector<8x4xf32> -> vector<8x4xf32>
    %118 = arith.mulf %116, %116 : vector<8x1152xf32>
    %cst_122 = arith.constant dense<0.000000e+00> : vector<8x4xf32>
    %119 = tpu.matmul %118, %11, %cst_122 {dimension_numbers = #tpu.dot_dimension_numbers<[1], [0], [0], [1], [0, 0, 1, 1], [], []>} : vector<8x1152xf32>, vector<1152x4xf32>, vector<8x4xf32> -> vector<8x4xf32>
    %120 = tpu.concatenate %117, %119 in 1 : vector<8x4xf32>, vector<8x4xf32> -> vector<8x8xf32>
    %cst_123 = arith.constant dense<0.000000e+00> : vector<8x8xf32>
    %121 = tpu.matmul %10, %120, %cst_123 {dimension_numbers = #tpu.dot_dimension_numbers<[1], [0], [0], [1], [0, 0, 1, 1], [], []>} : vector<8x8xf32>, vector<8x8xf32>, vector<8x8xf32> -> vector<8x8xf32>
    %122 = vector.extract_strided_slice %121 {offsets = [0, 0], sizes = [8, 4], strides = [1, 1]} : vector<8x8xf32> to vector<8x4xf32>
    %123 = vector.extract_strided_slice %121 {offsets = [0, 4], sizes = [8, 4], strides = [1, 1]} : vector<8x8xf32> to vector<8x4xf32>
    %124 = arith.mulf %122, %122 : vector<8x4xf32>
    %125 = arith.subf %123, %124 : vector<8x4xf32>
    %cst_124 = arith.constant 9.99999974E-6 : f32
    %126 = vector.broadcast %cst_124 : f32 to vector<8x4xf32>
    %127 = arith.addf %125, %126 : vector<8x4xf32>
    %128 = math.rsqrt %127 : vector<8x4xf32>
    %129 = vector.broadcast %5 : vector<8x1xf32> to vector<8x4xf32>
    %130 = arith.mulf %129, %128 : vector<8x4xf32>
    %131 = arith.mulf %122, %130 : vector<8x4xf32>
    %132 = vector.broadcast %6 : vector<8x1xf32> to vector<8x4xf32>
    %133 = arith.subf %132, %131 : vector<8x4xf32>
    %cst_125 = arith.constant dense<0.000000e+00> : vector<8x1152xf32>
    %134 = tpu.matmul %130, %12, %cst_125 {dimension_numbers = #tpu.dot_dimension_numbers<[1], [0], [0], [1], [0, 0, 1, 1], [], []>} : vector<8x4xf32>, vector<4x1152xf32>, vector<8x1152xf32> -> vector<8x1152xf32>
    %cst_126 = arith.constant dense<0.000000e+00> : vector<8x1152xf32>
    %135 = tpu.matmul %133, %12, %cst_126 {dimension_numbers = #tpu.dot_dimension_numbers<[1], [0], [0], [1], [0, 0, 1, 1], [], []>} : vector<8x4xf32>, vector<4x1152xf32>, vector<8x1152xf32> -> vector<8x1152xf32>
    %136 = arith.mulf %116, %134 : vector<8x1152xf32>
    %137 = arith.addf %136, %135 : vector<8x1152xf32>
    %cst_127 = arith.constant 5.000000e-01 : f32
    %138 = vector.broadcast %cst_127 : f32 to vector<8x1152xf32>
    %139 = arith.mulf %138, %137 : vector<8x1152xf32>
    %cst_128 = arith.constant 4.471500e-02 : f32
    %140 = vector.broadcast %cst_128 : f32 to vector<8x1152xf32>
    %141 = arith.mulf %140, %137 : vector<8x1152xf32>
    %142 = arith.mulf %141, %137 : vector<8x1152xf32>
    %143 = arith.mulf %142, %137 : vector<8x1152xf32>
    %144 = arith.addf %137, %143 : vector<8x1152xf32>
    %cst_129 = arith.constant 0.797884583 : f32
    %145 = vector.broadcast %cst_129 : f32 to vector<8x1152xf32>
    %146 = arith.mulf %145, %144 : vector<8x1152xf32>
    %147 = math.tanh %146 : vector<8x1152xf32>
    %cst_130 = arith.constant 1.000000e+00 : f32
    %148 = vector.broadcast %cst_130 : f32 to vector<8x1152xf32>
    %149 = arith.addf %148, %147 : vector<8x1152xf32>
    %150 = arith.mulf %139, %149 : vector<8x1152xf32>
    %151 = arith.truncf %150 : vector<8x1152xf32> to vector<8x1152xbf16>
    %152 = vector.extract_strided_slice %151 {offsets = [0, 0], sizes = [8, 288], strides = [1, 1]} : vector<8x1152xbf16> to vector<8x288xbf16>
    %c0_131 = arith.constant 0 : index
    %c19_132 = arith.constant 19 : index
    %153 = vector.load %arg9[%c0_131, %c19_132] : memref<8x1304xbf16, #tpu.memory_space<vmem>>, vector<8x288xbf16>
    tpu.vector_store %arg9[%c0_131, %c19_132], %152 {strides = array<i32>} : memref<8x1304xbf16, #tpu.memory_space<vmem>>, vector<8x288xbf16>,
    %154 = vector.extract_strided_slice %151 {offsets = [0, 288], sizes = [8, 288], strides = [1, 1]} : vector<8x1152xbf16> to vector<8x288xbf16>
    %c0_133 = arith.constant 0 : index
    %c345 = arith.constant 345 : index
    %155 = vector.load %arg9[%c0_133, %c345] : memref<8x1304xbf16, #tpu.memory_space<vmem>>, vector<8x288xbf16>
    tpu.vector_store %arg9[%c0_133, %c345], %154 {strides = array<i32>} : memref<8x1304xbf16, #tpu.memory_space<vmem>>, vector<8x288xbf16>,
    %156 = vector.extract_strided_slice %151 {offsets = [0, 576], sizes = [8, 288], strides = [1, 1]} : vector<8x1152xbf16> to vector<8x288xbf16>
    %c0_134 = arith.constant 0 : index
    %c671 = arith.constant 671 : index
    %157 = vector.load %arg9[%c0_134, %c671] : memref<8x1304xbf16, #tpu.memory_space<vmem>>, vector<8x288xbf16>
    tpu.vector_store %arg9[%c0_134, %c671], %156 {strides = array<i32>} : memref<8x1304xbf16, #tpu.memory_space<vmem>>, vector<8x288xbf16>,
    %158 = vector.extract_strided_slice %151 {offsets = [0, 864], sizes = [8, 288], strides = [1, 1]} : vector<8x1152xbf16> to vector<8x288xbf16>
    %c0_135 = arith.constant 0 : index
    %c997 = arith.constant 997 : index
    %159 = vector.load %arg9[%c0_135, %c997] : memref<8x1304xbf16, #tpu.memory_space<vmem>>, vector<8x288xbf16>
    tpu.vector_store %arg9[%c0_135, %c997], %158 {strides = array<i32>} : memref<8x1304xbf16, #tpu.memory_space<vmem>>, vector<8x288xbf16>,
    %c0_136 = arith.constant 0 : index
    %c0_137 = arith.constant 0 : index
    %160 = vector.load %arg9[%c0_136, %c0_137] : memref<8x1304xbf16, #tpu.memory_space<vmem>>, vector<8x288xbf16>
    %c0_138 = arith.constant 0 : index
    %c326 = arith.constant 326 : index
    %161 = vector.load %arg9[%c0_138, %c326] : memref<8x1304xbf16, #tpu.memory_space<vmem>>, vector<8x288xbf16>
    %c0_139 = arith.constant 0 : index
    %c652 = arith.constant 652 : index
    %162 = vector.load %arg9[%c0_139, %c652] : memref<8x1304xbf16, #tpu.memory_space<vmem>>, vector<8x288xbf16>
    %c0_140 = arith.constant 0 : index
    %c978 = arith.constant 978 : index
    %163 = vector.load %arg9[%c0_140, %c978] : memref<8x1304xbf16, #tpu.memory_space<vmem>>, vector<8x288xbf16>
    %164 = tpu.concatenate %160, %161, %162, %163 in 1 : vector<8x288xbf16>, vector<8x288xbf16>, vector<8x288xbf16>, vector<8x288xbf16> -> vector<8x1152xbf16>
    %c0_141 = arith.constant 0 : index
    %c0_142 = arith.constant 0 : index
    %165 = vector.load %arg11[%c0_141, %c0_142] : memref<144x1152xbf16, #tpu.memory_space<vmem>>, vector<8x1152xbf16>
    tpu.vector_store %arg11[%c0_141, %c0_142], %164 {strides = array<i32>} : memref<144x1152xbf16, #tpu.memory_space<vmem>>, vector<8x1152xbf16>,
    %c0_143 = arith.constant 0 : index
    %c1_144 = arith.constant 1 : index
    %166 = vector.load %arg9[%c0_143, %c1_144] : memref<8x1304xbf16, #tpu.memory_space<vmem>>, vector<8x288xbf16>
    %c0_145 = arith.constant 0 : index
    %c327 = arith.constant 327 : index
    %167 = vector.load %arg9[%c0_145, %c327] : memref<8x1304xbf16, #tpu.memory_space<vmem>>, vector<8x288xbf16>
    %c0_146 = arith.constant 0 : index
    %c653 = arith.constant 653 : index
    %168 = vector.load %arg9[%c0_146, %c653] : memref<8x1304xbf16, #tpu.memory_space<vmem>>, vector<8x288xbf16>
    %c0_147 = arith.constant 0 : index
    %c979 = arith.constant 979 : index
    %169 = vector.load %arg9[%c0_147, %c979] : memref<8x1304xbf16, #tpu.memory_space<vmem>>, vector<8x288xbf16>
    %170 = tpu.concatenate %166, %167, %168, %169 in 1 : vector<8x288xbf16>, vector<8x288xbf16>, vector<8x288xbf16>, vector<8x288xbf16> -> vector<8x1152xbf16>
    %c16_148 = arith.constant 16 : index
    %c0_149 = arith.constant 0 : index
    %171 = vector.load %arg11[%c16_148, %c0_149] : memref<144x1152xbf16, #tpu.memory_space<vmem>>, vector<8x1152xbf16>
    tpu.vector_store %arg11[%c16_148, %c0_149], %170 {strides = array<i32>} : memref<144x1152xbf16, #tpu.memory_space<vmem>>, vector<8x1152xbf16>,
    %c0_150 = arith.constant 0 : index
    %c2_151 = arith.constant 2 : index
    %172 = vector.load %arg9[%c0_150, %c2_151] : memref<8x1304xbf16, #tpu.memory_space<vmem>>, vector<8x288xbf16>
    %c0_152 = arith.constant 0 : index
    %c328 = arith.constant 328 : index
    %173 = vector.load %arg9[%c0_152, %c328] : memref<8x1304xbf16, #tpu.memory_space<vmem>>, vector<8x288xbf16>
    %c0_153 = arith.constant 0 : index
    %c654 = arith.constant 654 : index
    %174 = vector.load %arg9[%c0_153, %c654] : memref<8x1304xbf16, #tpu.memory_space<vmem>>, vector<8x288xbf16>
    %c0_154 = arith.constant 0 : index
    %c980 = arith.constant 980 : index
    %175 = vector.load %arg9[%c0_154, %c980] : memref<8x1304xbf16, #tpu.memory_space<vmem>>, vector<8x288xbf16>
    %176 = tpu.concatenate %172, %173, %174, %175 in 1 : vector<8x288xbf16>, vector<8x288xbf16>, vector<8x288xbf16>, vector<8x288xbf16> -> vector<8x1152xbf16>
    %c32_155 = arith.constant 32 : index
    %c0_156 = arith.constant 0 : index
    %177 = vector.load %arg11[%c32_155, %c0_156] : memref<144x1152xbf16, #tpu.memory_space<vmem>>, vector<8x1152xbf16>
    tpu.vector_store %arg11[%c32_155, %c0_156], %176 {strides = array<i32>} : memref<144x1152xbf16, #tpu.memory_space<vmem>>, vector<8x1152xbf16>,
    %c0_157 = arith.constant 0 : index
    %c18_158 = arith.constant 18 : index
    %178 = vector.load %arg9[%c0_157, %c18_158] : memref<8x1304xbf16, #tpu.memory_space<vmem>>, vector<8x288xbf16>
    %c0_159 = arith.constant 0 : index
    %c344 = arith.constant 344 : index
    %179 = vector.load %arg9[%c0_159, %c344] : memref<8x1304xbf16, #tpu.memory_space<vmem>>, vector<8x288xbf16>
    %c0_160 = arith.constant 0 : index
    %c670 = arith.constant 670 : index
    %180 = vector.load %arg9[%c0_160, %c670] : memref<8x1304xbf16, #tpu.memory_space<vmem>>, vector<8x288xbf16>
    %c0_161 = arith.constant 0 : index
    %c996 = arith.constant 996 : index
    %181 = vector.load %arg9[%c0_161, %c996] : memref<8x1304xbf16, #tpu.memory_space<vmem>>, vector<8x288xbf16>
    %182 = tpu.concatenate %178, %179, %180, %181 in 1 : vector<8x288xbf16>, vector<8x288xbf16>, vector<8x288xbf16>, vector<8x288xbf16> -> vector<8x1152xbf16>
    %c48_162 = arith.constant 48 : index
    %c0_163 = arith.constant 0 : index
    %183 = vector.load %arg11[%c48_162, %c0_163] : memref<144x1152xbf16, #tpu.memory_space<vmem>>, vector<8x1152xbf16>
    tpu.vector_store %arg11[%c48_162, %c0_163], %182 {strides = array<i32>} : memref<144x1152xbf16, #tpu.memory_space<vmem>>, vector<8x1152xbf16>,
    %c0_164 = arith.constant 0 : index
    %c19_165 = arith.constant 19 : index
    %184 = vector.load %arg9[%c0_164, %c19_165] : memref<8x1304xbf16, #tpu.memory_space<vmem>>, vector<8x288xbf16>
    %c0_166 = arith.constant 0 : index
    %c345_167 = arith.constant 345 : index
    %185 = vector.load %arg9[%c0_166, %c345_167] : memref<8x1304xbf16, #tpu.memory_space<vmem>>, vector<8x288xbf16>
    %c0_168 = arith.constant 0 : index
    %c671_169 = arith.constant 671 : index
    %186 = vector.load %arg9[%c0_168, %c671_169] : memref<8x1304xbf16, #tpu.memory_space<vmem>>, vector<8x288xbf16>
    %c0_170 = arith.constant 0 : index
    %c997_171 = arith.constant 997 : index
    %187 = vector.load %arg9[%c0_170, %c997_171] : memref<8x1304xbf16, #tpu.memory_space<vmem>>, vector<8x288xbf16>
    %188 = tpu.concatenate %184, %185, %186, %187 in 1 : vector<8x288xbf16>, vector<8x288xbf16>, vector<8x288xbf16>, vector<8x288xbf16> -> vector<8x1152xbf16>
    %c64_172 = arith.constant 64 : index
    %c0_173 = arith.constant 0 : index
    %189 = vector.load %arg11[%c64_172, %c0_173] : memref<144x1152xbf16, #tpu.memory_space<vmem>>, vector<8x1152xbf16>
    tpu.vector_store %arg11[%c64_172, %c0_173], %188 {strides = array<i32>} : memref<144x1152xbf16, #tpu.memory_space<vmem>>, vector<8x1152xbf16>,
    %c0_174 = arith.constant 0 : index
    %c20_175 = arith.constant 20 : index
    %190 = vector.load %arg9[%c0_174, %c20_175] : memref<8x1304xbf16, #tpu.memory_space<vmem>>, vector<8x288xbf16>
    %c0_176 = arith.constant 0 : index
    %c346 = arith.constant 346 : index
    %191 = vector.load %arg9[%c0_176, %c346] : memref<8x1304xbf16, #tpu.memory_space<vmem>>, vector<8x288xbf16>
    %c0_177 = arith.constant 0 : index
    %c672 = arith.constant 672 : index
    %192 = vector.load %arg9[%c0_177, %c672] : memref<8x1304xbf16, #tpu.memory_space<vmem>>, vector<8x288xbf16>
    %c0_178 = arith.constant 0 : index
    %c998 = arith.constant 998 : index
    %193 = vector.load %arg9[%c0_178, %c998] : memref<8x1304xbf16, #tpu.memory_space<vmem>>, vector<8x288xbf16>
    %194 = tpu.concatenate %190, %191, %192, %193 in 1 : vector<8x288xbf16>, vector<8x288xbf16>, vector<8x288xbf16>, vector<8x288xbf16> -> vector<8x1152xbf16>
    %c80_179 = arith.constant 80 : index
    %c0_180 = arith.constant 0 : index
    %195 = vector.load %arg11[%c80_179, %c0_180] : memref<144x1152xbf16, #tpu.memory_space<vmem>>, vector<8x1152xbf16>
    tpu.vector_store %arg11[%c80_179, %c0_180], %194 {strides = array<i32>} : memref<144x1152xbf16, #tpu.memory_space<vmem>>, vector<8x1152xbf16>,
    %c0_181 = arith.constant 0 : index
    %c36_182 = arith.constant 36 : index
    %196 = vector.load %arg9[%c0_181, %c36_182] : memref<8x1304xbf16, #tpu.memory_space<vmem>>, vector<8x288xbf16>
    %c0_183 = arith.constant 0 : index
    %c362 = arith.constant 362 : index
    %197 = vector.load %arg9[%c0_183, %c362] : memref<8x1304xbf16, #tpu.memory_space<vmem>>, vector<8x288xbf16>
    %c0_184 = arith.constant 0 : index
    %c688 = arith.constant 688 : index
    %198 = vector.load %arg9[%c0_184, %c688] : memref<8x1304xbf16, #tpu.memory_space<vmem>>, vector<8x288xbf16>
    %c0_185 = arith.constant 0 : index
    %c1014 = arith.constant 1014 : index
    %199 = vector.load %arg9[%c0_185, %c1014] : memref<8x1304xbf16, #tpu.memory_space<vmem>>, vector<8x288xbf16>
    %200 = tpu.concatenate %196, %197, %198, %199 in 1 : vector<8x288xbf16>, vector<8x288xbf16>, vector<8x288xbf16>, vector<8x288xbf16> -> vector<8x1152xbf16>
    %c96_186 = arith.constant 96 : index
    %c0_187 = arith.constant 0 : index
    %201 = vector.load %arg11[%c96_186, %c0_187] : memref<144x1152xbf16, #tpu.memory_space<vmem>>, vector<8x1152xbf16>
    tpu.vector_store %arg11[%c96_186, %c0_187], %200 {strides = array<i32>} : memref<144x1152xbf16, #tpu.memory_space<vmem>>, vector<8x1152xbf16>,
    %c0_188 = arith.constant 0 : index
    %c37_189 = arith.constant 37 : index
    %202 = vector.load %arg9[%c0_188, %c37_189] : memref<8x1304xbf16, #tpu.memory_space<vmem>>, vector<8x288xbf16>
    %c0_190 = arith.constant 0 : index
    %c363 = arith.constant 363 : index
    %203 = vector.load %arg9[%c0_190, %c363] : memref<8x1304xbf16, #tpu.memory_space<vmem>>, vector<8x288xbf16>
    %c0_191 = arith.constant 0 : index
    %c689 = arith.constant 689 : index
    %204 = vector.load %arg9[%c0_191, %c689] : memref<8x1304xbf16, #tpu.memory_space<vmem>>, vector<8x288xbf16>
    %c0_192 = arith.constant 0 : index
    %c1015 = arith.constant 1015 : index
    %205 = vector.load %arg9[%c0_192, %c1015] : memref<8x1304xbf16, #tpu.memory_space<vmem>>, vector<8x288xbf16>
    %206 = tpu.concatenate %202, %203, %204, %205 in 1 : vector<8x288xbf16>, vector<8x288xbf16>, vector<8x288xbf16>, vector<8x288xbf16> -> vector<8x1152xbf16>
    %c112_193 = arith.constant 112 : index
    %c0_194 = arith.constant 0 : index
    %207 = vector.load %arg11[%c112_193, %c0_194] : memref<144x1152xbf16, #tpu.memory_space<vmem>>, vector<8x1152xbf16>
    tpu.vector_store %arg11[%c112_193, %c0_194], %206 {strides = array<i32>} : memref<144x1152xbf16, #tpu.memory_space<vmem>>, vector<8x1152xbf16>,
    %c0_195 = arith.constant 0 : index
    %c38_196 = arith.constant 38 : index
    %208 = vector.load %arg9[%c0_195, %c38_196] : memref<8x1304xbf16, #tpu.memory_space<vmem>>, vector<8x288xbf16>
    %c0_197 = arith.constant 0 : index
    %c364 = arith.constant 364 : index
    %209 = vector.load %arg9[%c0_197, %c364] : memref<8x1304xbf16, #tpu.memory_space<vmem>>, vector<8x288xbf16>
    %c0_198 = arith.constant 0 : index
    %c690 = arith.constant 690 : index
    %210 = vector.load %arg9[%c0_198, %c690] : memref<8x1304xbf16, #tpu.memory_space<vmem>>, vector<8x288xbf16>
    %c0_199 = arith.constant 0 : index
    %c1016 = arith.constant 1016 : index
    %211 = vector.load %arg9[%c0_199, %c1016] : memref<8x1304xbf16, #tpu.memory_space<vmem>>, vector<8x288xbf16>
    %212 = tpu.concatenate %208, %209, %210, %211 in 1 : vector<8x288xbf16>, vector<8x288xbf16>, vector<8x288xbf16>, vector<8x288xbf16> -> vector<8x1152xbf16>
    %c128_200 = arith.constant 128 : index
    %c0_201 = arith.constant 0 : index
    %213 = vector.load %arg11[%c128_200, %c0_201] : memref<144x1152xbf16, #tpu.memory_space<vmem>>, vector<8x1152xbf16>
    tpu.vector_store %arg11[%c128_200, %c0_201], %212 {strides = array<i32>} : memref<144x1152xbf16, #tpu.memory_space<vmem>>, vector<8x1152xbf16>,
    %c0_202 = arith.constant 0 : index
    %c0_203 = arith.constant 0 : index
    %214 = vector.load %arg3[%c0_202, %c0_203] : memref<8x144xbf16, #tpu.memory_space<vmem>>, vector<8x144xbf16>
    %c0_204 = arith.constant 0 : index
    %c0_205 = arith.constant 0 : index
    %215 = vector.load %arg11[%c0_204, %c0_205] : memref<144x1152xbf16, #tpu.memory_space<vmem>>, vector<144x1152xbf16>
    %cst_206 = arith.constant dense<0.000000e+00> : vector<8x1152xf32>
    %216 = tpu.matmul %214, %215, %cst_206 {dimension_numbers = #tpu.dot_dimension_numbers<[1], [0], [0], [1], [0, 0, 1, 1], [], []>} : vector<8x144xbf16>, vector<144x1152xbf16>, vector<8x1152xf32> -> vector<8x1152xf32>
    %217 = vector.broadcast %7 : vector<8x1xf32> to vector<8x1152xf32>
    %218 = arith.addf %216, %217 : vector<8x1152xf32>
    %cst_207 = arith.constant dense<0.000000e+00> : vector<8x4xf32>
    %219 = tpu.matmul %218, %11, %cst_207 {dimension_numbers = #tpu.dot_dimension_numbers<[1], [0], [0], [1], [0, 0, 1, 1], [], []>} : vector<8x1152xf32>, vector<1152x4xf32>, vector<8x4xf32> -> vector<8x4xf32>
    %220 = arith.mulf %218, %218 : vector<8x1152xf32>
    %cst_208 = arith.constant dense<0.000000e+00> : vector<8x4xf32>
    %221 = tpu.matmul %220, %11, %cst_208 {dimension_numbers = #tpu.dot_dimension_numbers<[1], [0], [0], [1], [0, 0, 1, 1], [], []>} : vector<8x1152xf32>, vector<1152x4xf32>, vector<8x4xf32> -> vector<8x4xf32>
    %222 = tpu.concatenate %219, %221 in 1 : vector<8x4xf32>, vector<8x4xf32> -> vector<8x8xf32>
    %cst_209 = arith.constant dense<0.000000e+00> : vector<8x8xf32>
    %223 = tpu.matmul %10, %222, %cst_209 {dimension_numbers = #tpu.dot_dimension_numbers<[1], [0], [0], [1], [0, 0, 1, 1], [], []>} : vector<8x8xf32>, vector<8x8xf32>, vector<8x8xf32> -> vector<8x8xf32>
    %224 = vector.extract_strided_slice %223 {offsets = [0, 0], sizes = [8, 4], strides = [1, 1]} : vector<8x8xf32> to vector<8x4xf32>
    %225 = vector.extract_strided_slice %223 {offsets = [0, 4], sizes = [8, 4], strides = [1, 1]} : vector<8x8xf32> to vector<8x4xf32>
    %226 = arith.mulf %224, %224 : vector<8x4xf32>
    %227 = arith.subf %225, %226 : vector<8x4xf32>
    %cst_210 = arith.constant 9.99999974E-6 : f32
    %228 = vector.broadcast %cst_210 : f32 to vector<8x4xf32>
    %229 = arith.addf %227, %228 : vector<8x4xf32>
    %230 = math.rsqrt %229 : vector<8x4xf32>
    %231 = vector.broadcast %8 : vector<8x1xf32> to vector<8x4xf32>
    %232 = arith.mulf %231, %230 : vector<8x4xf32>
    %233 = arith.mulf %224, %232 : vector<8x4xf32>
    %234 = vector.broadcast %9 : vector<8x1xf32> to vector<8x4xf32>
    %235 = arith.subf %234, %233 : vector<8x4xf32>
    %cst_211 = arith.constant dense<0.000000e+00> : vector<8x1152xf32>
    %236 = tpu.matmul %232, %12, %cst_211 {dimension_numbers = #tpu.dot_dimension_numbers<[1], [0], [0], [1], [0, 0, 1, 1], [], []>} : vector<8x4xf32>, vector<4x1152xf32>, vector<8x1152xf32> -> vector<8x1152xf32>
    %cst_212 = arith.constant dense<0.000000e+00> : vector<8x1152xf32>
    %237 = tpu.matmul %235, %12, %cst_212 {dimension_numbers = #tpu.dot_dimension_numbers<[1], [0], [0], [1], [0, 0, 1, 1], [], []>} : vector<8x4xf32>, vector<4x1152xf32>, vector<8x1152xf32> -> vector<8x1152xf32>
    %238 = arith.mulf %218, %236 : vector<8x1152xf32>
    %239 = arith.addf %238, %237 : vector<8x1152xf32>
    %cst_213 = arith.constant 5.000000e-01 : f32
    %240 = vector.broadcast %cst_213 : f32 to vector<8x1152xf32>
    %241 = arith.mulf %240, %239 : vector<8x1152xf32>
    %cst_214 = arith.constant 4.471500e-02 : f32
    %242 = vector.broadcast %cst_214 : f32 to vector<8x1152xf32>
    %243 = arith.mulf %242, %239 : vector<8x1152xf32>
    %244 = arith.mulf %243, %239 : vector<8x1152xf32>
    %245 = arith.mulf %244, %239 : vector<8x1152xf32>
    %246 = arith.addf %239, %245 : vector<8x1152xf32>
    %cst_215 = arith.constant 0.797884583 : f32
    %247 = vector.broadcast %cst_215 : f32 to vector<8x1152xf32>
    %248 = arith.mulf %247, %246 : vector<8x1152xf32>
    %249 = math.tanh %248 : vector<8x1152xf32>
    %cst_216 = arith.constant 1.000000e+00 : f32
    %250 = vector.broadcast %cst_216 : f32 to vector<8x1152xf32>
    %251 = arith.addf %250, %249 : vector<8x1152xf32>
    %252 = arith.mulf %241, %251 : vector<8x1152xf32>
    %253 = arith.addf %150, %252 : vector<8x1152xf32>
    %cst_217 = arith.constant 0.70721358 : f32
    %254 = vector.broadcast %cst_217 : f32 to vector<8x1152xf32>
    %255 = arith.mulf %253, %254 : vector<8x1152xf32>
    %c0_218 = arith.constant 0 : index
    %c0_219 = arith.constant 0 : index
    %c0_220 = arith.constant 0 : index
    %256 = vector.load %arg8[%c0_218, %c0_219, %c0_220] : memref<1x8x1152xf32, #tpu.memory_space<vmem>>, vector<1x8x1152xf32>
    %257 = vector.shape_cast %256 : vector<1x8x1152xf32> to vector<8x1152xf32>
    %258 = vector.shape_cast %255 : vector<8x1152xf32> to vector<1x8x1152xf32>
    tpu.vector_store %arg8[%c0_218, %c0_219, %c0_220], %258 {strides = array<i32>} : memref<1x8x1152xf32, #tpu.memory_space<vmem>>, vector<1x8x1152xf32>,
    return
  }
  func.func @transform_0(%arg0: i32) -> (i32, i32, i32) {
    %c0_i32 = arith.constant 0 : i32
    %c0_i32_0 = arith.constant 0 : i32
    %c0_i32_1 = arith.constant 0 : i32
    return %arg0, %c0_i32, %c0_i32_0 : i32, i32, i32
  }
  func.func @transform_1(%arg0: i32) -> (i32, i32) {
    %c0_i32 = arith.constant 0 : i32
    %c0_i32_0 = arith.constant 0 : i32
    %c0_i32_1 = arith.constant 0 : i32
    return %c0_i32, %c0_i32_0 : i32, i32
  }
  func.func @transform_2(%arg0: i32) -> (i32, i32) {
    %c0_i32 = arith.constant 0 : i32
    %c0_i32_0 = arith.constant 0 : i32
    %c0_i32_1 = arith.constant 0 : i32
    return %c0_i32, %c0_i32_0 : i32, i32
  }
  func.func @transform_3(%arg0: i32) -> (i32, i32) {
    %c0_i32 = arith.constant 0 : i32
    %c0_i32_0 = arith.constant 0 : i32
    %c0_i32_1 = arith.constant 0 : i32
    return %c0_i32, %c0_i32_0 : i32, i32
  }
  func.func @transform_4(%arg0: i32) -> (i32, i32) {
    %c0_i32 = arith.constant 0 : i32
    %c0_i32_0 = arith.constant 0 : i32
    %c0_i32_1 = arith.constant 0 : i32
    return %c0_i32, %c0_i32_0 : i32, i32
  }
  func.func @transform_5(%arg0: i32) -> (i32, i32) {
    %c0_i32 = arith.constant 0 : i32
    %c0_i32_0 = arith.constant 0 : i32
    %c0_i32_1 = arith.constant 0 : i32
    return %c0_i32, %c0_i32_0 : i32, i32
  }
  func.func @transform_6(%arg0: i32) -> (i32, i32) {
    %c0_i32 = arith.constant 0 : i32
    %c0_i32_0 = arith.constant 0 : i32
    %c0_i32_1 = arith.constant 0 : i32
    return %c0_i32, %c0_i32_0 : i32, i32
  }
  func.func @transform_7(%arg0: i32) -> (i32, i32, i32) {
    %c0_i32 = arith.constant 0 : i32
    %c0_i32_0 = arith.constant 0 : i32
    %c0_i32_1 = arith.constant 0 : i32
    return %arg0, %c0_i32, %c0_i32_0 : i32, i32, i32
  }
}

</mosaic_0001>

<bundles_post_ra>
// kernel: residual_conv_block.1
= control target key start
LH: loop header
LB: loop body
LE: loop exit
PB: predicated region body
PF: predicated region fallthrough
CT: control target
= control target key end

     0   :  { %s7241_s15 = smov 32   ;;  %s7242_s22 = smov 127   ;;  %vm11262_vm0 = vcmask 261120   ;;  %vm11169_vm1 = vcmask 1039360   ;;  %vm506_vm2 = vcmask 252928   ;;  %vm11261_vm3 = vcmask 523264   ;;  %s11149_s0 = inlined_call_operand.vmem [shape: f32[4,4,326], index: 0, kind: input, shape index: {}]   ;;  %s11150_s1 = inlined_call_operand.vmem [shape: bf16[8,144], index: 1, kind: input, shape index: {}]   ;;  %s11151_s3 = inlined_call_operand.vmem [shape: f32[8,8], index: 3, kind: input, shape index: {}]   ;;  %s11152_s5 = inlined_call_operand.vmem [shape: f32[1152,4], index: 5, kind: input, shape index: {}]   ;;  %s11153_s4 = inlined_call_operand.vmem [shape: f32[8,8], index: 4, kind: input, shape index: {}]   ;;  %s11154_s6 = inlined_call_operand.vmem [shape: f32[4,1152], index: 6, kind: input, shape index: {}]   ;;  %s11155_s2 = inlined_call_operand.vmem [shape: bf16[8,144], index: 2, kind: input, shape index: {}]   ;;  %s11156_s7 = inlined_call_operand.vmem [shape: f32[1,8,1152], index: 7, kind: output, shape index: {}]  }
   0x1   :  { %v7346_v0 = vld [vmem:[%s11149_s0] sm:$0xff]  ;;  %v370_v1 = vld [vmem:[%s11149_s0 + $0x8] sm:$0xf]  ;;  %v7355_v2 = vld [vmem:[%s11149_s0 + $0xc] sm:$0xff]  ;;  %s7243_s25 = smov 31   ;;  %s7244_s28 = smov 63  }
   0x2   :  { %382 = vst [vmem:[#allocation1] ss:$2 sm:$0xff] %v7346_v0  ;;  %v5854_v3 = vld [vmem:[%s11149_s0 + $0x14] sm:$0xf]  ;;  %v7370_v7 = vld [vmem:[%s11149_s0 + $0x18] sm:$0xff]  ;;  %v7379_v13 = vld [vmem:[%s11149_s0 + $0x24] sm:$0xff] }
   0x3   :  { %384 = vst [vmem:[#allocation1 + $0x10] ss:$2 sm:$0xff] %v370_v1  ;;  %v5856_v8 = vld [vmem:[%s11149_s0 + $0x20] sm:$0xf]  ;;  %v5858_v14 = vld [vmem:[%s11149_s0 + $0x2c] sm:$0xf] }
   0x4   :  { %v465_v18 = vld [vmem:[%s11149_s0 + $0x8] sm:$0xf]  ;;  %v5860_v22 = vld [vmem:[%s11149_s0 + $0x14] sm:$0xf]  ;;  %v5862_v27 = vld [vmem:[%s11149_s0 + $0x20] sm:$0xf] }
   0x5   :  { %v5864_v32 = vld [vmem:[%s11149_s0 + $0x2c] sm:$0xf]  ;;  %v566_v37 = vld [vmem:[%s11149_s0 + $0x8] sm:$0xf]  ;;  %v5866_v41 = vld [vmem:[%s11149_s0 + $0x14] sm:$0xf] }
   0x6   :  { %s7245_s10 = smov 126   ;;  %v5868_v46 = vld [vmem:[%s11149_s0 + $0x20] sm:$0xf]  ;;  %s7246_s13 = smov 30   ;;  %v5870_v51 = vld [vmem:[%s11149_s0 + $0x2c] sm:$0xf] }
   0x7   :  { %s7247_s17 = smov 62   ;;  %v667_v56 = vld [vmem:[%s11149_s0 + $0x8] sm:$0xf]  ;;  %v5872_v60 = vld [vmem:[%s11149_s0 + $0x14] sm:$0xf]  ;;  %s7248_s23 = smov 110  }
   0x8   :  { %s11157_s26 = smov 14   ;;  %s7250_s30 = smov 46   ;;  %vm526_vm4 = vcmask 515072   ;;  %vm607_vm5 = vcmask 244736   ;;  %vm11170_vm6 = vcmask 1031168   ;;  %vm11165_vm7 = vcmask 113664  }
   0x9   :  { %v7360_v4 = vld.sshfl [vmem:[#allocation1] sm:$0xff pattern:$0x75316420]  ;;  %v7362_v5 = vld.sshfl [vmem:[#allocation1 + $0x8] sm:$0xff pattern:$0x75316420] }
   0xa   :  { %v7364_v6 = vld.sshfl [vmem:[#allocation1 + $0x10] sm:$0xff pattern:$0x75316420]  ;;  %393 = vst [vmem:[#allocation1] ss:$2 sm:$0xff] %v7355_v2  ;;  %s11161_s18 = smov 13  }
   0xb   :  { %395 = vst [vmem:[#allocation1 + $0x10] ss:$2 sm:$0xff] %v5854_v3  ;;  %v5874_v3 = vld [vmem:[%s11149_s0 + $0x20] sm:$0xf]  ;;  %s7253_s21 = smov 45   ;;  %s7254_s8 = smov 108  }
   0xc   :  { %s11159_s12 = smov 12   ;;  %s7256_s19 = smov 44   ;;  %vm11172_vm8 = vcmask 900096   ;;  %vm627_vm9 = vcmask 506880   ;;  %vm789_vm10 = vcmask 891904   ;;  %vm728_vm11 = vcmask 375808  }
   0xd   :  { %s7258_s9 = smov 92   ;;  %s7260_s16 = smov 124   ;;  %vm11166_vm12 = vcmask 105472   ;;  %vm829_vm13 = vcmask 367616   ;;  %vm890_vm14 = vcmask 883712   ;;  %vm11167_vm15 = vcmask 97280  }
   0xe   :  { %s7261_s24 = smov 28   ;;  %s7262_s11 = smov 91  }
   0xf   :  { %s7263_s14 = smov 60   ;;  %s11163_s29 = smov 123  }
  0x10   :  { %s7266_s20 = smov 27   ;;  %s7269_s27 = smov 77  }
  0x11   :  { %v396_v9 = vld.sshfl [vmem:[#allocation1] sm:$0xff pattern:$0x75316420]  ;;  %v397_v10 = vld.sshfl [vmem:[#allocation1 + $0x8] sm:$0xff pattern:$0x75316420] }
  0x12   :  { %v398_v11 = vld.sshfl [vmem:[#allocation1 + $0x10] sm:$0xff pattern:$0x75316420]  ;;  %413 = vst [vmem:[#allocation1] ss:$2 sm:$0xff] %v7370_v7  ;;  %v6871_v12 = vpack.i.bf16 %v397_v10, %v396_v9 }
  0x13   :  { %415 = vst [vmem:[#allocation1 + $0x10] ss:$2 sm:$0xff] %v5856_v8 }
  0x14   :  { %6872 = vrot.lane.b32.xlu2 %v6871_v12, %s7241_s15  ;;  %v5876_v12 = vld [vmem:[%s11149_s0 + $0x2c] sm:$0xf] }
  0x19   :  { %v7385_v15 = vld.sshfl [vmem:[#allocation1] sm:$0xff pattern:$0x75316420]  ;;  %v7387_v16 = vld.sshfl [vmem:[#allocation1 + $0x8] sm:$0xff pattern:$0x75316420] }
  0x1a   :  { %v7389_v17 = vld.sshfl [vmem:[#allocation1 + $0x10] sm:$0xff pattern:$0x75316420]  ;;  %433 = vst [vmem:[#allocation1] ss:$2 sm:$0xff] %v7379_v13 }
  0x1b   :  { %435 = vst [vmem:[#allocation1 + $0x10] ss:$2 sm:$0xff] %v5858_v14 }
  0x1c   :  { %403 = vrot.lane.b32.xlu2 %v398_v11, %s7241_s15 }
  0x21   :  { %v7396_v19 = vld.sshfl [vmem:[#allocation1] sm:$0xff pattern:$0x75316420]  ;;  %v7398_v20 = vld.sshfl [vmem:[#allocation1 + $0x8] sm:$0xff pattern:$0x75316420] }
  0x22   :  { %v7400_v21 = vld.sshfl [vmem:[#allocation1 + $0x10] sm:$0xff pattern:$0x75316420]  ;;  %474 = vst [vmem:[#allocation1] ss:$2 sm:$0xff] %v7346_v0 }
  0x23   :  { %476 = vst [vmem:[#allocation1 + $0x10] ss:$2 sm:$0xff] %v465_v18 }
  0x29   :  { %v477_v23 = vld.sshfl [vmem:[#allocation1] sm:$0xff pattern:$0x75316420]  ;;  %v478_v24 = vld.sshfl [vmem:[#allocation1 + $0x8] sm:$0xff pattern:$0x75316420] }
  0x2a   :  { %v479_v25 = vld.sshfl [vmem:[#allocation1 + $0x10] sm:$0xff pattern:$0x75316420]  ;;  %494 = vst [vmem:[#allocation1] ss:$2 sm:$0xff] %v7355_v2 }
  0x2b   :  { %v6876_v26 = vpack.i.bf16 %v477_v23, %v479_v25  ;;  %496 = vst [vmem:[#allocation1 + $0x10] ss:$2 sm:$0xff] %v5860_v22 }
  0x2d   :  { %6877 = vrot.lane.b32.xlu0 %v6876_v26, %s7242_s22 }
  0x31   :  { %v497_v28 = vld.sshfl [vmem:[#allocation1] sm:$0xff pattern:$0x75316420]  ;;  %v498_v29 = vld.sshfl [vmem:[#allocation1 + $0x8] sm:$0xff pattern:$0x75316420] }
  0x32   :  { %v6881_v30 = vpack.i.bf16 %v498_v29, %v497_v28  ;;  %v499_v31 = vld.sshfl [vmem:[#allocation1 + $0x10] sm:$0xff pattern:$0x75316420]  ;;  %514 = vst [vmem:[#allocation1] ss:$2 sm:$0xff] %v7370_v7 }
  0x33   :  { %516 = vst [vmem:[#allocation1 + $0x10] ss:$2 sm:$0xff] %v5862_v27  ;;  %v5878_v28 = vld [vmem:[%s11149_s0 + $0x14] sm:$0xf] }
  0x34   :  { %6882 = vrot.lane.b32.xlu1 %v6881_v30, %s7243_s25 }
  0x35   :  { %482 = vrot.lane.b32.xlu0 %v478_v24, %s7242_s22  ;;  %v768_v24 = vld [vmem:[%s11149_s0 + $0x8] sm:$0xf] }
  0x39   :  { %v517_v33 = vld.sshfl [vmem:[#allocation1] sm:$0xff pattern:$0x75316420]  ;;  %v518_v34 = vld.sshfl [vmem:[#allocation1 + $0x8] sm:$0xff pattern:$0x75316420] }
  0x3a   :  { %v6886_v35 = vpack.i.bf16 %v518_v34, %v517_v33  ;;  %534 = vst [vmem:[#allocation1] ss:$2 sm:$0xff] %v7379_v13  ;;  %v7417_v36 = vld.sshfl [vmem:[#allocation1 + $0x10] sm:$0xff pattern:$0x75316420] }
  0x3b   :  { %536 = vst [vmem:[#allocation1 + $0x10] ss:$2 sm:$0xff] %v5864_v32  ;;  %v5880_v33 = vld [vmem:[%s11149_s0 + $0x20] sm:$0xf] }
  0x3c   :  { %6887 = vrot.lane.b32.xlu1 %v6886_v35, %s7244_s28 }
  0x3d   :  { %504 = vrot.lane.b32.xlu0 %v499_v31, %s7243_s25  ;;  %s7257_s25 = smov 76  }
  0x41   :  { %v7423_v38 = vld.sshfl [vmem:[#allocation1] sm:$0xff pattern:$0x75316420]  ;;  %v7425_v39 = vld.sshfl [vmem:[#allocation1 + $0x8] sm:$0xff pattern:$0x75316420] }
  0x42   :  { %575 = vst [vmem:[#allocation1] ss:$2 sm:$0xff] %v7346_v0  ;;  %v7428_v40 = vld.sshfl [vmem:[#allocation1 + $0x10] sm:$0xff pattern:$0x75316420] }
  0x43   :  { %577 = vst [vmem:[#allocation1 + $0x10] ss:$2 sm:$0xff] %v566_v37 }
  0x49   :  { %v578_v42 = vld.sshfl [vmem:[#allocation1] sm:$0xff pattern:$0x75316420]  ;;  %v579_v43 = vld.sshfl [vmem:[#allocation1 + $0x8] sm:$0xff pattern:$0x75316420] }
  0x4a   :  { %595 = vst [vmem:[#allocation1] ss:$2 sm:$0xff] %v7355_v2  ;;  %v580_v44 = vld.sshfl [vmem:[#allocation1 + $0x10] sm:$0xff pattern:$0x75316420]  ;;  %583 = vrot.lane.b32.xlu1 %v579_v43, %s7245_s10 }
  0x4b   :  { %v6891_v45 = vpack.i.bf16 %v578_v42, %v580_v44  ;;  %597 = vst [vmem:[#allocation1 + $0x10] ss:$2 sm:$0xff] %v5866_v41  ;;  %v5882_v42 = vld [vmem:[%s11149_s0 + $0x2c] sm:$0xf] }
  0x4d   :  { %6892 = vrot.lane.b32.xlu2 %v6891_v45, %s7245_s10 }
  0x51   :  { %v598_v47 = vld.sshfl [vmem:[#allocation1] sm:$0xff pattern:$0x75316420]  ;;  %v599_v48 = vld.sshfl [vmem:[#allocation1 + $0x8] sm:$0xff pattern:$0x75316420] }
  0x52   :  { %v6896_v49 = vpack.i.bf16 %v599_v48, %v598_v47  ;;  %615 = vst [vmem:[#allocation1] ss:$2 sm:$0xff] %v7370_v7  ;;  %v600_v50 = vld.sshfl [vmem:[#allocation1 + $0x10] sm:$0xff pattern:$0x75316420] }
  0x53   :  { %617 = vst [vmem:[#allocation1 + $0x10] ss:$2 sm:$0xff] %v5868_v46  ;;  %v869_v47 = vld [vmem:[%s11149_s0 + $0x8] sm:$0xf] }
  0x54   :  { %6897 = vrot.lane.b32.xlu0 %v6896_v49, %s7246_s13 }
  0x55   :  { %605 = vrot.lane.b32.xlu2 %v600_v50, %s7246_s13  ;;  %s7251_s13 = smov 109  }
  0x59   :  { %v618_v52 = vld.sshfl [vmem:[#allocation1] sm:$0xff pattern:$0x75316420]  ;;  %v619_v53 = vld.sshfl [vmem:[#allocation1 + $0x8] sm:$0xff pattern:$0x75316420] }
  0x5a   :  { %v6901_v54 = vpack.i.bf16 %v619_v53, %v618_v52  ;;  %v7443_v55 = vld.sshfl [vmem:[#allocation1 + $0x10] sm:$0xff pattern:$0x75316420]  ;;  %635 = vst [vmem:[#allocation1] ss:$2 sm:$0xff] %v7379_v13 }
  0x5b   :  { %637 = vst [vmem:[#allocation1 + $0x10] ss:$2 sm:$0xff] %v5870_v51  ;;  %v5884_v51 = vld [vmem:[%s11149_s0 + $0x14] sm:$0xf] }
  0x5c   :  { %6902 = vrot.lane.b32.xlu0 %v6901_v54, %s7247_s17 }
  0x61   :  { %v7450_v57 = vld.sshfl [vmem:[#allocation1] sm:$0xff pattern:$0x75316420]  ;;  %v7452_v58 = vld.sshfl [vmem:[#allocation1 + $0x8] sm:$0xff pattern:$0x75316420] }
  0x62   :  { %676 = vst [vmem:[#allocation1] ss:$2 sm:$0xff] %v7346_v0  ;;  %v7455_v59 = vld.sshfl [vmem:[#allocation1 + $0x10] sm:$0xff pattern:$0x75316420] }
  0x63   :  { %678 = vst [vmem:[#allocation1 + $0x10] ss:$2 sm:$0xff] %v667_v56 }
  0x69   :  { %v680_v61 = vld.sshfl [vmem:[#allocation1 + $0x8] sm:$0xff pattern:$0x75316420]  ;;  %v679_v62 = vld.sshfl [vmem:[#allocation1] sm:$0xff pattern:$0x75316420] }
  0x6a   :  { %684 = vrot.lane.b32.xlu0 %v680_v61, %s7248_s23  ;;  %v681_v63 = vld.sshfl [vmem:[#allocation1 + $0x10] sm:$0xff pattern:$0x75316420]  ;;  %696 = vst [vmem:[#allocation1] ss:$2 sm:$0xff] %v7355_v2 }
  0x6b   :  { %v6906_v1 = vpack.i.bf16 %v679_v62, %v681_v63  ;;  %698 = vst [vmem:[#allocation1 + $0x10] ss:$2 sm:$0xff] %v5872_v60  ;;  %v5886_v60 = vld [vmem:[%s11149_s0 + $0x20] sm:$0xf] }
  0x6d   :  { %6907 = vrot.lane.b32.xlu1 %v6906_v1, %s7248_s23 }
  0x71   :  { %v699_v8 = vld.sshfl [vmem:[#allocation1] sm:$0xff pattern:$0x75316420]  ;;  %v700_v9 = vld.sshfl [vmem:[#allocation1 + $0x8] sm:$0xff pattern:$0x75316420] }
  0x72   :  { %v6911_v10 = vpack.i.bf16 %v700_v9, %v699_v8  ;;  %716 = vst [vmem:[#allocation1] ss:$2 sm:$0xff] %v7370_v7  ;;  %v701_v11 = vld.sshfl [vmem:[#allocation1 + $0x10] sm:$0xff pattern:$0x75316420] }
  0x73   :  { %718 = vst [vmem:[#allocation1 + $0x10] ss:$2 sm:$0xff] %v5874_v3  ;;  %v5888_v3 = vld [vmem:[%s11149_s0 + $0x2c] sm:$0xf] }
  0x74   :  { %6912 = vrot.lane.b32.xlu2 %v6911_v10, %s11157_s26 }
  0x75   :  { %706 = vrot.lane.b32.xlu1 %v701_v11, %s11157_s26  ;;  %s7298_s26 = smov 34  }
  0x79   :  { %v719_v14 = vld.sshfl [vmem:[#allocation1] sm:$0xff pattern:$0x75316420]  ;;  %v720_v18 = vld.sshfl [vmem:[#allocation1 + $0x8] sm:$0xff pattern:$0x75316420] }
  0x7a   :  { %736 = vst [vmem:[#allocation1] ss:$2 sm:$0xff] %v7379_v13  ;;  %v7473_v22 = vld.sshfl [vmem:[#allocation1 + $0x10] sm:$0xff pattern:$0x75316420]  ;;  %v6916_v23 = vpack.i.bf16 %v720_v18, %v719_v14 }
  0x7b   :  { %738 = vst [vmem:[#allocation1 + $0x10] ss:$2 sm:$0xff] %v5876_v12  ;;  %v970_v12 = vld [vmem:[%s11149_s0 + $0x8] sm:$0xf] }
  0x7c   :  { %6917 = vrot.lane.b32.xlu2 %v6916_v23, %s7250_s30 }
  0x81   :  { %v7479_v25 = vld.sshfl [vmem:[#allocation1] sm:$0xff pattern:$0x75316420]  ;;  %v7481_v26 = vld.sshfl [vmem:[#allocation1 + $0x8] sm:$0xff pattern:$0x75316420] }
  0x82   :  { %777 = vst [vmem:[#allocation1] ss:$2 sm:$0xff] %v7346_v0  ;;  %v7484_v27 = vld.sshfl [vmem:[#allocation1 + $0x10] sm:$0xff pattern:$0x75316420] }
  0x83   :  { %779 = vst [vmem:[#allocation1 + $0x10] ss:$2 sm:$0xff] %v768_v24 }
  0x89   :  { %v781_v29 = vld.sshfl [vmem:[#allocation1 + $0x8] sm:$0xff pattern:$0x75316420]  ;;  %v780_v30 = vld.sshfl [vmem:[#allocation1] sm:$0xff pattern:$0x75316420] }
  0x8a   :  { %785 = vrot.lane.b32.xlu0 %v781_v29, %s7251_s13  ;;  %797 = vst [vmem:[#allocation1] ss:$2 sm:$0xff] %v7355_v2  ;;  %v782_v31 = vld.sshfl [vmem:[#allocation1 + $0x10] sm:$0xff pattern:$0x75316420] }
  0x8b   :  { %v6921_v32 = vpack.i.bf16 %v780_v30, %v782_v31  ;;  %799 = vst [vmem:[#allocation1 + $0x10] ss:$2 sm:$0xff] %v5878_v28  ;;  %v5890_v28 = vld [vmem:[%s11149_s0 + $0x14] sm:$0xf] }
  0x8d   :  { %6922 = vrot.lane.b32.xlu2 %v6921_v32, %s7251_s13 }
  0x91   :  { %v800_v34 = vld.sshfl [vmem:[#allocation1] sm:$0xff pattern:$0x75316420]  ;;  %v801_v35 = vld.sshfl [vmem:[#allocation1 + $0x8] sm:$0xff pattern:$0x75316420] }
  0x92   :  { %v6926_v37 = vpack.i.bf16 %v801_v35, %v800_v34  ;;  %817 = vst [vmem:[#allocation1] ss:$2 sm:$0xff] %v7370_v7  ;;  %v802_v41 = vld.sshfl [vmem:[#allocation1 + $0x10] sm:$0xff pattern:$0x75316420]  ;;  %v7259_v34 = vmov 0  }
  0x93   :  { %819 = vst [vmem:[#allocation1 + $0x10] ss:$2 sm:$0xff] %v5880_v33  ;;  %v7544_v33 = vpop.permute.xlu2 %6872  ;;  %7046 = vset.pattern.permute.xlu1 %v7259_v34 }
  0x94   :  { %6927 = vrot.lane.b32.xlu0 %v6926_v37, %s11161_s18  ;;  %32 = vst [vmem:[#allocation3 + $0x8] sm:$0xff] %v7259_v34  ;;  %v6875_v35 = vunpack.i.h.bf16 %v7544_v33  ;;  %v6874_v37 = vunpack.i.l.bf16 %v7544_v33 }
  0x95   :  { %31 = vst [vmem:[#allocation3] sm:$0xff] %v7259_v34 }
  0x96   :  { %33 = vst [vmem:[#allocation3 + $0x10] sm:$0xff] %v7259_v34 }
  0x97   :  { %34 = vst [vmem:[#allocation3 + $0x18] sm:$0xff] %v7259_v34 }
  0x98   :  { %35 = vst [vmem:[#allocation3 + $0x20] sm:$0xf] %v7259_v34 }
  0x99   :  { %v820_v43 = vld.sshfl [vmem:[#allocation1] sm:$0xff pattern:$0x75316420]  ;;  %v821_v44 = vld.sshfl [vmem:[#allocation1 + $0x8] sm:$0xff pattern:$0x75316420] }
  0x9a   :  { %v6931_v45 = vpack.i.bf16 %v821_v44, %v820_v43  ;;  %837 = vst [vmem:[#allocation1] ss:$2 sm:$0xff] %v7379_v13  ;;  %v7501_v46 = vld.sshfl [vmem:[#allocation1 + $0x10] sm:$0xff pattern:$0x75316420]  ;;  %v451_v43 = vsel %vm11262_vm0, %v7364_v6, %v6874_v37 }
  0x9b   :  { %839 = vst [vmem:[#allocation1 + $0x10] ss:$2 sm:$0xff] %v5882_v42  ;;  %v406_v42 = vsel %vm11262_vm0, %v6874_v37, %v6875_v35  ;;  %v5894_v6 = vld [vmem:[%s11149_s0 + $0x2c] sm:$0xf] }
  0x9c   :  { %6932 = vrot.lane.b32.xlu1 %v6931_v45, %s7253_s21  ;;  %807 = vrot.lane.b32.xlu0 %v802_v41, %s11161_s18  ;;  %v5892_v41 = vld [vmem:[%s11149_s0 + $0x20] sm:$0xf]  ;;  %36 = vst [vmem:[#allocation3 + $0x24] sm:$0xff] %v7259_v34  ;;  %s7268_s18 = smov 90  }
  0x9d   :  { %37 = vst [vmem:[#allocation3 + $0x2c] sm:$0xff] %v7259_v34 }
  0x9e   :  { %38 = vst [vmem:[#allocation3 + $0x34] sm:$0xff] %v7259_v34 }
  0x9f   :  { %39 = vst [vmem:[#allocation3 + $0x3c] sm:$0xff] %v7259_v34 }
  0xa0   :  { %40 = vst [vmem:[#allocation3 + $0x44] sm:$0xf] %v7259_v34 }
  0xa1   :  { %v7508_v48 = vld.sshfl [vmem:[#allocation1] sm:$0xff pattern:$0x75316420]  ;;  %v7510_v49 = vld.sshfl [vmem:[#allocation1 + $0x8] sm:$0xff pattern:$0x75316420] }
  0xa2   :  { %v7512_v50 = vld.sshfl [vmem:[#allocation1 + $0x10] sm:$0xff pattern:$0x75316420]  ;;  %878 = vst [vmem:[#allocation1] ss:$2 sm:$0xff] %v7346_v0 }
  0xa3   :  { %880 = vst [vmem:[#allocation1 + $0x10] ss:$2 sm:$0xff] %v869_v47  ;;  %v455_v47 = vpack.c.bf16 %v406_v42, %v451_v43 }
  0xa4   :  { %41 = vst [vmem:[#allocation3 + $0x48] sm:$0xff] %v7259_v34 }
  0xa5   :  { %460 = vst [vmem:[#allocation3 + $0x8] sm:$0x33] %v455_v47 }
  0xa6   :  { %42 = vst [vmem:[#allocation3 + $0x50] sm:$0xff] %v7259_v34 }
  0xa7   :  { %43 = vst [vmem:[#allocation3 + $0x58] sm:$0xff] %v7259_v34 }
  0xa8   :  { %44 = vst [vmem:[#allocation3 + $0x60] sm:$0xff] %v7259_v34 }
  0xa9   :  { %v881_v52 = vld.sshfl [vmem:[#allocation1] sm:$0xff pattern:$0x75316420]  ;;  %v882_v53 = vld.sshfl [vmem:[#allocation1 + $0x8] sm:$0xff pattern:$0x75316420] }
  0xaa   :  { %v883_v54 = vld.sshfl [vmem:[#allocation1 + $0x10] sm:$0xff pattern:$0x75316420]  ;;  %886 = vrot.lane.b32.xlu1 %v882_v53, %s7254_s8  ;;  %898 = vst [vmem:[#allocation1] ss:$2 sm:$0xff] %v7355_v2 }
  0xab   :  { %v6936_v56 = vpack.i.bf16 %v881_v52, %v883_v54  ;;  %900 = vst [vmem:[#allocation1 + $0x10] ss:$2 sm:$0xff] %v5884_v51 }
  0xac   :  { %45 = vst [vmem:[#allocation3 + $0x68] sm:$0xf] %v7259_v34 }
  0xad   :  { %6937 = vrot.lane.b32.xlu2 %v6936_v56, %s7254_s8  ;;  %46 = vst [vmem:[#allocation3 + $0x6c] sm:$0xff] %v7259_v34 }
  0xae   :  { %47 = vst [vmem:[#allocation3 + $0x74] sm:$0xff] %v7259_v34 }
  0xaf   :  { %48 = vst [vmem:[#allocation3 + $0x7c] sm:$0xff] %v7259_v34 }
  0xb0   :  { %49 = vst [vmem:[#allocation3 + $0x84] sm:$0xff] %v7259_v34 }
  0xb1   :  { %v901_v61 = vld.sshfl [vmem:[#allocation1] sm:$0xff pattern:$0x75316420]  ;;  %v902_v62 = vld.sshfl [vmem:[#allocation1 + $0x8] sm:$0xff pattern:$0x75316420] }
  0xb2   :  { %v6941_v63 = vpack.i.bf16 %v902_v62, %v901_v61  ;;  %v903_v1 = vld.sshfl [vmem:[#allocation1 + $0x10] sm:$0xff pattern:$0x75316420]  ;;  %918 = vst [vmem:[#allocation1] ss:$2 sm:$0xff] %v7370_v7 }
  0xb3   :  { %920 = vst [vmem:[#allocation1 + $0x10] ss:$2 sm:$0xff] %v5886_v60  ;;  %v1071_v61 = vld [vmem:[%s11149_s0 + $0x8] sm:$0xf] }
  0xb4   :  { %6942 = vrot.lane.b32.xlu0 %v6941_v63, %s11159_s12  ;;  %50 = vst [vmem:[#allocation3 + $0x8c] sm:$0xf] %v7259_v34 }
  0xb5   :  { %908 = vrot.lane.b32.xlu2 %v903_v1, %s11159_s12  ;;  %51 = vst [vmem:[#allocation3 + $0x90] sm:$0xff] %v7259_v34  ;;  %s7293_s12 = smov 105  }
  0xb6   :  { %52 = vst [vmem:[#allocation3 + $0x98] sm:$0xff] %v7259_v34 }
  0xb7   :  { %53 = vst [vmem:[#allocation3 + $0xa0] sm:$0xff] %v7259_v34 }
  0xb8   :  { %54 = vst [vmem:[#allocation3 + $0xa8] sm:$0xff] %v7259_v34 }
  0xb9   :  { %v921_v8 = vld.sshfl [vmem:[#allocation1] sm:$0xff pattern:$0x75316420]  ;;  %v922_v9 = vld.sshfl [vmem:[#allocation1 + $0x8] sm:$0xff pattern:$0x75316420] }
  0xba   :  { %v6946_v10 = vpack.i.bf16 %v922_v9, %v921_v8  ;;  %938 = vst [vmem:[#allocation1] ss:$2 sm:$0xff] %v7379_v13  ;;  %v923_v11 = vld.sshfl [vmem:[#allocation1 + $0x10] sm:$0xff pattern:$0x75316420]  ;;  %v7705_v9 = vpop.permute.xlu2 %403 }
  0xbb   :  { %940 = vst [vmem:[#allocation1 + $0x10] ss:$2 sm:$0xff] %v5888_v3 }
  0xbc   :  { %6947 = vrot.lane.b32.xlu1 %v6946_v10, %s7256_s19  ;;  %55 = vst [vmem:[#allocation3 + $0xb0] sm:$0xf] %v7259_v34  ;;  %v6878_v10 = vpop.permute.xlu0 %6877 }
  0xbd   :  { %928 = vrot.lane.b32.xlu2 %v923_v11, %s7256_s19  ;;  %56 = vst [vmem:[#allocation3 + $0xb4] sm:$0xff] %v7259_v34  ;;  %s7265_s19 = smov 64  }
  0xbe   :  { %57 = vst [vmem:[#allocation3 + $0xbc] sm:$0xff] %v7259_v34 }
  0xbf   :  { %58 = vst [vmem:[#allocation3 + $0xc4] sm:$0xff] %v7259_v34 }
  0xc0   :  { %59 = vst [vmem:[#allocation3 + $0xcc] sm:$0xff] %v7259_v34 }
  0xc1   :  { %v941_v14 = vld.sshfl [vmem:[#allocation1] sm:$0xff pattern:$0x75316420]  ;;  %v942_v18 = vld.sshfl [vmem:[#allocation1 + $0x8] sm:$0xff pattern:$0x75316420] }
  0xc2   :  { %v6951_v23 = vpack.i.bf16 %v942_v18, %v941_v14  ;;  %v7534_v24 = vld.sshfl [vmem:[#allocation1 + $0x10] sm:$0xff pattern:$0x75316420]  ;;  %979 = vst [vmem:[#allocation1] ss:$2 sm:$0xff] %v7346_v0  ;;  %v6883_v18 = vpop.permute.xlu1 %6882 }
  0xc3   :  { %981 = vst [vmem:[#allocation1 + $0x10] ss:$2 sm:$0xff] %v970_v12  ;;  %v7718_v12 = vpop.permute.xlu2 %6892 }
  0xc4   :  { %6952 = vrot.lane.b32.xlu0 %v6951_v23, %s7257_s25  ;;  %60 = vst [vmem:[#allocation3 + $0xd4] sm:$0xf] %v7259_v34  ;;  %v483_v14 = vpop.permute.xlu0 %482  ;;  %v6880_v23 = vunpack.i.h.bf16 %v6878_v10 }
  0xc5   :  { %61 = vst [vmem:[#allocation3 + $0xd8] sm:$0xff] %v7259_v34 }
  0xc6   :  { %62 = vst [vmem:[#allocation3 + $0xe0] sm:$0xff] %v7259_v34 }
  0xc7   :  { %63 = vst [vmem:[#allocation3 + $0xe8] sm:$0xff] %v7259_v34 }
  0xc8   :  { %64 = vst [vmem:[#allocation3 + $0xf0] sm:$0xff] %v7259_v34 }
  0xc9   :  { %v983_v29 = vld.sshfl [vmem:[#allocation1 + $0x8] sm:$0xff pattern:$0x75316420]  ;;  %v982_v30 = vld.sshfl [vmem:[#allocation1] sm:$0xff pattern:$0x75316420] }
  0xca   :  { %987 = vrot.lane.b32.xlu1 %v983_v29, %s7258_s9  ;;  %v984_v31 = vld.sshfl [vmem:[#allocation1 + $0x10] sm:$0xff pattern:$0x75316420]  ;;  %999 = vst [vmem:[#allocation1] ss:$2 sm:$0xff] %v7355_v2  ;;  %v6885_v29 = vunpack.i.h.bf16 %v6883_v18 }
  0xcb   :  { %v6956_v32 = vpack.i.bf16 %v982_v30, %v984_v31  ;;  %1001 = vst [vmem:[#allocation1 + $0x10] ss:$2 sm:$0xff] %v5890_v28  ;;  %v6879_v28 = vunpack.i.l.bf16 %v6878_v10  ;;  %v6884_v30 = vunpack.i.l.bf16 %v6883_v18  ;;  %v487_v31 = vsel %vm11169_vm1, %v6880_v23, %v483_v14  ;;  %v7730_v37 = vpop.permute.xlu2 %605 }
  0xcc   :  { %65 = vst [vmem:[#allocation3 + $0xf8] sm:$0xf] %v7259_v34 }
  0xcd   :  { %6957 = vrot.lane.b32.xlu2 %v6956_v32, %s7258_s9  ;;  %66 = vst [vmem:[#allocation3 + $0xfc] sm:$0xff] %v7259_v34  ;;  %v488_v32 = vsel %vm11169_vm1, %v483_v14, %v6879_v28  ;;  %v552_v42 = vsel %vm11262_vm0, %v6879_v28, %v6884_v30  ;;  %v507_v43 = vsel %vm506_vm2, %v6884_v30, %v6885_v29  ;;  %v6895_v14 = vunpack.i.h.bf16 %v7718_v12 }
  0xce   :  { %67 = vst [vmem:[#allocation3 + $0x104] sm:$0xff] %v7259_v34  ;;  %v556_v47 = vpack.c.bf16 %v507_v43, %v552_v42  ;;  %v5900_v42 = vld [vmem:[%s11149_s0 + $0x2c] sm:$0xf]  ;;  %vm1092_vm1 = vcmask 744448  }
  0xcf   :  { %68 = vst [vmem:[#allocation3 + $0x10c] sm:$0xff] %v7259_v34 }
  0xd0   :  { %69 = vst [vmem:[#allocation3 + $0x114] sm:$0xff] %v7259_v34 }
  0xd1   :  { %v1002_v44 = vld.sshfl [vmem:[#allocation1] sm:$0xff pattern:$0x75316420]  ;;  %v1003_v45 = vld.sshfl [vmem:[#allocation1 + $0x8] sm:$0xff pattern:$0x75316420] }
  0xd2   :  { %v1004_v51 = vld.sshfl [vmem:[#allocation1 + $0x10] sm:$0xff pattern:$0x75316420]  ;;  %v6961_v52 = vpack.i.bf16 %v1003_v45, %v1002_v44  ;;  %1019 = vst [vmem:[#allocation1] ss:$2 sm:$0xff] %v7370_v7  ;;  %v555_v45 = vpack.c.bf16 %v488_v32, %v487_v31 }
  0xd3   :  { %1009 = vrot.lane.b32.xlu0 %v1004_v51, %s7260_s16  ;;  %1021 = vst [vmem:[#allocation1 + $0x10] ss:$2 sm:$0xff] %v5892_v41  ;;  %v505_v41 = vpop.permute.xlu0 %504  ;;  %v5896_v44 = vld [vmem:[%s11149_s0 + $0x14] sm:$0xf]  ;;  %v6894_v51 = vunpack.i.l.bf16 %v7718_v12 }
  0xd4   :  { %70 = vst [vmem:[#allocation3 + $0x11c] sm:$0xf] %v7259_v34 }
  0xd5   :  { %6962 = vrot.lane.b32.xlu2 %v6961_v52, %s7260_s16  ;;  %71 = vst [vmem:[#allocation3 + $0x120] sm:$0xff] %v7259_v34  ;;  %v508_v52 = vsel %vm506_vm2, %v6885_v29, %v505_v41  ;;  %v6986_v41 = vpack.i.bf16 %v7387_v16, %v7385_v15  ;;  %vm930_vm2 = vcmask 359424  }
  0xd6   :  { %72 = vst [vmem:[#allocation3 + $0x128] sm:$0xff] %v7259_v34 }
  0xd7   :  { %73 = vst [vmem:[#allocation3 + $0x130] sm:$0xff] %v7259_v34 }
  0xd8   :  { %74 = vst [vmem:[#allocation3 + $0x138] sm:$0xff] %v7259_v34 }
  0xd9   :  { %v1022_v53 = vld.sshfl [vmem:[#allocation1] sm:$0xff pattern:$0x75316420]  ;;  %v1023_v54 = vld.sshfl [vmem:[#allocation1 + $0x8] sm:$0xff pattern:$0x75316420] }
  0xda   :  { %v1024_v56 = vld.sshfl [vmem:[#allocation1 + $0x10] sm:$0xff pattern:$0x75316420]  ;;  %1039 = vst [vmem:[#allocation1] ss:$2 sm:$0xff] %v7379_v13  ;;  %v6966_v60 = vpack.i.bf16 %v1023_v54, %v1022_v53  ;;  %v7744_v53 = vpop.permute.xlu1 %6887 }
  0xdb   :  { %1041 = vst [vmem:[#allocation1 + $0x10] ss:$2 sm:$0xff] %v5894_v6  ;;  %1029 = vrot.lane.b32.xlu1 %v1024_v56, %s7261_s24  ;;  %v7742_v6 = vpop.permute.xlu2 %6912  ;;  %v6890_v54 = vunpack.i.h.bf16 %v7744_v53  ;;  %v6889_v56 = vunpack.i.l.bf16 %v7744_v53 }
  0xdc   :  { %75 = vst [vmem:[#allocation3 + $0x140] sm:$0xf] %v7259_v34 }
  0xdd   :  { %6967 = vrot.lane.b32.xlu2 %v6966_v60, %s7261_s24  ;;  %76 = vst [vmem:[#allocation3 + $0x144] sm:$0xff] %v7259_v34  ;;  %s7267_s24 = smov 59  }
  0xde   :  { %77 = vst [vmem:[#allocation3 + $0x14c] sm:$0xff] %v7259_v34 }
  0xdf   :  { %78 = vst [vmem:[#allocation3 + $0x154] sm:$0xff] %v7259_v34 }
  0xe0   :  { %79 = vst [vmem:[#allocation3 + $0x15c] sm:$0xff] %v7259_v34 }
  0xe1   :  { %v7579_v13 = vld.sshfl [vmem:[#allocation1] sm:$0xff pattern:$0x75316420]  ;;  %v7581_v62 = vld.sshfl [vmem:[#allocation1 + $0x8] sm:$0xff pattern:$0x75316420] }
  0xe2   :  { %v7583_v63 = vld.sshfl [vmem:[#allocation1 + $0x10] sm:$0xff pattern:$0x75316420]  ;;  %1080 = vst [vmem:[#allocation1] ss:$2 sm:$0xff] %v7346_v0  ;;  %v6971_v11 = vpack.i.bf16 %v7581_v62, %v7579_v13  ;;  %v553_v13 = vsel %vm11261_vm3, %v508_v52, %v6889_v56  ;;  %v584_v29 = vpop.permute.xlu1 %583  ;;  %v6914_v52 = vunpack.i.l.bf16 %v7742_v6 }
  0xe3   :  { %1082 = vst [vmem:[#allocation1 + $0x10] ss:$2 sm:$0xff] %v1071_v61  ;;  %v7761_v28 = vpop.permute.xlu2 %6917  ;;  %v588_v31 = vsel %vm11170_vm6, %v6895_v14, %v584_v29  ;;  %v589_v32 = vsel %vm11170_vm6, %v584_v29, %v6894_v51  ;;  %vm1132_vm6 = vcmask 220160  }
  0xe4   :  { %80 = vst [vmem:[#allocation3 + $0x164] sm:$0xf] %v7259_v34  ;;  %v656_v12 = vpack.c.bf16 %v589_v32, %v588_v31 }
  0xe5   :  { %81 = vst [vmem:[#allocation3 + $0x168] sm:$0xff] %v7259_v34  ;;  %6972 = vrot.lane.b32.xlu2 %v6971_v11, %s7263_s14 }
  0xe6   :  { %82 = vst [vmem:[#allocation3 + $0x170] sm:$0xff] %v7259_v34 }
  0xe7   :  { %83 = vst [vmem:[#allocation3 + $0x178] sm:$0xff] %v7259_v34 }
  0xe8   :  { %84 = vst [vmem:[#allocation3 + $0x180] sm:$0xff] %v7259_v34 }
  0xe9   :  { %v1084_v1 = vld.sshfl [vmem:[#allocation1 + $0x8] sm:$0xff pattern:$0x75316420]  ;;  %v1083_v3 = vld.sshfl [vmem:[#allocation1] sm:$0xff pattern:$0x75316420] }
  0xea   :  { %1088 = vrot.lane.b32.xlu1 %v1084_v1, %s7262_s11  ;;  %v1085_v8 = vld.sshfl [vmem:[#allocation1 + $0x10] sm:$0xff pattern:$0x75316420]  ;;  %85 = vst [vmem:[#allocation3 + $0x188] sm:$0xf] %v7259_v34 }
  0xeb   :  { %v6976_v0 = vpack.i.bf16 %v1083_v3, %v1085_v8  ;;  %86 = vst [vmem:[#allocation3 + $0x18c] sm:$0xff] %v7259_v34  ;;  %v5898_v1 = vld [vmem:[%s11149_s0 + $0x20] sm:$0xf] }
  0xec   :  { %87 = vst [vmem:[#allocation3 + $0x194] sm:$0xff] %v7259_v34 }
  0xed   :  { %6977 = vrot.lane.b32.xlu0 %v6976_v0, %s7262_s11  ;;  %88 = vst [vmem:[#allocation3 + $0x19c] sm:$0xff] %v7259_v34 }
  0xee   :  { %89 = vst [vmem:[#allocation3 + $0x1a4] sm:$0xff] %v7259_v34 }
  0xef   :  { %90 = vst [vmem:[#allocation3 + $0x1ac] sm:$0xf] %v7259_v34 }
  0xf0   :  { %91 = vst [vmem:[#allocation3 + $0x1b0] sm:$0xff] %v7259_v34 }
  0xf1   :  { %92 = vst [vmem:[#allocation3 + $0x1b8] sm:$0xff] %v7259_v34 }
  0xf2   :  { %93 = vst [vmem:[#allocation3 + $0x1c0] sm:$0xff] %v7259_v34 }
  0xf3   :  { %94 = vst [vmem:[#allocation3 + $0x1c8] sm:$0xff] %v7259_v34 }
  0xf4   :  { %95 = vst [vmem:[#allocation3 + $0x1d0] sm:$0xf] %v7259_v34 }
  0xf5   :  { %96 = vst [vmem:[#allocation3 + $0x1d4] sm:$0xff] %v7259_v34 }
  0xf6   :  { %97 = vst [vmem:[#allocation3 + $0x1dc] sm:$0xff] %v7259_v34 }
  0xf7   :  { %98 = vst [vmem:[#allocation3 + $0x1e4] sm:$0xff] %v7259_v34 }
  0xf8   :  { %99 = vst [vmem:[#allocation3 + $0x1ec] sm:$0xff] %v7259_v34 }
  0xf9   :  { %100 = vst [vmem:[#allocation3 + $0x1f4] sm:$0xf] %v7259_v34 }
  0xfa   :  { %101 = vst [vmem:[#allocation3 + $0x1f8] sm:$0xff] %v7259_v34 }
  0xfb   :  { %102 = vst [vmem:[#allocation3 + $0x200] sm:$0xff] %v7259_v34 }
  0xfc   :  { %103 = vst [vmem:[#allocation3 + $0x208] sm:$0xff] %v7259_v34 }
  0xfd   :  { %104 = vst [vmem:[#allocation3 + $0x210] sm:$0xff] %v7259_v34 }
  0xfe   :  { %105 = vst [vmem:[#allocation3 + $0x218] sm:$0xf] %v7259_v34 }
  0xff   :  { %106 = vst [vmem:[#allocation3 + $0x21c] sm:$0xff] %v7259_v34 }
 0x100   :  { %107 = vst [vmem:[#allocation3 + $0x224] sm:$0xff] %v7259_v34 }
 0x101   :  { %108 = vst [vmem:[#allocation3 + $0x22c] sm:$0xff] %v7259_v34 }
 0x102   :  { %109 = vst [vmem:[#allocation3 + $0x234] sm:$0xff] %v7259_v34 }
 0x103   :  { %110 = vst [vmem:[#allocation3 + $0x23c] sm:$0xf] %v7259_v34 }
 0x104   :  { %111 = vst [vmem:[#allocation3 + $0x240] sm:$0xff] %v7259_v34 }
 0x105   :  { %112 = vst [vmem:[#allocation3 + $0x248] sm:$0xff] %v7259_v34 }
 0x106   :  { %113 = vst [vmem:[#allocation3 + $0x250] sm:$0xff] %v7259_v34 }
 0x107   :  { %114 = vst [vmem:[#allocation3 + $0x258] sm:$0xff] %v7259_v34 }
 0x108   :  { %115 = vst [vmem:[#allocation3 + $0x260] sm:$0xf] %v7259_v34 }
 0x109   :  { %116 = vst [vmem:[#allocation3 + $0x264] sm:$0xff] %v7259_v34 }
 0x10a   :  { %117 = vst [vmem:[#allocation3 + $0x26c] sm:$0xff] %v7259_v34 }
 0x10b   :  { %118 = vst [vmem:[#allocation3 + $0x274] sm:$0xff] %v7259_v34 }
 0x10c   :  { %119 = vst [vmem:[#allocation3 + $0x27c] sm:$0xff] %v7259_v34 }
 0x10d   :  { %120 = vst [vmem:[#allocation3 + $0x284] sm:$0xf] %v7259_v34 }
 0x10e   :  { %125 = vst [vmem:[#allocation4 + $0x20] sm:$0xf] %v7259_v34 }
 0x10f   :  { %126 = vst [vmem:[#allocation4 + $0x24] sm:$0xff] %v7259_v34 }
 0x110   :  { %127 = vst [vmem:[#allocation4 + $0x2c] sm:$0xff] %v7259_v34 }
 0x111   :  { %128 = vst [vmem:[#allocation4 + $0x34] sm:$0xff] %v7259_v34 }
 0x112   :  { %129 = vst [vmem:[#allocation4 + $0x3c] sm:$0xff] %v7259_v34 }
 0x113   :  { %130 = vst [vmem:[#allocation4 + $0x44] sm:$0xf] %v7259_v34 }
 0x114   :  { %135 = vst [vmem:[#allocation4 + $0x68] sm:$0xf] %v7259_v34 }
 0x115   :  { %136 = vst [vmem:[#allocation4 + $0x6c] sm:$0xff] %v7259_v34 }
 0x116   :  { %137 = vst [vmem:[#allocation4 + $0x74] sm:$0xff] %v7259_v34 }
 0x117   :  { %138 = vst [vmem:[#allocation4 + $0x7c] sm:$0xff] %v7259_v34 }
 0x118   :  { %139 = vst [vmem:[#allocation4 + $0x84] sm:$0xff] %v7259_v34 }
 0x119   :  { %140 = vst [vmem:[#allocation4 + $0x8c] sm:$0xf] %v7259_v34 }
 0x11a   :  { %145 = vst [vmem:[#allocation4 + $0xb0] sm:$0xf] %v7259_v34 }
 0x11b   :  { %146 = vst [vmem:[#allocation4 + $0xb4] sm:$0xff] %v7259_v34 }
 0x11c   :  { %147 = vst [vmem:[#allocation4 + $0xbc] sm:$0xff] %v7259_v34 }
 0x11d   :  { %148 = vst [vmem:[#allocation4 + $0xc4] sm:$0xff] %v7259_v34 }
 0x11e   :  { %149 = vst [vmem:[#allocation4 + $0xcc] sm:$0xff] %v7259_v34 }
 0x11f   :  { %150 = vst [vmem:[#allocation4 + $0xd4] sm:$0xf] %v7259_v34 }
 0x120   :  { %155 = vst [vmem:[#allocation4 + $0xf8] sm:$0xf] %v7259_v34 }
 0x121   :  { %156 = vst [vmem:[#allocation4 + $0xfc] sm:$0xff] %v7259_v34 }
 0x122   :  { %157 = vst [vmem:[#allocation4 + $0x104] sm:$0xff] %v7259_v34 }
 0x123   :  { %158 = vst [vmem:[#allocation4 + $0x10c] sm:$0xff] %v7259_v34 }
 0x124   :  { %159 = vst [vmem:[#allocation4 + $0x114] sm:$0xff] %v7259_v34 }
 0x125   :  { %160 = vst [vmem:[#allocation4 + $0x11c] sm:$0xf] %v7259_v34 }
 0x126   :  { %165 = vst [vmem:[#allocation4 + $0x140] sm:$0xf] %v7259_v34 }
 0x127   :  { %166 = vst [vmem:[#allocation4 + $0x144] sm:$0xff] %v7259_v34 }
 0x128   :  { %167 = vst [vmem:[#allocation4 + $0x14c] sm:$0xff] %v7259_v34 }
 0x129   :  { %168 = vst [vmem:[#allocation4 + $0x154] sm:$0xff] %v7259_v34 }
 0x12a   :  { %169 = vst [vmem:[#allocation4 + $0x15c] sm:$0xff] %v7259_v34 }
 0x12b   :  { %170 = vst [vmem:[#allocation4 + $0x164] sm:$0xf] %v7259_v34 }
 0x12c   :  { %175 = vst [vmem:[#allocation4 + $0x188] sm:$0xf] %v7259_v34 }
 0x12d   :  { %176 = vst [vmem:[#allocation4 + $0x18c] sm:$0xff] %v7259_v34 }
 0x12e   :  { %177 = vst [vmem:[#allocation4 + $0x194] sm:$0xff] %v7259_v34 }
 0x12f   :  { %178 = vst [vmem:[#allocation4 + $0x19c] sm:$0xff] %v7259_v34 }
 0x130   :  { %179 = vst [vmem:[#allocation4 + $0x1a4] sm:$0xff] %v7259_v34 }
 0x131   :  { %180 = vst [vmem:[#allocation4 + $0x1ac] sm:$0xf] %v7259_v34 }
 0x132   :  { %185 = vst [vmem:[#allocation4 + $0x1d0] sm:$0xf] %v7259_v34 }
 0x133   :  { %186 = vst [vmem:[#allocation4 + $0x1d4] sm:$0xff] %v7259_v34 }
 0x134   :  { %187 = vst [vmem:[#allocation4 + $0x1dc] sm:$0xff] %v7259_v34 }
 0x135   :  { %188 = vst [vmem:[#allocation4 + $0x1e4] sm:$0xff] %v7259_v34 }
 0x136   :  { %189 = vst [vmem:[#allocation4 + $0x1ec] sm:$0xff] %v7259_v34 }
 0x137   :  { %190 = vst [vmem:[#allocation4 + $0x1f4] sm:$0xf] %v7259_v34 }
 0x138   :  { %195 = vst [vmem:[#allocation4 + $0x218] sm:$0xf] %v7259_v34 }
 0x139   :  { %196 = vst [vmem:[#allocation4 + $0x21c] sm:$0xff] %v7259_v34 }
 0x13a   :  { %197 = vst [vmem:[#allocation4 + $0x224] sm:$0xff] %v7259_v34 }
 0x13b   :  { %198 = vst [vmem:[#allocation4 + $0x22c] sm:$0xff] %v7259_v34 }
 0x13c   :  { %199 = vst [vmem:[#allocation4 + $0x234] sm:$0xff] %v7259_v34 }
 0x13d   :  { %200 = vst [vmem:[#allocation4 + $0x23c] sm:$0xf] %v7259_v34 }
 0x13e   :  { %205 = vst [vmem:[#allocation4 + $0x260] sm:$0xf] %v7259_v34 }
 0x13f   :  { %206 = vst [vmem:[#allocation4 + $0x264] sm:$0xff] %v7259_v34 }
 0x140   :  { %207 = vst [vmem:[#allocation4 + $0x26c] sm:$0xff] %v7259_v34 }
 0x141   :  { %208 = vst [vmem:[#allocation4 + $0x274] sm:$0xff] %v7259_v34 }
 0x142   :  { %209 = vst [vmem:[#allocation4 + $0x27c] sm:$0xff] %v7259_v34 }
 0x143   :  { %210 = vst [vmem:[#allocation4 + $0x284] sm:$0xf] %v7259_v34 }
 0x144   :  { %211 = vst [vmem:[#allocation2] sm:$0xff] %v7259_v34 }
 0x145   :  { %212 = vst [vmem:[#allocation2 + $0x8] sm:$0xff] %v7259_v34 }
 0x146   :  { %213 = vst [vmem:[#allocation2 + $0x10] sm:$0xff] %v7259_v34 }
 0x147   :  { %214 = vst [vmem:[#allocation2 + $0x18] sm:$0xff] %v7259_v34 }
 0x148   :  { %215 = vst [vmem:[#allocation2 + $0x20] sm:$0xff] %v7259_v34  ;;  %v6898_v34 = vpop.permute.xlu0 %6897 }
 0x149   :  { %1102 = vst [vmem:[#allocation1 + $0x10] ss:$2 sm:$0xff] %v5896_v44  ;;  %v6900_v60 = vunpack.i.h.bf16 %v6898_v34  ;;  %v6899_v61 = vunpack.i.l.bf16 %v6898_v34  ;;  %v7785_v34 = vpop.permute.xlu2 %6922 }
 0x14a   :  { %1100 = vst [vmem:[#allocation1] ss:$2 sm:$0xff] %v7355_v2  ;;  %v527_v2 = vsel %vm526_vm4, %v6889_v56, %v6890_v54  ;;  %v6925_v32 = vunpack.i.h.bf16 %v7785_v34 }
 0x14b   :  { %560 = vst [vmem:[#allocation3 + $0x48] sm:$0x33] %v555_v45  ;;  %v557_v3 = vpack.c.bf16 %v527_v2, %v553_v13  ;;  %v608_v8 = vsel %vm607_vm5, %v6899_v61, %v6900_v60  ;;  %v653_v0 = vsel %vm11262_vm0, %v6894_v51, %v6899_v61  ;;  %v6915_v51 = vunpack.i.h.bf16 %v7742_v6  ;;  %v6908_v61 = vpop.permute.xlu1 %6907 }
 0x14c   :  { %561 = vst [vmem:[#allocation3 + $0x50] sm:$0x33] %v556_v47  ;;  %v657_v18 = vpack.c.bf16 %v608_v8, %v653_v0  ;;  %v609_v15 = vsel %vm607_vm5, %v6900_v60, %v7730_v37  ;;  %v6910_v6 = vunpack.i.h.bf16 %v6908_v61  ;;  %v6909_v13 = vunpack.i.l.bf16 %v6908_v61  ;;  %v1171_v37 = vld [vmem:[%s11149_s0] sm:$0xff] }
 0x14d   :  { %562 = vst [vmem:[#allocation3 + $0x58] sm:$0x33] %v557_v3  ;;  %v6920_v61 = vunpack.i.h.bf16 %v7761_v28  ;;  %vm11259_vm5 = vcmask 785408  }
 0x14e   :  { %662 = vst [vmem:[#allocation3 + $0x98] sm:$0x33] %v657_v18  ;;  %v754_v8 = vsel %vm11262_vm0, %v6909_v13, %v6914_v52 }
 0x14f   :  { %661 = vst [vmem:[#allocation3 + $0x90] sm:$0x33] %v656_v12  ;;  %v6924_v12 = vunpack.i.l.bf16 %v7785_v34  ;;  %v5902_v34 = vld [vmem:[%s11149_s0 + $0x14] sm:$0xf] }
 0x150   :  { %v1105_v62 = vld.sshfl [vmem:[#allocation1 + $0x10] sm:$0xff pattern:$0x75316420]  ;;  %v7763_v30 = vpop.permute.xlu0 %6902 }
 0x151   :  { %1110 = vrot.lane.b32.xlu1 %v1105_v62, %s11163_s29  ;;  %v1103_v10 = vld.sshfl [vmem:[#allocation1] sm:$0xff pattern:$0x75316420]  ;;  %v1104_v11 = vld.sshfl [vmem:[#allocation1 + $0x8] sm:$0xff pattern:$0x75316420]  ;;  %v6904_v56 = vunpack.i.l.bf16 %v7763_v30  ;;  %v6905_v16 = vunpack.i.h.bf16 %v7763_v30  ;;  %v709_v62 = vsel %vm11165_vm7, %v6914_v52, %v6915_v51 }
 0x152   :  { %v6981_v23 = vpack.i.bf16 %v1104_v11, %v1103_v10  ;;  %1120 = vst [vmem:[#allocation1] ss:$2 sm:$0xff] %v7370_v7  ;;  %v7770_v7 = vld [vmem:[%s11149_s0 + $0x24] sm:$0xff] }
 0x153   :  { %1122 = vst [vmem:[#allocation1 + $0x10] ss:$2 sm:$0xff] %v5898_v1  ;;  %v654_v1 = vsel %vm11261_vm3, %v609_v15, %v6904_v56  ;;  %v628_v0 = vsel %vm627_vm9, %v6904_v56, %v6905_v16  ;;  %v1172_v10 = vld [vmem:[%s11149_s0 + $0x8] sm:$0xf] }
 0x154   :  { %6982 = vrot.lane.b32.xlu0 %v6981_v23, %s11163_s29  ;;  %v758_v23 = vpack.c.bf16 %v709_v62, %v754_v8  ;;  %s7270_s29 = smov 122  }
 0x156   :  { %763 = vst [vmem:[#allocation3 + $0xe0] sm:$0x33] %v758_v23 }
 0x158   :  { %v685_v2 = vpop.permute.xlu0 %684 }
 0x159   :  { %v1123_v43 = vld.sshfl [vmem:[#allocation1] sm:$0xff pattern:$0x75316420]  ;;  %v1124_v44 = vld.sshfl [vmem:[#allocation1 + $0x8] sm:$0xff pattern:$0x75316420]  ;;  %v689_v60 = vsel %vm11172_vm8, %v6910_v6, %v685_v2  ;;  %v690_v3 = vsel %vm11172_vm8, %v685_v2, %v6909_v13 }
 0x15a   :  { %v6991_v45 = vpack.i.bf16 %v1124_v44, %v1123_v43  ;;  %v1125_v47 = vld.sshfl [vmem:[#allocation1 + $0x10] sm:$0xff pattern:$0x75316420]  ;;  %1140 = vst [vmem:[#allocation1] ss:$2 sm:$0xff] %v7770_v7  ;;  %v757_v11 = vpack.c.bf16 %v690_v3, %v689_v60  ;;  %v707_v43 = vpop.permute.xlu1 %706  ;;  %vm11263_vm8 = vcmask 736256  }
 0x15b   :  { %1142 = vst [vmem:[#allocation1 + $0x10] ss:$2 sm:$0xff] %v5900_v42  ;;  %v7803_v42 = vpop.permute.xlu2 %6937  ;;  %v710_v15 = vsel %vm11165_vm7, %v6915_v51, %v707_v43  ;;  %vm991_vm7 = vcmask 752640  }
 0x15c   :  { %6987 = vrot.lane.b32.xlu0 %v6986_v41, %s7265_s19  ;;  %6992 = vrot.lane.b32.xlu1 %v6991_v45, %s7266_s20  ;;  %v658_v41 = vpack.c.bf16 %v628_v0, %v654_v1  ;;  %762 = vst [vmem:[#allocation3 + $0xd8] sm:$0x33] %v757_v11  ;;  %v6919_v45 = vunpack.i.l.bf16 %v7761_v28  ;;  %v7006_v0 = vpack.i.bf16 %v7510_v49, %v7508_v48 }
 0x15e   :  { %663 = vst [vmem:[#allocation3 + $0xa0] sm:$0x33] %v658_v41  ;;  %v729_v60 = vsel %vm728_vm11, %v6919_v45, %v6920_v61 }
 0x160   :  { %v786_v44 = vpop.permute.xlu0 %785 }
 0x161   :  { %v1143_v14 = vld.sshfl [vmem:[#allocation1] sm:$0xff pattern:$0x75316420]  ;;  %v1144_v18 = vld.sshfl [vmem:[#allocation1 + $0x8] sm:$0xff pattern:$0x75316420]  ;;  %v790_v52 = vsel %vm789_vm10, %v6925_v32, %v786_v44  ;;  %v791_v56 = vsel %vm789_vm10, %v786_v44, %v6924_v12 }
 0x162   :  { %v1145_v29 = vld.sshfl [vmem:[#allocation1 + $0x10] sm:$0xff pattern:$0x75316420]  ;;  %v6996_v31 = vpack.i.bf16 %v1144_v18, %v1143_v14  ;;  %1181 = vst [vmem:[#allocation1] ss:$2 sm:$0xff] %v1171_v37  ;;  %v858_v2 = vpack.c.bf16 %v791_v56, %v790_v52  ;;  %v755_v37 = vsel %vm11261_vm3, %v710_v15, %v6919_v45  ;;  %v7839_v32 = vpop.permute.xlu1 %6932 }
 0x163   :  { %1183 = vst [vmem:[#allocation1 + $0x10] ss:$2 sm:$0xff] %v1172_v10  ;;  %v7819_v51 = vpop.permute.xlu2 %908  ;;  %v759_v8 = vpack.c.bf16 %v729_v60, %v755_v37  ;;  %v5903_v10 = vld [vmem:[%s11149_s0 + $0x18] sm:$0xff]  ;;  %v5904_v14 = vld [vmem:[%s11149_s0 + $0x20] sm:$0xf]  ;;  %v6934_v41 = vunpack.i.l.bf16 %v7839_v32  ;;  %v6935_v56 = vunpack.i.h.bf16 %v7839_v32 }
 0x164   :  { %1130 = vrot.lane.b32.xlu0 %v1125_v47, %s7266_s20  ;;  %6997 = vrot.lane.b32.xlu1 %v6996_v31, %s7267_s24  ;;  %v5901_v47 = vld [vmem:[%s11149_s0 + $0xc] sm:$0xff]  ;;  %863 = vst [vmem:[#allocation3 + $0x120] sm:$0x33] %v858_v2  ;;  %v6715_v32 = vld [vmem:[#allocation3 + $0x220] sm:$0xf0]  ;;  %s11530_s20 = smov 13  }
 0x165   :  { %764 = vst [vmem:[#allocation3 + $0xe8] sm:$0x33] %v759_v8 }
 0x168   :  { %v6928_v3 = vpop.permute.xlu0 %6927 }
 0x169   :  { %v1184_v6 = vld.sshfl [vmem:[#allocation1] sm:$0xff pattern:$0x75316420]  ;;  %v1185_v13 = vld.sshfl [vmem:[#allocation1 + $0x8] sm:$0xff pattern:$0x75316420]  ;;  %v6929_v11 = vunpack.i.l.bf16 %v6928_v3  ;;  %v6930_v31 = vunpack.i.h.bf16 %v6928_v3 }
 0x16a   :  { %v1186_v62 = vld.sshfl [vmem:[#allocation1 + $0x10] sm:$0xff pattern:$0x75316420]  ;;  %v7001_v1 = vpack.i.bf16 %v1185_v13, %v1184_v6  ;;  %1201 = vst [vmem:[#allocation1] ss:$2 sm:$0xff] %v5901_v47  ;;  %v6940_v47 = vunpack.i.h.bf16 %v7803_v42  ;;  %v830_v6 = vsel %vm829_vm13, %v6934_v41, %v6935_v56 }
 0x16b   :  { %1191 = vrot.lane.b32.xlu2 %v1186_v62, %s7268_s18  ;;  %1203 = vst [vmem:[#allocation1 + $0x10] ss:$2 sm:$0xff] %v5902_v34  ;;  %v855_v48 = vsel %vm11262_vm0, %v6924_v12, %v6929_v11  ;;  %v7837_v49 = vpop.permute.xlu2 %928  ;;  %v810_v44 = vsel %vm11166_vm12, %v6929_v11, %v6930_v31  ;;  %v887_v62 = vpop.permute.xlu1 %886 }
 0x16c   :  { %1150 = vrot.lane.b32.xlu0 %v1145_v29, %s7267_s24  ;;  %7002 = vrot.lane.b32.xlu1 %v7001_v1, %s7268_s18  ;;  %v859_v52 = vpack.c.bf16 %v810_v44, %v855_v48  ;;  %v891_v37 = vsel %vm890_vm14, %v6940_v47, %v887_v62  ;;  %v7021_v48 = vpack.i.bf16 %v7452_v58, %v7450_v57  ;;  %s7295_s24 = smov 106  }
 0x16d   :  { %v7031_v57 = vpack.i.bf16 %v7425_v39, %v7423_v38 }
 0x16e   :  { %864 = vst [vmem:[#allocation3 + $0x128] sm:$0x33] %v859_v52 }
 0x170   :  { %v808_v43 = vpop.permute.xlu0 %807 }
 0x171   :  { %v1204_v18 = vld.sshfl [vmem:[#allocation1] sm:$0xff pattern:$0x75316420]  ;;  %v1205_v23 = vld.sshfl [vmem:[#allocation1 + $0x8] sm:$0xff pattern:$0x75316420]  ;;  %v811_v45 = vsel %vm11166_vm12, %v6930_v31, %v808_v43 }
 0x172   :  { %v1206_v29 = vld.sshfl [vmem:[#allocation1 + $0x10] sm:$0xff pattern:$0x75316420]  ;;  %1221 = vst [vmem:[#allocation1] ss:$2 sm:$0xff] %v5903_v10  ;;  %v7011_v12 = vpack.i.bf16 %v1205_v23, %v1204_v18  ;;  %v856_v2 = vsel %vm11261_vm3, %v811_v45, %v6934_v41  ;;  %vm950_vm12 = vcmask 621568  }
 0x173   :  { %7007 = vrot.lane.b32.xlu2 %v7006_v0, %s7269_s27  ;;  %1223 = vst [vmem:[#allocation1 + $0x10] ss:$2 sm:$0xff] %v5904_v14  ;;  %v7857_v13 = vpop.permute.xlu2 %6957  ;;  %v860_v1 = vpack.c.bf16 %v830_v6, %v856_v2  ;;  %v7016_v0 = vpack.i.bf16 %v7481_v26, %v7479_v25  ;;  %v6948_v18 = vpop.permute.xlu1 %6947 }
 0x174   :  { %1211 = vrot.lane.b32.xlu0 %v1206_v29, %s7270_s29  ;;  %827 = vrot.lane.b32.xlu1 %v7501_v46, %s7253_s21  ;;  %v6939_v46 = vunpack.i.l.bf16 %v7803_v42  ;;  %v6950_v23 = vunpack.i.h.bf16 %v6948_v18  ;;  %v6949_v29 = vunpack.i.l.bf16 %v6948_v18  ;;  %v6960_v45 = vunpack.i.h.bf16 %v7857_v13  ;;  %s7277_s21 = smov 4  }
 0x175   :  { %865 = vst [vmem:[#allocation3 + $0x130] sm:$0x33] %v860_v1 }
 0x176   :  { %v892_v60 = vsel %vm890_vm14, %v887_v62, %v6939_v46  ;;  %v931_v41 = vsel %vm930_vm2, %v6949_v29, %v6950_v23  ;;  %v932_v52 = vsel %vm930_vm2, %v6950_v23, %v7837_v49  ;;  %vm11168_vm2 = vcmask 1014784  }
 0x178   :  { %v6943_v3 = vpop.permute.xlu0 %6942 }
 0x179   :  { %v1224_v15 = vld.sshfl [vmem:[#allocation1] sm:$0xff pattern:$0x75316420]  ;;  %v1225_v34 = vld.sshfl [vmem:[#allocation1 + $0x8] sm:$0xff pattern:$0x75316420]  ;;  %v6945_v8 = vunpack.i.h.bf16 %v6943_v3 }
 0x17a   :  { %1241 = vst [vmem:[#allocation1] ss:$2 sm:$0xff] %v7770_v7  ;;  %v1226_v42 = vld.sshfl [vmem:[#allocation1 + $0x10] sm:$0xff pattern:$0x75316420] }
 0x17b   :  { %7012 = vrot.lane.b32.xlu2 %v7011_v12, %s7270_s29  ;;  %v5906_v7 = vld [vmem:[%s11149_s0 + $0x2c] sm:$0xf]  ;;  %s7271_s0 = smov 78   ;;  %v912_v25 = vsel %vm11167_vm15, %v6945_v8, %v7819_v51  ;;  %v6963_v26 = vpop.permute.xlu2 %6962  ;;  %v6959_v51 = vunpack.i.l.bf16 %v7857_v13  ;;  %v988_v49 = vpop.permute.xlu1 %987 }
 0x17c   :  { %1049 = vrot.lane.b32.xlu0 %v7583_v63, %s7263_s14  ;;  %726 = vrot.lane.b32.xlu1 %v7473_v22, %s7250_s30  ;;  %1243 = vst [vmem:[#allocation1 + $0x10] ss:$2 sm:$0xff] %v5906_v7  ;;  %v959_v63 = vpack.c.bf16 %v892_v60, %v891_v37  ;;  %v6944_v22 = vunpack.i.l.bf16 %v6943_v3  ;;  %v957_v43 = vsel %vm11261_vm3, %v912_v25, %v6949_v29  ;;  %v6965_v12 = vunpack.i.h.bf16 %v6963_v26  ;;  %s7273_s30 = smov 26   ;;  %s7276_s14 = smov 96  }
 0x17d   :  { %v961_v44 = vpack.c.bf16 %v931_v41, %v957_v43  ;;  %v6964_v47 = vunpack.i.l.bf16 %v6963_v26  ;;  %v992_v6 = vsel %vm991_vm7, %v6960_v45, %v988_v49  ;;  %v993_v13 = vsel %vm991_vm7, %v988_v49, %v6959_v51 }
 0x17e   :  { %964 = vst [vmem:[#allocation3 + $0x168] sm:$0x33] %v959_v63  ;;  %v911_v10 = vsel %vm11167_vm15, %v6944_v22, %v6945_v8  ;;  %v956_v11 = vsel %vm11262_vm0, %v6939_v46, %v6944_v22  ;;  %v1060_v38 = vpack.c.bf16 %v993_v13, %v992_v6  ;;  %vm1031_vm15 = vcmask 228352   ;;  %v6091_v6 = vld [vmem:[#allocation3 + $0x18c] sm:$0xf0] }
 0x17f   :  { %v960_v14 = vpack.c.bf16 %v911_v10, %v956_v11  ;;  %966 = vst [vmem:[#allocation3 + $0x178] sm:$0x33] %v961_v44  ;;  %v1012_v39 = vsel %vm11168_vm2, %v6964_v47, %v6965_v12  ;;  %v7036_v45 = vpack.i.bf16 %v7398_v20, %v7396_v19  ;;  %v6163_v47 = vld [vmem:[#allocation3 + $0x21c] sm:$0xf0]  ;;  %v6705_v20 = vld [vmem:[#allocation3 + $0x1d0] sm:$0xf0] }
 0x180   :  { %v7875_v31 = vpop.permute.xlu0 %6952  ;;  %v1057_v7 = vsel %vm11262_vm0, %v6959_v51, %v1012_v39  ;;  %1065 = vst [vmem:[#allocation3 + $0x1b0] sm:$0x33] %v1060_v38  ;;  %v6687_v38 = vld [vmem:[#allocation3 + $0x140] sm:$0xf0] }
 0x181   :  { %965 = vst [vmem:[#allocation3 + $0x170] sm:$0x33] %v960_v14  ;;  %v6955_v58 = vunpack.i.h.bf16 %v7875_v31  ;;  %v1244_v22 = vld.sshfl [vmem:[#allocation1] sm:$0xff pattern:$0x75316420] }
 0x182   :  { %v6683_v39 = vld [vmem:[#allocation3 + $0x124] sm:$0xf] }
 0x183   :  { %7017 = vrot.lane.b32.xlu2 %v7016_v0, %s7271_s0  ;;  %v1245_v0 = vld.sshfl [vmem:[#allocation1 + $0x8] sm:$0xff pattern:$0x75316420]  ;;  %v1030_v11 = vpop.permute.xlu1 %1029  ;;  %v1246_v51 = vld.sshfl [vmem:[#allocation1 + $0x10] sm:$0xff pattern:$0x75316420] }
 0x184   :  { %948 = vrot.lane.b32.xlu0 %v7534_v24, %s7257_s25  ;;  %625 = vrot.lane.b32.xlu1 %v7443_v55, %s7247_s17  ;;  %v7026_v24 = vpack.i.bf16 %v1225_v34, %v1224_v15  ;;  %v6954_v55 = vunpack.i.l.bf16 %v7875_v31  ;;  %s7272_s17 = smov 94   ;;  %v6968_v15 = vpop.permute.xlu2 %6967  ;;  %s7274_s25 = smov 95   ;;  %v7041_v23 = vpack.i.bf16 %v1245_v0, %v1244_v22  ;;  %v5981_v0 = vld [vmem:[#allocation3 + $0x90] sm:$0xf] }
 0x185   :  { %v6970_v34 = vunpack.i.h.bf16 %v6968_v15  ;;  %v6969_v2 = vunpack.i.l.bf16 %v6968_v15  ;;  %v6127_v15 = vld [vmem:[#allocation3 + $0x1d4] sm:$0xf0] }
 0x186   :  { %v958_v46 = vsel %vm11259_vm5, %v932_v52, %v6954_v55  ;;  %v951_v60 = vsel %vm950_vm12, %v6954_v55, %v6955_v58 }
 0x187   :  { %v1032_v37 = vsel %vm1031_vm15, %v6969_v2, %v6970_v34  ;;  %v962_v8 = vpack.c.bf16 %v951_v60, %v958_v46  ;;  %v1033_v26 = vsel %vm1031_vm15, %v6970_v34, %v1030_v11  ;;  %v6125_v19 = vld [vmem:[#allocation3 + $0x1b0] sm:$0xf]  ;;  %v6701_v46 = vld [vmem:[#allocation3 + $0x1b4] sm:$0xf]  ;;  %v6089_v34 = vld [vmem:[#allocation3 + $0x168] sm:$0xf] }
 0x188   :  { %v1010_v62 = vpop.permute.xlu0 %1009  ;;  %v6130_v49 = vor.u32 %v6701_v46, %v6127_v15  ;;  %v6678_v60 = vld [vmem:[#allocation3 + $0xf8] sm:$0xf0]  ;;  %v6669_v11 = vld [vmem:[#allocation3 + $0xb0] sm:$0xf0]  ;;  %vm11171_vm15 = vcmask 1006592  }
 0x189   :  { %v1058_v1 = vsel %vm11261_vm3, %v1010_v62, %v6969_v2  ;;  %967 = vst [vmem:[#allocation3 + $0x180] sm:$0x33] %v962_v8  ;;  %v6696_v2 = vld [vmem:[#allocation3 + $0x188] sm:$0xf0] }
 0x18a   :  { %v1062_v63 = vpack.c.bf16 %v1032_v37, %v1058_v1  ;;  %v6017_v37 = vld [vmem:[#allocation3 + $0xd8] sm:$0xf] }
 0x18b   :  { %7022 = vrot.lane.b32.xlu2 %v7021_v48, %s7272_s17  ;;  %v1089_v43 = vpop.permute.xlu1 %1088  ;;  %v6018_v8 = vor.u32 %v6678_v60, %v6017_v37 }
 0x18c   :  { %1231 = vrot.lane.b32.xlu0 %v1226_v42, %s7273_s30  ;;  %7027 = vrot.lane.b32.xlu1 %v7026_v24, %s7273_s30  ;;  %v1013_v42 = vsel %vm11168_vm2, %v6965_v12, %v1010_v62  ;;  %1067 = vst [vmem:[#allocation3 + $0x1c0] sm:$0x33] %v1062_v63  ;;  %v7904_v10 = vpop.permute.xlu2 %6972  ;;  %vm1051_vm2 = vcmask 490496   ;;  %v6053_v62 = vld [vmem:[#allocation3 + $0x120] sm:$0xf]  ;;  %s7282_s30 = smov 57  }
 0x18d   :  { %v1061_v3 = vpack.c.bf16 %v1013_v42, %v1057_v7  ;;  %v6975_v14 = vunpack.i.h.bf16 %v7904_v10  ;;  %v6974_v25 = vunpack.i.l.bf16 %v7904_v10  ;;  %v6055_v42 = vld [vmem:[#allocation3 + $0x144] sm:$0xf0]  ;;  %v6054_v7 = vor.u32 %v6687_v38, %v6053_v62  ;;  %v6019_v63 = vld [vmem:[#allocation3 + $0xfc] sm:$0xf0] }
 0x18e   :  { %v6058_v1 = vor.u32 %v6683_v39, %v6055_v42  ;;  %v7960_v42 = vld [vmem:[%s11150_s1] sm:$0xff]  ;;  %s7294_s1 = smov 50  }
 0x18f   :  { %1066 = vst [vmem:[#allocation3 + $0x1b8] sm:$0x33] %v1061_v3  ;;  %v1059_v29 = vsel %vm11259_vm5, %v1033_v26, %v6974_v25  ;;  %v1052_v48 = vsel %vm1051_vm2, %v6974_v25, %v6975_v14  ;;  %v6674_v3 = vld [vmem:[#allocation3 + $0xdc] sm:$0xf]  ;;  %v6665_v25 = vld [vmem:[#allocation3 + $0x94] sm:$0xf] }
 0x190   :  { %v7909_v18 = vpop.permute.xlu0 %6977  ;;  %v1063_v41 = vpack.c.bf16 %v1052_v48, %v1059_v29  ;;  %v6022_v22 = vor.u32 %v6674_v3, %v6019_v63  ;;  %v5983_v26 = vld [vmem:[#allocation3 + $0xb4] sm:$0xf0]  ;;  %v5982_v29 = vor.u32 %v6669_v11, %v5981_v0  ;;  %v5945_v48 = vld [vmem:[#allocation3 + $0x48] sm:$0xf] }
 0x192   :  { %1068 = vst [vmem:[#allocation3 + $0x1c8] sm:$0x33] %v1063_v41  ;;  %v6660_v41 = vld [vmem:[#allocation3 + $0x68] sm:$0xf0] }
 0x193   :  { %7032 = vrot.lane.b32.xlu2 %v7031_v57, %s7274_s25 }
 0x194   :  { %423 = vrot.lane.b32.xlu0 %v7389_v17, %s7265_s19  ;;  %524 = vrot.lane.b32.xlu1 %v7417_v36, %s7244_s28  ;;  %v6980_v17 = vunpack.i.h.bf16 %v7909_v18  ;;  %v6979_v36 = vunpack.i.l.bf16 %v7909_v18  ;;  %s7275_s28 = smov 58   ;;  %v407_v18 = vsel %vm11262_vm0, %v6875_v35, %v7705_v9  ;;  %v1369_v35 = vunpack.c.l.b16 %v7960_v42  ;;  %s7292_s19 = smov 52  }
 0x196   :  { %v1093_v24 = vsel %vm1092_vm1, %v6980_v17, %v1089_v43  ;;  %v1094_v44 = vsel %vm1092_vm1, %v1089_v43, %v6979_v36  ;;  %v5986_v17 = vor.u32 %v6665_v25, %v5983_v26  ;;  %v6656_v43 = vld [vmem:[#allocation3 + $0x4c] sm:$0xf]  ;;  %v7963_v9 = vpack.c.b16 %v1369_v35, %v1369_v35 }
 0x197   :  { %v1161_v55 = vpack.c.bf16 %v1094_v44, %v1093_v24  ;;  %v5947_v24 = vld [vmem:[#allocation3 + $0x6c] sm:$0xf0]  ;;  %v6716_v25 = vld [vmem:[#allocation3 + $0x228] sm:$0xf0] }
 0x198   :  { %v6680_v35 = vld [vmem:[#allocation3 + $0x108] sm:$0xf0] }
 0x199   :  { %1166 = vst [vmem:[#allocation3 + $0x1f8] sm:$0x33] %v1161_v55 }
 0x19b   :  { %7042 = vrot.lane.b32.xlu2 %v7041_v23, %s7275_s28  ;;  %v454_v23 = vpack.c.bf16 %v7362_v5, %v7360_v4  ;;  %v5911_v5 = vld [vmem:[#allocation3 + $0x24] sm:$0xf0] }
 0x19c   :  { %645 = vrot.lane.b32.xlu0 %v7455_v59, %s7272_s17  ;;  %847 = vrot.lane.b32.xlu1 %v7512_v50, %s7269_s27  ;;  %v6714_v50 = vld [vmem:[#allocation3 + $0x218] sm:$0xf0]  ;;  %s7281_s17 = smov 5   ;;  %s7297_s27 = smov 33  }
 0x19d   :  { %459 = vst [vmem:[#allocation3] sm:$0x33] %v454_v23 }
 0x1a0   :  { %v6161_v59 = vld [vmem:[#allocation3 + $0x1f8] sm:$0xf]  ;;  %v6710_v52 = vld [vmem:[#allocation3 + $0x1fc] sm:$0xf] }
 0x1a1   :  { %v6162_v12 = vor.u32 %v6714_v50, %v6161_v59  ;;  %v6166_v57 = vor.u32 %v6710_v52, %v6163_v47  ;;  %v5950_v59 = vor.u32 %v6656_v43, %v5947_v24  ;;  %v6707_v43 = vld [vmem:[#allocation3 + $0x1e0] sm:$0xf0] }
 0x1a3   :  { %746 = vrot.lane.b32.xlu2 %v7484_v27, %s7271_s0  ;;  %1792 = vmatpush.bf16.msra.mxu0 %v6162_v12  ;;  %v6126_v27 = vor.u32 %v6705_v20, %v6125_v19  ;;  %s11538_s0 = smov 12  }
 0x1a4   :  { %1251 = vrot.lane.b32.xlu0 %v1246_v51, %s7275_s28  ;;  %7037 = vrot.lane.b32.xlu1 %v7036_v45, %s7276_s14  ;;  %v5946_v45 = vor.u32 %v6660_v41, %v5945_v48  ;;  %v6647_v4 = vld [vmem:[#allocation3 + $0x4] sm:$0xf]  ;;  %v6141_v41 = vld [vmem:[#allocation3 + $0x1c0] sm:$0xf]  ;;  %s7284_s28 = smov 70  }
 0x1a5   :  { %1818 = vmatpush.bf16.msra.mxu2 %v6166_v57  ;;  %v5914_v57 = vor.u32 %v6647_v4, %v5911_v5  ;;  %v6142_v5 = vor.u32 %v6707_v43, %v6141_v41  ;;  %v5997_v41 = vld [vmem:[#allocation3 + $0xa0] sm:$0xf]  ;;  %v6671_v43 = vld [vmem:[#allocation3 + $0xc0] sm:$0xf0] }
 0x1a7   :  { %1793 = vmatpush.bf16.msra.mxu0 %v6126_v27 }
 0x1a9   :  { %1819 = vmatpush.bf16.msra.mxu2 %v6130_v49 }
 0x1ab   :  { %443 = vrot.lane.b32.xlu2 %v7400_v21, %s7276_s14  ;;  %v6692_v21 = vld [vmem:[#allocation3 + $0x16c] sm:$0xf]  ;;  %s7285_s14 = smov 54  }
 0x1ac   :  { %544 = vrot.lane.b32.xlu1 %v7428_v40, %s7274_s25  ;;  %v6090_v40 = vor.u32 %v6696_v2, %v6089_v34  ;;  %v6094_v13 = vor.u32 %v6692_v21, %v6091_v6  ;;  %v5909_v6 = vld [vmem:[#allocation3] sm:$0xf] }
 0x1ae   :  { %1794 = vmatpush.bf16.msra.mxu0 %v6090_v40  ;;  %1820 = vmatpush.bf16.msra.mxu2 %v6094_v13  ;;  %v6651_v40 = vld [vmem:[#allocation3 + $0x20] sm:$0xf0] }
 0x1b2   :  { %1795 = vmatpush.bf16.msra.mxu0 %v6054_v7  ;;  %1821 = vmatpush.bf16.msra.mxu2 %v6058_v1 }
 0x1b6   :  { %1796 = vmatpush.bf16.msra.mxu0 %v6018_v8  ;;  %1822 = vmatpush.bf16.msra.mxu2 %v6022_v22 }
 0x1ba   :  { %1797 = vmatpush.bf16.msra.mxu0 %v5982_v29  ;;  %1823 = vmatpush.bf16.msra.mxu2 %v5986_v17 }
 0x1be   :  { %1798 = vmatpush.bf16.msra.mxu0 %v5946_v45  ;;  %1824 = vmatpush.bf16.msra.mxu2 %v5950_v59 }
 0x1c2   :  { %1825 = vmatpush.bf16.msra.mxu2 %v5914_v57  ;;  %v6698_v57 = vld [vmem:[#allocation3 + $0x198] sm:$0xf0] }
 0x1c3   :  { %v1111_v44 = vpop.permute.xlu1 %1110 }
 0x1c5   :  { %v7934_v55 = vpop.permute.xlu2 %1191  ;;  %1826 = vmatmul.bf16.vlgmr.msra.gmra.mxu2 %v7963_v9 }
 0x1c6   :  { %v6983_v51 = vpop.permute.xlu0 %6982 }
 0x1c7   :  { %v6985_v50 = vunpack.i.h.bf16 %v6983_v51  ;;  %v6984_v52 = vunpack.i.l.bf16 %v6983_v51 }
 0x1c9   :  { %v1114_v12 = vsel %vm11171_vm15, %v6985_v50, %v1111_v44  ;;  %v1113_v47 = vsel %vm11171_vm15, %v6984_v52, %v6985_v50  ;;  %vm1152_vm15 = vcmask 482304  }
 0x1ca   :  { %v1158_v19 = vsel %vm11262_vm0, %v6979_v36, %v1113_v47  ;;  %v5910_v36 = vor.u32 %v6651_v40, %v5909_v6  ;;  %v6105_v47 = vld [vmem:[#allocation3 + $0x178] sm:$0xf]  ;;  %v6069_v40 = vld [vmem:[#allocation3 + $0x130] sm:$0xf] }
 0x1cb   :  { %v1162_v20 = vpack.c.bf16 %v1114_v12, %v1158_v19 }
 0x1cc   :  { %1799 = vmatpush.bf16.msra.mxu0 %v5910_v36 }
 0x1cd   :  { %1167 = vst [vmem:[#allocation3 + $0x200] sm:$0x33] %v1162_v20  ;;  %v7941_v46 = vpop.permute.xlu2 %7007 }
 0x1ce   :  { %v7943_v15 = vpop.permute.xlu0 %6987  ;;  %v6993_v27 = vpop.permute.xlu1 %6992  ;;  %v7010_v19 = vunpack.i.h.bf16 %v7941_v46  ;;  %v7009_v20 = vunpack.i.l.bf16 %v7941_v46 }
 0x1cf   :  { %v6990_v49 = vunpack.i.h.bf16 %v7943_v15  ;;  %v6989_v34 = vunpack.i.l.bf16 %v7943_v15  ;;  %v6995_v2 = vunpack.i.h.bf16 %v6993_v27  ;;  %v6994_v21 = vunpack.i.l.bf16 %v6993_v27  ;;  %1800 = vmatmul.bf16.vlgmr.msra.gmra.mxu0 %v7963_v9 }
 0x1d1   :  { %v426_v13 = vsel %vm11261_vm3, %v6989_v34, %v6990_v49  ;;  %v452_v62 = vsel %vm11261_vm3, %v407_v18, %v6989_v34  ;;  %v1159_v38 = vsel %vm11261_vm3, %v1111_v44, %v6994_v21  ;;  %v1133_v39 = vsel %vm1132_vm6, %v6994_v21, %v6995_v2  ;;  %v6689_v18 = vld [vmem:[#allocation3 + $0x150] sm:$0xf0] }
 0x1d2   :  { %v456_v7 = vpack.c.bf16 %v426_v13, %v452_v62  ;;  %v1163_v33 = vpack.c.bf16 %v1133_v39, %v1159_v38  ;;  %v218_v38 = vld [vmem:[%s11151_s3] sm:$0xff] }
 0x1d3   :  { %1365 = vperm.xlu1 %7046, %v218_v38  }
 0x1d4   :  { %461 = vst [vmem:[#allocation3 + $0x10] sm:$0x33] %v456_v7 }
 0x1d5   :  { %v7013_v1 = vpop.permute.xlu2 %7012  ;;  %1168 = vst [vmem:[#allocation3 + $0x208] sm:$0x33] %v1163_v33  ;;  %v6033_v33 = vld [vmem:[#allocation3 + $0xe8] sm:$0xf] }
 0x1d6   :  { %v1131_v37 = vpop.permute.xlu0 %1130  ;;  %v6998_v60 = vpop.permute.xlu1 %6997  ;;  %v7015_v51 = vunpack.i.h.bf16 %v7013_v1  ;;  %v7014_v59 = vunpack.i.l.bf16 %v7013_v1 }
 0x1d7   :  { %v1134_v3 = vsel %vm1132_vm6, %v6995_v2, %v1131_v37  ;;  %v7000_v63 = vunpack.i.h.bf16 %v6998_v60  ;;  %v6999_v8 = vunpack.i.l.bf16 %v6998_v60  ;;  %vm11173_vm6 = vcmask 998400   ;;  %v6199_v37 = vld [vmem:[#allocation3 + $0x264] sm:$0xf0] }
 0x1d8   :  { %v1214_v27 = vsel %vm11173_vm6, %v7014_v59, %v7015_v51  ;;  %v6106_v2 = vor.u32 %v6698_v57, %v6105_v47  ;;  %v6070_v60 = vor.u32 %v6689_v18, %v6069_v40  ;;  %v6662_v40 = vld [vmem:[#allocation3 + $0x78] sm:$0xf0] }
 0x1d9   :  { %v1160_v22 = vsel %vm11259_vm5, %v1134_v3, %v6999_v8  ;;  %v1153_v0 = vsel %vm1152_vm15, %v6999_v8, %v7000_v63  ;;  %v1259_v13 = vsel %vm11262_vm0, %v7934_v55, %v1214_v27  ;;  %vm3026_vm0 = vcmask 465920  }
 0x1da   :  { %v1164_v11 = vpack.c.bf16 %v1153_v0, %v1160_v22  ;;  %v6169_v22 = vld [vmem:[#allocation3 + $0x200] sm:$0xf] }
 0x1dc   :  { %1169 = vst [vmem:[#allocation3 + $0x210] sm:$0x33] %v1164_v11  ;;  %v6177_v26 = vld [vmem:[#allocation3 + $0x208] sm:$0xf]  ;;  %v6712_v27 = vld [vmem:[#allocation3 + $0x20c] sm:$0xf] }
 0x1dd   :  { %v7970_v23 = vpop.permute.xlu2 %7017  ;;  %v6178_v29 = vor.u32 %v6716_v25, %v6177_v26 }
 0x1de   :  { %v1151_v17 = vpop.permute.xlu0 %1150  ;;  %v7003_v48 = vpop.permute.xlu1 %7002  ;;  %v7019_v8 = vunpack.i.l.bf16 %v7970_v23 }
 0x1df   :  { %v1154_v24 = vsel %vm1152_vm15, %v7000_v63, %v1151_v17  ;;  %v7005_v44 = vunpack.i.h.bf16 %v7003_v48  ;;  %v7004_v45 = vunpack.i.l.bf16 %v7003_v48  ;;  %1896 = vmatpush.bf16.msrb.mxu2 %v6178_v29  ;;  %vm849_vm15 = vcmask 629760  }
 0x1e0   :  { %v1165_v50 = vpack.c.bf16 %v1154_v24, %v1154_v24  ;;  %v850_v1 = vsel %vm849_vm15, %v7009_v20, %v7010_v19  ;;  %v7020_v63 = vunpack.i.h.bf16 %v7970_v23  ;;  %v6170_v17 = vor.u32 %v6715_v32, %v6169_v22  ;;  %v6143_v32 = vld [vmem:[#allocation3 + $0x1e4] sm:$0xf0] }
 0x1e1   :  { %v1195_v52 = vsel %vm11263_vm8, %v7005_v44, %v7934_v55  ;;  %v1194_v4 = vsel %vm11263_vm8, %v7004_v45, %v7005_v44  ;;  %v6723_v55 = vld [vmem:[#allocation3 + $0x260] sm:$0xf0]  ;;  %v6133_v45 = vld [vmem:[#allocation3 + $0x1b8] sm:$0xf]  ;;  %v6027_v23 = vld [vmem:[#allocation3 + $0x104] sm:$0xf0] }
 0x1e2   :  { %1170 = vst [vmem:[#allocation3 + $0x218] sm:$0x3] %v1165_v50  ;;  %v1262_v12 = vpack.c.bf16 %v1195_v52, %v1194_v4  ;;  %v6724_v4 = vld [vmem:[#allocation3 + $0x268] sm:$0xf0] }
 0x1e3   :  { %1897 = vmatpush.bf16.msrb.mxu2 %v6142_v5  ;;  %v6207_v5 = vld [vmem:[#allocation3 + $0x26c] sm:$0xf0]  ;;  %v6713_v15 = vld [vmem:[#allocation3 + $0x214] sm:$0xf] }
 0x1e4   :  { %1267 = vst [vmem:[#allocation3 + $0x240] sm:$0x33] %v1262_v12  ;;  %v6171_v12 = vld [vmem:[#allocation3 + $0x224] sm:$0xf0] }
 0x1e5   :  { %v7979_v34 = vpop.permute.xlu2 %7022 }
 0x1e6   :  { %v7981_v21 = vpop.permute.xlu0 %1211  ;;  %v828_v6 = vpop.permute.xlu1 %827 }
 0x1e7   :  { %v1215_v36 = vsel %vm11173_vm6, %v7015_v51, %v7981_v21  ;;  %v831_v62 = vsel %vm829_vm13, %v6935_v56, %v828_v6  ;;  %1898 = vmatpush.bf16.msrb.mxu2 %v6106_v2  ;;  %v1370_v56 = vunpack.c.h.b16 %v7960_v42  ;;  %vm748_vm13 = vcmask 637952   ;;  %v6706_v51 = vld [vmem:[#allocation3 + $0x1d8] sm:$0xf0]  ;;  %v6179_v2 = vld [vmem:[#allocation3 + $0x22c] sm:$0xf0] }
 0x1e8   :  { %v1263_v39 = vpack.c.bf16 %v1215_v36, %v1259_v13  ;;  %v857_v7 = vsel %vm11259_vm5, %v831_v62, %v7009_v20  ;;  %v6034_v42 = vor.u32 %v6680_v35, %v6033_v33  ;;  %vm11260_vm6 = vcmask 130048   ;;  %v6711_v20 = vld [vmem:[#allocation3 + $0x204] sm:$0xf]  ;;  %v5961_v6 = vld [vmem:[#allocation3 + $0x58] sm:$0xf] }
 0x1e9   :  { %v861_v3 = vpack.c.bf16 %v850_v1, %v857_v7  ;;  %v8002_v48 = vpack.c.b16 %v1370_v56, %v1370_v56  ;;  %v749_v59 = vsel %vm748_vm13, %v7019_v8, %v7020_v63  ;;  %v6134_v10 = vor.u32 %v6706_v51, %v6133_v45  ;;  %v6697_v7 = vld [vmem:[#allocation3 + $0x190] sm:$0xf0]  ;;  %v6702_v33 = vld [vmem:[#allocation3 + $0x1bc] sm:$0xf] }
 0x1ea   :  { %1268 = vst [vmem:[#allocation3 + $0x248] sm:$0x33] %v1263_v39  ;;  %v5998_v36 = vor.u32 %v6671_v43, %v5997_v41  ;;  %v7025_v13 = vunpack.i.h.bf16 %v7979_v34  ;;  %v7024_v62 = vunpack.i.l.bf16 %v7979_v34  ;;  %v6174_v35 = vor.u32 %v6711_v20, %v6171_v12  ;;  %v6708_v34 = vld [vmem:[#allocation3 + $0x1e8] sm:$0xf0] }
 0x1eb   :  { %v6197_v0 = vld [vmem:[#allocation3 + $0x240] sm:$0xf]  ;;  %v6719_v11 = vld [vmem:[#allocation3 + $0x244] sm:$0xf]  ;;  %1899 = vmatpush.bf16.msrb.mxu2 %v6070_v60  ;;  %866 = vst [vmem:[#allocation3 + $0x138] sm:$0x33] %v861_v3  ;;  %v6182_v1 = vor.u32 %v6712_v27, %v6179_v2 }
 0x1ec   :  { %v6198_v25 = vor.u32 %v6723_v55, %v6197_v0  ;;  %v6202_v26 = vor.u32 %v6719_v11, %v6199_v37  ;;  %v6135_v55 = vld [vmem:[#allocation3 + $0x1dc] sm:$0xf0]  ;;  %v6703_v37 = vld [vmem:[#allocation3 + $0x1c4] sm:$0xf]  ;;  %v6061_v3 = vld [vmem:[#allocation3 + $0x128] sm:$0xf] }
 0x1ed   :  { %v8000_v29 = vpop.permute.xlu2 %7032  ;;  %v6138_v11 = vor.u32 %v6702_v33, %v6135_v55  ;;  %v6685_v2 = vld [vmem:[#allocation3 + $0x134] sm:$0xf] }
 0x1ee   :  { %v1050_v24 = vpop.permute.xlu0 %1049  ;;  %v727_v44 = vpop.permute.xlu1 %726  ;;  %1812 = vmatpush.bf16.msra.mxu1 %v6198_v25  ;;  %1838 = vmatpush.bf16.msra.mxu3 %v6202_v26  ;;  %v6688_v25 = vld [vmem:[#allocation3 + $0x148] sm:$0xf0]  ;;  %v5925_v26 = vld [vmem:[#allocation3 + $0x10] sm:$0xf] }
 0x1ef   :  { %v1053_v50 = vsel %vm1051_vm2, %v6975_v14, %v1050_v24  ;;  %v730_v52 = vsel %vm728_vm11, %v6920_v61, %v727_v44  ;;  %1900 = vmatpush.bf16.msrb.mxu2 %v6034_v42  ;;  %v6097_v61 = vld [vmem:[#allocation3 + $0x170] sm:$0xf]  ;;  %vm647_vm11 = vcmask 769024   ;;  %v6146_v24 = vor.u32 %v6703_v37, %v6143_v32  ;;  %v6693_v44 = vld [vmem:[#allocation3 + $0x174] sm:$0xf] }
 0x1f0   :  { %v1064_v47 = vpack.c.bf16 %v1053_v50, %v1053_v50  ;;  %v756_v57 = vsel %vm11259_vm5, %v730_v52, %v7019_v8  ;;  %v6098_v60 = vor.u32 %v6697_v7, %v6097_v61  ;;  %v5962_v8 = vor.u32 %v6662_v40, %v5961_v6  ;;  %v6694_v50 = vld [vmem:[#allocation3 + $0x17c] sm:$0xf]  ;;  %v6107_v52 = vld [vmem:[#allocation3 + $0x19c] sm:$0xf0]  ;;  %v6071_v6 = vld [vmem:[#allocation3 + $0x154] sm:$0xf0] }
 0x1f1   :  { %6232 = vmatmul.msk.bf16.vlgmr.msra.gmra.mxu3 %vm11260_vm6, %v8002_v48  ;;  %v6205_v28 = vld [vmem:[#allocation3 + $0x248] sm:$0xf]  ;;  %v6720_v14 = vld [vmem:[#allocation3 + $0x24c] sm:$0xf]  ;;  %6231 = vmatmul.msk.bf16.vlgmr.msra.gmra.mxu1 %vm11260_vm6, %v8002_v48  ;;  %v760_v18 = vpack.c.bf16 %v749_v59, %v756_v57  ;;  %v648_v42 = vsel %vm647_vm11, %v7024_v62, %v7025_v13  ;;  %v6099_v59 = vld [vmem:[#allocation3 + $0x194] sm:$0xf0]  ;;  %v6062_v31 = vor.u32 %v6688_v25, %v6061_v3 }
 0x1f2   :  { %1844 = vmatpush.bf16.msrb.mxu1 %v6170_v17  ;;  %1069 = vst [vmem:[#allocation3 + $0x1d0] sm:$0x3] %v1064_v47  ;;  %v6206_v38 = vor.u32 %v6724_v4, %v6205_v28  ;;  %v6210_v39 = vor.u32 %v6720_v14, %v6207_v5  ;;  %v6653_v17 = vld [vmem:[#allocation3 + $0x30] sm:$0xf0]  ;;  %v6679_v4 = vld [vmem:[#allocation3 + $0x100] sm:$0xf0]  ;;  %v6102_v5 = vor.u32 %v6693_v44, %v6099_v59 }
 0x1f3   :  { %765 = vst [vmem:[#allocation3 + $0xf0] sm:$0x33] %v760_v18  ;;  %1901 = vmatpush.bf16.msrb.mxu2 %v5998_v36  ;;  %v6110_v12 = vor.u32 %v6694_v50, %v6107_v52  ;;  %v6684_v47 = vld [vmem:[#allocation3 + $0x12c] sm:$0xf]  ;;  %v6063_v57 = vld [vmem:[#allocation3 + $0x14c] sm:$0xf0]  ;;  %v6074_v33 = vor.u32 %v6685_v2, %v6071_v6 }
 0x1f4   :  { %1864 = vmatpush.bf16.msrb.mxu3 %v6206_v38  ;;  %1890 = vmatpush.bf16.msrb.mxu0 %v6210_v39  ;;  %v5989_v28 = vld [vmem:[#allocation3 + $0x98] sm:$0xf]  ;;  %v6670_v14 = vld [vmem:[#allocation3 + $0xb8] sm:$0xf0]  ;;  %v6676_v37 = vld [vmem:[#allocation3 + $0xec] sm:$0xf] }
 0x1f5   :  { %v8020_v56 = vpop.permute.xlu2 %7042  ;;  %v5990_v55 = vor.u32 %v6670_v14, %v5989_v28  ;;  %v5953_v25 = vld [vmem:[#allocation3 + $0x50] sm:$0xf]  ;;  %vm546_vm2 = vcmask 777216   ;;  %v5999_v44 = vld [vmem:[#allocation3 + $0xc4] sm:$0xf0] }
 0x1f6   :  { %1845 = vmatpush.bf16.msrb.mxu1 %v6134_v10  ;;  %v949_v22 = vpop.permute.xlu0 %948  ;;  %v626_v0 = vpop.permute.xlu1 %625  ;;  %v7045_v20 = vunpack.i.h.bf16 %v8020_v56  ;;  %v7044_v27 = vunpack.i.l.bf16 %v8020_v56  ;;  %v5917_v50 = vld [vmem:[#allocation3 + $0x8] sm:$0xf]  ;;  %v6652_v52 = vld [vmem:[#allocation3 + $0x28] sm:$0xf0]  ;;  %v6725_v2 = vld [vmem:[#allocation3 + $0x270] sm:$0xf0] }
 0x1f7   :  { %v952_v41 = vsel %vm950_vm12, %v6955_v58, %v949_v22  ;;  %v629_v43 = vsel %vm627_vm9, %v6905_v16, %v626_v0  ;;  %1902 = vmatpush.bf16.msrb.mxu2 %v5962_v8  ;;  %6234 = vmatmul.msk.bf16.vlgmr.msrb.gmra.mxu0 %vm11260_vm6, %v8002_v48  ;;  %v5926_v58 = vor.u32 %v6653_v17, %v5925_v26  ;;  %v6025_v16 = vld [vmem:[#allocation3 + $0xe0] sm:$0xf]  ;;  %vm1253_vm9 = vcmask 474112   ;;  %v6661_v26 = vld [vmem:[#allocation3 + $0x70] sm:$0xf0] }
 0x1f8   :  { %1870 = vmatpush.bf16.msra.mxu3 %v6174_v35  ;;  %1922 = vmatpush.bf16.msra.mxu0 %v6182_v1  ;;  %v963_v45 = vpack.c.bf16 %v952_v41, %v952_v41  ;;  %v655_v51 = vsel %vm11259_vm5, %v629_v43, %v7024_v62  ;;  %v6026_v10 = vor.u32 %v6679_v4, %v6025_v16  ;;  %vm1233_vm12 = vcmask 211968   ;;  %v6675_v35 = vld [vmem:[#allocation3 + $0xe4] sm:$0xf]  ;;  %v6666_v43 = vld [vmem:[#allocation3 + $0x9c] sm:$0xf] }
 0x1f9   :  { %v659_v30 = vpack.c.bf16 %v648_v42, %v655_v51  ;;  %v6066_v62 = vor.u32 %v6684_v47, %v6063_v57  ;;  %v1254_v1 = vsel %vm1253_vm9, %v7044_v27, %v7045_v20  ;;  %v7035_v8 = vunpack.i.h.bf16 %v8000_v29  ;;  %v6657_v4 = vld [vmem:[#allocation3 + $0x54] sm:$0xf]  ;;  %v6658_v47 = vld [vmem:[#allocation3 + $0x5c] sm:$0xf]  ;;  %v5963_v57 = vld [vmem:[#allocation3 + $0x7c] sm:$0xf0] }
 0x1fa   :  { %1846 = vmatpush.bf16.msrb.mxu1 %v6098_v60  ;;  %968 = vst [vmem:[#allocation3 + $0x188] sm:$0x3] %v963_v45  ;;  %v7034_v22 = vunpack.i.l.bf16 %v8000_v29  ;;  %v6030_v42 = vor.u32 %v6675_v35, %v6027_v23  ;;  %v5954_v45 = vor.u32 %v6661_v26, %v5953_v25  ;;  %v6215_v6 = vld [vmem:[#allocation3 + $0x274] sm:$0xf0]  ;;  %v5919_v28 = vld [vmem:[#allocation3 + $0x2c] sm:$0xf0] }
 0x1fb   :  { %1903 = vmatpush.bf16.msrb.mxu2 %v5926_v58  ;;  %664 = vst [vmem:[#allocation3 + $0xa8] sm:$0x33] %v659_v30  ;;  %v6726_v14 = vld [vmem:[#allocation3 + $0x278] sm:$0xf0]  ;;  %v6695_v29 = vld [vmem:[#allocation3 + $0x184] sm:$0xf] }
 0x1fc   :  { %1871 = vmatpush.bf16.msra.mxu3 %v6138_v11  ;;  %1923 = vmatpush.bf16.msra.mxu0 %v6146_v24  ;;  %v6667_v24 = vld [vmem:[#allocation3 + $0xa4] sm:$0xf]  ;;  %v6690_v56 = vld [vmem:[#allocation3 + $0x158] sm:$0xf0] }
 0x1fd   :  { %v747_v40 = vpop.permute.xlu2 %746  ;;  %v6002_v16 = vor.u32 %v6667_v24, %v5999_v44  ;;  %v6149_v24 = vld [vmem:[#allocation3 + $0x1c8] sm:$0xf]  ;;  %v6700_v44 = vld [vmem:[#allocation3 + $0x1a8] sm:$0xf0] }
 0x1fe   :  { %1847 = vmatpush.bf16.msrb.mxu1 %v6062_v31  ;;  %v750_v61 = vsel %vm748_vm13, %v7020_v63, %v747_v40  ;;  %v1232_v18 = vpop.permute.xlu0 %1231  ;;  %v7028_v36 = vpop.permute.xlu1 %7027  ;;  %1904 = vmatmul.bf16.vlgmr.msrb.gmra.mxu2 %v7963_v9  ;;  %v6035_v63 = vld [vmem:[#allocation3 + $0x10c] sm:$0xf0]  ;;  %v547_v31 = vsel %vm546_vm2, %v7034_v22, %v7035_v8  ;;  %v6718_v40 = vld [vmem:[#allocation3 + $0x238] sm:$0xf0]  ;;  %vm2481_vm13 = vcmask 1043456  }
 0x1ff   :  { %v761_v38 = vpack.c.bf16 %v750_v61, %v750_v61  ;;  %v7030_v39 = vunpack.i.h.bf16 %v7028_v36  ;;  %v7029_v7 = vunpack.i.l.bf16 %v7028_v36  ;;  %v6038_v41 = vor.u32 %v6676_v37, %v6035_v63  ;;  %v5927_v61 = vld [vmem:[#allocation3 + $0x34] sm:$0xf0]  ;;  %v6185_v37 = vld [vmem:[#allocation3 + $0x210] sm:$0xf]  ;;  %v6717_v63 = vld [vmem:[#allocation3 + $0x230] sm:$0xf0] }
 0x200   :  { %1872 = vmatpush.bf16.msra.mxu3 %v6102_v5  ;;  %1924 = vmatpush.bf16.msra.mxu0 %v6110_v12  ;;  %v5955_v12 = vld [vmem:[#allocation3 + $0x74] sm:$0xf0] }
 0x201   :  { %766 = vst [vmem:[#allocation3 + $0xf8] sm:$0x3] %v761_v38  ;;  %v1235_v32 = vsel %vm1233_vm12, %v7030_v39, %v1232_v18  ;;  %v1234_v60 = vsel %vm1233_vm12, %v7029_v7, %v7030_v39  ;;  %v1260_v3 = vsel %vm11261_vm3, %v7981_v21, %v7029_v7  ;;  %6233 = vmatmul.msk.bf16.vlgmr.msrb.gmra.mxu3 %vm11260_vm6, %v8002_v48  ;;  %v5991_v21 = vld [vmem:[#allocation3 + $0xbc] sm:$0xf0] }
 0x202   :  { %1848 = vmatpush.bf16.msrb.mxu1 %v6026_v10  ;;  %v1261_v0 = vsel %vm11259_vm5, %v1235_v32, %v7044_v27  ;;  %v1264_v11 = vpack.c.bf16 %v1234_v60, %v1260_v3  ;;  %v5994_v30 = vor.u32 %v6666_v43, %v5991_v21  ;;  %v5918_v27 = vor.u32 %v6652_v52, %v5917_v50  ;;  %v6648_v10 = vld [vmem:[#allocation3 + $0xc] sm:$0xf]  ;;  %v6223_v18 = vld [vmem:[#allocation3 + $0x27c] sm:$0xf0]  ;;  %v6157_v43 = vld [vmem:[#allocation3 + $0x1d0] sm:$0xf] }
 0x203   :  { %v1265_v17 = vpack.c.bf16 %v1254_v1, %v1261_v0  ;;  %v5958_v36 = vor.u32 %v6657_v4, %v5955_v12  ;;  %v6649_v1 = vld [vmem:[#allocation3 + $0x14] sm:$0xf] }
 0x204   :  { %1873 = vmatpush.bf16.msra.mxu3 %v6066_v62  ;;  %1925 = vmatpush.bf16.msra.mxu0 %v6074_v33  ;;  %1269 = vst [vmem:[#allocation3 + $0x250] sm:$0x33] %v1264_v11  ;;  %v5966_v62 = vor.u32 %v6658_v47, %v5963_v57  ;;  %v5930_v26 = vor.u32 %v6649_v1, %v5927_v61  ;;  %v6709_v21 = vld [vmem:[#allocation3 + $0x1f0] sm:$0xf0]  ;;  %v6691_v57 = vld [vmem:[#allocation3 + $0x160] sm:$0xf0] }
 0x205   :  { %1270 = vst [vmem:[#allocation3 + $0x258] sm:$0x33] %v1265_v17  ;;  %v6158_v46 = vor.u32 %v6709_v21, %v6157_v43  ;;  %v444_v50 = vpop.permute.xlu2 %443  ;;  %v8109_v43 = vld [vmem:[%s11152_s5 + $0x60] sm:$0xff] }
 0x206   :  { %1849 = vmatpush.bf16.msrb.mxu1 %v5990_v55  ;;  %v8052_v51 = vpop.permute.xlu0 %423  ;;  %v525_v59 = vpop.permute.xlu1 %524  ;;  %v6664_v21 = vld [vmem:[#allocation3 + $0x88] sm:$0xf0] }
 0x207   :  { %v528_v58 = vsel %vm526_vm4, %v6890_v54, %v525_v59  ;;  %v6193_v54 = vld [vmem:[#allocation3 + $0x218] sm:$0xf]  ;;  %v6699_v59 = vld [vmem:[#allocation3 + $0x1a0] sm:$0xf0]  ;;  %vm11258_vm4 = vcmask 31744  }
 0x208   :  { %1874 = vmatpush.bf16.msra.mxu3 %v6030_v42  ;;  %1926 = vmatpush.bf16.msra.mxu0 %v6038_v41  ;;  %v554_v5 = vsel %vm11259_vm5, %v528_v58, %v7034_v22  ;;  %v6194_v3 = vor.u32 %v6718_v40, %v6193_v54  ;;  %v5922_v22 = vor.u32 %v6648_v10, %v5919_v28  ;;  %v6187_v40 = vld [vmem:[#allocation3 + $0x234] sm:$0xf0]  ;;  %v6682_v54 = vld [vmem:[#allocation3 + $0x118] sm:$0xf0] }
 0x209   :  { %v558_v53 = vpack.c.bf16 %v547_v31, %v554_v5  ;;  %v6186_v41 = vor.u32 %v6717_v63, %v6185_v37  ;;  %v427_v5 = vsel %vm11261_vm3, %v6990_v49, %v8052_v51  ;;  %v6190_v61 = vor.u32 %v6713_v15, %v6187_v40  ;;  %v6115_v37 = vld [vmem:[#allocation3 + $0x1a4] sm:$0xf0] }
 0x20a   :  { %1850 = vmatpush.bf16.msrb.mxu1 %v5954_v45  ;;  %v6113_v45 = vld [vmem:[#allocation3 + $0x180] sm:$0xf]  ;;  %v8145_v40 = vld [vmem:[%s11152_s5 + $0x1f8] sm:$0xff]  ;;  %vm3031_vm3 = vcmask 1044168  }
 0x20b   :  { %v6213_v38 = vld [vmem:[#allocation3 + $0x250] sm:$0xf]  ;;  %v6721_v39 = vld [vmem:[#allocation3 + $0x254] sm:$0xf]  ;;  %563 = vst [vmem:[#allocation3 + $0x60] sm:$0x33] %v558_v53  ;;  %v6114_v47 = vor.u32 %v6699_v59, %v6113_v45 }
 0x20c   :  { %1875 = vmatpush.bf16.msra.mxu3 %v5994_v30  ;;  %1927 = vmatpush.bf16.msra.mxu0 %v6002_v16  ;;  %v6214_v7 = vor.u32 %v6725_v2, %v6213_v38  ;;  %v6218_v33 = vor.u32 %v6721_v39, %v6215_v6  ;;  %v6221_v35 = vld [vmem:[#allocation3 + $0x258] sm:$0xf]  ;;  %v6722_v55 = vld [vmem:[#allocation3 + $0x25c] sm:$0xf]  ;;  %v6704_v38 = vld [vmem:[#allocation3 + $0x1cc] sm:$0xf] }
 0x20d   :  { %v6222_v23 = vor.u32 %v6726_v14, %v6221_v35  ;;  %v6226_v0 = vor.u32 %v6722_v55, %v6223_v18  ;;  %v6077_v6 = vld [vmem:[#allocation3 + $0x138] sm:$0xf]  ;;  %v6041_v18 = vld [vmem:[#allocation3 + $0xf0] sm:$0xf] }
 0x20e   :  { %1851 = vmatpush.bf16.msrb.mxu1 %v5918_v27  ;;  %v646_v32 = vpop.permute.xlu0 %645  ;;  %v848_v60 = vpop.permute.xlu1 %847  ;;  %v6078_v51 = vor.u32 %v6690_v56, %v6077_v6  ;;  %v6049_v14 = vld [vmem:[#allocation3 + $0xf8] sm:$0xf]  ;;  %v6151_v39 = vld [vmem:[#allocation3 + $0x1ec] sm:$0xf0]  ;;  %v8140_v56 = vld [vmem:[%s11152_s5 + $0x178] sm:$0xff] }
 0x20f   :  { %v649_v11 = vsel %vm647_vm11, %v7025_v13, %v646_v32  ;;  %v851_v25 = vsel %vm849_vm15, %v7010_v19, %v848_v60  ;;  %1968 = vmatpush.bf16.msra.mxu2 %v6222_v23  ;;  %v6150_v19 = vor.u32 %v6708_v34, %v6149_v24  ;;  %v6121_v13 = vld [vmem:[#allocation3 + $0x188] sm:$0xf]  ;;  %v6673_v23 = vld [vmem:[#allocation3 + $0xd0] sm:$0xf0]  ;;  %v6154_v63 = vor.u32 %v6704_v38, %v6151_v39  ;;  %v6672_v60 = vld [vmem:[#allocation3 + $0xc8] sm:$0xf0] }
 0x210   :  { %1876 = vmatpush.bf16.msra.mxu3 %v5958_v36  ;;  %1928 = vmatpush.bf16.msra.mxu0 %v5966_v62  ;;  %v660_v17 = vpack.c.bf16 %v649_v11, %v649_v11  ;;  %v862_v42 = vpack.c.bf16 %v851_v25, %v851_v25  ;;  %v6122_v4 = vor.u32 %v6700_v44, %v6121_v13  ;;  %v6681_v36 = vld [vmem:[#allocation3 + $0x110] sm:$0xf0]  ;;  %v6005_v32 = vld [vmem:[#allocation3 + $0xa8] sm:$0xf]  ;;  %v6654_v34 = vld [vmem:[#allocation3 + $0x38] sm:$0xf0] }
 0x211   :  { %1852 = vmatmul.bf16.vlgmr.msrb.gmra.mxu1 %v7963_v9  ;;  %v6042_v1 = vor.u32 %v6681_v36, %v6041_v18  ;;  %v8103_v11 = vld [vmem:[%s11152_s5 + $0x68] sm:$0xff]  ;;  %v6118_v25 = vor.u32 %v6695_v29, %v6115_v37  ;;  %v6655_v13 = vld [vmem:[#allocation3 + $0x40] sm:$0xf0]  ;;  %v8135_v6 = vld [vmem:[%s11152_s5 + $0x40] sm:$0xff]  ;;  %vm11257_vm15 = vcmask 64512  }
 0x212   :  { %1916 = vmatpush.bf16.msra.mxu1 %v6214_v7  ;;  %665 = vst [vmem:[#allocation3 + $0xb0] sm:$0x3] %v660_v17  ;;  %6237 = vmatmul.msk.bf16.vlgmr.msra.gmra.mxu2 %vm11260_vm6, %v8002_v48  ;;  %v6663_v17 = vld [vmem:[#allocation3 + $0x80] sm:$0xf0]  ;;  %v8188_v18 = vld [vmem:[%s11152_s5 + $0x28] sm:$0xff]  ;;  %v8193_v36 = vld [vmem:[%s11152_s5 + $0x160] sm:$0xff] }
 0x213   :  { %2000 = vmatpush.bf16.msrb.mxu2 %v6194_v3  ;;  %867 = vst [vmem:[#allocation3 + $0x140] sm:$0x3] %v862_v42  ;;  %v8090_v3 = vld [vmem:[%s11152_s5 + $0x78] sm:$0xff]  ;;  %v6686_v42 = vld [vmem:[#allocation3 + $0x13c] sm:$0xf]  ;;  %v8201_v39 = vld [vmem:[%s11152_s5 + $0x1e0] sm:$0xff] }
 0x214   :  { %1877 = vmatpush.bf16.msra.mxu3 %v5922_v22  ;;  %1929 = vmatpush.bf16.msra.mxu0 %v5930_v26  ;;  %v5969_v26 = vld [vmem:[#allocation3 + $0x60] sm:$0xf]  ;;  %v8115_v44 = vld [vmem:[%s11152_s5 + $0x58] sm:$0xff]  ;;  %v8260_v29 = vld [vmem:[%s11152_s5 + $0x148] sm:$0xff] }
 0x215   :  { %v5970_v24 = vor.u32 %v6663_v17, %v5969_v26  ;;  %v6659_v15 = vld [vmem:[#allocation3 + $0x64] sm:$0xf]  ;;  %v5935_v38 = vld [vmem:[#allocation3 + $0x3c] sm:$0xf0]  ;;  %v8286_v26 = vld [vmem:[%s11152_s5] sm:$0xff] }
 0x216   :  { %1942 = vmatpush.bf16.msrb.mxu1 %v6218_v33  ;;  %v1252_v52 = vpop.permute.xlu0 %1251  ;;  %v7038_v31 = vpop.permute.xlu1 %7037  ;;  %v6050_v33 = vor.u32 %v6682_v54, %v6049_v14  ;;  %v8176_v14 = vld [vmem:[%s11152_s5 + $0x168] sm:$0xff]  ;;  %v8237_v37 = vld [vmem:[%s11152_s5 + $0x150] sm:$0xff]  ;;  %v8296_v17 = vld [vmem:[%s11152_s5 + $0xe0] sm:$0xff] }
 0x217   :  { %1878 = vmatmul.bf16.vlgmr.msra.gmra.mxu3 %v7963_v9  ;;  %1930 = vmatmul.bf16.vlgmr.msra.gmra.mxu0 %v7963_v9  ;;  %v1255_v58 = vsel %vm1253_vm9, %v7045_v20, %v1252_v52  ;;  %v7040_v30 = vunpack.i.h.bf16 %v7038_v31  ;;  %v7039_v16 = vunpack.i.l.bf16 %v7038_v31  ;;  %v8183_v54 = vld [vmem:[%s11152_s5 + $0x1e8] sm:$0xff] }
 0x218   :  { %1948 = vmatpush.bf16.msrb.mxu3 %v6186_v41  ;;  %1994 = vmatpush.bf16.msrb.mxu0 %v6226_v0  ;;  %v1266_v12 = vpack.c.bf16 %v1255_v58, %v1255_v58  ;;  %v6006_v0 = vor.u32 %v6672_v60, %v6005_v32  ;;  %v6079_v41 = vld [vmem:[#allocation3 + $0x15c] sm:$0xf0] }
 0x219   :  { %2001 = vmatpush.bf16.msrb.mxu2 %v6158_v46  ;;  %v446_v27 = vsel %vm11259_vm5, %v7039_v16, %v7040_v30  ;;  %v453_v2 = vsel %vm11259_vm5, %v427_v5, %v7039_v16  ;;  %v447_v20 = vsel %vm11259_vm5, %v7040_v30, %v444_v50  ;;  %v6013_v55 = vld [vmem:[#allocation3 + $0xb0] sm:$0xf]  ;;  %v6677_v46 = vld [vmem:[#allocation3 + $0xf4] sm:$0xf]  ;;  %v6082_v45 = vor.u32 %v6686_v42, %v6079_v41  ;;  %v6727_v30 = vld [vmem:[#allocation3 + $0x280] sm:$0xf0] }
 0x21a   :  { %1271 = vst [vmem:[#allocation3 + $0x260] sm:$0x3] %v1266_v12  ;;  %v457_v10 = vpack.c.bf16 %v446_v27, %v453_v2  ;;  %v6085_v28 = vld [vmem:[#allocation3 + $0x140] sm:$0xf]  ;;  %v458_v53 = vpack.c.bf16 %v447_v20, %v447_v20  ;;  %v6014_v22 = vor.u32 %v6673_v23, %v6013_v55  ;;  %v6668_v27 = vld [vmem:[#allocation3 + $0xac] sm:$0xf] }
 0x21b   :  { %v6086_v49 = vor.u32 %v6691_v57, %v6085_v28  ;;  %v8121_v16 = vld [vmem:[%s11152_s5 + $0x50] sm:$0xff]  ;;  %v8128_v57 = vld [vmem:[%s11152_s5 + $0x48] sm:$0xff]  ;;  %v6007_v2 = vld [vmem:[#allocation3 + $0xcc] sm:$0xf0]  ;;  %vm3070_vm5 = vcmask 39940  }
 0x21c   :  { %1949 = vmatpush.bf16.msrb.mxu3 %v6150_v19  ;;  %462 = vst [vmem:[#allocation3 + $0x18] sm:$0x33] %v457_v10  ;;  %2026 = vmatpush.msra.mxu0 %v8090_v3  ;;  %v6043_v19 = vld [vmem:[#allocation3 + $0x114] sm:$0xf0]  ;;  %v6010_v20 = vor.u32 %v6668_v27, %v6007_v2  ;;  %v8152_v10 = vld [vmem:[%s11152_s5 + $0x38] sm:$0xff]  ;;  %v8157_v28 = vld [vmem:[%s11152_s5 + $0x170] sm:$0xff] }
 0x21d   :  { %2002 = vmatpush.bf16.msrb.mxu2 %v6122_v4  ;;  %463 = vst [vmem:[#allocation3 + $0x20] sm:$0x3] %v458_v53  ;;  %v6046_v12 = vor.u32 %v6677_v46, %v6043_v19  ;;  %v5971_v53 = vld [vmem:[#allocation3 + $0x84] sm:$0xf0]  ;;  %v8247_v32 = vld [vmem:[%s11152_s5 + $0x10] sm:$0xff]  ;;  %v8346_v19 = vld [vmem:[%s11152_s5 + $0x268] sm:$0xff] }
 0x21e   :  { %v545_v62 = vpop.permute.xlu1 %544  ;;  %v8224_v55 = vld [vmem:[%s11152_s5 + $0xf8] sm:$0xff]  ;;  %v8254_v60 = vld [vmem:[%s11152_s5 + $0xf0] sm:$0xff]  ;;  %11352 = vst [vmem:[#allocation6_spill] sm:$0xff] %v8346_v19 }
 0x21f   :  { %v548_v7 = vsel %vm546_vm2, %v7035_v8, %v545_v62  ;;  %v8096_v8 = vld [vmem:[%s11152_s5 + $0x70] sm:$0xff]  ;;  %v8229_v23 = vld [vmem:[%s11152_s5 + $0x18] sm:$0xff] }
 0x220   :  { %1950 = vmatpush.bf16.msrb.mxu3 %v6114_v47  ;;  %v559_v35 = vpack.c.bf16 %v548_v7, %v548_v7  ;;  %2027 = vmatpush.msra.mxu0 %v8096_v8  ;;  %v8206_v7 = vld [vmem:[%s11152_s5 + $0x20] sm:$0xff]  ;;  %v8302_v42 = vld [vmem:[%s11152_s5 + $0x278] sm:$0xff]  ;;  %v8340_v46 = vld [vmem:[%s11152_s5 + $0xd0] sm:$0xff] }
 0x221   :  { %2003 = vmatpush.bf16.msrb.mxu2 %v6086_v49  ;;  %6235 = vmatmul.msk.bf16.vlgmr.msra.gmra.mxu1 %vm11260_vm6, %v8002_v48  ;;  %v6229_v58 = vld [vmem:[#allocation3 + $0x260] sm:$0xf]  ;;  %v8311_v41 = vld [vmem:[%s11152_s5 + $0x138] sm:$0xff] }
 0x222   :  { %1974 = vmatpush.bf16.msra.mxu1 %v6190_v61  ;;  %564 = vst [vmem:[#allocation3 + $0x68] sm:$0x3] %v559_v35  ;;  %2028 = vmatpush.msra.mxu0 %v8103_v11  ;;  %v6230_v47 = vor.u32 %v6727_v30, %v6229_v58  ;;  %v8165_v49 = vld [vmem:[%s11152_s5 + $0x1f0] sm:$0xff]  ;;  %v5974_v61 = vor.u32 %v6659_v15, %v5971_v53  ;;  %v8219_v35 = vld [vmem:[%s11152_s5 + $0x1d8] sm:$0xff] }
 0x223   :  { %v5933_v50 = vld [vmem:[#allocation3 + $0x18] sm:$0xf]  ;;  %v6650_v62 = vld [vmem:[#allocation3 + $0x1c] sm:$0xf]  ;;  %v8390_v58 = vld [vmem:[%s11152_s5 + $0xb8] sm:$0xff] }
 0x224   :  { %1951 = vmatpush.bf16.msrb.mxu3 %v6078_v51  ;;  %v5941_v52 = vld [vmem:[#allocation3 + $0x20] sm:$0xf]  ;;  %2029 = vmatpush.msra.mxu0 %v8109_v43  ;;  %v5934_v4 = vor.u32 %v6654_v34, %v5933_v50  ;;  %v8372_v50 = vld [vmem:[%s11152_s5 + $0x120] sm:$0xff] }
 0x225   :  { %2004 = vmatpush.bf16.msrb.mxu2 %v6050_v33  ;;  %v5942_v5 = vor.u32 %v6655_v13, %v5941_v52  ;;  %v8171_v51 = vld [vmem:[%s11152_s5 + $0x30] sm:$0xff]  ;;  %v8211_v33 = vld [vmem:[%s11152_s5 + $0x158] sm:$0xff]  ;;  %v8354_v13 = vld [vmem:[%s11152_s5 + $0x128] sm:$0xff]  ;;  %11355 = vst [vmem:[#allocation9_spill] sm:$0xff] %v8372_v50 }
 0x226   :  { %1975 = vmatpush.bf16.msra.mxu1 %v6154_v63  ;;  %2030 = vmatpush.msra.mxu0 %v8115_v44  ;;  %v8242_v63 = vld [vmem:[%s11152_s5 + $0x1d0] sm:$0xff]  ;;  %11353 = vst [vmem:[#allocation7_spill] sm:$0xff] %v8354_v13  ;;  %v8377_v52 = vld [vmem:[%s11152_s5 + $0xc0] sm:$0xff] }
 0x227   :  { %6238 = vmatmul.msk.bf16.vlgmr.msrb.gmra.mxu0 %vm11260_vm6, %v8002_v48  ;;  %v8335_v34 = vld [vmem:[%s11152_s5 + $0x130] sm:$0xff] }
 0x228   :  { %1952 = vmatpush.bf16.msrb.mxu3 %v6042_v1  ;;  %2031 = vmatpush.msra.mxu0 %v8121_v16  ;;  %v5938_v1 = vor.u32 %v6650_v62, %v5935_v38  ;;  %v8398_v30 = vld [vmem:[%s11152_s5 + $0xb0] sm:$0xff]  ;;  %v8457_v62 = vld [vmem:[%s11152_s5 + $0x248] sm:$0xff] }
 0x229   :  { %2005 = vmatpush.bf16.msrb.mxu2 %v6014_v22  ;;  %v5977_v59 = vld [vmem:[#allocation3 + $0x68] sm:$0xf]  ;;  %v8266_v22 = vld [vmem:[%s11152_s5 + $0x8] sm:$0xff]  ;;  %v8430_v2 = vld [vmem:[%s11152_s5 + $0x90] sm:$0xff]  ;;  %11362 = vst [vmem:[#allocation16_spill] sm:$0xff] %v8457_v62 }
 0x22a   :  { %1976 = vmatpush.bf16.msra.mxu1 %v6118_v25  ;;  %v5978_v31 = vor.u32 %v6664_v21, %v5977_v59  ;;  %2032 = vmatpush.msra.mxu0 %v8128_v57  ;;  %v8278_v25 = vld [vmem:[%s11152_s5 + $0xe8] sm:$0xff]  ;;  %v8316_v21 = vld [vmem:[%s11152_s5 + $0x1c0] sm:$0xff]  ;;  %v8440_v15 = vld [vmem:[%s11152_s5 + $0x250] sm:$0xff] }
 0x22b   :  { %v8365_v59 = vld [vmem:[%s11152_s5 + $0x260] sm:$0xff]  ;;  %11359 = vst [vmem:[#allocation13_spill] sm:$0xff] %v8440_v15  ;;  %v8447_v53 = vld [vmem:[%s11152_s5 + $0x1b0] sm:$0xff]  ;;  %v8462_v38 = vld [vmem:[%s11152_s5 + $0x88] sm:$0xff] }
 0x22c   :  { %1953 = vmatpush.bf16.msrb.mxu3 %v6006_v0  ;;  %2033 = vmatpush.msra.mxu0 %v8135_v6  ;;  %v8272_v0 = vld [vmem:[%s11152_s5 + $0x1c8] sm:$0xff]  ;;  %11354 = vst [vmem:[#allocation8_spill] sm:$0xff] %v8365_v59 }
 0x22d   :  { %2006 = vmatpush.bf16.msrb.mxu2 %v5978_v31  ;;  %v8383_v31 = vld [vmem:[%s11152_s5 + $0x258] sm:$0xff]  ;;  %11360 = vst [vmem:[#allocation14_spill] sm:$0xff] %v8447_v53 }
 0x22e   :  { %1977 = vmatpush.bf16.msra.mxu1 %v6082_v45  ;;  %2034 = vmatpush.msra.mxu0 %v8152_v10  ;;  %v8359_v45 = vld [vmem:[%s11152_s5 + $0xc8] sm:$0xff]  ;;  %11356 = vst [vmem:[#allocation10_spill] sm:$0xff] %v8383_v31 }
 0x230   :  { %1954 = vmatpush.bf16.msrb.mxu3 %v5970_v24  ;;  %2035 = vmatpush.msra.mxu0 %v8171_v51  ;;  %v8321_v24 = vld [vmem:[%s11152_s5 + $0xd8] sm:$0xff] }
 0x231   :  { %6236 = vmatmul.msk.bf16.vlgmr.msrb.gmra.mxu1 %vm11260_vm6, %v8002_v48  ;;  %2007 = vmatpush.bf16.msrb.mxu2 %v5942_v5  ;;  %v8409_v5 = vld [vmem:[%s11152_s5 + $0x1b8] sm:$0xff] }
 0x232   :  { %1978 = vmatpush.bf16.msra.mxu1 %v6046_v12  ;;  %2036 = vmatpush.msra.mxu0 %v8188_v18  ;;  %11357 = vst [vmem:[#allocation11_spill] sm:$0xff] %v8409_v5  ;;  %v8416_v12 = vld [vmem:[%s11152_s5 + $0xa0] sm:$0xff] }
 0x234   :  { %1955 = vmatpush.bf16.msrb.mxu3 %v5934_v4  ;;  %2008 = vmatmul.bf16.vlgmr.msrb.gmra.mxu2 %v7963_v9  ;;  %v8404_v4 = vld [vmem:[%s11152_s5 + $0xa8] sm:$0xff] }
 0x235   :  { %2086 = vmatpush.msra.mxu2 %v8145_v40  ;;  %2037 = vmatpush.msra.mxu0 %v8206_v7 }
 0x236   :  { %1979 = vmatpush.bf16.msra.mxu1 %v6010_v20  ;;  %v8435_v20 = vld [vmem:[%s11152_s5 + $0x118] sm:$0xff] }
 0x237   :  { %1956 = vmatmul.bf16.vlgmr.msrb.gmra.mxu3 %v7963_v9  ;;  %2087 = vmatpush.msra.mxu2 %v8165_v49  ;;  %11358 = vst [vmem:[#allocation12_spill] sm:$0xff] %v8435_v20 }
 0x238   :  { %2020 = vmatpush.bf16.msra.mxu3 %v6230_v47  ;;  %2038 = vmatpush.msra.mxu0 %v8229_v23  ;;  %v8422_v47 = vld [vmem:[%s11152_s5 + $0x98] sm:$0xff] }
 0x239   :  { %2088 = vmatpush.msra.mxu2 %v8183_v54 }
 0x23a   :  { %1980 = vmatpush.bf16.msra.mxu1 %v5974_v61  ;;  %2039 = vmatpush.msra.mxu0 %v8247_v32  ;;  %v8452_v61 = vld [vmem:[%s11152_s5 + $0x110] sm:$0xff] }
 0x23b   :  { %2089 = vmatpush.msra.mxu2 %v8201_v39  ;;  %11361 = vst [vmem:[#allocation15_spill] sm:$0xff] %v8452_v61 }
 0x23c   :  { %2066 = vmatpush.msrb.mxu3 %v8140_v56  ;;  %2040 = vmatpush.msra.mxu0 %v8266_v22 }
 0x23d   :  { %2090 = vmatpush.msra.mxu2 %v8219_v35 }
 0x23e   :  { %2067 = vmatpush.msrb.mxu3 %v8157_v28  ;;  %1981 = vmatpush.bf16.msra.mxu1 %v5938_v1  ;;  %v8469_v1 = vld [vmem:[%s11152_s5 + $0x1a8] sm:$0xff] }
 0x23f   :  { %2091 = vmatpush.msra.mxu2 %v8242_v63  ;;  %2041 = vmatpush.msra.mxu0 %v8286_v26  ;;  %11363 = vst [vmem:[#allocation17_spill] sm:$0xff] %v8469_v1 }
 0x240   :  { %2068 = vmatpush.msrb.mxu3 %v8176_v14 }
 0x241   :  { %1982 = vmatmul.bf16.vlgmr.msra.gmra.mxu1 %v7963_v9  ;;  %v8291_v9 = vld [vmem:[%s11152_s5 + $0x140] sm:$0xff]  ;;  %2092 = vmatpush.msra.mxu2 %v8272_v0 }
 0x242   :  { %2069 = vmatpush.msrb.mxu3 %v8193_v36  ;;  %2046 = vmatpush.msrb.mxu1 %v8224_v55 }
 0x243   :  { %2106 = vmatpush.msrb.mxu0 %v8302_v42  ;;  %2093 = vmatpush.msra.mxu2 %v8316_v21 }
 0x244   :  { %2070 = vmatpush.msrb.mxu3 %v8211_v33  ;;  %2047 = vmatpush.msrb.mxu1 %v8254_v60 }
 0x245   :  { %2094 = vmatpush.msra.mxu2 %v8409_v5  ;;  %v8715_v5 = vld [vmem:[%s11152_s5 + $0x2b0] sm:$0xff] }
 0x246   :  { %2071 = vmatpush.msrb.mxu3 %v8237_v37  ;;  %2048 = vmatpush.msrb.mxu1 %v8278_v25  ;;  %11403 = vst [vmem:[#allocation57_spill] sm:$0xff] %v8715_v5 }
 0x247   :  { %6239 = vmatmul.msk.bf16.vlgmr.msra.gmra.mxu3 %vm11260_vm6, %v8002_v48  ;;  %v8328_v48 = vld [vmem:[%s11152_s5 + $0x270] sm:$0xff]  ;;  %2095 = vmatpush.msra.mxu2 %v8447_v53  ;;  %vm3071_vm6 = vmor %vm3070_vm5, %vm2481_vm13  ;;  %vm3067_vm5 = vcmask 1044264  }
 0x248   :  { %2072 = vmatpush.msrb.mxu3 %v8260_v29  ;;  %11351 = vst [vmem:[#allocation5_spill] sm:$0xff] %v8328_v48  ;;  %2049 = vmatpush.msrb.mxu1 %v8296_v17  ;;  %v8530_v53 = vld [vmem:[%s11152_s5 + $0x2f0] sm:$0xff] }
 0x249   :  { %2107 = vmatpush.msrb.mxu0 %v8328_v48  ;;  %2096 = vmatpush.msra.mxu2 %v8469_v1  ;;  %v8519_v1 = vld [vmem:[%s11152_s5 + $0x198] sm:$0xff]  ;;  %11373 = vst [vmem:[#allocation27_spill] sm:$0xff] %v8530_v53 }
 0x24a   :  { %2073 = vmatpush.msrb.mxu3 %v8291_v9  ;;  %2050 = vmatpush.msrb.mxu1 %v8321_v24  ;;  %11371 = vst [vmem:[#allocation25_spill] sm:$0xff] %v8519_v1  ;;  %v8615_v48 = vld [vmem:[%s11152_s5 + $0x3f8] sm:$0xff] }
 0x24b   :  { %2108 = vmatpush.msrb.mxu0 %v8346_v19  ;;  %v8507_v19 = vpop.f32.mrf.mxu2  ;;  %11387 = vst [vmem:[#allocation41_spill] sm:$0xff] %v8615_v48 }
 0x24c   :  { %2074 = vmatpush.msrb.mxu3 %v8311_v41  ;;  %2051 = vmatpush.msrb.mxu1 %v8340_v46  ;;  %v8425_v27 = vpop.f32.mrf.mxu0 }
 0x24d   :  { %2109 = vmatpush.msrb.mxu0 %v8365_v59  ;;  %v8491_v59 = vld [vmem:[%s11152_s5 + $0x80] sm:$0xff] }
 0x24e   :  { %2075 = vmatpush.msrb.mxu3 %v8335_v34  ;;  %2052 = vmatpush.msrb.mxu1 %v8359_v45  ;;  %11367 = vst [vmem:[#allocation21_spill] sm:$0xff] %v8491_v59 }
 0x24f   :  { %2110 = vmatpush.msrb.mxu0 %v8383_v31  ;;  %v8474_v31 = vld [vmem:[%s11152_s5 + $0x108] sm:$0xff] }
 0x250   :  { %2076 = vmatpush.msrb.mxu3 %v8354_v13  ;;  %2053 = vmatpush.msrb.mxu1 %v8377_v52  ;;  %11364 = vst [vmem:[#allocation18_spill] sm:$0xff] %v8474_v31  ;;  %v8543_v13 = vld [vmem:[%s11152_s5 + $0x190] sm:$0xff] }
 0x251   :  { %2111 = vmatpush.msrb.mxu0 %v8440_v15  ;;  %v8481_v15 = vld [vmem:[%s11152_s5 + $0x240] sm:$0xff]  ;;  %11375 = vst [vmem:[#allocation29_spill] sm:$0xff] %v8543_v13 }
 0x252   :  { %2077 = vmatpush.msrb.mxu3 %v8372_v50  ;;  %2054 = vmatpush.msrb.mxu1 %v8390_v58  ;;  %11365 = vst [vmem:[#allocation19_spill] sm:$0xff] %v8481_v15  ;;  %v8504_v50 = vld [vmem:[%s11152_s5 + $0x2f8] sm:$0xff] }
 0x253   :  { %2112 = vmatpush.msrb.mxu0 %v8457_v62  ;;  %11369 = vst [vmem:[#allocation23_spill] sm:$0xff] %v8504_v50  ;;  %v8512_v62 = vld [vmem:[%s11152_s5 + $0x238] sm:$0xff] }
 0x254   :  { %2055 = vmatpush.msrb.mxu1 %v8398_v30  ;;  %2078 = vmatpush.msrb.mxu3 %v8435_v20  ;;  %v8486_v20 = vld [vmem:[%s11152_s5 + $0x1a0] sm:$0xff]  ;;  %11370 = vst [vmem:[#allocation24_spill] sm:$0xff] %v8512_v62 }
 0x255   :  { %11366 = vst [vmem:[#allocation20_spill] sm:$0xff] %v8486_v20  ;;  %2113 = vmatpush.msrb.mxu0 %v8481_v15  ;;  %2097 = vmatpush.msra.mxu2 %v8486_v20  ;;  %v1803_v15 = vpop.f32.mrf.mxu0  ;;  %v8538_v20 = vld [vmem:[%s11152_s5 + $0x230] sm:$0xff] }
 0x256   :  { %2056 = vmatpush.msrb.mxu1 %v8404_v4  ;;  %2079 = vmatpush.msrb.mxu3 %v8452_v61  ;;  %v8498_v61 = vld [vmem:[%s11152_s5 + $0x100] sm:$0xff]  ;;  %11374 = vst [vmem:[#allocation28_spill] sm:$0xff] %v8538_v20  ;;  %v8548_v15 = vld [vmem:[%s11152_s5 + $0x2e8] sm:$0xff] }
 0x257   :  { %11368 = vst [vmem:[#allocation22_spill] sm:$0xff] %v8498_v61  ;;  %2114 = vmatpush.msrb.mxu0 %v8512_v62  ;;  %2098 = vmatpush.msra.mxu2 %v8519_v1  ;;  %v8555_v62 = vld [vmem:[%s11152_s5 + $0x370] sm:$0xff]  ;;  %v8577_v1 = vld [vmem:[%s11152_s5 + $0x2e0] sm:$0xff] }
 0x258   :  { %2057 = vmatpush.msrb.mxu1 %v8416_v12  ;;  %2080 = vmatpush.msrb.mxu3 %v8474_v31  ;;  %v8524_v31 = vld [vmem:[%s11152_s5 + $0x378] sm:$0xff]  ;;  %11376 = vst [vmem:[#allocation30_spill] sm:$0xff] %v8548_v15 }
 0x259   :  { %11372 = vst [vmem:[#allocation26_spill] sm:$0xff] %v8524_v31  ;;  %2115 = vmatpush.msrb.mxu0 %v8538_v20  ;;  %2099 = vmatpush.msra.mxu2 %v8543_v13  ;;  %v8584_v20 = vld [vmem:[%s11152_s5 + $0x220] sm:$0xff] }
 0x25a   :  { %2058 = vmatpush.msrb.mxu1 %v8422_v47  ;;  %2081 = vmatpush.msrb.mxu3 %v8498_v61  ;;  %11377 = vst [vmem:[#allocation31_spill] sm:$0xff] %v8555_v62  ;;  %v8560_v61 = vld [vmem:[%s11152_s5 + $0x228] sm:$0xff]  ;;  %v8596_v13 = vld [vmem:[%s11152_s5 + $0x360] sm:$0xff] }
 0x25b   :  { %11378 = vst [vmem:[#allocation32_spill] sm:$0xff] %v8560_v61  ;;  %2116 = vmatpush.msrb.mxu0 %v8560_v61  ;;  %v8608_v61 = vld [vmem:[%s11152_s5 + $0x218] sm:$0xff] }
 0x25c   :  { %2059 = vmatpush.msrb.mxu1 %v8430_v2  ;;  %2146 = vmatpush.msra.mxu3 %v8524_v31  ;;  %v8572_v31 = vld [vmem:[%s11152_s5 + $0x368] sm:$0xff]  ;;  %11381 = vst [vmem:[#allocation35_spill] sm:$0xff] %v8577_v1 }
 0x25d   :  { %11380 = vst [vmem:[#allocation34_spill] sm:$0xff] %v8572_v31  ;;  %2117 = vmatpush.msrb.mxu0 %v8584_v20 }
 0x25e   :  { %2060 = vmatpush.msrb.mxu1 %v8462_v38  ;;  %2147 = vmatpush.msra.mxu3 %v8555_v62  ;;  %11382 = vst [vmem:[#allocation36_spill] sm:$0xff] %v8584_v20  ;;  %v8601_v62 = vld [vmem:[%s11152_s5 + $0x2d8] sm:$0xff]  ;;  %v8639_v20 = vld [vmem:[%s11152_s5 + $0x3f0] sm:$0xff] }
 0x25f   :  { %11384 = vst [vmem:[#allocation38_spill] sm:$0xff] %v8596_v13  ;;  %2118 = vmatpush.msrb.mxu0 %v8608_v61 }
 0x260   :  { %2061 = vmatpush.msrb.mxu1 %v8491_v59  ;;  %11385 = vst [vmem:[#allocation39_spill] sm:$0xff] %v8601_v62  ;;  %2148 = vmatpush.msra.mxu3 %v8572_v31  ;;  %v8625_v31 = vld [vmem:[%s11152_s5 + $0x2d0] sm:$0xff] }
 0x261   :  { %11386 = vst [vmem:[#allocation40_spill] sm:$0xff] %v8608_v61  ;;  %v8656_v61 = vld [vmem:[%s11152_s5 + $0x208] sm:$0xff] }
 0x262   :  { %2126 = vmatpush.msra.mxu1 %v8504_v50  ;;  %v8567_v50 = vld [vmem:[%s11152_s5 + $0x188] sm:$0xff]  ;;  %11389 = vst [vmem:[#allocation43_spill] sm:$0xff] %v8625_v31  ;;  %2149 = vmatpush.msra.mxu3 %v8596_v13 }
 0x263   :  { %11379 = vst [vmem:[#allocation33_spill] sm:$0xff] %v8567_v50  ;;  %2100 = vmatpush.msra.mxu2 %v8567_v50  ;;  %v8620_v50 = vld [vmem:[%s11152_s5 + $0x358] sm:$0xff]  ;;  %v8649_v13 = vld [vmem:[%s11152_s5 + $0x2c8] sm:$0xff] }
 0x264   :  { %2127 = vmatpush.msra.mxu1 %v8530_v53  ;;  %v8591_v53 = vld [vmem:[%s11152_s5 + $0x180] sm:$0xff]  ;;  %11388 = vst [vmem:[#allocation42_spill] sm:$0xff] %v8620_v50  ;;  %2150 = vmatpush.msra.mxu3 %v8620_v50 }
 0x265   :  { %11383 = vst [vmem:[#allocation37_spill] sm:$0xff] %v8591_v53  ;;  %2101 = vmatpush.msra.mxu2 %v8591_v53  ;;  %v8673_v50 = vld [vmem:[%s11152_s5 + $0x2c0] sm:$0xff] }
 0x266   :  { %2128 = vmatpush.msra.mxu1 %v8548_v15  ;;  %v1829_v15 = vpop.f32.mrf.mxu2  ;;  %11391 = vst [vmem:[#allocation45_spill] sm:$0xff] %v8639_v20  ;;  %v8689_v53 = vld [vmem:[%s11152_s5 + $0x3e0] sm:$0xff] }
 0x267   :  { %v8632_v15 = vld [vmem:[%s11152_s5 + $0x210] sm:$0xff]  ;;  %11393 = vst [vmem:[#allocation47_spill] sm:$0xff] %v8649_v13  ;;  %2166 = vmatpush.msrb.mxu2 %v8615_v48  ;;  %v8668_v48 = vld [vmem:[%s11152_s5 + $0x348] sm:$0xff] }
 0x268   :  { %2129 = vmatpush.msra.mxu1 %v8577_v1  ;;  %11390 = vst [vmem:[#allocation44_spill] sm:$0xff] %v8632_v15  ;;  %v8644_v1 = vld [vmem:[%s11152_s5 + $0x350] sm:$0xff]  ;;  %2119 = vmatpush.msrb.mxu0 %v8632_v15  ;;  %v8680_v15 = vld [vmem:[%s11152_s5 + $0x200] sm:$0xff] }
 0x269   :  { %11392 = vst [vmem:[#allocation46_spill] sm:$0xff] %v8644_v1  ;;  %2167 = vmatpush.msrb.mxu2 %v8639_v20  ;;  %2151 = vmatpush.msra.mxu3 %v8644_v1  ;;  %v8694_v1 = vld [vmem:[%s11152_s5 + $0x340] sm:$0xff]  ;;  %v8699_v20 = vld [vmem:[%s11152_s5 + $0x2b8] sm:$0xff] }
 0x26a   :  { %2130 = vmatpush.msra.mxu1 %v8601_v62  ;;  %11394 = vst [vmem:[#allocation48_spill] sm:$0xff] %v8656_v61  ;;  %v8663_v62 = vld [vmem:[%s11152_s5 + $0x3e8] sm:$0xff]  ;;  %2120 = vmatpush.msrb.mxu0 %v8656_v61  ;;  %v8708_v61 = vld [vmem:[%s11152_s5 + $0x3d8] sm:$0xff] }
 0x26b   :  { %11395 = vst [vmem:[#allocation49_spill] sm:$0xff] %v8663_v62  ;;  %2168 = vmatpush.msrb.mxu2 %v8663_v62  ;;  %2152 = vmatpush.msra.mxu3 %v8668_v48  ;;  %v8746_v62 = vld [vmem:[%s11152_s5 + $0x3c8] sm:$0xff] }
 0x26c   :  { %2131 = vmatpush.msra.mxu1 %v8625_v31  ;;  %11396 = vst [vmem:[#allocation50_spill] sm:$0xff] %v8668_v48  ;;  %v8682_v31 = vpop.permute.xlu1 %1365  ;;  %2121 = vmatpush.msrb.mxu0 %v8680_v15  ;;  %v8722_v48 = vld [vmem:[%s11152_s5 + $0x338] sm:$0xff] }
 0x26d   :  { %11397 = vst [vmem:[#allocation51_spill] sm:$0xff] %v8673_v50  ;;  %2169 = vmatpush.msrb.mxu2 %v8689_v53  ;;  %2153 = vmatpush.msra.mxu3 %v8694_v1 }
 0x26e   :  { %11398 = vst [vmem:[#allocation52_spill] sm:$0xff] %v8680_v15  ;;  %2132 = vmatpush.msra.mxu1 %v8649_v13  ;;  %v1802_v13 = vadd.f32 %v8425_v27, %v8682_v31  ;;  %v8728_v27 = vld [vmem:[%s11152_s5 + $0x3d0] sm:$0xff]  ;;  %v8733_v15 = vld [vmem:[%s11152_s5 + $0x2a8] sm:$0xff] }
 0x26f   :  { %11399 = vst [vmem:[#allocation53_spill] sm:$0xff] %v8689_v53  ;;  %2170 = vmatpush.msrb.mxu2 %v8708_v61  ;;  %2154 = vmatpush.msra.mxu3 %v8722_v48  ;;  %v1814_v53 = vpop.f32.mrf.mxu1 }
 0x270   :  { %11400 = vst [vmem:[#allocation54_spill] sm:$0xff] %v8694_v1  ;;  %2133 = vmatpush.msra.mxu1 %v8673_v50  ;;  %v8740_v1 = vld [vmem:[%s11152_s5 + $0x330] sm:$0xff] }
 0x271   :  { %11401 = vst [vmem:[#allocation55_spill] sm:$0xff] %v8699_v20  ;;  %2171 = vmatpush.msrb.mxu2 %v8728_v27  ;;  %2155 = vmatpush.msra.mxu3 %v8740_v1  ;;  %v8802_v50 = vld [vmem:[%s11152_s5 + $0x290] sm:$0xff] }
 0x272   :  { %11402 = vst [vmem:[#allocation56_spill] sm:$0xff] %v8708_v61  ;;  %2134 = vmatpush.msra.mxu1 %v8699_v20  ;;  %v8748_v20 = vadd.f32 %v1814_v53, %v1802_v13  ;;  %v8753_v61 = vld [vmem:[%s11152_s5 + $0x2a0] sm:$0xff]  ;;  %v8766_v13 = vld [vmem:[%s11152_s5 + $0x328] sm:$0xff] }
 0x273   :  { %11404 = vst [vmem:[#allocation58_spill] sm:$0xff] %v8722_v48  ;;  %v8758_v48 = vld [vmem:[%s11152_s5 + $0x478] sm:$0xff]  ;;  %v8771_v53 = vld [vmem:[%s11152_s5 + $0x3c0] sm:$0xff]  ;;  %2172 = vmatpush.msrb.mxu2 %v8746_v62  ;;  %2156 = vmatpush.msra.mxu3 %v8766_v13 }
 0x274   :  { %11405 = vst [vmem:[#allocation59_spill] sm:$0xff] %v8728_v27  ;;  %2135 = vmatpush.msra.mxu1 %v8715_v5  ;;  %2042 = vmatmul.f32.vlgmr.msra.gmra.mxu0 %v8748_v20  ;;  %v1828_v5 = vadd.f32 %v8507_v19, %v8682_v31  ;;  %v8784_v27 = vld [vmem:[%s11152_s5 + $0x470] sm:$0xff]  ;;  %v8792_v19 = vld [vmem:[%s11152_s5 + $0x320] sm:$0xff]  ;;  %v8820_v59 = vpop.f32.mrf.mxu0 }
 0x275   :  { %11406 = vst [vmem:[#allocation60_spill] sm:$0xff] %v8733_v15  ;;  %2186 = vmatpush.msra.mxu0 %v8758_v48  ;;  %2173 = vmatpush.msrb.mxu2 %v8771_v53 }
 0x276   :  { %11407 = vst [vmem:[#allocation61_spill] sm:$0xff] %v8740_v1  ;;  %2136 = vmatpush.msra.mxu1 %v8733_v15  ;;  %v8779_v1 = vld [vmem:[%s11152_s5 + $0x298] sm:$0xff]  ;;  %2157 = vmatpush.msra.mxu3 %v8792_v19 }
 0x277   :  { %11408 = vst [vmem:[#allocation62_spill] sm:$0xff] %v8746_v62  ;;  %v8797_v15 = vld [vmem:[%s11152_s5 + $0x3b8] sm:$0xff]  ;;  %v8807_v62 = vld [vmem:[%s11152_s5 + $0x468] sm:$0xff]  ;;  %2187 = vmatpush.msra.mxu0 %v8784_v27 }
 0x278   :  { %11409 = vst [vmem:[#allocation63_spill] sm:$0xff] %v8748_v20  ;;  %2137 = vmatpush.msra.mxu1 %v8753_v61  ;;  %2174 = vmatpush.msrb.mxu2 %v8797_v15 }
 0x279   :  { %11410 = vst [vmem:[#allocation64_spill] sm:$0xff] %v8753_v61  ;;  %v1840_v61 = vpop.f32.mrf.mxu3  ;;  %2188 = vmatpush.msra.mxu0 %v8807_v62 }
 0x27a   :  { %11411 = vst [vmem:[#allocation65_spill] sm:$0xff] %v8758_v48  ;;  %2138 = vmatpush.msra.mxu1 %v8779_v1  ;;  %v8816_v48 = vld [vmem:[%s11152_s5 + $0x318] sm:$0xff]  ;;  %v8818_v20 = vadd.f32 %v1840_v61, %v1828_v5  ;;  %v8839_v5 = vld [vmem:[%s11152_s5 + $0x3b0] sm:$0xff] }
 0x27b   :  { %11412 = vst [vmem:[#allocation66_spill] sm:$0xff] %v8766_v13  ;;  %v8825_v13 = vld [vmem:[%s11152_s5 + $0x288] sm:$0xff]  ;;  %v8844_v61 = vld [vmem:[%s11152_s5 + $0x310] sm:$0xff]  ;;  %2158 = vmatpush.msra.mxu3 %v8816_v48  ;;  %2175 = vmatpush.msrb.mxu2 %v8839_v5 }
 0x27c   :  { %11413 = vst [vmem:[#allocation67_spill] sm:$0xff] %v8771_v53  ;;  %v8830_v53 = vld [vmem:[%s11152_s5 + $0x460] sm:$0xff]  ;;  %2139 = vmatpush.msra.mxu1 %v8802_v50 }
 0x27d   :  { %11414 = vst [vmem:[#allocation68_spill] sm:$0xff] %v8779_v1  ;;  %v1816_v1 = vpop.f32.mrf.mxu1  ;;  %2062 = vmatmul.f32.vlgmr.msrb.gmra.mxu1 %v8818_v20  ;;  %2189 = vmatpush.msra.mxu0 %v8830_v53 }
 0x27e   :  { %11415 = vst [vmem:[#allocation69_spill] sm:$0xff] %v8792_v19  ;;  %v8850_v1 = vld [vmem:[%s11152_s5 + $0x280] sm:$0xff]  ;;  %2140 = vmatpush.msra.mxu1 %v8825_v13  ;;  %v8863_v19 = vld [vmem:[%s11152_s5 + $0x3a8] sm:$0xff]  ;;  %2159 = vmatpush.msra.mxu3 %v8844_v61 }
 0x27f   :  { %11416 = vst [vmem:[#allocation70_spill] sm:$0xff] %v8797_v15  ;;  %v8855_v15 = vld [vmem:[%s11152_s5 + $0x458] sm:$0xff]  ;;  %2176 = vmatpush.msrb.mxu2 %v8863_v19 }
 0x280   :  { %11417 = vst [vmem:[#allocation71_spill] sm:$0xff] %v8802_v50  ;;  %v8868_v50 = vld [vmem:[%s11152_s5 + $0x450] sm:$0xff]  ;;  %2141 = vmatpush.msra.mxu1 %v8850_v1  ;;  %2190 = vmatpush.msra.mxu0 %v8855_v15 }
 0x281   :  { %11418 = vst [vmem:[#allocation72_spill] sm:$0xff] %v8816_v48  ;;  %v8875_v48 = vld [vmem:[%s11152_s5 + $0x308] sm:$0xff] }
 0x282   :  { %11419 = vst [vmem:[#allocation73_spill] sm:$0xff] %v8825_v13  ;;  %v8882_v13 = vld [vmem:[%s11152_s5 + $0x3a0] sm:$0xff]  ;;  %2215 = vmatpush.msrb.mxu1 %v8090_v3  ;;  %2191 = vmatpush.msra.mxu0 %v8868_v50  ;;  %v8901_v3 = vld [vmem:[%s11152_s5 + $0x398] sm:$0xff] }
 0x283   :  { %11420 = vst [vmem:[#allocation74_spill] sm:$0xff] %v8839_v5  ;;  %v8894_v5 = vld [vmem:[%s11152_s5 + $0x300] sm:$0xff]  ;;  %2160 = vmatpush.msra.mxu3 %v8875_v48  ;;  %2177 = vmatpush.msrb.mxu2 %v8882_v13 }
 0x284   :  { %11421 = vst [vmem:[#allocation75_spill] sm:$0xff] %v8844_v61  ;;  %v8888_v61 = vld [vmem:[%s11152_s5 + $0x448] sm:$0xff]  ;;  %2216 = vmatpush.msrb.mxu1 %v8096_v8  ;;  %v8921_v8 = vld [vmem:[%s11152_s5 + $0x438] sm:$0xff] }
 0x285   :  { %11422 = vst [vmem:[#allocation76_spill] sm:$0xff] %v8850_v1  ;;  %v1842_v1 = vpop.f32.mrf.mxu3  ;;  %2192 = vmatpush.msra.mxu0 %v8888_v61  ;;  %2161 = vmatpush.msra.mxu3 %v8894_v5 }
 0x286   :  { %11423 = vst [vmem:[#allocation77_spill] sm:$0xff] %v8855_v15  ;;  %v1894_v15 = vpop.f32.mrf.mxu0  ;;  %v8915_v1 = vld [vmem:[%s11152_s5 + $0x390] sm:$0xff]  ;;  %2217 = vmatpush.msrb.mxu1 %v8103_v11  ;;  %2178 = vmatpush.msrb.mxu2 %v8901_v3 }
 0x287   :  { %11424 = vst [vmem:[#allocation78_spill] sm:$0xff] %v8863_v19  ;;  %v8907_v19 = vld [vmem:[%s11152_s5 + $0x440] sm:$0xff]  ;;  %v8928_v15 = vld [vmem:[%s11152_s5 + $0x388] sm:$0xff]  ;;  %v8934_v11 = vld [vmem:[%s11152_s5 + $0x430] sm:$0xff] }
 0x288   :  { %11425 = vst [vmem:[#allocation79_spill] sm:$0xff] %v8882_v13  ;;  %2193 = vmatpush.msra.mxu0 %v8907_v19  ;;  %2218 = vmatpush.msrb.mxu1 %v8109_v43  ;;  %v8947_v43 = vld [vmem:[%s11152_s5 + $0x428] sm:$0xff] }
 0x289   :  { %11426 = vst [vmem:[#allocation80_spill] sm:$0xff] %v8894_v5  ;;  %v1905_v5 = vpop.f32.mrf.mxu2  ;;  %2179 = vmatpush.msrb.mxu2 %v8915_v1 }
 0x28a   :  { %11427 = vst [vmem:[#allocation81_spill] sm:$0xff] %v8901_v3  ;;  %2194 = vmatpush.msra.mxu0 %v8921_v8  ;;  %v8941_v3 = vld [vmem:[%s11152_s5 + $0x380] sm:$0xff]  ;;  %2219 = vmatpush.msrb.mxu1 %v8115_v44  ;;  %v8963_v44 = vld [vmem:[%s11152_s5 + $0x418] sm:$0xff] }
 0x28b   :  { %11428 = vst [vmem:[#allocation82_spill] sm:$0xff] %v8915_v1  ;;  %2180 = vmatpush.msrb.mxu2 %v8928_v15  ;;  %v8955_v1 = vld [vmem:[%s11152_s5 + $0x420] sm:$0xff] }
 0x28c   :  { %11429 = vst [vmem:[#allocation83_spill] sm:$0xff] %v8928_v15  ;;  %2195 = vmatpush.msra.mxu0 %v8934_v11  ;;  %2220 = vmatpush.msrb.mxu1 %v8121_v16  ;;  %v8970_v15 = vld [vmem:[%s11152_s5 + $0x410] sm:$0xff] }
 0x28d   :  { %11430 = vst [vmem:[#allocation84_spill] sm:$0xff] %v8941_v3  ;;  %v1866_v13 = vpop.f32.mrf.mxu3  ;;  %2181 = vmatpush.msrb.mxu2 %v8941_v3 }
 0x28e   :  { %11431 = vst [vmem:[#allocation85_spill] sm:$0xff] %v8955_v1  ;;  %2196 = vmatpush.msra.mxu0 %v8947_v43  ;;  %2221 = vmatpush.msrb.mxu1 %v8128_v57  ;;  %v1853_v3 = vpop.f32.mrf.mxu1  ;;  %v8977_v57 = vld [vmem:[%s11152_s5 + $0x408] sm:$0xff] }
 0x28f   :  { %11432 = vst [vmem:[#allocation86_spill] sm:$0xff] %v8963_v44 }
 0x290   :  { %2197 = vmatpush.msra.mxu0 %v8955_v1  ;;  %2222 = vmatpush.msrb.mxu1 %v8135_v6  ;;  %v1854_v1 = vadd.f32 %v1853_v3, %v8682_v31 }
 0x291   :  { %v1907_v16 = vpop.f32.mrf.mxu2 }
 0x292   :  { %2198 = vmatpush.msra.mxu0 %v8963_v44  ;;  %2223 = vmatpush.msrb.mxu1 %v8152_v10  ;;  %v8985_v16 = vld [vmem:[%s11152_s5 + $0x400] sm:$0xff]  ;;  %v8987_v44 = vadd.f32 %v1866_v13, %v1854_v1  ;;  %v11453_v1 = vld [vmem:[#allocation27_spill] sm:$0xff] }
 0x294   :  { %2199 = vmatpush.msra.mxu0 %v8970_v15  ;;  %2224 = vmatpush.msrb.mxu1 %v8171_v51  ;;  %v1931_v10 = vpop.f32.mrf.mxu0 }
 0x295   :  { %v1868_v6 = vpop.f32.mrf.mxu3  ;;  %2082 = vmatmul.f32.vlgmr.msrb.gmra.mxu3 %v8987_v44 }
 0x296   :  { %2200 = vmatpush.msra.mxu0 %v8977_v57  ;;  %2225 = vmatpush.msrb.mxu1 %v8188_v18  ;;  %v1855_v51 = vpop.f32.mrf.mxu1 }
 0x297   :  { %2235 = vmatpush.msrb.mxu3 %v8224_v55  ;;  %v11455_v51 = vld [vmem:[#allocation19_spill] sm:$0xff] }
 0x298   :  { %2201 = vmatpush.msra.mxu0 %v8985_v16  ;;  %2226 = vmatpush.msrb.mxu1 %v8206_v7 }
 0x299   :  { %2236 = vmatpush.msrb.mxu3 %v8254_v60  ;;  %v8999_v13 = vpop.f32.mrf.mxu2 }
 0x29a   :  { %2227 = vmatpush.msrb.mxu1 %v8229_v23  ;;  %v1906_v23 = vadd.f32 %v1905_v5, %v8682_v31  ;;  %v11452_v5 = vld [vmem:[#allocation29_spill] sm:$0xff] }
 0x29b   :  { %2237 = vmatpush.msrb.mxu3 %v8278_v25 }
 0x29c   :  { %2228 = vmatpush.msrb.mxu1 %v8247_v32  ;;  %v1933_v7 = vpop.f32.mrf.mxu0 }
 0x29d   :  { %v1879_v18 = vpop.f32.mrf.mxu3  ;;  %2238 = vmatpush.msrb.mxu3 %v8296_v17 }
 0x29e   :  { %2229 = vmatpush.msrb.mxu1 %v8266_v22  ;;  %v1880_v55 = vadd.f32 %v1879_v18, %v8682_v31  ;;  %v1918_v32 = vpop.f32.mrf.mxu1 }
 0x29f   :  { %2239 = vmatpush.msrb.mxu3 %v8321_v24  ;;  %v9011_v25 = vadd.f32 %v1918_v32, %v1906_v23  ;;  %v11442_v24 = vld [vmem:[#allocation8_spill] sm:$0xff]  ;;  %v11459_v32 = vld [vmem:[#allocation37_spill] sm:$0xff] }
 0x2a0   :  { %2230 = vmatpush.msrb.mxu1 %v8286_v26  ;;  %v9008_v60 = vadd.f32 %v8820_v59, %v1880_v55  ;;  %v11457_v55 = vld [vmem:[#allocation30_spill] sm:$0xff]  ;;  %v11458_v23 = vld [vmem:[#allocation24_spill] sm:$0xff] }
 0x2a1   :  { %2240 = vmatpush.msrb.mxu3 %v8340_v46  ;;  %2122 = vmatmul.f32.vlgmr.msrb.gmra.mxu0 %v9011_v25  ;;  %v1972_v22 = vpop.f32.mrf.mxu2 }
 0x2a2   :  { %2102 = vmatmul.f32.vlgmr.msra.gmra.mxu2 %v9008_v60  ;;  %2275 = vmatpush.msrb.mxu0 %v8145_v40  ;;  %v11460_v22 = vld [vmem:[#allocation35_spill] sm:$0xff] }
 0x2a3   :  { %2255 = vmatpush.msra.mxu2 %v8140_v56  ;;  %2241 = vmatpush.msrb.mxu3 %v8359_v45  ;;  %v11444_v45 = vld [vmem:[#allocation20_spill] sm:$0xff] }
 0x2a4   :  { %v1996_v17 = vpop.f32.mrf.mxu0  ;;  %2276 = vmatpush.msrb.mxu0 %v8165_v49 }
 0x2a5   :  { %v1881_v26 = vpop.f32.mrf.mxu3  ;;  %2256 = vmatpush.msra.mxu2 %v8157_v28  ;;  %2242 = vmatpush.msrb.mxu3 %v8377_v52  ;;  %v1932_v28 = vadd.f32 %v1931_v10, %v8682_v31  ;;  %v11445_v52 = vld [vmem:[#allocation10_spill] sm:$0xff] }
 0x2a6   :  { %v1920_v56 = vpop.f32.mrf.mxu1  ;;  %2277 = vmatpush.msrb.mxu0 %v8183_v54  ;;  %v11433_v54 = vld [vmem:[#allocation21_spill] sm:$0xff]  ;;  %v11454_v10 = vld [vmem:[#allocation22_spill] sm:$0xff]  ;;  %v2207_v26 = vmul.f32 %v8818_v20, %v8818_v20 }
 0x2a7   :  { %2257 = vmatpush.msra.mxu2 %v8176_v14  ;;  %2243 = vmatpush.msrb.mxu3 %v8390_v58  ;;  %v11446_v58 = vld [vmem:[#allocation15_spill] sm:$0xff]  ;;  %v11461_v56 = vld [vmem:[#allocation28_spill] sm:$0xff] }
 0x2a8   :  { %2278 = vmatpush.msrb.mxu0 %v8201_v39  ;;  %v11435_v39 = vld [vmem:[#allocation5_spill] sm:$0xff] }
 0x2a9   :  { %2258 = vmatpush.msra.mxu2 %v8193_v36  ;;  %2244 = vmatpush.msrb.mxu3 %v8398_v30  ;;  %v11434_v36 = vld [vmem:[#allocation11_spill] sm:$0xff]  ;;  %v11447_v30 = vld [vmem:[#allocation25_spill] sm:$0xff] }
 0x2aa   :  { %2279 = vmatpush.msrb.mxu0 %v8219_v35  ;;  %v11437_v35 = vld [vmem:[#allocation14_spill] sm:$0xff] }
 0x2ab   :  { %2259 = vmatpush.msra.mxu2 %v8211_v33  ;;  %2245 = vmatpush.msrb.mxu3 %v8404_v4  ;;  %v11436_v33 = vld [vmem:[#allocation7_spill] sm:$0xff]  ;;  %v11448_v4 = vld [vmem:[#allocation13_spill] sm:$0xff] }
 0x2ac   :  { %v1998_v40 = vpop.f32.mrf.mxu0  ;;  %2280 = vmatpush.msrb.mxu0 %v8242_v63 }
 0x2ad   :  { %2260 = vmatpush.msra.mxu2 %v8237_v37  ;;  %2246 = vmatpush.msrb.mxu3 %v8416_v12  ;;  %v11438_v37 = vld [vmem:[#allocation6_spill] sm:$0xff]  ;;  %v11449_v12 = vld [vmem:[#allocation23_spill] sm:$0xff] }
 0x2ae   :  { %v1944_v49 = vpop.f32.mrf.mxu1  ;;  %2281 = vmatpush.msrb.mxu0 %v8272_v0  ;;  %v11462_v40 = vld [vmem:[#allocation26_spill] sm:$0xff] }
 0x2af   :  { %2261 = vmatpush.msra.mxu2 %v8260_v29  ;;  %2247 = vmatpush.msrb.mxu3 %v8422_v47  ;;  %v9038_v14 = vadd.f32 %v1944_v49, %v1932_v28  ;;  %v11439_v29 = vld [vmem:[#allocation9_spill] sm:$0xff]  ;;  %v11450_v47 = vld [vmem:[#allocation18_spill] sm:$0xff]  ;;  %v11463_v28 = vld [vmem:[#allocation39_spill] sm:$0xff] }
 0x2b0   :  { %2282 = vmatpush.msrb.mxu0 %v8316_v21  ;;  %v11464_v49 = vld [vmem:[#allocation32_spill] sm:$0xff] }
 0x2b1   :  { %2262 = vmatpush.msra.mxu2 %v8291_v9  ;;  %2248 = vmatpush.msrb.mxu3 %v8430_v2  ;;  %v11440_v9 = vld [vmem:[#allocation63_spill] sm:$0xff]  ;;  %v11451_v2 = vld [vmem:[#allocation16_spill] sm:$0xff] }
 0x2b2   :  { %2142 = vmatmul.f32.vlgmr.msra.gmra.mxu1 %v9038_v14  ;;  %2283 = vmatpush.msrb.mxu0 %v11434_v36  ;;  %v11465_v36 = vld [vmem:[#allocation31_spill] sm:$0xff] }
 0x2b3   :  { %2263 = vmatpush.msra.mxu2 %v8311_v41  ;;  %2249 = vmatpush.msrb.mxu3 %v8462_v38  ;;  %v11441_v41 = vld [vmem:[#allocation17_spill] sm:$0xff] }
 0x2b4   :  { %2295 = vmatpush.msra.mxu1 %v8302_v42  ;;  %2284 = vmatpush.msrb.mxu0 %v11437_v35  ;;  %v2206_v42 = vmul.f32 %v11440_v9, %v11440_v9 }
 0x2b5   :  { %2264 = vmatpush.msra.mxu2 %v8335_v34  ;;  %2250 = vmatpush.msrb.mxu3 %v11433_v54  ;;  %v11443_v34 = vld [vmem:[#allocation12_spill] sm:$0xff] }
 0x2b6   :  { %2296 = vmatpush.msra.mxu1 %v11435_v39  ;;  %v1946_v63 = vpop.f32.mrf.mxu1  ;;  %2285 = vmatpush.msrb.mxu0 %v11441_v41  ;;  %v11472_v41 = vld [vmem:[#allocation51_spill] sm:$0xff] }
 0x2b7   :  { %2265 = vmatpush.msra.mxu2 %v11436_v33  ;;  %v2009_v46 = vpop.f32.mrf.mxu2  ;;  %v11466_v33 = vld [vmem:[#allocation43_spill] sm:$0xff]  ;;  %v11468_v63 = vld [vmem:[#allocation34_spill] sm:$0xff] }
 0x2b8   :  { %2297 = vmatpush.msra.mxu1 %v11438_v37  ;;  %2286 = vmatpush.msrb.mxu0 %v11444_v45  ;;  %v11467_v37 = vld [vmem:[#allocation36_spill] sm:$0xff]  ;;  %v11477_v45 = vld [vmem:[#allocation45_spill] sm:$0xff] }
 0x2b9   :  { %2266 = vmatpush.msra.mxu2 %v11439_v29  ;;  %v11469_v29 = vld [vmem:[#allocation47_spill] sm:$0xff] }
 0x2ba   :  { %v1957_v0 = vpop.f32.mrf.mxu3  ;;  %2298 = vmatpush.msra.mxu1 %v11442_v24  ;;  %2287 = vmatpush.msrb.mxu0 %v11447_v30  ;;  %v11474_v24 = vld [vmem:[#allocation44_spill] sm:$0xff]  ;;  %v2210_v30 = vmul.f32 %v9011_v25, %v9011_v25 }
 0x2bb   :  { %v1958_v21 = vadd.f32 %v1957_v0, %v8682_v31  ;;  %2267 = vmatpush.msra.mxu2 %v11443_v34  ;;  %2231 = vmatmul.f32.vlgmr.msrb.gmra.mxu1 %v2206_v42  ;;  %v11470_v0 = vld [vmem:[#allocation40_spill] sm:$0xff]  ;;  %v11471_v42 = vld [vmem:[#allocation38_spill] sm:$0xff] }
 0x2bc   :  { %2299 = vmatpush.msra.mxu1 %v11445_v52  ;;  %2288 = vmatpush.msrb.mxu0 %v11452_v5  ;;  %v11475_v34 = vld [vmem:[#allocation42_spill] sm:$0xff]  ;;  %v11478_v52 = vld [vmem:[#allocation48_spill] sm:$0xff] }
 0x2bd   :  { %v9062_v59 = vadd.f32 %v8999_v13, %v1958_v21  ;;  %2268 = vmatpush.msra.mxu2 %v11446_v58  ;;  %v11456_v13 = vld [vmem:[#allocation33_spill] sm:$0xff]  ;;  %v11484_v5 = vld [vmem:[#allocation60_spill] sm:$0xff] }
 0x2be   :  { %2300 = vmatpush.msra.mxu1 %v11448_v4  ;;  %v1983_v38 = vpop.f32.mrf.mxu1  ;;  %2289 = vmatpush.msrb.mxu0 %v11456_v13  ;;  %v11473_v21 = vld [vmem:[#allocation41_spill] sm:$0xff]  ;;  %v11479_v4 = vld [vmem:[#allocation46_spill] sm:$0xff]  ;;  %v11489_v13 = vld [vmem:[#allocation56_spill] sm:$0xff] }
 0x2bf   :  { %2162 = vmatmul.f32.vlgmr.msra.gmra.mxu3 %v9062_v59  ;;  %2269 = vmatpush.msra.mxu2 %v11450_v47  ;;  %v1984_v3 = vadd.f32 %v1983_v38, %v8682_v31  ;;  %v2011_v7 = vpop.f32.mrf.mxu2  ;;  %v11481_v47 = vld [vmem:[#allocation49_spill] sm:$0xff]  ;;  %v11483_v38 = vld [vmem:[#allocation50_spill] sm:$0xff] }
 0x2c0   :  { %2315 = vmatpush.msra.mxu3 %v11449_v12  ;;  %2301 = vmatpush.msra.mxu1 %v11451_v2  ;;  %v11480_v12 = vld [vmem:[#allocation57_spill] sm:$0xff]  ;;  %v11482_v2 = vld [vmem:[#allocation52_spill] sm:$0xff] }
 0x2c1   :  { %2270 = vmatpush.msra.mxu2 %v11454_v10  ;;  %v9078_v18 = vadd.f32 %v1996_v17, %v1984_v3  ;;  %2290 = vmatpush.msrb.mxu0 %v11459_v32  ;;  %v2010_v17 = vadd.f32 %v2009_v46, %v8682_v31  ;;  %v2208_v31 = vmul.f32 %v8987_v44, %v8987_v44  ;;  %v11476_v46 = vld [vmem:[#allocation55_spill] sm:$0xff]  ;;  %v11485_v3 = vld [vmem:[#allocation53_spill] sm:$0xff]  ;;  %v11487_v10 = vld [vmem:[#allocation54_spill] sm:$0xff] }
 0x2c2   :  { %2316 = vmatpush.msra.mxu3 %v11453_v1  ;;  %v1959_v6 = vpop.f32.mrf.mxu3  ;;  %2302 = vmatpush.msra.mxu1 %v11455_v51  ;;  %v2209_v1 = vmul.f32 %v9008_v60, %v9008_v60  ;;  %v11488_v51 = vld [vmem:[#allocation64_spill] sm:$0xff]  ;;  %v11493_v32 = vld [vmem:[#allocation61_spill] sm:$0xff] }
 0x2c3   :  { %2182 = vmatmul.f32.vlgmr.msrb.gmra.mxu2 %v9078_v18  ;;  %v11486_v6 = vld [vmem:[#allocation65_spill] sm:$0xff]  ;;  %v11491_v7 = vld [vmem:[#allocation68_spill] sm:$0xff] }
 0x2c4   :  { %2317 = vmatpush.msra.mxu3 %v11457_v55  ;;  %2303 = vmatpush.msra.mxu1 %v11458_v23  ;;  %v11490_v55 = vld [vmem:[#allocation58_spill] sm:$0xff]  ;;  %v11492_v23 = vld [vmem:[#allocation59_spill] sm:$0xff] }
 0x2c5   :  { %2335 = vmatpush.msrb.mxu2 %v11462_v40  ;;  %v11497_v40 = vld [vmem:[#allocation73_spill] sm:$0xff] }
 0x2c6   :  { %2318 = vmatpush.msra.mxu3 %v11460_v22  ;;  %2304 = vmatpush.msra.mxu1 %v11461_v56  ;;  %v1985_v54 = vpop.f32.mrf.mxu1  ;;  %v11494_v22 = vld [vmem:[#allocation71_spill] sm:$0xff]  ;;  %v11496_v56 = vld [vmem:[#allocation66_spill] sm:$0xff] }
 0x2c7   :  { %2251 = vmatmul.f32.vlgmr.msrb.gmra.mxu3 %v2207_v26  ;;  %2336 = vmatpush.msrb.mxu2 %v11465_v36  ;;  %v11495_v26 = vld [vmem:[#allocation62_spill] sm:$0xff] }
 0x2c8   :  { %2319 = vmatpush.msra.mxu3 %v11463_v28  ;;  %2305 = vmatpush.msra.mxu1 %v11464_v49  ;;  %v2211_v28 = vmul.f32 %v9038_v14, %v9038_v14  ;;  %v11501_v49 = vld [vmem:[#allocation76_spill] sm:$0xff]  ;;  %v11502_v54 = vld [vmem:[#allocation70_spill] sm:$0xff] }
 0x2c9   :  { %2337 = vmatpush.msrb.mxu2 %v11468_v63  ;;  %v11504_v36 = vld [vmem:[#allocation74_spill] sm:$0xff]  ;;  %v11508_v63 = vld [vmem:[#allocation80_spill] sm:$0xff] }
 0x2ca   :  { %v2022_v39 = vpop.f32.mrf.mxu3  ;;  %2320 = vmatpush.msra.mxu3 %v11466_v33  ;;  %2306 = vmatpush.msra.mxu1 %v11467_v37  ;;  %v11506_v33 = vld [vmem:[#allocation78_spill] sm:$0xff]  ;;  %v11507_v37 = vld [vmem:[#allocation79_spill] sm:$0xff] }
 0x2cb   :  { %v9094_v35 = vadd.f32 %v2022_v39, %v2010_v17  ;;  %2338 = vmatpush.msrb.mxu2 %v11471_v42  ;;  %v11499_v17 = vld [vmem:[#allocation77_spill] sm:$0xff]  ;;  %v11505_v39 = vld [vmem:[#allocation75_spill] sm:$0xff] }
 0x2cc   :  { %2321 = vmatpush.msra.mxu3 %v11469_v29  ;;  %2307 = vmatpush.msra.mxu1 %v11470_v0  ;;  %v11509_v29 = vld [vmem:[#allocation81_spill] sm:$0xff]  ;;  %v11513_v0 = vld [vmem:[#allocation84_spill] sm:$0xff] }
 0x2cd   :  { %2202 = vmatmul.f32.vlgmr.msra.gmra.mxu0 %v9094_v35  ;;  %2271 = vmatmul.f32.vlgmr.msra.gmra.mxu2 %v2208_v31  ;;  %v11514_v31 = vld [vmem:[#allocation86_spill] sm:$0xff] }
 0x2ce   :  { %2322 = vmatpush.msra.mxu3 %v11472_v41  ;;  %2355 = vmatpush.msra.mxu0 %v11473_v21 }
 0x2cf   :  { %2308 = vmatpush.msra.mxu1 %v11474_v24  ;;  %2339 = vmatpush.msrb.mxu2 %v11475_v34 }
 0x2d0   :  { %2323 = vmatpush.msra.mxu3 %v11476_v46  ;;  %2356 = vmatpush.msra.mxu0 %v11477_v45 }
 0x2d1   :  { %2309 = vmatpush.msra.mxu1 %v11478_v52  ;;  %2340 = vmatpush.msrb.mxu2 %v11479_v4 }
 0x2d2   :  { %v2024_v58 = vpop.f32.mrf.mxu3  ;;  %2324 = vmatpush.msra.mxu3 %v11480_v12  ;;  %2357 = vmatpush.msra.mxu0 %v11481_v47 }
 0x2d3   :  { %2310 = vmatpush.msra.mxu1 %v11482_v2  ;;  %2341 = vmatpush.msrb.mxu2 %v11483_v38 }
 0x2d4   :  { %2311 = vmatmul.f32.vlgmr.msra.gmra.mxu1 %v2210_v30  ;;  %2325 = vmatpush.msra.mxu3 %v11484_v5 }
 0x2d5   :  { %2358 = vmatpush.msra.mxu0 %v11485_v3  ;;  %2375 = vmatpush.msrb.mxu1 %v11486_v6 }
 0x2d6   :  { %2342 = vmatpush.msrb.mxu2 %v11487_v10  ;;  %2291 = vmatmul.f32.vlgmr.msrb.gmra.mxu0 %v2209_v1 }
 0x2d7   :  { %2326 = vmatpush.msra.mxu3 %v11488_v51  ;;  %2359 = vmatpush.msra.mxu0 %v11489_v13 }
 0x2d8   :  { %2376 = vmatpush.msrb.mxu1 %v8784_v27  ;;  %2343 = vmatpush.msrb.mxu2 %v11490_v55  ;;  %v11498_v27 = vld [vmem:[#allocation67_spill] sm:$0xff] }
 0x2d9   :  { %2327 = vmatpush.msra.mxu3 %v11491_v7  ;;  %2360 = vmatpush.msra.mxu0 %v11492_v23 }
 0x2da   :  { %2377 = vmatpush.msrb.mxu1 %v8807_v62  ;;  %2344 = vmatpush.msrb.mxu2 %v11493_v32  ;;  %v11500_v62 = vld [vmem:[#allocation69_spill] sm:$0xff] }
 0x2db   :  { %2328 = vmatpush.msra.mxu3 %v11494_v22  ;;  %2361 = vmatpush.msra.mxu0 %v11495_v26 }
 0x2dc   :  { %2378 = vmatpush.msrb.mxu1 %v8830_v53  ;;  %2345 = vmatpush.msrb.mxu2 %v11496_v56  ;;  %v11503_v53 = vld [vmem:[#allocation72_spill] sm:$0xff] }
 0x2dd   :  { %2329 = vmatpush.msra.mxu3 %v11497_v40  ;;  %2362 = vmatpush.msra.mxu0 %v11498_v27 }
 0x2de   :  { %2379 = vmatpush.msrb.mxu1 %v11499_v17  ;;  %2346 = vmatpush.msrb.mxu2 %v11500_v62  ;;  %v219_v17 = vld [vmem:[%s11153_s4] sm:$0xff]  ;;  %v7278_v62 = vmov 1  }
 0x2df   :  { %2330 = vmatpush.msra.mxu3 %v11501_v49  ;;  %2363 = vmatpush.msra.mxu0 %v11502_v54  ;;  %v7092_v49 = vld [vmem:[%s11151_s3] sm:$0xff] }
 0x2e0   :  { %2380 = vmatpush.msrb.mxu1 %v8868_v50  ;;  %2331 = vmatmul.f32.vlgmr.msra.gmra.mxu3 %v2211_v28  ;;  %v2212_v50 = vmul.f32 %v9062_v59, %v9062_v59 }
 0x2e1   :  { %2347 = vmatpush.msrb.mxu2 %v11503_v53  ;;  %2364 = vmatpush.msra.mxu0 %v11504_v36  ;;  %v7279_v36 = vmov 2  }
 0x2e2   :  { %2381 = vmatpush.msrb.mxu1 %v8888_v61  ;;  %v11510_v61 = vld [vmem:[#allocation82_spill] sm:$0xff]  ;;  %7047 = vset.pattern.permute.xlu1 %v7278_v62 }
 0x2e3   :  { %2348 = vmatpush.msrb.mxu2 %v11505_v39  ;;  %2365 = vmatpush.msra.mxu0 %v11506_v33  ;;  %v9189_v39 = vld [vmem:[%s11154_s6] sm:$0xff]  ;;  %v9194_v33 = vld [vmem:[%s11154_s6 + $0x8] sm:$0xff] }
 0x2e4   :  { %2382 = vmatpush.msrb.mxu1 %v8907_v19  ;;  %v11511_v19 = vld [vmem:[#allocation83_spill] sm:$0xff]  ;;  %2443 = vperm.xlu1 %7047, %v7092_v49   ;;  %11515 = vst [vmem:[#allocation21_spill] sm:$0xff] %v9189_v39 }
 0x2e5   :  { %2349 = vmatpush.msrb.mxu2 %v8875_v48  ;;  %2366 = vmatpush.msra.mxu0 %v11507_v37  ;;  %v11512_v48 = vld [vmem:[#allocation85_spill] sm:$0xff]  ;;  %11516 = vst [vmem:[#allocation11_spill] sm:$0xff] %v9194_v33  ;;  %v9199_v37 = vld [vmem:[%s11154_s6 + $0x10] sm:$0xff] }
 0x2e6   :  { %2383 = vmatpush.msrb.mxu1 %v8921_v8  ;;  %v2213_v8 = vmul.f32 %v9078_v18, %v9078_v18  ;;  %7048 = vset.pattern.permute.xlu0 %v7279_v36  ;;  %11517 = vst [vmem:[#allocation5_spill] sm:$0xff] %v9199_v37 }
 0x2e7   :  { %2350 = vmatpush.msrb.mxu2 %v11508_v63  ;;  %2367 = vmatpush.msra.mxu0 %v11509_v29  ;;  %2466 = vst [vmem:[#allocation1 + $0x20] ss:$2 sm:$0xff] %v9199_v37 }
 0x2e8   :  { %2351 = vmatmul.f32.vlgmr.msrb.gmra.mxu2 %v2212_v50  ;;  %2384 = vmatpush.msrb.mxu1 %v8934_v11  ;;  %v2214_v11 = vmul.f32 %v9094_v35, %v9094_v35  ;;  %v9205_v50 = vld [vmem:[%s11154_s6 + $0x18] sm:$0xff]  ;;  %2462 = vst [vmem:[#allocation1] ss:$2 sm:$0xff] %v9189_v39 }
 0x2e9   :  { %2368 = vmatpush.msra.mxu0 %v11510_v61  ;;  %11518 = vst [vmem:[#allocation7_spill] sm:$0xff] %v9205_v50 }
 0x2ea   :  { %2385 = vmatpush.msrb.mxu1 %v8947_v43  ;;  %2464 = vst [vmem:[#allocation1 + $0x10] ss:$2 sm:$0xff] %v9194_v33 }
 0x2eb   :  { %2369 = vmatpush.msra.mxu0 %v11511_v19  ;;  %2468 = vst [vmem:[#allocation1 + $0x30] ss:$2 sm:$0xff] %v9205_v50 }
 0x2ec   :  { %2386 = vmatpush.msrb.mxu1 %v11512_v48 }
 0x2ed   :  { %2370 = vmatpush.msra.mxu0 %v11513_v0 }
 0x2ee   :  { %2387 = vmatpush.msrb.mxu1 %v11514_v31  ;;  %2371 = vmatmul.f32.vlgmr.msra.gmra.mxu0 %v2213_v8  ;;  %v2474_v61 = vld.sshfl [vmem:[#allocation1 + $0x28] sm:$0xff pattern:$0x75316420] }
 0x2ef   :  { %6251 = vmatpush.msk.msrb.mxu0 %vm2481_vm13, %v2474_v61 }
 0x2f0   :  { %2388 = vmatpush.msrb.mxu1 %v8970_v15 }
 0x2f1   :  { %v2043_v43 = vpop.f32.mrf.mxu0 }
 0x2f2   :  { %2389 = vmatpush.msrb.mxu1 %v8977_v57  ;;  %v2476_v48 = vld.sshfl [vmem:[#allocation1 + $0x38] sm:$0xff pattern:$0x75316420] }
 0x2f4   :  { %2390 = vmatpush.msrb.mxu1 %v8985_v16 }
 0x2f5   :  { %2391 = vmatmul.f32.vlgmr.msrb.gmra.mxu1 %v2214_v11 }
 0x2f6   :  { %6255 = vmatpush.msk.msra.mxu1 %vm2481_vm13, %v2476_v48 }
 0x2fa   :  { %v2063_v41 = vpop.f32.mrf.mxu1 }
 0x2fb   :  { %v2064_v55 = vadd.f32 %v2063_v41, %v2043_v43 }
 0x318   :  { %v2083_v42 = vpop.f32.mrf.mxu3 }
 0x319   :  { %v2084_v7 = vadd.f32 %v2083_v42, %v2064_v55 }
 0x31e   :  { %v2123_v24 = vpop.f32.mrf.mxu0 }
 0x325   :  { %v2103_v21 = vpop.f32.mrf.mxu2 }
 0x326   :  { %v2104_v23 = vadd.f32 %v2103_v21, %v2084_v7 }
 0x328   :  { %v2124_v32 = vadd.f32 %v2123_v24, %v2104_v23 }
 0x32f   :  { %v2143_v46 = vpop.f32.mrf.mxu1 }
 0x330   :  { %v2144_v22 = vadd.f32 %v2143_v46, %v2124_v32  ;;  %v2469_v46 = vld.sshfl [vmem:[#allocation1] sm:$0xff pattern:$0x75316420] }
 0x338   :  { %v2232_v30 = vpop.f32.mrf.mxu1 }
 0x342   :  { %v2163_v34 = vpop.f32.mrf.mxu3 }
 0x343   :  { %v2164_v26 = vadd.f32 %v2163_v34, %v2144_v22  ;;  %v9217_v34 = vld [vmem:[%s11154_s6 + $0x20] sm:$0xf]  ;;  %s7280_s6 = smov 19  }
 0x344   :  { %11519 = vst [vmem:[#allocation14_spill] sm:$0xff] %v9217_v34 }
 0x346   :  { %v2183_v45 = vpop.f32.mrf.mxu2 }
 0x347   :  { %v2184_v56 = vadd.f32 %v2183_v45, %v2164_v26  ;;  %v2470_v45 = vld.sshfl [vmem:[#allocation1 + $0x8] sm:$0xff pattern:$0x75316420] }
 0x348   :  { %2477 = vst [vmem:[#allocation1] ss:$2 sm:$0xff] %v9217_v34  ;;  %6243 = vmatpush.msk.msra.mxu2 %vm2481_vm13, %v2470_v45 }
 0x34a   :  { %v2203_v52 = vpop.f32.mrf.mxu0  ;;  %v2252_v58 = vpop.f32.mrf.mxu3 }
 0x34b   :  { %v2253_v4 = vadd.f32 %v2252_v58, %v2232_v30  ;;  %v2204_v40 = vadd.f32 %v2203_v52, %v2184_v56  ;;  %v2471_v58 = vld.sshfl [vmem:[#allocation1 + $0x10] sm:$0xff pattern:$0x75316420]  ;;  %v2472_v30 = vld.sshfl [vmem:[#allocation1 + $0x18] sm:$0xff pattern:$0x75316420] }
 0x34c   :  { %6247 = vmatpush.msk.msrb.mxu2 %vm2481_vm13, %v2472_v30  ;;  %2682 = vst [vmem:[#allocation1 + $0x10] ss:$2 sm:$0xff] %v9194_v33 }
 0x34f   :  { %v2478_v52 = vld.sshfl [vmem:[#allocation1] sm:$0xff pattern:$0x75316420] }
 0x350   :  { %v2272_v15 = vpop.f32.mrf.mxu2  ;;  %2680 = vst [vmem:[#allocation1] ss:$2 sm:$0xff] %v9189_v39 }
 0x351   :  { %v2273_v57 = vadd.f32 %v2272_v15, %v2253_v4  ;;  %v2312_v2 = vpop.f32.mrf.mxu1  ;;  %v2473_v4 = vld.sshfl [vmem:[#allocation1 + $0x20] sm:$0xff pattern:$0x75316420] }
 0x352   :  { %2684 = vst [vmem:[#allocation1 + $0x20] ss:$2 sm:$0xff] %v9199_v37 }
 0x353   :  { %v2292_v12 = vpop.f32.mrf.mxu0 }
 0x354   :  { %v2293_v47 = vadd.f32 %v2292_v12, %v2273_v57  ;;  %v2475_v57 = vld.sshfl [vmem:[#allocation1 + $0x30] sm:$0xff pattern:$0x75316420] }
 0x355   :  { %v2689_v12 = vld.sshfl [vmem:[#allocation1 + $0x10] sm:$0xff pattern:$0x75316420]  ;;  %2686 = vst [vmem:[#allocation1 + $0x30] ss:$2 sm:$0xff] %v9205_v50 }
 0x356   :  { %v2313_v16 = vadd.f32 %v2312_v2, %v2293_v47  ;;  %v2444_v42 = vpop.permute.xlu1 %2443  ;;  %6263 = vmatpush.msk.msrb.mxu1 %vm2481_vm13, %v2689_v12 }
 0x357   :  { %v2687_v15 = vld.sshfl [vmem:[#allocation1] sm:$0xff pattern:$0x75316420]  ;;  %v2688_v47 = vld.sshfl [vmem:[#allocation1 + $0x8] sm:$0xff pattern:$0x75316420] }
 0x358   :  { %6259 = vmatpush.msk.msra.mxu0 %vm2481_vm13, %v2687_v15  ;;  %2695 = vst [vmem:[#allocation1] ss:$2 sm:$0xff] %v9217_v34  ;;  %v10320_v34 = vld [vmem:[%s11152_s5 + $0x80] sm:$0xff] }
 0x35f   :  { %v2696_v2 = vld.sshfl [vmem:[#allocation1] sm:$0xff pattern:$0x75316420] }
 0x360   :  { %5288 = vst [vmem:[#allocation1] ss:$2 sm:$0xff] %v9189_v39  ;;  %v10314_v39 = vld [vmem:[%s11152_s5 + $0x108] sm:$0xff] }
 0x363   :  { %v2332_v38 = vpop.f32.mrf.mxu3 }
 0x364   :  { %v2333_v3 = vadd.f32 %v2332_v38, %v2313_v16  ;;  %v2691_v38 = vld.sshfl [vmem:[#allocation1 + $0x20] sm:$0xff pattern:$0x75316420]  ;;  %v2690_v16 = vld.sshfl [vmem:[#allocation1 + $0x18] sm:$0xff pattern:$0x75316420] }
 0x365   :  { %5290 = vst [vmem:[#allocation1 + $0x10] ss:$2 sm:$0xff] %v9194_v33  ;;  %v10308_v33 = vld [vmem:[%s11152_s5 + $0x1b8] sm:$0xff] }
 0x366   :  { %11605 = vst [vmem:[#allocation22_spill] sm:$0xff] %v10308_v33 }
 0x36b   :  { %v2352_v5 = vpop.f32.mrf.mxu2  ;;  %v2372_v6 = vpop.f32.mrf.mxu0 }
 0x36c   :  { %v2353_v1 = vadd.f32 %v2352_v5, %v2333_v3  ;;  %v2692_v5 = vld.sshfl [vmem:[#allocation1 + $0x28] sm:$0xff pattern:$0x75316420] }
 0x36d   :  { %5292 = vst [vmem:[#allocation1 + $0x20] ss:$2 sm:$0xff] %v9199_v37  ;;  %v10302_v37 = vld [vmem:[%s11152_s5 + $0x258] sm:$0xff] }
 0x36e   :  { %v2373_v10 = vadd.f32 %v2372_v6, %v2353_v1  ;;  %v2693_v1 = vld.sshfl [vmem:[#allocation1 + $0x30] sm:$0xff pattern:$0x75316420]  ;;  %v2694_v6 = vld.sshfl [vmem:[#allocation1 + $0x38] sm:$0xff pattern:$0x75316420] }
 0x36f   :  { %5294 = vst [vmem:[#allocation1 + $0x30] ss:$2 sm:$0xff] %v9205_v50  ;;  %v10296_v50 = vld [vmem:[%s11152_s5 + $0x88] sm:$0xff] }
 0x370   :  { %11604 = vst [vmem:[#allocation27_spill] sm:$0xff] %v10302_v37 }
 0x372   :  { %v2392_v51 = vpop.f32.mrf.mxu1 }
 0x373   :  { %v2393_v13 = vadd.f32 %v2392_v51, %v2373_v10 }
 0x375   :  { %2396 = vrot.lane.b32.xlu2 %v2393_v13, %s7277_s21 }
 0x3cf   :  { %v2397_v27 = vpop.permute.xlu2 %2396 }
 0x3d0   :  { %v2400_v28 = vsel %vm11258_vm4, %v2204_v40, %v2397_v27 }
 0x3d1   :  { %2420 = vmatpush.msrb.mxu3 %v2400_v28 }
 0x3d2   :  { %6240 = vmatmul.msk.f32.vlgmr.msrb.gmra.mxu3 %vm11257_vm15, %v219_v17  ;;  %vm3009_vm15 = vcmask 154624  }
 0x3d3   :  { %6241 = vmatpush.msk.msra.mxu3 %vm2481_vm13, %v2469_v46 }
 0x3d5   :  { %6245 = vmatpush.msk.msrb.mxu3 %vm2481_vm13, %v2471_v58 }
 0x455   :  { %v9181_v54 = vpop.f32.mrf.mxu3 }
 0x456   :  { %v2425_v53 = vmul.f32 %v9181_v54, %v9181_v54 }
 0x458   :  { %2427 = vrot.lane.b32.xlu0 %v2425_v53, %s7277_s21 }
 0x460   :  { %2453 = vperm.xlu0 %7048, %v7092_v49  }
 0x4ca   :  { %v2428_v63 = vpop.permute.xlu0 %2427 }
 0x4cb   :  { %v2430_v29 = vsub.f32 %v9181_v54, %v2428_v63 }
 0x4cd   :  { %v2431_v19 = vadd.f32 1e-05, %v2430_v29 }
 0x4cf   :  { %7052 = vrsqrt.f32 %v2431_v19  ;;  %vm2438_vm9 = vweird.f32 %v2431_v19 }
 0x4d2   :  { %v2454_v51 = vpop.permute.xlu0 %2453 }
 0x4d5   :  { %v7053_v8 = vpop.eup %7052 }
 0x4d6   :  { %v2433_v0 = vmul.f32 %v7053_v8, %v2431_v19  ;;  %vm2439_vm11 = vweird.f32 %v7053_v8 }
 0x4d7   :  { %vm2440_vm12 = vmor %vm2438_vm9, %vm2439_vm11  ;;  %vm216_vm11 = vcmask 191488   ;;  %vm3014_vm9 = vcmask 1043608  }
 0x4d8   :  { %v2434_v31 = vmul.f32 %v7053_v8, %v2433_v0 }
 0x4da   :  { %v2435_v11 = vmul.f32 0.5, %v2434_v31 }
 0x4dc   :  { %v2436_v43 = vsub.f32 1.5, %v2435_v11 }
 0x4de   :  { %v2437_v41 = vmul.f32 %v7053_v8, %v2436_v43 }
 0x4e0   :  { %v2441_v21 = vsel %vm2440_vm12, %v7053_v8, %v2437_v41  ;;  %vm3015_vm12 = vcmask 1047556  }
 0x4e1   :  { %v2446_v24 = vmul.f32 %v2444_v42, %v2441_v21  ;;  %vm3032_vm8 = vmor %vm3015_vm12, %vm3031_vm3  ;;  %vm3049_vm3 = vcmask 1043704  }
 0x4e3   :  { %2448 = vrot.lane.b32.xlu2 %v2446_v24, %s7260_s16 }
 0x53d   :  { %v2449_v3 = vpop.permute.xlu2 %2448 }
 0x53e   :  { %6242 = vmatmul.msk.f32.vlgmr.msra.gmra.mxu3 %vm11258_vm4, %v2449_v3  ;;  %6244 = vmatmul.msk.f32.vlgmr.msra.gmra.mxu2 %vm11258_vm4, %v2449_v3  ;;  %v2451_v10 = vmul.f32 %v2449_v3, %v9181_v54 }
 0x53f   :  { %6252 = vmatmul.msk.f32.vlgmr.msrb.gmra.mxu0 %vm11258_vm4, %v2449_v3  ;;  %6256 = vmatmul.msk.f32.vlgmr.msra.gmra.mxu1 %vm11258_vm4, %v2449_v3 }
 0x540   :  { %6249 = vmatpush.msk.msra.mxu3 %vm2481_vm13, %v2473_v4  ;;  %6253 = vmatpush.msk.msra.mxu2 %vm2481_vm13, %v2475_v57  ;;  %v2456_v13 = vsub.f32 %v2454_v51, %v2451_v10 }
 0x541   :  { %6267 = vmatpush.msk.msrb.mxu0 %vm2481_vm13, %v2691_v38  ;;  %6271 = vmatpush.msk.msra.mxu1 %vm2481_vm13, %v2693_v1 }
 0x546   :  { %6246 = vmatmul.msk.f32.vlgmr.msrb.gmra.mxu3 %vm11258_vm4, %v2449_v3  ;;  %6248 = vmatmul.msk.f32.vlgmr.msrb.gmra.mxu2 %vm11258_vm4, %v2449_v3 }
 0x547   :  { %6260 = vmatmul.msk.f32.vlgmr.msra.gmra.mxu0 %vm11258_vm4, %v2456_v13  ;;  %6264 = vmatmul.msk.f32.vlgmr.msrb.gmra.mxu1 %vm11258_vm4, %v2456_v13 }
 0x548   :  { %6257 = vmatpush.msk.msrb.mxu3 %vm2481_vm13, %v2478_v52  ;;  %6261 = vmatpush.msk.msrb.mxu2 %vm2481_vm13, %v2688_v47 }
 0x549   :  { %6275 = vmatpush.msk.msra.mxu0 %vm2481_vm13, %v2696_v2 }
 0x54e   :  { %6250 = vmatmul.msk.f32.vlgmr.msra.gmra.mxu3 %vm11258_vm4, %v2449_v3  ;;  %6254 = vmatmul.msk.f32.vlgmr.msra.gmra.mxu2 %vm11258_vm4, %v2449_v3 }
 0x54f   :  { %6268 = vmatmul.msk.f32.vlgmr.msrb.gmra.mxu0 %vm11258_vm4, %v2456_v13  ;;  %6272 = vmatmul.msk.f32.vlgmr.msra.gmra.mxu1 %vm11258_vm4, %v2456_v13 }
 0x550   :  { %6265 = vmatpush.msk.msra.mxu3 %vm2481_vm13, %v2690_v16  ;;  %6269 = vmatpush.msk.msra.mxu2 %vm2481_vm13, %v2692_v5 }
 0x556   :  { %6258 = vmatmul.msk.f32.vlgmr.msrb.gmra.mxu3 %vm11258_vm4, %v2449_v3  ;;  %6262 = vmatmul.msk.f32.vlgmr.msrb.gmra.mxu2 %vm11258_vm4, %v2456_v13 }
 0x557   :  { %6276 = vmatmul.msk.f32.vlgmr.msra.gmra.mxu0 %vm11258_vm4, %v2456_v13  ;;  %6273 = vmatpush.msk.msrb.mxu3 %vm2481_vm13, %v2694_v6 }
 0x55e   :  { %6266 = vmatmul.msk.f32.vlgmr.msra.gmra.mxu3 %vm11258_vm4, %v2456_v13  ;;  %6270 = vmatmul.msk.f32.vlgmr.msra.gmra.mxu2 %vm11258_vm4, %v2456_v13 }
 0x566   :  { %6274 = vmatmul.msk.f32.vlgmr.msrb.gmra.mxu3 %vm11258_vm4, %v2456_v13  ;;  %vm3016_vm4 = vmor %vm3015_vm12, %vm3014_vm9  ;;  %vm3018_vm9 = vcmask 412672  }
 0x5bc   :  { %v2617_v55 = vpop.f32.mrf.mxu0  ;;  %v9264_v32 = vpop.f32.mrf.mxu1 }
 0x5bd   :  { %v2903_v15 = vmul.f32 %v2617_v55, %v9038_v14 }
 0x5c1   :  { %v2517_v7 = vpop.f32.mrf.mxu3  ;;  %v2537_v23 = vpop.f32.mrf.mxu2 }
 0x5c2   :  { %v2898_v22 = vmul.f32 %v2517_v7, %v11440_v9  ;;  %v2899_v48 = vmul.f32 %v2537_v23, %v8818_v20 }
 0x5c4   :  { %v2735_v26 = vpop.f32.mrf.mxu0  ;;  %v2775_v62 = vpop.f32.mrf.mxu1 }
 0x5c5   :  { %v9267_v56 = vadd.f32 %v2898_v22, %v2735_v26 }
 0x5c7   :  { %v2925_v17 = vmul.f32 0.044715, %v9267_v56 }
 0x5c9   :  { %v2557_v40 = vpop.f32.mrf.mxu3  ;;  %v2577_v27 = vpop.f32.mrf.mxu2  ;;  %v2934_v54 = vmul.f32 %v2925_v17, %v9267_v56 }
 0x5ca   :  { %v2900_v28 = vmul.f32 %v2557_v40, %v8987_v44  ;;  %v2901_v4 = vmul.f32 %v2577_v27, %v9008_v60  ;;  %v2905_v27 = vmul.f32 %v9264_v32, %v9078_v18  ;;  %v2916_v18 = vmul.f32 0.5, %v9267_v56 }
 0x5cb   :  { %v2943_v19 = vmul.f32 %v2934_v54, %v9267_v56 }
 0x5cc   :  { %v2815_v49 = vpop.f32.mrf.mxu0  ;;  %v9272_v53 = vadd.f32 %v2900_v28, %v2775_v62  ;;  %v2855_v8 = vpop.f32.mrf.mxu1 }
 0x5cd   :  { %v2952_v43 = vadd.f32 %v2943_v19, %v9267_v56 }
 0x5ce   :  { %v2927_v29 = vmul.f32 0.044715, %v9272_v53 }
 0x5cf   :  { %v2961_v45 = vmul.f32 0.7978846, %v2952_v43 }
 0x5d0   :  { %v2936_v42 = vmul.f32 %v2927_v29, %v9272_v53 }
 0x5d1   :  { %v2597_v36 = vpop.f32.mrf.mxu3  ;;  %v2637_v63 = vpop.f32.mrf.mxu2  ;;  %7054 = vtanh.f32 %v2961_v45 }
 0x5d2   :  { %v2902_v9 = vmul.f32 %v2597_v36, %v9011_v25  ;;  %v2904_v61 = vmul.f32 %v2637_v63, %v9062_v59  ;;  %v2945_v52 = vmul.f32 %v2936_v42, %v9272_v53 }
 0x5d4   :  { %v9279_v44 = vadd.f32 %v2902_v9, %v2815_v49  ;;  %v9281_v0 = vadd.f32 %v2904_v61, %v2855_v8  ;;  %v2895_v21 = vpop.f32.mrf.mxu0  ;;  %v2954_v2 = vadd.f32 %v2945_v52, %v9272_v53 }
 0x5d6   :  { %v2929_v46 = vmul.f32 0.044715, %v9279_v44  ;;  %v2931_v20 = vmul.f32 0.044715, %v9281_v0  ;;  %v2963_v13 = vmul.f32 0.7978846, %v2954_v2 }
 0x5d7   :  { %v7055_v40 = vpop.eup %7054 }
 0x5d8   :  { %v2938_v38 = vmul.f32 %v2929_v46, %v9279_v44  ;;  %v2940_v16 = vmul.f32 %v2931_v20, %v9281_v0  ;;  %v2979_v9 = vadd.f32 1.0, %v7055_v40 }
 0x5d9   :  { %v2677_v31 = vpop.f32.mrf.mxu3  ;;  %v2755_v11 = vpop.f32.mrf.mxu2 }
 0x5da   :  { %v2906_v41 = vmul.f32 %v2677_v31, %v9094_v35  ;;  %v2908_v25 = vadd.f32 %v2899_v48, %v2755_v11  ;;  %v2947_v55 = vmul.f32 %v2938_v38, %v9279_v44  ;;  %v2949_v7 = vmul.f32 %v2940_v16, %v9281_v0 }
 0x5dc   :  { %v2915_v59 = vadd.f32 %v2906_v41, %v2895_v21  ;;  %v2926_v24 = vmul.f32 0.044715, %v2908_v25  ;;  %v2956_v49 = vadd.f32 %v2947_v55, %v9279_v44  ;;  %v2958_v29 = vadd.f32 %v2949_v7, %v9281_v0 }
 0x5dd   :  { %v2917_v32 = vmul.f32 0.5, %v2908_v25  ;;  %v2922_v55 = vmul.f32 0.5, %v9281_v0 }
 0x5de   :  { %v2933_v58 = vmul.f32 0.044715, %v2915_v59  ;;  %v2935_v30 = vmul.f32 %v2926_v24, %v2908_v25  ;;  %v2965_v11 = vmul.f32 0.7978846, %v2956_v49  ;;  %v2967_v41 = vmul.f32 0.7978846, %v2958_v29 }
 0x5df   :  { %v9307_v24 = vmul.f32 %v2979_v9, %v2916_v18  ;;  %v2924_v20 = vmul.f32 0.5, %v2915_v59 }
 0x5e0   :  { %v2944_v57 = vmul.f32 %v2935_v30, %v2908_v25  ;;  %v2942_v12 = vmul.f32 %v2933_v58, %v2915_v59 }
 0x5e1   :  { %v2795_v35 = vpop.f32.mrf.mxu3  ;;  %v2835_v47 = vpop.f32.mrf.mxu2  ;;  %11520 = vst [vmem:[#allocation6_spill] sm:$0xff] %v9307_v24 }
 0x5e2   :  { %v2910_v5 = vadd.f32 %v2901_v4, %v2795_v35  ;;  %v9294_v3 = vadd.f32 %v2903_v15, %v2835_v47  ;;  %v2953_v1 = vadd.f32 %v2944_v57, %v2908_v25  ;;  %v2951_v6 = vmul.f32 %v2942_v12, %v2915_v59 }
 0x5e4   :  { %v2928_v10 = vmul.f32 0.044715, %v2910_v5  ;;  %v2930_v14 = vmul.f32 0.044715, %v9294_v3  ;;  %v2962_v60 = vmul.f32 0.7978846, %v2953_v1  ;;  %v2960_v51 = vadd.f32 %v2951_v6, %v2915_v59 }
 0x5e5   :  { %v2918_v59 = vmul.f32 0.5, %v9272_v53  ;;  %v2919_v12 = vmul.f32 0.5, %v2910_v5 }
 0x5e6   :  { %v2937_v23 = vmul.f32 %v2928_v10, %v2910_v5  ;;  %v2939_v22 = vmul.f32 %v2930_v14, %v9294_v3  ;;  %7056 = vtanh.f32 %v2962_v60  ;;  %v2969_v26 = vmul.f32 0.7978846, %v2960_v51 }
 0x5e7   :  { %v2921_v14 = vmul.f32 0.5, %v9294_v3  ;;  %v2920_v51 = vmul.f32 0.5, %v9279_v44  ;;  %v7093_v44 = vld [vmem:[#allocation3 + $0x24] sm:$0xff] }
 0x5e8   :  { %7058 = vtanh.f32 %v2969_v26  ;;  %v2946_v17 = vmul.f32 %v2937_v23, %v2910_v5  ;;  %v2948_v28 = vmul.f32 %v2939_v22, %v9294_v3  ;;  %217 = vst.msk [vmem:[#allocation2 + $0x28] sm:$0xf] %vm216_vm11, %v7093_v44  ;;  %vm3061_vm11 = vcmask 39936  }
 0x5e9   :  { %v2875_v62 = vpop.f32.mrf.mxu3  ;;  %7060 = vtanh.f32 %v2963_v13 }
 0x5ea   :  { %v2914_v54 = vadd.f32 %v2905_v27, %v2875_v62  ;;  %v2955_v36 = vadd.f32 %v2946_v17, %v2910_v5  ;;  %v2957_v63 = vadd.f32 %v2948_v28, %v9294_v3 }
 0x5ec   :  { %v7057_v61 = vpop.eup %7056  ;;  %v2932_v19 = vmul.f32 0.044715, %v2914_v54  ;;  %v2964_v48 = vmul.f32 0.7978846, %v2955_v36  ;;  %v2966_v8 = vmul.f32 0.7978846, %v2957_v63 }
 0x5ed   :  { %v2980_v31 = vadd.f32 1.0, %v7057_v61  ;;  %v2923_v7 = vmul.f32 0.5, %v2914_v54 }
 0x5ee   :  { %v7059_v43 = vpop.eup %7058  ;;  %v2941_v42 = vmul.f32 %v2932_v19, %v2914_v54  ;;  %7062 = vtanh.f32 %v2964_v48 }
 0x5ef   :  { %v7061_v21 = vpop.eup %7060  ;;  %v9309_v46 = vmul.f32 %v2980_v31, %v2917_v32  ;;  %v2987_v45 = vadd.f32 1.0, %v7059_v43  ;;  %7064 = vtanh.f32 %v2966_v8 }
 0x5f0   :  { %v2950_v52 = vmul.f32 %v2941_v42, %v2914_v54  ;;  %7066 = vtanh.f32 %v2965_v11  ;;  %v2981_v15 = vadd.f32 1.0, %v7061_v21 }
 0x5f1   :  { %11521 = vst [vmem:[#allocation9_spill] sm:$0xff] %v9309_v46  ;;  %v2997_v58 = vpack.c.bf16 %v9309_v46, %v9307_v24  ;;  %v9313_v56 = vmul.f32 %v2987_v45, %v2924_v20  ;;  %7068 = vtanh.f32 %v2967_v41  ;;  %v6742_v24 = vld [vmem:[#allocation4 + $0x70] sm:$0xf0] }
 0x5f2   :  { %v2959_v25 = vadd.f32 %v2950_v52, %v2914_v54  ;;  %v9319_v38 = vmul.f32 %v2981_v15, %v2918_v59 }
 0x5f3   :  { %11522 = vst [vmem:[#allocation63_spill] sm:$0xff] %v9313_v56  ;;  %3004 = vrot.lane.b32.xlu1 %v2997_v58, %s7280_s6  ;;  %v3001_v30 = vpack.c.bf16 %v9313_v56, %v9313_v56 }
 0x5f4   :  { %v7063_v4 = vpop.eup %7062  ;;  %v2968_v57 = vmul.f32 0.7978846, %v2959_v25  ;;  %11523 = vst [vmem:[#allocation17_spill] sm:$0xff] %v9319_v38 }
 0x5f5   :  { %3057 = vrot.lane.b32.xlu0 %v3001_v30, %s7281_s17  ;;  %v2982_v35 = vadd.f32 1.0, %v7063_v4  ;;  %v7065_v47 = vpop.eup %7064 }
 0x5f6   :  { %7070 = vtanh.f32 %v2968_v57  ;;  %v7067_v2 = vpop.eup %7066  ;;  %v2984_v10 = vadd.f32 1.0, %v7065_v47 }
 0x5f7   :  { %v9321_v16 = vmul.f32 %v2982_v35, %v2919_v12  ;;  %v7069_v1 = vpop.eup %7068  ;;  %v2983_v53 = vadd.f32 1.0, %v7067_v2 }
 0x5f8   :  { %v2985_v5 = vadd.f32 1.0, %v7069_v1  ;;  %v9327_v13 = vmul.f32 %v2984_v10, %v2921_v14 }
 0x5f9   :  { %11524 = vst [vmem:[#allocation8_spill] sm:$0xff] %v9321_v16  ;;  %v2998_v6 = vpack.c.bf16 %v9321_v16, %v9319_v38  ;;  %v9330_v22 = vmul.f32 %v2983_v53, %v2920_v51  ;;  %v6733_v38 = vld [vmem:[#allocation4 + $0x28] sm:$0xf0]  ;;  %v10284_v16 = vld [vmem:[%s11152_s5 + $0x1c0] sm:$0xff] }
 0x5fa   :  { %11525 = vst [vmem:[#allocation12_spill] sm:$0xff] %v9327_v13  ;;  %v9332_v26 = vmul.f32 %v2985_v5, %v2922_v55 }
 0x5fb   :  { %3006 = vrot.lane.b32.xlu1 %v2998_v6, %s7280_s6  ;;  %3021 = vrot.lane.b32.xlu2 %v2998_v6, %s7282_s30  ;;  %11526 = vst [vmem:[#allocation20_spill] sm:$0xff] %v9330_v22  ;;  %v2999_v3 = vpack.c.bf16 %v9327_v13, %v9330_v22  ;;  %s11540_s6 = smov 14  }
 0x5fc   :  { %v7071_v60 = vpop.eup %7070  ;;  %11527 = vst [vmem:[#allocation10_spill] sm:$0xff] %v9332_v26 }
 0x5fd   :  { %v2986_v23 = vadd.f32 1.0, %v7071_v60  ;;  %11603 = vst [vmem:[#allocation29_spill] sm:$0xff] %v10284_v16 }
 0x5ff   :  { %v9334_v40 = vmul.f32 %v2986_v23, %v2923_v7 }
 0x601   :  { %11528 = vst [vmem:[#allocation15_spill] sm:$0xff] %v9334_v40  ;;  %v3000_v27 = vpack.c.bf16 %v9334_v40, %v9332_v26 }
 0x603   :  { %3023 = vrot.lane.b32.xlu1 %v2999_v3, %s7282_s30  ;;  %3037 = vrot.lane.b32.xlu2 %v2999_v3, %s7274_s25 }
 0x604   :  { %3039 = vrot.lane.b32.xlu0 %v3000_v27, %s7274_s25  ;;  %s7283_s25 = smov 53  }
 0x60b   :  { %3055 = vrot.lane.b32.xlu2 %v3000_v27, %s7281_s17  ;;  %s7299_s17 = smov 51  }
 0x655   :  { %v3022_v0 = vpop.permute.xlu2 %3021 }
 0x656   :  { %v3025_v61 = vrot.slane %v3022_v0, 4 }
 0x658   :  { %v3027_v18 = vsel %vm3026_vm0, %v3025_v61, %v3022_v0 }
 0x65d   :  { %v3038_v17 = vpop.permute.xlu2 %3037 }
 0x65e   :  { %v3041_v45 = vrot.slane %v3038_v17, 4 }
 0x665   :  { %v3005_v28 = vpop.permute.xlu1 %3004  ;;  %v3056_v62 = vpop.permute.xlu2 %3055 }
 0x666   :  { %v3008_v49 = vrot.slane %v3005_v28, 4  ;;  %v3059_v63 = vrot.slane %v3056_v62, 4 }
 0x667   :  { %v3058_v54 = vpop.permute.xlu0 %3057 }
 0x668   :  { %v3010_v36 = vsel %vm3009_vm15, %v3008_v49, %v3005_v28  ;;  %v3060_v29 = vrot.slane %v3058_v54, 4  ;;  %v3062_v58 = vsel %vm3061_vm11, %v3059_v63, %v3056_v62 }
 0x669   :  { %3017 = vst.msk [vmem:[#allocation2] sm:$0xff] %vm3016_vm4, %v3010_v36  ;;  %vm3034_vm4 = vcmask 986112  }
 0x66a   :  { %v3063_v9 = vsel %vm2481_vm13, %v3059_v63, %v3060_v29 }
 0x66b   :  { %v3064_v19 = vsel %vm3061_vm11, %v3063_v9, %v3058_v54 }
 0x66c   :  { %3072 = vst.msk [vmem:[#allocation2 + $0x24] sm:$0xff] %vm3071_vm6, %v3064_v19  ;;  %vm3052_vm6 = vcmask 510976  }
 0x66d   :  { %v3007_v48 = vpop.permute.xlu1 %3006 }
 0x66e   :  { %v3011_v8 = vsel %vm3009_vm15, %v3008_v49, %v3007_v48  ;;  %vm3050_vm15 = vmor %vm3015_vm12, %vm3049_vm3  ;;  %vm11541_vm3 = vcmask 1039360  }
 0x66f   :  { %3019 = vst.msk [vmem:[#allocation2 + $0x8] sm:$0xf] %vm3018_vm9, %v3011_v8  ;;  %vm3790_vm9 = vcmask 441344  }
 0x670   :  { %v3073_v32 = vld [vmem:[#allocation2] sm:$0xff]  ;;  %3033 = vst.msk [vmem:[#allocation2 + $0x8] sm:$0xff] %vm3032_vm8, %v3027_v18  ;;  %vm3068_vm8 = vmor %vm3015_vm12, %vm3067_vm5  ;;  %vm11536_vm12 = vcmask 261120  }
 0x671   :  { %3167 = vst [vmem:[#allocation4] sm:$0xff] %v3073_v32  ;;  %v3879_v31 = vunpack.c.l.b16 %v3073_v32  ;;  %v3880_v11 = vunpack.c.h.b16 %v3073_v32  ;;  %vm11539_vm5 = vmmov %vm11536_vm12 }
 0x673   :  { %v3882_v43 = vpack.c.b16 %v3879_v31, %v3879_v31  ;;  %v9351_v42 = vpack.c.b16 %v3880_v11, %v3880_v11 }
 0x675   :  { %3885 = vrot.lane.b32.xlu1 %v3882_v43, %s7262_s11  ;;  %v3024_v41 = vpop.permute.xlu1 %3023  ;;  %3887 = vrot.lane.b32.xlu2 %v9351_v42, %s7262_s11 }
 0x676   :  { %v3028_v21 = vsel %vm3026_vm0, %v3025_v61, %v3024_v41  ;;  %3763 = vrot.lane.b32.xlu0 %v3882_v43, %s7258_s9  ;;  %v3040_v20 = vpop.permute.xlu0 %3039  ;;  %vm11531_vm0 = vcmask 900096  }
 0x677   :  { %3035 = vst.msk [vmem:[#allocation2 + $0x10] sm:$0xf] %vm3034_vm4, %v3028_v21  ;;  %v3042_v52 = vrot.slane %v3040_v20, 4  ;;  %v3871_v15 = vld [vmem:[#allocation2 + $0x8] sm:$0xff]  ;;  %vm3669_vm4 = vcmask 572416  }
 0x678   :  { %3053 = vst.msk [vmem:[#allocation2 + $0x1c] sm:$0xf] %vm3052_vm6, %v3040_v20  ;;  %v3870_v4 = vld [vmem:[#allocation2 + $0x8] sm:$0xf]  ;;  %v3897_v57 = vunpack.c.h.b16 %v3871_v15  ;;  %v3896_v0 = vunpack.c.l.b16 %v3871_v15  ;;  %vm11542_vm6 = vmmov %vm11541_vm3 }
 0x679   :  { %v3044_v25 = vsel %vm2481_vm13, %v3041_v45, %v3042_v52  ;;  %3069 = vst.msk [vmem:[#allocation2 + $0x1c] sm:$0xff] %vm3068_vm8, %v3062_v58  ;;  %v3881_v59 = vunpack.c.l.b16 %v3870_v4  ;;  %v3748_v47 = vld [vmem:[#allocation2 + $0x8] sm:$0xf]  ;;  %vm11543_vm8 = vmmov %vm11539_vm5 }
 0x67a   :  { %v3046_v30 = vsel %vm546_vm2, %v3038_v17, %v3044_v25  ;;  %v9378_v12 = vpack.c.b16 %v3897_v57, %v3897_v57  ;;  %v3759_v1 = vunpack.c.l.b16 %v3748_v47  ;;  %v3397_v53 = vld [vmem:[#allocation2 + $0x8] sm:$0xf]  ;;  %v9395_v28 = vpack.c.b16 %v3896_v0, %v3896_v0 }
 0x67b   :  { %3051 = vst.msk [vmem:[#allocation2 + $0x14] sm:$0xff] %vm3050_vm15, %v3046_v30  ;;  %v3884_v35 = vpack.c.b16 %v3881_v59, %v3881_v59  ;;  %v3408_v5 = vunpack.c.l.b16 %v3397_v53  ;;  %v3631_v51 = vld [vmem:[#allocation2 + $0x8] sm:$0xf]  ;;  %vm11535_vm2 = vcmask 1031168   ;;  %vm3552_vm15 = vcmask 580608  }
 0x67c   :  { %v3762_v10 = vpack.c.b16 %v3759_v1, %v3759_v1  ;;  %v3992_v55 = vld [vmem:[#allocation2 + $0x8] sm:$0xf]  ;;  %v3642_v7 = vunpack.c.l.b16 %v3631_v51  ;;  %vm11537_vm11 = vmmov %vm11535_vm2 }
 0x67d   :  { %3765 = vrot.lane.b32.xlu1 %v9351_v42, %s7258_s9  ;;  %3414 = vrot.lane.b32.xlu2 %v9351_v42, %s7248_s23  ;;  %v3411_v60 = vpack.c.b16 %v3408_v5, %v3408_v5  ;;  %v4003_v23 = vunpack.c.l.b16 %v3992_v55  ;;  %v3285_v44 = vld [vmem:[#allocation2 + $0x8] sm:$0xf] }
 0x67e   :  { %3646 = vrot.lane.b32.xlu0 %v3882_v43, %s7254_s8  ;;  %v3633_v2 = vld [vmem:[#allocation2 + $0x10] sm:$0xf]  ;;  %v3645_v3 = vpack.c.b16 %v3642_v7, %v3642_v7  ;;  %v3296_v17 = vunpack.c.l.b16 %v3285_v44  ;;  %v3514_v49 = vld [vmem:[#allocation2 + $0x8] sm:$0xf] }
 0x67f   :  { %v3659_v6 = vunpack.c.l.b16 %v3633_v2  ;;  %v4006_v27 = vpack.c.b16 %v4003_v23, %v4003_v23  ;;  %v3287_v54 = vld [vmem:[#allocation2 + $0x10] sm:$0xf]  ;;  %v3525_v36 = vunpack.c.l.b16 %v3514_v49  ;;  %v3173_v11 = vld [vmem:[#allocation2 + $0x8] sm:$0xf] }
 0x680   :  { %v3299_v62 = vpack.c.b16 %v3296_v17, %v3296_v17  ;;  %v3313_v63 = vunpack.c.l.b16 %v3287_v54  ;;  %v3516_v61 = vld [vmem:[#allocation2 + $0x10] sm:$0xf]  ;;  %v3874_v19 = vld [vmem:[#allocation2 + $0x1c] sm:$0xf]  ;;  %v3184_v41 = vunpack.c.l.b16 %v3173_v11 }
 0x681   :  { %v3662_v14 = vpack.c.b16 %v3659_v6, %v3659_v6  ;;  %v3528_v29 = vpack.c.b16 %v3525_v36, %v3525_v36  ;;  %v3542_v8 = vunpack.c.l.b16 %v3516_v61  ;;  %v3920_v18 = vunpack.c.l.b16 %v3874_v19  ;;  %v3399_v52 = vld [vmem:[#allocation2 + $0x10] sm:$0xf]  ;;  %v3635_v25 = vld [vmem:[#allocation2 + $0x1c] sm:$0xf] }
 0x682   :  { %v3316_v9 = vpack.c.b16 %v3313_v63, %v3313_v63  ;;  %v3187_v20 = vpack.c.b16 %v3184_v41, %v3184_v41  ;;  %v3175_v58 = vld [vmem:[#allocation2 + $0x10] sm:$0xf]  ;;  %v3425_v15 = vunpack.c.l.b16 %v3399_v52  ;;  %v3676_v57 = vunpack.c.l.b16 %v3635_v25  ;;  %v3519_v2 = vld [vmem:[#allocation2 + $0x1c] sm:$0xff] }
 0x683   :  { %v3545_v32 = vpack.c.b16 %v3542_v8, %v3542_v8  ;;  %v3923_v31 = vpack.c.b16 %v3920_v18, %v3920_v18  ;;  %v3201_v4 = vunpack.c.l.b16 %v3175_v58  ;;  %v3575_v51 = vunpack.c.h.b16 %v3519_v2  ;;  %v3076_v23 = vld [vmem:[#allocation2 + $0x10] sm:$0xf] }
 0x684   :  { %v3428_v59 = vpack.c.b16 %v3425_v15, %v3425_v15  ;;  %v3679_v47 = vpack.c.b16 %v3676_v57, %v3676_v57  ;;  %v3091_v17 = vunpack.c.l.b16 %v3076_v23  ;;  %v3518_v15 = vld [vmem:[#allocation2 + $0x1c] sm:$0xf] }
 0x685   :  { %3648 = vrot.lane.b32.xlu1 %v9351_v42, %s7254_s8  ;;  %4009 = vrot.lane.b32.xlu2 %v9351_v42, %s7268_s18  ;;  %v9444_v7 = vpack.c.b16 %v3575_v51, %v3575_v51 }
 0x686   :  { %3529 = vrot.lane.b32.xlu0 %v3882_v43, %s7251_s13 }
 0x68d   :  { %3531 = vrot.lane.b32.xlu1 %v9351_v42, %s7251_s13  ;;  %3302 = vrot.lane.b32.xlu2 %v9351_v42, %s7245_s10 }
 0x68e   :  { %3188 = vrot.lane.b32.xlu0 %v3882_v43, %s7242_s22 }
 0x695   :  { %3412 = vrot.lane.b32.xlu1 %v3882_v43, %s7248_s23  ;;  %3906 = vrot.lane.b32.xlu2 %v9378_v12, %s7283_s25 }
 0x696   :  { %3889 = vrot.lane.b32.xlu0 %v3884_v35, %s7262_s11  ;;  %s7291_s11 = smov 16   ;;  %v3204_v35 = vpack.c.b16 %v3201_v4, %v3201_v4  ;;  %v3078_v4 = vld [vmem:[#allocation2 + $0x1c] sm:$0xf] }
 0x69d   :  { %4007 = vrot.lane.b32.xlu1 %v3882_v43, %s7268_s18  ;;  %3767 = vrot.lane.b32.xlu2 %v3762_v10, %s7258_s9  ;;  %s7288_s9 = smov 89  }
 0x69e   :  { %3667 = vrot.lane.b32.xlu0 %v3662_v14, %s7284_s28  ;;  %v3574_v14 = vunpack.c.l.b16 %v3519_v2 }
 0x6a0   :  { %v9434_v53 = vpack.c.b16 %v3574_v14, %v3574_v14 }
 0x6a5   :  { %3300 = vrot.lane.b32.xlu1 %v3882_v43, %s7245_s10  ;;  %3784 = vrot.lane.b32.xlu2 %v9378_v12, %s7285_s14  ;;  %v3752_v43 = vld [vmem:[#allocation2 + $0x1c] sm:$0xf] }
 0x6a6   :  { %3416 = vrot.lane.b32.xlu0 %v3411_v60, %s7248_s23  ;;  %s7286_s23 = smov 88   ;;  %v3798_v21 = vunpack.c.l.b16 %v3752_v43 }
 0x6a8   :  { %v3801_v45 = vpack.c.b16 %v3798_v21, %v3798_v21 }
 0x6ad   :  { %3190 = vrot.lane.b32.xlu1 %v9351_v42, %s7242_s22  ;;  %3650 = vrot.lane.b32.xlu2 %v3645_v3, %s7254_s8  ;;  %s7287_s8 = smov 71   ;;  %v3289_v3 = vld [vmem:[#allocation2 + $0x1c] sm:$0xf] }
 0x6ae   :  { %4011 = vrot.lane.b32.xlu0 %v4006_v27, %s7268_s18  ;;  %v3330_v54 = vunpack.c.l.b16 %v3289_v3 }
 0x6b5   :  { %3904 = vrot.lane.b32.xlu1 %v9395_v28, %s7283_s25  ;;  %3665 = vrot.lane.b32.xlu2 %v9378_v12, %s7284_s28 }
 0x6b6   :  { %3304 = vrot.lane.b32.xlu0 %v3299_v62, %s7245_s10  ;;  %s7289_s10 = smov 72  }
 0x6bd   :  { %3782 = vrot.lane.b32.xlu1 %v9395_v28, %s7285_s14  ;;  %3533 = vrot.lane.b32.xlu2 %v3528_v29, %s7251_s13  ;;  %s7290_s13 = smov 15  }
 0x6be   :  { %3321 = vrot.lane.b32.xlu0 %v3316_v9, %s7286_s23  ;;  %v3094_v9 = vpack.c.b16 %v3091_v17, %v3091_v17 }
 0x6c5   :  { %3663 = vrot.lane.b32.xlu1 %v9395_v28, %s7284_s28  ;;  %3548 = vrot.lane.b32.xlu2 %v9378_v12, %s7287_s8 }
 0x6c6   :  { %3205 = vrot.lane.b32.xlu0 %v9395_v28, %s7288_s9 }
 0x6cd   :  { %3546 = vrot.lane.b32.xlu1 %v9395_v28, %s7287_s8  ;;  %3431 = vrot.lane.b32.xlu2 %v9378_v12, %s7289_s10 }
 0x6ce   :  { %3097 = vrot.lane.b32.xlu0 %v9378_v12, %s7268_s18 }
 0x6cf   :  { %v9416_v48 = vpop.permute.xlu2 %3887 }
 0x6d5   :  { %3550 = vrot.lane.b32.xlu1 %v3545_v32, %s7287_s8  ;;  %3319 = vrot.lane.b32.xlu2 %v9378_v12, %s7286_s23 }
 0x6d6   :  { %3928 = vrot.lane.b32.xlu0 %v3923_v31, %s7290_s13 }
 0x6d7   :  { %v9421_v42 = vpop.permute.xlu2 %3414 }
 0x6dd   :  { %3429 = vrot.lane.b32.xlu1 %v9395_v28, %s7289_s10  ;;  %3192 = vrot.lane.b32.xlu2 %v3187_v20, %s7242_s22  ;;  %s11529_s22 = smov 123  }
 0x6de   :  { %3806 = vrot.lane.b32.xlu0 %v3801_v45, %s7291_s11 }
 0x6df   :  { %v9427_v30 = vpop.permute.xlu2 %4009 }
 0x6e5   :  { %3433 = vrot.lane.b32.xlu1 %v3428_v59, %s7289_s10  ;;  %3209 = vrot.lane.b32.xlu2 %v3204_v35, %s7288_s9 }
 0x6e6   :  { %3684 = vrot.lane.b32.xlu0 %v3679_v47, %s7241_s15  ;;  %v3108_v47 = vunpack.c.l.b16 %v3078_v4 }
 0x6e7   :  { %v3886_v1 = vpop.permute.xlu1 %3885  ;;  %v9432_v6 = vpop.permute.xlu2 %3302 }
 0x6e8   :  { %v3764_v10 = vpop.permute.xlu0 %3763  ;;  %v3892_v32 = vsel %vm1092_vm1, %v3886_v1, %v9416_v48  ;;  %v6795_v1 = vld [vmem:[#allocation4 + $0x218] sm:$0xf0]  ;;  %v3111_v14 = vpack.c.b16 %v3108_v47, %v3108_v47 }
 0x6e9   :  { %v3967_v45 = vunpack.c.l.b16 %v3892_v32 }
 0x6ed   :  { %3317 = vrot.lane.b32.xlu1 %v9395_v28, %s7286_s23  ;;  %3095 = vrot.lane.b32.xlu2 %v9395_v28, %s7268_s18 }
 0x6ee   :  { %3582 = vrot.lane.b32.xlu0 %v9434_v53, %s11529_s22 }
 0x6ef   :  { %v3766_v5 = vpop.permute.xlu1 %3765  ;;  %v9442_v60 = vpop.permute.xlu2 %3906 }
 0x6f0   :  { %v3647_v55 = vpop.permute.xlu0 %3646  ;;  %v3770_v27 = vsel %vm991_vm7, %v3764_v10, %v3766_v5  ;;  %v6533_v10 = vld [vmem:[#allocation4 + $0x21c] sm:$0xf0] }
 0x6f1   :  { %v3845_v36 = vunpack.c.l.b16 %v3770_v27 }
 0x6f5   :  { %3207 = vrot.lane.b32.xlu1 %v9378_v12, %s7288_s9  ;;  %4027 = vrot.lane.b32.xlu2 %v9378_v12, %s7292_s19  ;;  %v3333_v12 = vpack.c.b16 %v3330_v54, %v3330_v54 }
 0x6f6   :  { %3467 = vrot.lane.b32.xlu0 %v9444_v7, %s7260_s16 }
 0x6f7   :  { %v3649_v44 = vpop.permute.xlu1 %3648  ;;  %v9453_v0 = vpop.permute.xlu2 %3767 }
 0x6f8   :  { %v3771_v62 = vsel %vm991_vm7, %v3766_v5, %v9453_v0  ;;  %v3530_v49 = vpop.permute.xlu0 %3529  ;;  %v3653_v18 = vsel %vm890_vm14, %v3647_v55, %v3649_v44  ;;  %v9496_v55 = vld [vmem:[#allocation2 + $0x10] sm:$0xff]  ;;  %vm11533_vm7 = vcmask 736256  }
 0x6f9   :  { %v3846_v63 = vunpack.c.l.b16 %v3771_v62  ;;  %v3723_v41 = vunpack.c.l.b16 %v3653_v18 }
 0x6fb   :  { %v3854_v29 = vpack.c.b16 %v3846_v63, %v3845_v36 }
 0x6fd   :  { %3864 = vst [vmem:[#allocation4 + $0x1b0] sm:$0xff] %v3854_v29  ;;  %3099 = vrot.lane.b32.xlu1 %v3094_v9, %s7268_s18  ;;  %3945 = vrot.lane.b32.xlu2 %v9444_v7, %s7293_s12  ;;  %s7296_s18 = smov 104   ;;  %v6497_v29 = vld [vmem:[#allocation4 + $0x1d4] sm:$0xf0] }
 0x6fe   :  { %3338 = vrot.lane.b32.xlu0 %v3333_v12, %s7294_s1  ;;  %v3898_v12 = vunpack.c.l.b16 %v9496_v55 }
 0x6ff   :  { %v3532_v61 = vpop.permute.xlu1 %3531  ;;  %v9461_v19 = vpop.permute.xlu2 %3784 }
 0x700   :  { %v9463_v8 = vpop.permute.xlu0 %3188  ;;  %v3536_v23 = vsel %vm789_vm10, %v3530_v49, %v3532_v61  ;;  %v9512_v4 = vpack.c.b16 %v3898_v12, %v3898_v12 }
 0x701   :  { %v3606_v18 = vunpack.c.l.b16 %v3536_v23  ;;  %v6768_v23 = vld [vmem:[#allocation4 + $0x140] sm:$0xf0] }
 0x704   :  { %v6495_v36 = vld [vmem:[#allocation4 + $0x1b0] sm:$0xf]  ;;  %v6782_v63 = vld [vmem:[#allocation4 + $0x1b4] sm:$0xf] }
 0x705   :  { %4025 = vrot.lane.b32.xlu1 %v9395_v28, %s7292_s19  ;;  %3823 = vrot.lane.b32.xlu2 %v9444_v7, %s7295_s24 }
 0x706   :  { %4064 = vrot.lane.b32.xlu0 %v9444_v7, %s7296_s18 }
 0x707   :  { %v3413_v31 = vpop.permute.xlu1 %3412  ;;  %v9474_v11 = vpop.permute.xlu2 %3650 }
 0x708   :  { %v3654_v43 = vsel %vm890_vm14, %v3649_v44, %v9474_v11  ;;  %v9478_v28 = vpop.permute.xlu0 %3889  ;;  %v6786_v44 = vld [vmem:[#allocation4 + $0x1d0] sm:$0xf0]  ;;  %v3419_v17 = vsel %vm11531_vm0, %v3413_v31, %v9421_v42  ;;  %vm3912_vm14 = vcmask 433152  }
 0x709   :  { %v3724_v21 = vunpack.c.l.b16 %v3654_v43  ;;  %v3893_v20 = vsel %vm1092_vm1, %v9416_v48, %v9478_v28  ;;  %v3559_v48 = vunpack.c.l.b16 %v3518_v15  ;;  %vm11532_vm1 = vmmov %vm11531_vm0  ;;  %v3489_v43 = vunpack.c.l.b16 %v3419_v17 }
 0x70a   :  { %v3968_v52 = vunpack.c.l.b16 %v3893_v20  ;;  %v6500_v20 = vor.u32 %v6782_v63, %v6497_v29  ;;  %v6759_v29 = vld [vmem:[#allocation4 + $0xf8] sm:$0xf0]  ;;  %vm11544_vm0 = vmmov %vm11539_vm5 }
 0x70b   :  { %v3732_v58 = vpack.c.b16 %v3724_v21, %v3723_v41  ;;  %v3562_v2 = vpack.c.b16 %v3559_v48, %v3559_v48  ;;  %v6496_v21 = vor.u32 %v6786_v44, %v6495_v36 }
 0x70c   :  { %v3976_v25 = vpack.c.b16 %v3968_v52, %v3967_v45  ;;  %v6777_v45 = vld [vmem:[#allocation4 + $0x188] sm:$0xf0] }
 0x70d   :  { %3742 = vst [vmem:[#allocation4 + $0x168] sm:$0xff] %v3732_v58  ;;  %3943 = vrot.lane.b32.xlu1 %v9434_v53, %s7293_s12  ;;  %3701 = vrot.lane.b32.xlu2 %v9444_v7, %s7270_s29 }
 0x70e   :  { %3986 = vst [vmem:[#allocation4 + $0x1f8] sm:$0xff] %v3976_v25  ;;  %3239 = vrot.lane.b32.xlu0 %v9434_v53, %s11530_s20  ;;  %v6461_v25 = vld [vmem:[#allocation4 + $0x18c] sm:$0xf0] }
 0x70f   :  { %v4008_v57 = vpop.permute.xlu1 %4007  ;;  %v9489_v59 = vpop.permute.xlu2 %3665 }
 0x710   :  { %v9491_v35 = vpop.permute.xlu0 %3667  ;;  %v4013_v47 = vsel %vm11533_vm7, %v4008_v57, %v9427_v30  ;;  %v3401_v57 = vld [vmem:[#allocation2 + $0x1c] sm:$0xf] }
 0x714   :  { %v6459_v58 = vld [vmem:[#allocation4 + $0x168] sm:$0xf] }
 0x715   :  { %3821 = vrot.lane.b32.xlu1 %v9434_v53, %s7295_s24  ;;  %3567 = vrot.lane.b32.xlu2 %v3562_v2, %s7297_s27  ;;  %v6531_v5 = vld [vmem:[#allocation4 + $0x1f8] sm:$0xf]  ;;  %v6791_v51 = vld [vmem:[#allocation4 + $0x1fc] sm:$0xf] }
 0x716   :  { %3116 = vrot.lane.b32.xlu0 %v3111_v14, %s7292_s19  ;;  %v6532_v3 = vor.u32 %v6795_v1, %v6531_v5  ;;  %v6536_v27 = vor.u32 %v6791_v51, %v6533_v10  ;;  %v4086_v5 = vunpack.c.l.b16 %v4013_v47 }
 0x717   :  { %v3301_v62 = vpop.permute.xlu1 %3300  ;;  %v9502_v54 = vpop.permute.xlu2 %3533 }
 0x718   :  { %v3537_v9 = vsel %vm789_vm10, %v3532_v61, %v9502_v54  ;;  %4628 = vmatpush.bf16.msrb.mxu2 %v6532_v3  ;;  %4654 = vmatpush.bf16.msra.mxu3 %v6536_v27  ;;  %v9506_v49 = vpop.permute.xlu0 %3416  ;;  %v6773_v61 = vld [vmem:[#allocation4 + $0x16c] sm:$0xf]  ;;  %vm11534_vm10 = vmmov %vm11533_vm7  ;;  %v6425_v3 = vld [vmem:[#allocation4 + $0x144] sm:$0xf0] }
 0x719   :  { %v3607_v32 = vunpack.c.l.b16 %v3537_v9  ;;  %v3420_v31 = vsel %vm11532_vm1, %v9421_v42, %v9506_v49  ;;  %v6460_v42 = vor.u32 %v6777_v45, %v6459_v58  ;;  %v6464_v48 = vor.u32 %v6773_v61, %v6461_v25  ;;  %v6389_v9 = vld [vmem:[#allocation4 + $0xfc] sm:$0xf0]  ;;  %vm11545_vm7 = vmmov %vm11544_vm0 }
 0x71a   :  { %v3490_v41 = vunpack.c.l.b16 %v3420_v31  ;;  %vm3435_vm1 = vcmask 588800  }
 0x71b   :  { %v3615_v52 = vpack.c.b16 %v3607_v32, %v3606_v18  ;;  %v3307_v18 = vsel %vm11535_vm2, %v3301_v62, %v9432_v6  ;;  %vm11546_vm2 = vmmov %vm11544_vm0 }
 0x71c   :  { %v3498_v15 = vpack.c.b16 %v3490_v41, %v3489_v43  ;;  %4629 = vmatpush.bf16.msrb.mxu2 %v6496_v21  ;;  %4655 = vmatpush.bf16.msra.mxu3 %v6500_v20  ;;  %v3442_v43 = vunpack.c.l.b16 %v3401_v57  ;;  %v3899_v20 = vunpack.c.h.b16 %v9496_v55  ;;  %v3372_v61 = vunpack.c.l.b16 %v3307_v18  ;;  %v3996_v55 = vld [vmem:[#allocation2 + $0x1c] sm:$0xf]  ;;  %v6750_v18 = vld [vmem:[#allocation4 + $0xb0] sm:$0xf0] }
 0x71d   :  { %3625 = vst [vmem:[#allocation4 + $0x120] sm:$0xff] %v3615_v52  ;;  %3699 = vrot.lane.b32.xlu1 %v9434_v53, %s7270_s29  ;;  %3465 = vrot.lane.b32.xlu2 %v9434_v53, %s7260_s16 }
 0x71e   :  { %3508 = vst [vmem:[#allocation4 + $0xd8] sm:$0xff] %v3498_v15  ;;  %3908 = vrot.lane.b32.xlu0 %v9512_v4, %s7283_s25  ;;  %v3445_v15 = vpack.c.b16 %v3442_v43, %v3442_v43 }
 0x71f   :  { %v9522_v2 = vpop.permute.xlu1 %3190  ;;  %v9524_v1 = vpop.permute.xlu2 %3548 }
 0x720   :  { %4630 = vmatpush.bf16.msrb.mxu2 %v6460_v42  ;;  %4656 = vmatpush.bf16.msra.mxu3 %v6464_v48  ;;  %v9526_v10 = vpop.permute.xlu0 %4011  ;;  %v6804_v42 = vld [vmem:[#allocation4 + $0x260] sm:$0xf0]  ;;  %v6569_v48 = vld [vmem:[#allocation4 + $0x264] sm:$0xf0] }
 0x721   :  { %v4014_v14 = vsel %vm11534_vm10, %v9427_v30, %v9526_v10  ;;  %vm3323_vm10 = vcmask 719872  }
 0x722   :  { %v4087_v51 = vunpack.c.l.b16 %v4014_v14  ;;  %v9553_v14 = vpack.c.b16 %v3899_v20, %v3899_v20 }
 0x724   :  { %v4095_v27 = vpack.c.b16 %v4087_v51, %v4086_v5  ;;  %v6423_v44 = vld [vmem:[#allocation4 + $0x120] sm:$0xf]  ;;  %v6764_v17 = vld [vmem:[#allocation4 + $0x124] sm:$0xf]  ;;  %v3177_v5 = vld [vmem:[#allocation2 + $0x1c] sm:$0xf] }
 0x725   :  { %3584 = vrot.lane.b32.xlu1 %v9444_v7, %s11529_s22  ;;  %4062 = vrot.lane.b32.xlu2 %v9434_v53, %s7296_s18  ;;  %v6424_v36 = vor.u32 %v6768_v23, %v6423_v44  ;;  %v6428_v63 = vor.u32 %v6764_v17, %v6425_v3  ;;  %v6387_v30 = vld [vmem:[#allocation4 + $0xd8] sm:$0xf]  ;;  %v6755_v12 = vld [vmem:[#allocation4 + $0xdc] sm:$0xf]  ;;  %v3873_v51 = vld [vmem:[#allocation2 + $0x14] sm:$0xff]  ;;  %v4040_v17 = vunpack.c.l.b16 %v3996_v55  ;;  %v3218_v57 = vunpack.c.l.b16 %v3177_v5 }
 0x726   :  { %4105 = vst [vmem:[#allocation4 + $0x240] sm:$0xff] %v4095_v27  ;;  %3786 = vrot.lane.b32.xlu0 %v9512_v4, %s7285_s14  ;;  %v6388_v52 = vor.u32 %v6759_v29, %v6387_v30  ;;  %v6392_v58 = vor.u32 %v6755_v12, %v6389_v9  ;;  %v3919_v29 = vunpack.c.h.b16 %v3873_v51 }
 0x727   :  { %v3905_v32 = vpop.permute.xlu1 %3904  ;;  %v9539_v31 = vpop.permute.xlu2 %3431  ;;  %4631 = vmatpush.bf16.msrb.mxu2 %v6424_v36  ;;  %4657 = vmatpush.bf16.msra.mxu3 %v6428_v63  ;;  %v4043_v30 = vpack.c.b16 %v4040_v17, %v4040_v17  ;;  %v3221_v12 = vpack.c.b16 %v3218_v57, %v3218_v57  ;;  %v6317_v17 = vld [vmem:[#allocation4 + $0x6c] sm:$0xf0] }
 0x728   :  { %v3913_v41 = vsel %vm3912_vm14, %v3905_v32, %v9442_v60  ;;  %v9543_v21 = vpop.permute.xlu0 %3304  ;;  %v6353_v32 = vld [vmem:[#allocation4 + $0xb4] sm:$0xf0]  ;;  %v9570_v43 = vpack.c.b16 %v3919_v29, %v3919_v29 }
 0x729   :  { %v9548_v45 = vsel %vm11536_vm12, %v9478_v28, %v3913_v41  ;;  %v3308_v62 = vsel %vm11537_vm11, %v9432_v6, %v9543_v21  ;;  %vm3211_vm12 = vcmask 728064   ;;  %vm11547_vm11 = vmmov %vm11544_vm0 }
 0x72a   :  { %v3373_v25 = vunpack.c.l.b16 %v3308_v62  ;;  %v3195_v62 = vsel %vm11541_vm3, %v9463_v8, %v9522_v2 }
 0x72b   :  { %4632 = vmatpush.bf16.msrb.mxu2 %v6388_v52  ;;  %4658 = vmatpush.bf16.msra.mxu3 %v6392_v58  ;;  %v3671_v58 = vsel %vm3669_vm4, %v9489_v59, %v9491_v35 }
 0x72c   :  { %v3381_v47 = vpack.c.b16 %v3373_v25, %v3372_v61 }
 0x72d   :  { %3450 = vrot.lane.b32.xlu1 %v3445_v15, %s7298_s26  ;;  %3353 = vrot.lane.b32.xlu2 %v9444_v7, %s11538_s0  ;;  %v6567_v6 = vld [vmem:[#allocation4 + $0x240] sm:$0xf]  ;;  %v6800_v28 = vld [vmem:[#allocation4 + $0x244] sm:$0xf]  ;;  %v3918_v15 = vunpack.c.l.b16 %v3873_v51 }
 0x72e   :  { %3391 = vst [vmem:[#allocation4 + $0x90] sm:$0xff] %v3381_v47  ;;  %3910 = vrot.lane.b32.xlu0 %v9553_v14, %s7283_s25  ;;  %v6568_v23 = vor.u32 %v6804_v42, %v6567_v6  ;;  %v6572_v3 = vor.u32 %v6800_v28, %v6569_v48  ;;  %v3260_v47 = vunpack.c.l.b16 %v3195_v62  ;;  %v3726_v6 = vunpack.c.l.b16 %v3671_v58  ;;  %v6281_v62 = vld [vmem:[#allocation4 + $0x24] sm:$0xf0] }
 0x72f   :  { %v3783_v27 = vpop.permute.xlu1 %3782  ;;  %v9560_v44 = vpop.permute.xlu2 %3319 }
 0x730   :  { %v3791_v36 = vsel %vm3790_vm9, %v3783_v27, %v9461_v19  ;;  %4648 = vmatpush.bf16.msrb.mxu1 %v6568_v23  ;;  %4674 = vmatpush.bf16.msrb.mxu0 %v6572_v3  ;;  %v9564_v63 = vpop.permute.xlu0 %3321  ;;  %v9591_v3 = vpack.c.b16 %v3918_v15, %v3918_v15  ;;  %v6741_v27 = vld [vmem:[#allocation4 + $0x68] sm:$0xf0] }
 0x731   :  { %v9568_v9 = vsel %vm11539_vm5, %v9453_v0, %v3791_v36  ;;  %vm11548_vm5 = vcmask 736256  }
 0x732   :  { %vm11550_vm3 = vmmov %vm11548_vm5 }
 0x735   :  { %4048 = vrot.lane.b32.xlu1 %v4043_v30, %s11540_s6  ;;  %3226 = vrot.lane.b32.xlu2 %v3221_v12, %s7299_s17  ;;  %v6351_v41 = vld [vmem:[#allocation4 + $0x90] sm:$0xf]  ;;  %v6746_v20 = vld [vmem:[#allocation4 + $0x94] sm:$0xf] }
 0x736   :  { %3926 = vrot.lane.b32.xlu0 %v9570_v43, %s7290_s13  ;;  %v6352_v0 = vor.u32 %v6750_v18, %v6351_v41  ;;  %v6356_v52 = vor.u32 %v6746_v20, %v6353_v32  ;;  %v6732_v18 = vld [vmem:[#allocation4 + $0x20] sm:$0xf0]  ;;  %v6279_v41 = vld [vmem:[#allocation4] sm:$0xf] }
 0x737   :  { %v3664_v61 = vpop.permute.xlu1 %3663  ;;  %v9581_v25 = vpop.permute.xlu2 %3192  ;;  %v6728_v20 = vld [vmem:[#allocation4 + $0x4] sm:$0xf] }
 0x738   :  { %v3670_v42 = vsel %vm3669_vm4, %v3664_v61, %v9489_v59  ;;  %v3196_v48 = vsel %vm11542_vm6, %v9522_v2, %v9581_v25  ;;  %4633 = vmatpush.bf16.msrb.mxu2 %v6352_v0  ;;  %4659 = vmatpush.bf16.msra.mxu3 %v6356_v52  ;;  %v9587_v8 = vpop.permute.xlu0 %3205  ;;  %vm11549_vm4 = vmmov %vm11544_vm0  ;;  %vm3930_vm6 = vcmask 121856  }
 0x739   :  { %v3713_v55 = vsel %vm11543_vm8, %v9474_v11, %v3670_v42  ;;  %v3261_v5 = vunpack.c.l.b16 %v3196_v48  ;;  %v6280_v42 = vor.u32 %v6732_v18, %v6279_v41  ;;  %v6284_v48 = vor.u32 %v6728_v20, %v6281_v62 }
 0x73a   :  { %v3725_v28 = vunpack.c.l.b16 %v3713_v55  ;;  %vm11551_vm8 = vcmask 523264  }
 0x73b   :  { %v3269_v23 = vpack.c.b16 %v3261_v5, %v3260_v47 }
 0x73c   :  { %v3733_v51 = vpack.c.b16 %v3726_v6, %v3725_v28 }
 0x73d   :  { %3279 = vst [vmem:[#allocation4 + $0x48] sm:$0xff] %v3269_v23  ;;  %3351 = vrot.lane.b32.xlu1 %v9434_v53, %s11538_s0  ;;  %3924 = vrot.lane.b32.xlu2 %v9591_v3, %s7290_s13 }
 0x73e   :  { %3743 = vst [vmem:[#allocation4 + $0x170] sm:$0xff] %v3733_v51  ;;  %3788 = vrot.lane.b32.xlu0 %v9553_v14, %s7285_s14 }
 0x73f   :  { %v3547_v59 = vpop.permute.xlu1 %3546  ;;  %v9599_v11 = vpop.permute.xlu2 %3209 }
 0x740   :  { %v9601_v2 = vpop.permute.xlu0 %3097  ;;  %v3553_v57 = vsel %vm3552_vm15, %v3547_v59, %v9524_v1 }
 0x741   :  { %v3596_v32 = vsel %vm11544_vm0, %v9502_v54, %v3553_v57  ;;  %vm3118_vm0 = vcmask 424960  }
 0x742   :  { %v3608_v15 = vunpack.c.l.b16 %v3596_v32 }
 0x744   :  { %v6315_v36 = vld [vmem:[#allocation4 + $0x48] sm:$0xf]  ;;  %v6737_v29 = vld [vmem:[#allocation4 + $0x4c] sm:$0xf] }
 0x745   :  { %3241 = vrot.lane.b32.xlu1 %v9444_v7, %s11530_s20  ;;  %3802 = vrot.lane.b32.xlu2 %v9591_v3, %s7291_s11  ;;  %v6316_v30 = vor.u32 %v6741_v27, %v6315_v36  ;;  %v6320_v12 = vor.u32 %v6737_v29, %v6317_v17  ;;  %v3876_v29 = vld [vmem:[#allocation2 + $0x24] sm:$0xff] }
 0x746   :  { %3804 = vrot.lane.b32.xlu0 %v9570_v43, %s7291_s11 }
 0x747   :  { %v9613_v0 = vpop.permute.xlu1 %3550  ;;  %v9615_v52 = vpop.permute.xlu2 %3095  ;;  %4634 = vmatpush.bf16.msrb.mxu2 %v6316_v30  ;;  %4660 = vmatpush.bf16.msra.mxu3 %v6320_v12  ;;  %v3937_v12 = vunpack.c.l.b16 %v3876_v29 }
 0x748   :  { %v3554_v58 = vsel %vm3552_vm15, %v9524_v1, %v9613_v0  ;;  %v9620_v61 = vpop.permute.xlu0 %3928 }
 0x749   :  { %v3609_v54 = vunpack.c.l.b16 %v3554_v58  ;;  %v3941_v62 = vpack.c.b16 %v3937_v12, %v3937_v12 }
 0x74b   :  { %v3616_v47 = vpack.c.b16 %v3609_v54, %v3608_v15  ;;  %4635 = vmatpush.bf16.msrb.mxu2 %v6280_v42  ;;  %4661 = vmatpush.bf16.msra.mxu3 %v6284_v48  ;;  %v3074_v15 = vld [vmem:[#allocation2 + $0x8] sm:$0xf] }
 0x74c   :  { %v3085_v42 = vunpack.c.l.b16 %v3074_v15 }
 0x74d   :  { %3626 = vst [vmem:[#allocation4 + $0x128] sm:$0xff] %v3616_v47  ;;  %3682 = vrot.lane.b32.xlu2 %v9570_v43, %s7241_s15  ;;  %3680 = vrot.lane.b32.xlu1 %v9591_v3, %s7241_s15 }
 0x74e   :  { %3563 = vrot.lane.b32.xlu0 %v9591_v3, %s7297_s27 }
 0x74f   :  { %v3430_v1 = vpop.permute.xlu1 %3429  ;;  %v9628_v55 = vpop.permute.xlu2 %4027 }
 0x750   :  { %v9630_v5 = vpop.permute.xlu0 %3806  ;;  %v3436_v6 = vsel %vm3435_vm1, %v3430_v1, %v9539_v31 }
 0x751   :  { %v3479_v28 = vsel %vm11545_vm7, %v9506_v49, %v3436_v6  ;;  %v3325_v49 = vsel %vm3323_vm10, %v9560_v44, %v9564_v63  ;;  %vm11555_vm7 = vmmov %vm11551_vm8 }
 0x752   :  { %v3491_v17 = vunpack.c.l.b16 %v3479_v28  ;;  %v3375_v41 = vunpack.c.l.b16 %v3325_v49  ;;  %v3938_v49 = vunpack.c.h.b16 %v3876_v29 }
 0x755   :  { %3565 = vrot.lane.b32.xlu1 %v9570_v43, %s7297_s27  ;;  %3446 = vrot.lane.b32.xlu2 %v9591_v3, %s7298_s26 }
 0x756   :  { %3448 = vrot.lane.b32.xlu0 %v9570_v43, %s7298_s26 }
 0x757   :  { %v9641_v23 = vpop.permute.xlu1 %3433  ;;  %v9643_v51 = vpop.permute.xlu2 %3945 }
 0x758   :  { %v3437_v59 = vsel %vm3435_vm1, %v9539_v31, %v9641_v23  ;;  %v9647_v27 = vpop.permute.xlu0 %3684  ;;  %vm11554_vm1 = vmmov %vm11546_vm2 }
 0x759   :  { %v3492_v57 = vunpack.c.l.b16 %v3437_v59  ;;  %v3102_v59 = vsel %vm11548_vm5, %v9615_v52, %v9601_v2  ;;  %vm11559_vm5 = vmmov %vm11555_vm7 }
 0x75b   :  { %v3499_v36 = vpack.c.b16 %v3492_v57, %v3491_v17  ;;  %v3086_v17 = vpack.c.b16 %v3085_v42, %v3085_v42 }
 0x75d   :  { %3509 = vst [vmem:[#allocation4 + $0xe0] sm:$0xff] %v3499_v36  ;;  %4029 = vrot.lane.b32.xlu2 %v9512_v4, %s7292_s19  ;;  %3336 = vrot.lane.b32.xlu1 %v9570_v43, %s7294_s1 }
 0x75e   :  { %3334 = vrot.lane.b32.xlu0 %v9591_v3, %s7294_s1 }
 0x75f   :  { %v3318_v31 = vpop.permute.xlu1 %3317  ;;  %v9657_v30 = vpop.permute.xlu2 %3823 }
 0x760   :  { %v3324_v18 = vsel %vm3323_vm10, %v3318_v31, %v9560_v44  ;;  %v9660_v32 = vpop.permute.xlu0 %3582  ;;  %vm3951_vm10 = vcmask 859136  }
 0x761   :  { %v3362_v4 = vsel %vm11546_vm2, %v9543_v21, %v3324_v18  ;;  %vm11557_vm2 = vcmask 785408  }
 0x762   :  { %v3374_v20 = vunpack.c.l.b16 %v3362_v4 }
 0x764   :  { %v3382_v58 = vpack.c.b16 %v3375_v41, %v3374_v20  ;;  %v3942_v41 = vpack.c.b16 %v3938_v49, %v3938_v49  ;;  %v3080_v49 = vld [vmem:[#allocation2 + $0x24] sm:$0xf] }
 0x765   :  { %3947 = vrot.lane.b32.xlu2 %v3941_v62, %s7293_s12  ;;  %3224 = vrot.lane.b32.xlu1 %v9570_v43, %s7299_s17 }
 0x766   :  { %3392 = vst [vmem:[#allocation4 + $0x98] sm:$0xff] %v3382_v58  ;;  %3222 = vrot.lane.b32.xlu0 %v9591_v3, %s7299_s17 }
 0x767   :  { %v3208_v44 = vpop.permute.xlu1 %3207  ;;  %v9669_v54 = vpop.permute.xlu2 %3701 }
 0x768   :  { %v3212_v21 = vsel %vm3211_vm12, %v9587_v8, %v3208_v44  ;;  %v3213_v48 = vsel %vm3211_vm12, %v3208_v44, %v9599_v11  ;;  %v9673_v47 = vpop.permute.xlu0 %3467  ;;  %v3140_v8 = vsel %vm11549_vm4, %v3086_v17, %v3102_v59  ;;  %v3969_v59 = vunpack.c.l.b16 %v9548_v45 }
 0x769   :  { %v3250_v1 = vsel %vm11547_vm11, %v9581_v25, %v3212_v21  ;;  %v3263_v6 = vunpack.c.l.b16 %v3213_v48  ;;  %v3150_v12 = vunpack.c.l.b16 %v3140_v8  ;;  %vm3829_vm12 = vcmask 867328   ;;  %vm11558_vm11 = vmmov %vm11554_vm1 }
 0x76a   :  { %v3262_v28 = vunpack.c.l.b16 %v3250_v1 }
 0x76c   :  { %v3270_v57 = vpack.c.b16 %v3263_v6, %v3262_v28 }
 0x76d   :  { %3825 = vrot.lane.b32.xlu2 %v3941_v62, %s7295_s24  ;;  %3114 = vrot.lane.b32.xlu1 %v9570_v43, %s7292_s19 }
 0x76e   :  { %3280 = vst [vmem:[#allocation4 + $0x50] sm:$0xff] %v3270_v57  ;;  %3112 = vrot.lane.b32.xlu0 %v9591_v3, %s7292_s19 }
 0x76f   :  { %v9686_v25 = vpop.permute.xlu1 %3099  ;;  %v9688_v36 = vpop.permute.xlu2 %3567 }
 0x770   :  { %v3103_v52 = vsel %vm11550_vm3, %v9601_v2, %v9686_v25  ;;  %v9693_v31 = vpop.permute.xlu0 %3338  ;;  %vm11561_vm3 = vmmov %vm11557_vm2 }
 0x771   :  { %v3151_v18 = vunpack.c.l.b16 %v3103_v52  ;;  %v3179_v52 = vld [vmem:[#allocation2 + $0x24] sm:$0xf] }
 0x773   :  { %v3158_v4 = vpack.c.b16 %v3151_v18, %v3150_v12  ;;  %v3235_v18 = vunpack.c.l.b16 %v3179_v52 }
 0x775   :  { %3168 = vst [vmem:[#allocation4 + $0x8] sm:$0xff] %v3158_v4  ;;  %3949 = vrot.lane.b32.xlu2 %v3942_v41, %s7293_s12  ;;  %3703 = vrot.lane.b32.xlu1 %v3941_v62, %s7270_s29 }
 0x776   :  { %4031 = vrot.lane.b32.xlu0 %v9553_v14, %s7292_s19 }
 0x777   :  { %v9699_v20 = vpop.permute.xlu1 %4025  ;;  %v9701_v29 = vpop.permute.xlu2 %3465 }
 0x778   :  { %v9703_v58 = vpop.permute.xlu0 %4064 }
 0x77c   :  { %v6287_v46 = vld [vmem:[#allocation4 + $0x8] sm:$0xf] }
 0x77d   :  { %3586 = vrot.lane.b32.xlu2 %v3941_v62, %s11529_s22  ;;  %4046 = vrot.lane.b32.xlu1 %v9570_v43, %s11540_s6 }
 0x77e   :  { %4044 = vrot.lane.b32.xlu0 %v9591_v3, %s11540_s6  ;;  %v3291_v3 = vld [vmem:[#allocation2 + $0x24] sm:$0xf] }
 0x77f   :  { %v9710_v2 = vpop.permute.xlu1 %3943  ;;  %v9712_v15 = vpop.permute.xlu2 %4062  ;;  %v3347_v6 = vunpack.c.l.b16 %v3291_v3  ;;  %v3847_v3 = vunpack.c.l.b16 %v9568_v9  ;;  %v6787_v9 = vld [vmem:[#allocation4 + $0x1d8] sm:$0xf0] }
 0x780   :  { %v9714_v44 = vpop.permute.xlu0 %3239 }
 0x781   :  { %v3350_v8 = vpack.c.b16 %v3347_v6, %v3347_v6 }
 0x785   :  { %3705 = vrot.lane.b32.xlu2 %v3942_v41, %s7270_s29  ;;  %3469 = vrot.lane.b32.xlu1 %v3941_v62, %s7260_s16 }
 0x786   :  { %3827 = vrot.lane.b32.xlu0 %v3942_v41, %s7295_s24 }
 0x787   :  { %v9719_v14 = vpop.permute.xlu1 %3821  ;;  %v9721_v42 = vpop.permute.xlu2 %3353 }
 0x788   :  { %v9723_v43 = vpop.permute.xlu0 %3116 }
 0x78d   :  { %3471 = vrot.lane.b32.xlu2 %v3942_v41, %s7260_s16  ;;  %4066 = vrot.lane.b32.xlu1 %v3941_v62, %s7296_s18 }
 0x78e   :  { %3588 = vrot.lane.b32.xlu0 %v3942_v41, %s11529_s22 }
 0x78f   :  { %v9728_v21 = vpop.permute.xlu1 %3699  ;;  %v9730_v48 = vpop.permute.xlu2 %3226 }
 0x790   :  { %v3909_v1 = vpop.permute.xlu0 %3908 }
 0x791   :  { %v3914_v28 = vsel %vm3912_vm14, %v9442_v60, %v3909_v1  ;;  %v3125_v60 = vunpack.c.l.b16 %v3080_v49 }
 0x792   :  { %v3970_v17 = vunpack.c.l.b16 %v3914_v28  ;;  %v3238_v28 = vpack.c.b16 %v3235_v18, %v3235_v18 }
 0x793   :  { %v3128_v6 = vpack.c.b16 %v3125_v60, %v3125_v60 }
 0x794   :  { %v3977_v57 = vpack.c.b16 %v3970_v17, %v3969_v59 }
 0x795   :  { %3131 = vrot.lane.b32.xlu2 %v9444_v7, %s11540_s6  ;;  %3129 = vrot.lane.b32.xlu1 %v9434_v53, %s11540_s6  ;;  %v6796_v53 = vld [vmem:[#allocation4 + $0x220] sm:$0xf0] }
 0x796   :  { %3987 = vst [vmem:[#allocation4 + $0x200] sm:$0xff] %v3977_v57  ;;  %3355 = vrot.lane.b32.xlu0 %v3350_v8, %s11538_s0 }
 0x797   :  { %v9740_v62 = vpop.permute.xlu1 %3584  ;;  %v3925_v12 = vpop.permute.xlu2 %3924 }
 0x798   :  { %v9742_v45 = vpop.permute.xlu0 %3786 }
 0x799   :  { %v3792_v4 = vsel %vm3790_vm9, %v9461_v19, %v9742_v45 }
 0x79a   :  { %v3848_v7 = vunpack.c.l.b16 %v3792_v4 }
 0x79c   :  { %v3855_v59 = vpack.c.b16 %v3848_v7, %v3847_v3 }
 0x79d   :  { %3133 = vrot.lane.b32.xlu2 %v3128_v6, %s11540_s6  ;;  %3243 = vrot.lane.b32.xlu1 %v3238_v28, %s11530_s20  ;;  %v6539_v17 = vld [vmem:[#allocation4 + $0x200] sm:$0xf]  ;;  %v6778_v6 = vld [vmem:[#allocation4 + $0x190] sm:$0xf0] }
 0x79e   :  { %3865 = vst [vmem:[#allocation4 + $0x1b8] sm:$0xff] %v3855_v59  ;;  %4068 = vrot.lane.b32.xlu0 %v3942_v41, %s7296_s18  ;;  %v6540_v57 = vor.u32 %v6796_v53, %v6539_v17  ;;  %v6467_v41 = vld [vmem:[#allocation4 + $0x170] sm:$0xf] }
 0x79f   :  { %v9751_v8 = vpop.permute.xlu1 %3450  ;;  %v9753_v49 = vpop.permute.xlu2 %3802 }
 0x7a0   :  { %4680 = vmatpush.bf16.msra.mxu1 %v6540_v57  ;;  %v3911_v19 = vpop.permute.xlu0 %3910  ;;  %v6468_v57 = vor.u32 %v6778_v6, %v6467_v41  ;;  %v6395_v41 = vld [vmem:[#allocation4 + $0xe0] sm:$0xf]  ;;  %v6760_v6 = vld [vmem:[#allocation4 + $0x100] sm:$0xf0] }
 0x7a1   :  { %v3915_v52 = vsel %vm3912_vm14, %v3909_v1, %v3911_v19  ;;  %v4110_v1 = vld [vmem:[%s11155_s2] sm:$0xff]  ;;  %vm11552_vm14 = vcmask 130048  }
 0x7a2   :  { %v3960_v4 = vsel %vm11551_vm8, %v3915_v52, %v3925_v12  ;;  %v6431_v19 = vld [vmem:[#allocation4 + $0x128] sm:$0xf]  ;;  %v4207_v52 = vunpack.c.h.b16 %v4110_v1  ;;  %v4206_v56 = vunpack.c.l.b16 %v4110_v1  ;;  %vm11553_vm15 = vmmov %vm11552_vm14  ;;  %v6797_v1 = vld [vmem:[#allocation4 + $0x228] sm:$0xf0] }
 0x7a3   :  { %v3971_v59 = vunpack.c.l.b16 %v3960_v4  ;;  %vm11562_vm8 = vmmov %vm11559_vm5 }
 0x7a4   :  { %v9765_v22 = vpack.c.b16 %v4207_v52, %v4207_v52  ;;  %v9767_v13 = vpack.c.b16 %v4206_v56, %v4206_v56  ;;  %v6396_v56 = vor.u32 %v6760_v6, %v6395_v41 }
 0x7a5   :  { %v6503_v60 = vld [vmem:[#allocation4 + $0x1b8] sm:$0xf] }
 0x7a6   :  { %v6504_v18 = vor.u32 %v6787_v9, %v6503_v60  ;;  %v6769_v9 = vld [vmem:[#allocation4 + $0x148] sm:$0xf0]  ;;  %6602 = vmatmul.msk.bf16.vlgmr.msrb.gmra.mxu0 %vm11552_vm14, %v9765_v22  ;;  %6601 = vmatmul.msk.bf16.vlgmr.msrb.gmra.mxu1 %vm11553_vm15, %v9765_v22  ;;  %vm11563_vm15 = vmmov %vm11559_vm5 }
 0x7a7   :  { %v9757_v3 = vpop.permute.xlu1 %4048  ;;  %v9759_v7 = vpop.permute.xlu2 %3682  ;;  %4636 = vmatmul.bf16.vlgmr.msrb.gmra.mxu2 %v9767_v13  ;;  %4662 = vmatmul.bf16.vlgmr.msra.gmra.mxu3 %v9767_v13 }
 0x7a8   :  { %4681 = vmatpush.bf16.msra.mxu1 %v6504_v18  ;;  %v3927_v28 = vpop.permute.xlu0 %3926  ;;  %v6432_v18 = vor.u32 %v6769_v9, %v6431_v19 }
 0x7a9   :  { %v3931_v53 = vsel %vm3930_vm6, %v3925_v12, %v3927_v28 }
 0x7aa   :  { %v3972_v17 = vunpack.c.l.b16 %v3931_v53 }
 0x7ac   :  { %v3978_v60 = vpack.c.b16 %v3972_v17, %v3971_v59  ;;  %4682 = vmatpush.bf16.msra.mxu1 %v6468_v57  ;;  %v4033_v59 = vsel %vm3118_vm0, %v9699_v20, %v9628_v55  ;;  %v6359_v17 = vld [vmem:[#allocation4 + $0x98] sm:$0xf]  ;;  %v6751_v57 = vld [vmem:[#allocation4 + $0xb8] sm:$0xf0]  ;;  %v6323_v20 = vld [vmem:[#allocation4 + $0x50] sm:$0xf] }
 0x7ad   :  { %v4076_v52 = vsel %vm11554_vm1, %v9526_v10, %v4033_v59  ;;  %vm11564_vm1 = vcmask 1014784  }
 0x7ae   :  { %3988 = vst [vmem:[#allocation4 + $0x208] sm:$0xff] %v3978_v60  ;;  %v6360_v60 = vor.u32 %v6751_v57, %v6359_v17 }
 0x7af   :  { %v9769_v12 = vpop.permute.xlu1 %3351  ;;  %v9771_v4 = vpop.permute.xlu2 %3446 }
 0x7b0   :  { %4683 = vmatpush.bf16.msra.mxu1 %v6432_v18  ;;  %v3789_v53 = vpop.permute.xlu0 %3788 }
 0x7b1   :  { %v3793_v19 = vsel %vm3790_vm9, %v9742_v45, %v3789_v53  ;;  %vm11556_vm9 = vmmov %vm11552_vm14  ;;  %vm3452_vm14 = vcmask 277504  }
 0x7b2   :  { %v3838_v41 = vsel %vm11555_vm7, %v3793_v19, %v9753_v49  ;;  %v3932_v19 = vsel %vm3930_vm6, %v3927_v28, %v9620_v61  ;;  %vm11560_vm4 = vmmov %vm11556_vm9  ;;  %vm3569_vm6 = vcmask 269312  }
 0x7b3   :  { %v3849_v17 = vunpack.c.l.b16 %v3838_v41  ;;  %vm11565_vm7 = vmmov %vm11560_vm4 }
 0x7b4   :  { %4684 = vmatpush.bf16.msra.mxu1 %v6396_v56  ;;  %v4088_v56 = vunpack.c.l.b16 %v4076_v52 }
 0x7b5   :  { %v6547_v9 = vld [vmem:[#allocation4 + $0x208] sm:$0xf] }
 0x7b6   :  { %v6548_v18 = vor.u32 %v6797_v1, %v6547_v9  ;;  %v6324_v1 = vor.u32 %v6742_v24, %v6323_v20 }
 0x7b7   :  { %v9788_v6 = vpop.permute.xlu1 %3241  ;;  %v9790_v26 = vpop.permute.xlu2 %4029 }
 0x7b8   :  { %v4034_v45 = vsel %vm3118_vm0, %v9628_v55, %v9790_v26  ;;  %4685 = vmatpush.bf16.msra.mxu1 %v6360_v60  ;;  %4732 = vmatpush.bf16.msrb.mxu3 %v6548_v18  ;;  %v3805_v53 = vpop.permute.xlu0 %3804  ;;  %v3952_v55 = vsel %vm3951_vm10, %v9710_v2, %v9643_v51 }
 0x7b9   :  { %v4089_v10 = vunpack.c.l.b16 %v4034_v45  ;;  %v3809_v59 = vsel %vm11556_vm9, %v9753_v49, %v3805_v53  ;;  %v3963_v52 = vsel %vm11557_vm2, %v3932_v19, %v3952_v55  ;;  %v6288_v49 = vor.u32 %v6733_v38, %v6287_v46  ;;  %v6805_v45 = vld [vmem:[#allocation4 + $0x268] sm:$0xf0]  ;;  %vm11566_vm9 = vmmov %vm11560_vm4 }
 0x7ba   :  { %v3850_v57 = vunpack.c.l.b16 %v3809_v59  ;;  %v3973_v41 = vunpack.c.l.b16 %v3963_v52  ;;  %v3810_v38 = vsel %vm11560_vm4, %v3805_v53, %v9630_v5  ;;  %v6793_v55 = vld [vmem:[#allocation4 + $0x20c] sm:$0xf]  ;;  %vm11568_vm4 = vmmov %vm11557_vm2 }
 0x7bb   :  { %v4096_v9 = vpack.c.b16 %v4089_v10, %v4088_v56  ;;  %v6577_v56 = vld [vmem:[#allocation4 + $0x26c] sm:$0xf0]  ;;  %v6541_v10 = vld [vmem:[#allocation4 + $0x224] sm:$0xf0] }
 0x7bc   :  { %v3856_v40 = vpack.c.b16 %v3850_v57, %v3849_v17  ;;  %4686 = vmatpush.bf16.msra.mxu1 %v6324_v1  ;;  %v6788_v57 = vld [vmem:[#allocation4 + $0x1e0] sm:$0xf0]  ;;  %v6549_v1 = vld [vmem:[#allocation4 + $0x22c] sm:$0xf0] }
 0x7bd   :  { %4106 = vst [vmem:[#allocation4 + $0x248] sm:$0xff] %v4096_v9 }
 0x7be   :  { %3866 = vst [vmem:[#allocation4 + $0x1c0] sm:$0xff] %v3856_v40 }
 0x7bf   :  { %v3681_v60 = vpop.permute.xlu1 %3680  ;;  %v9803_v18 = vpop.permute.xlu2 %3947 }
 0x7c0   :  { %v3687_v24 = vsel %vm11558_vm11, %v3681_v60, %v9759_v7  ;;  %v3716_v61 = vsel %vm11559_vm5, %v9491_v35, %v3681_v60  ;;  %v3953_v28 = vsel %vm3951_vm10, %v9643_v51, %v9803_v18  ;;  %4687 = vmatpush.bf16.msra.mxu1 %v6288_v49  ;;  %v3564_v2 = vpop.permute.xlu0 %3563  ;;  %v6792_v35 = vld [vmem:[#allocation4 + $0x204] sm:$0xf]  ;;  %v3830_v51 = vsel %vm3829_vm12, %v9719_v14, %v9657_v30 }
 0x7c1   :  { %v3727_v20 = vunpack.c.l.b16 %v3716_v61  ;;  %v3728_v40 = vunpack.c.l.b16 %v3687_v24  ;;  %v3974_v46 = vunpack.c.l.b16 %v3953_v28  ;;  %v3841_v52 = vsel %vm11561_vm3, %v3810_v38, %v3830_v51  ;;  %vm11569_vm3 = vmmov %vm11562_vm8 }
 0x7c2   :  { %v3599_v60 = vsel %vm11562_vm8, %v9613_v0, %v3564_v2  ;;  %v6544_v61 = vor.u32 %v6792_v35, %v6541_v10  ;;  %v3482_v14 = vsel %vm11563_vm15, %v9641_v23, %v9771_v4  ;;  %v3474_v38 = vsel %vm11564_vm1, %v9701_v29, %v9673_v47  ;;  %vm11574_vm1 = vmmov %vm11557_vm2 }
 0x7c3   :  { %v3734_v59 = vpack.c.b16 %v3728_v40, %v3727_v20  ;;  %v3979_v17 = vpack.c.b16 %v3974_v46, %v3973_v41  ;;  %4688 = vmatmul.bf16.vlgmr.msra.gmra.mxu1 %v9767_v13  ;;  %v6552_v20 = vor.u32 %v6793_v55, %v6549_v1  ;;  %v6783_v40 = vld [vmem:[#allocation4 + $0x1bc] sm:$0xf]  ;;  %v6505_v46 = vld [vmem:[#allocation4 + $0x1dc] sm:$0xf0]  ;;  %v3851_v0 = vunpack.c.l.b16 %v3841_v52 }
 0x7c4   :  { %v6575_v19 = vld [vmem:[#allocation4 + $0x248] sm:$0xf]  ;;  %v6801_v9 = vld [vmem:[#allocation4 + $0x24c] sm:$0xf]  ;;  %v3493_v29 = vunpack.c.l.b16 %v3482_v14  ;;  %vm3340_vm11 = vcmask 408576   ;;  %vm11567_vm5 = vcmask 97280  }
 0x7c5   :  { %3744 = vst [vmem:[#allocation4 + $0x178] sm:$0xff] %v3734_v59  ;;  %v6576_v5 = vor.u32 %v6805_v45, %v6575_v19  ;;  %v6580_v53 = vor.u32 %v6801_v9, %v6577_v56  ;;  %v6511_v49 = vld [vmem:[#allocation4 + $0x1c0] sm:$0xf]  ;;  %v6784_v10 = vld [vmem:[#allocation4 + $0x1c4] sm:$0xf]  ;;  %v6508_v19 = vor.u32 %v6783_v40, %v6505_v46  ;;  %vm3228_vm8 = vcmask 416768  }
 0x7c6   :  { %3989 = vst [vmem:[#allocation4 + $0x210] sm:$0xff] %v3979_v17  ;;  %v6512_v24 = vor.u32 %v6788_v57, %v6511_v49  ;;  %v6513_v59 = vld [vmem:[#allocation4 + $0x1e4] sm:$0xf0]  ;;  %v3610_v17 = vunpack.c.l.b16 %v3599_v60  ;;  %v6779_v9 = vld [vmem:[#allocation4 + $0x198] sm:$0xf0] }
 0x7c7   :  { %v3566_v28 = vpop.permute.xlu1 %3565  ;;  %v9824_v41 = vpop.permute.xlu2 %3825  ;;  %4700 = vmatpush.bf16.msra.mxu0 %v6576_v5  ;;  %4726 = vmatpush.bf16.msra.mxu2 %v6580_v53  ;;  %v6774_v53 = vld [vmem:[#allocation4 + $0x174] sm:$0xf]  ;;  %v6469_v49 = vld [vmem:[#allocation4 + $0x194] sm:$0xf0]  ;;  %v6433_v60 = vld [vmem:[#allocation4 + $0x14c] sm:$0xf0] }
 0x7c8   :  { %v3570_v45 = vsel %vm3569_vm6, %v3564_v2, %v3566_v28  ;;  %v3831_v56 = vsel %vm3829_vm12, %v9657_v30, %v9824_v41  ;;  %4733 = vmatpush.bf16.msrb.mxu3 %v6512_v24  ;;  %v3449_v23 = vpop.permute.xlu0 %3448  ;;  %v6477_v30 = vld [vmem:[#allocation4 + $0x19c] sm:$0xf0]  ;;  %v6765_v14 = vld [vmem:[#allocation4 + $0x12c] sm:$0xf]  ;;  %v6472_v46 = vor.u32 %v6774_v53, %v6469_v49 }
 0x7c9   :  { %v3611_v57 = vunpack.c.l.b16 %v3570_v45  ;;  %v3852_v35 = vunpack.c.l.b16 %v3831_v56  ;;  %v3453_v1 = vsel %vm3452_vm14, %v9771_v4, %v3449_v23  ;;  %v3454_v2 = vsel %vm3452_vm14, %v3449_v23, %v9751_v8  ;;  %v6361_v53 = vld [vmem:[#allocation4 + $0xbc] sm:$0xf0] }
 0x7ca   :  { %v3494_v51 = vunpack.c.l.b16 %v3453_v1  ;;  %6603 = vmatmul.msk.bf16.vlgmr.msra.gmra.mxu0 %vm11565_vm7, %v9765_v22  ;;  %6604 = vmatmul.msk.bf16.vlgmr.msra.gmra.mxu2 %vm11566_vm9, %v9765_v22  ;;  %v9842_v5 = vsel %vm11557_vm2, %v3454_v2, %v3474_v38  ;;  %v6516_v4 = vor.u32 %v6784_v10, %v6513_v59  ;;  %v3358_v38 = vsel %vm11567_vm5, %v9769_v12, %v9721_v42  ;;  %vm11575_vm7 = vmmov %vm11569_vm3 }
 0x7cb   :  { %4706 = vmatpush.bf16.msrb.mxu0 %v6544_v61  ;;  %4758 = vmatpush.bf16.msrb.mxu2 %v6552_v20  ;;  %v3617_v55 = vpack.c.b16 %v3611_v57, %v3610_v17  ;;  %v3857_v52 = vpack.c.b16 %v3852_v35, %v3851_v0  ;;  %v6436_v56 = vor.u32 %v6765_v14, %v6433_v60  ;;  %v7300_v23 = vmov 3   ;;  %v7094_v35 = vld [vmem:[%s11151_s3] sm:$0xff]  ;;  %vm11576_vm9 = vmmov %vm11569_vm3 }
 0x7cc   :  { %v3500_v8 = vpack.c.b16 %v3494_v51, %v3493_v29  ;;  %v6475_v24 = vld [vmem:[#allocation4 + $0x178] sm:$0xf]  ;;  %v6775_v61 = vld [vmem:[#allocation4 + $0x17c] sm:$0xf]  ;;  %7049 = vset.pattern.permute.xlu1 %v7300_v23  ;;  %v3571_v10 = vsel %vm3569_vm6, %v3566_v28, %v9688_v36  ;;  %vm11571_vm6 = vmmov %vm11557_vm2  ;;  %vm11572_vm14 = vcmask 105472   ;;  %vm11577_vm2 = vcmask 261120  }
 0x7cd   :  { %3627 = vst [vmem:[#allocation4 + $0x130] sm:$0xff] %v3617_v55  ;;  %v6476_v20 = vor.u32 %v6779_v9, %v6475_v24  ;;  %v6480_v40 = vor.u32 %v6775_v61, %v6477_v30  ;;  %4202 = vperm.xlu1 %7049, %v7094_v35   ;;  %v6441_v9 = vld [vmem:[#allocation4 + $0x154] sm:$0xf0]  ;;  %v6397_v30 = vld [vmem:[#allocation4 + $0x104] sm:$0xf0]  ;;  %vm11579_vm5 = vmmov %vm11574_vm1 }
 0x7ce   :  { %3867 = vst [vmem:[#allocation4 + $0x1c8] sm:$0xff] %v3857_v52  ;;  %v6761_v61 = vld [vmem:[#allocation4 + $0x108] sm:$0xf0] }
 0x7cf   :  { %4707 = vmatpush.bf16.msrb.mxu0 %v6508_v19  ;;  %4759 = vmatpush.bf16.msrb.mxu2 %v6516_v4  ;;  %3510 = vst [vmem:[#allocation4 + $0xe8] sm:$0xff] %v3500_v8  ;;  %v3950_v0 = vpop.permute.xlu2 %3949  ;;  %v3337_v45 = vpop.permute.xlu1 %3336  ;;  %v6770_v19 = vld [vmem:[#allocation4 + $0x150] sm:$0xf0]  ;;  %v6756_v4 = vld [vmem:[#allocation4 + $0xe4] sm:$0xf] }
 0x7d0   :  { %4734 = vmatpush.bf16.msrb.mxu3 %v6476_v20  ;;  %v3954_v59 = vsel %vm3951_vm10, %v9803_v18, %v3950_v0  ;;  %v3342_v17 = vsel %vm3340_vm11, %v3337_v45, %v9693_v31  ;;  %v3335_v57 = vpop.permute.xlu0 %3334  ;;  %v3379_v18 = vunpack.c.l.b16 %v3358_v38  ;;  %vm11570_vm10 = vcmask 1006592  }
 0x7d1   :  { %v3975_v1 = vunpack.c.l.b16 %v3954_v59  ;;  %v3368_v29 = vsel %vm11568_vm4, %v3342_v17, %v9769_v12  ;;  %v3341_v2 = vsel %vm3340_vm11, %v3335_v57, %v3337_v45  ;;  %v3365_v36 = vsel %vm11569_vm3, %v9564_v63, %v3335_v57  ;;  %v6747_v12 = vld [vmem:[#allocation4 + $0x9c] sm:$0xf]  ;;  %vm11573_vm15 = vmmov %vm11570_vm10 }
 0x7d2   :  { %v3378_v28 = vunpack.c.l.b16 %v3368_v29  ;;  %v3376_v31 = vunpack.c.l.b16 %v3365_v36  ;;  %v3377_v51 = vunpack.c.l.b16 %v3341_v2  ;;  %v3591_v55 = vsel %vm11570_vm10, %v9660_v32, %v9740_v62 }
 0x7d3   :  { %4708 = vmatpush.bf16.msrb.mxu0 %v6472_v46  ;;  %4760 = vmatpush.bf16.msrb.mxu2 %v6480_v40  ;;  %v3980_v52 = vpack.c.b16 %v3975_v1, %v3975_v1  ;;  %v3602_v49 = vsel %vm11571_vm6, %v3571_v10, %v3591_v55  ;;  %v6405_v40 = vld [vmem:[#allocation4 + $0x10c] sm:$0xf0]  ;;  %v6400_v46 = vor.u32 %v6756_v4, %v6397_v30  ;;  %v6369_v4 = vld [vmem:[#allocation4 + $0xc4] sm:$0xf0]  ;;  %vm11578_vm11 = vcmask 998400   ;;  %vm11583_vm6 = vmmov %vm11575_vm7 }
 0x7d4   :  { %v3384_v60 = vpack.c.b16 %v3379_v18, %v3378_v28  ;;  %v3383_v63 = vpack.c.b16 %v3377_v51, %v3376_v31  ;;  %v6439_v8 = vld [vmem:[#allocation4 + $0x130] sm:$0xf]  ;;  %v6766_v24 = vld [vmem:[#allocation4 + $0x134] sm:$0xf]  ;;  %v3246_v0 = vsel %vm11572_vm14, %v9714_v44, %v9788_v6  ;;  %v3612_v45 = vunpack.c.l.b16 %v3602_v49  ;;  %vm11580_vm4 = vmmov %vm11578_vm11 }
 0x7d5   :  { %3990 = vst [vmem:[#allocation4 + $0x218] sm:$0xf] %v3980_v52  ;;  %v6440_v14 = vor.u32 %v6770_v19, %v6439_v8  ;;  %v6444_v20 = vor.u32 %v6766_v24, %v6441_v9  ;;  %v6364_v10 = vor.u32 %v6747_v12, %v6361_v53  ;;  %v3267_v28 = vunpack.c.l.b16 %v3246_v0  ;;  %v6325_v9 = vld [vmem:[#allocation4 + $0x74] sm:$0xf0]  ;;  %v6752_v52 = vld [vmem:[#allocation4 + $0xc0] sm:$0xf0]  ;;  %vm11581_vm3 = vmmov %vm11580_vm4 }
 0x7d6   :  { %3394 = vst [vmem:[#allocation4 + $0xa8] sm:$0xff] %v3384_v60  ;;  %v6403_v32 = vld [vmem:[#allocation4 + $0xe8] sm:$0xf]  ;;  %v6757_v38 = vld [vmem:[#allocation4 + $0xec] sm:$0xf]  ;;  %vm11582_vm10 = vcmask 113664  }
 0x7d7   :  { %4709 = vmatpush.bf16.msrb.mxu0 %v6436_v56  ;;  %3393 = vst [vmem:[#allocation4 + $0xa0] sm:$0xff] %v3383_v63  ;;  %v9868_v23 = vpop.permute.xlu2 %3586  ;;  %v3225_v56 = vpop.permute.xlu1 %3224  ;;  %4735 = vmatpush.bf16.msrb.mxu3 %v6440_v14  ;;  %v6404_v35 = vor.u32 %v6761_v61, %v6403_v32  ;;  %v6408_v1 = vor.u32 %v6757_v38, %v6405_v40  ;;  %v6729_v8 = vld [vmem:[#allocation4 + $0xc] sm:$0xf]  ;;  %v6289_v24 = vld [vmem:[#allocation4 + $0x2c] sm:$0xf0]  ;;  %vm11585_vm14 = vcmask 1014784  }
 0x7d8   :  { %4761 = vmatpush.bf16.msrb.mxu2 %v6444_v20  ;;  %v3592_v59 = vsel %vm11573_vm15, %v9740_v62, %v9868_v23  ;;  %v3230_v17 = vsel %vm3228_vm8, %v3225_v56, %v9730_v48  ;;  %v3223_v57 = vpop.permute.xlu0 %3222  ;;  %v6738_v48 = vld [vmem:[#allocation4 + $0x54] sm:$0xf]  ;;  %v6555_v14 = vld [vmem:[#allocation4 + $0x210] sm:$0xf]  ;;  %v6292_v0 = vor.u32 %v6729_v8, %v6289_v24  ;;  %vm11586_vm15 = vmmov %vm11585_vm14 }
 0x7d9   :  { %v3613_v29 = vunpack.c.l.b16 %v3592_v59  ;;  %v3256_v2 = vsel %vm11574_vm1, %v3230_v17, %v9714_v44  ;;  %v3229_v36 = vsel %vm3228_vm8, %v3223_v57, %v3225_v56  ;;  %v3253_v18 = vsel %vm11575_vm7, %v9599_v11, %v3223_v57  ;;  %v6798_v20 = vld [vmem:[#allocation4 + $0x230] sm:$0xf0]  ;;  %v6743_v59 = vld [vmem:[#allocation4 + $0x78] sm:$0xf0]  ;;  %v6333_v17 = vld [vmem:[#allocation4 + $0x7c] sm:$0xf0] }
 0x7da   :  { %v3266_v31 = vunpack.c.l.b16 %v3256_v2  ;;  %v3264_v51 = vunpack.c.l.b16 %v3253_v18  ;;  %v3265_v62 = vunpack.c.l.b16 %v3229_v36  ;;  %v6328_v53 = vor.u32 %v6738_v48, %v6325_v9  ;;  %vm11584_vm8 = vmmov %vm11582_vm10 }
 0x7db   :  { %4710 = vmatpush.bf16.msrb.mxu0 %v6400_v46  ;;  %v3618_v19 = vpack.c.b16 %v3613_v29, %v3612_v45  ;;  %4736 = vmatpush.bf16.msrb.mxu3 %v6404_v35  ;;  %v3688_v45 = vsel %vm11577_vm2, %v9759_v7, %v9647_v27  ;;  %v6556_v56 = vor.u32 %v6798_v20, %v6555_v14  ;;  %v6519_v35 = vld [vmem:[#allocation4 + $0x1c8] sm:$0xf]  ;;  %v6780_v20 = vld [vmem:[#allocation4 + $0x1a0] sm:$0xf0]  ;;  %vm4070_vm1 = vcmask 850944   ;;  %vm11587_vm7 = vmmov %vm11584_vm8 }
 0x7dc   :  { %4762 = vmatpush.bf16.msrb.mxu2 %v6408_v1  ;;  %v3272_v30 = vpack.c.b16 %v3267_v28, %v3266_v31  ;;  %v3271_v55 = vpack.c.b16 %v3265_v62, %v3264_v51  ;;  %v3708_v57 = vsel %vm11578_vm11, %v9728_v21, %v9669_v54  ;;  %v6789_v1 = vld [vmem:[#allocation4 + $0x1e8] sm:$0xf0]  ;;  %vm11590_vm2 = vcmask 130048   ;;  %vm11591_vm11 = vmmov %vm11587_vm7 }
 0x7dd   :  { %3628 = vst [vmem:[#allocation4 + $0x138] sm:$0xff] %v3618_v19  ;;  %v6520_v51 = vor.u32 %v6789_v1, %v6519_v35 }
 0x7de   :  { %3282 = vst [vmem:[#allocation4 + $0x60] sm:$0xff] %v3272_v30  ;;  %v6367_v44 = vld [vmem:[#allocation4 + $0xa0] sm:$0xf]  ;;  %v6748_v12 = vld [vmem:[#allocation4 + $0xa4] sm:$0xf] }
 0x7df   :  { %4711 = vmatpush.bf16.msrb.mxu0 %v6364_v10  ;;  %3281 = vst [vmem:[#allocation4 + $0x58] sm:$0xff] %v3271_v55  ;;  %v3706_v11 = vpop.permute.xlu2 %3705  ;;  %v9880_v49 = vpop.permute.xlu1 %3114  ;;  %v6368_v60 = vor.u32 %v6752_v52, %v6367_v44  ;;  %v6372_v63 = vor.u32 %v6748_v12, %v6369_v4  ;;  %v6734_v55 = vld [vmem:[#allocation4 + $0x30] sm:$0xf0]  ;;  %v6297_v52 = vld [vmem:[#allocation4 + $0x34] sm:$0xf0] }
 0x7e0   :  { %v3113_v61 = vpop.permute.xlu0 %3112 }
 0x7e1   :  { %4737 = vmatpush.bf16.msrb.mxu3 %v6368_v60  ;;  %4763 = vmatpush.bf16.msrb.mxu2 %v6372_v63  ;;  %v3119_v40 = vsel %vm3118_vm0, %v3113_v61, %v9880_v49  ;;  %v3143_v46 = vsel %vm11576_vm9, %v9686_v25, %v3113_v61  ;;  %v3719_v25 = vsel %vm11579_vm5, %v3688_v45, %v3708_v57  ;;  %vm11589_vm9 = vcmask 1006592  }
 0x7e2   :  { %v3152_v32 = vunpack.c.l.b16 %v3143_v46  ;;  %v3153_v38 = vunpack.c.l.b16 %v3119_v40  ;;  %v3729_v62 = vunpack.c.l.b16 %v3719_v25 }
 0x7e3   :  { %4712 = vmatpush.bf16.msrb.mxu0 %v6328_v53 }
 0x7e4   :  { %v3159_v10 = vpack.c.b16 %v3153_v38, %v3152_v32  ;;  %v6447_v38 = vld [vmem:[#allocation4 + $0x138] sm:$0xf] }
 0x7e6   :  { %3169 = vst [vmem:[#allocation4 + $0x10] sm:$0xff] %v3159_v10  ;;  %v6331_v29 = vld [vmem:[#allocation4 + $0x58] sm:$0xf]  ;;  %v6739_v2 = vld [vmem:[#allocation4 + $0x5c] sm:$0xf] }
 0x7e7   :  { %4713 = vmatpush.bf16.msrb.mxu0 %v6292_v0  ;;  %v3472_v36 = vpop.permute.xlu2 %3471  ;;  %v3704_v18 = vpop.permute.xlu1 %3703  ;;  %v6332_v27 = vor.u32 %v6743_v59, %v6331_v29  ;;  %v6336_v7 = vor.u32 %v6739_v2, %v6333_v17  ;;  %v6771_v0 = vld [vmem:[#allocation4 + $0x158] sm:$0xf0] }
 0x7e8   :  { %v3709_v28 = vsel %vm11580_vm4, %v9669_v54, %v3704_v18  ;;  %v3710_v31 = vsel %vm11581_vm3, %v3704_v18, %v3706_v11  ;;  %v4032_v21 = vpop.permute.xlu0 %4031  ;;  %v6448_v35 = vor.u32 %v6771_v0, %v6447_v38  ;;  %v6485_v38 = vld [vmem:[#allocation4 + $0x1a4] sm:$0xf0]  ;;  %vm11592_vm4 = vcmask 97280   ;;  %vm11594_vm3 = vmmov %vm11590_vm2 }
 0x7e9   :  { %v3730_v19 = vunpack.c.l.b16 %v3709_v28  ;;  %v3731_v48 = vunpack.c.l.b16 %v3710_v31  ;;  %4738 = vmatpush.bf16.msrb.mxu3 %v6332_v27  ;;  %4764 = vmatpush.bf16.msrb.mxu2 %v6336_v7  ;;  %v4035_v60 = vsel %vm3118_vm0, %v9790_v26, %v4032_v21  ;;  %v3495_v26 = vunpack.c.l.b16 %v9842_v5  ;;  %v6585_v31 = vld [vmem:[#allocation4 + $0x274] sm:$0xf0] }
 0x7ea   :  { %4714 = vmatmul.bf16.vlgmr.msrb.gmra.mxu0 %v9767_v13  ;;  %v4071_v21 = vsel %vm4070_vm1, %v9712_v15, %v9703_v58 }
 0x7eb   :  { %4784 = vmatpush.bf16.msra.mxu0 %v6556_v56  ;;  %v3735_v9 = vpack.c.b16 %v3730_v19, %v3729_v62  ;;  %v3736_v30 = vpack.c.b16 %v3731_v48, %v3731_v48 }
 0x7ed   :  { %3745 = vst [vmem:[#allocation4 + $0x180] sm:$0xff] %v3735_v9  ;;  %v6295_v4 = vld [vmem:[#allocation4 + $0x10] sm:$0xf]  ;;  %v6730_v44 = vld [vmem:[#allocation4 + $0x14] sm:$0xf] }
 0x7ee   :  { %3746 = vst [vmem:[#allocation4 + $0x188] sm:$0xf] %v3736_v30  ;;  %v6296_v12 = vor.u32 %v6734_v55, %v6295_v4  ;;  %v6300_v54 = vor.u32 %v6730_v44, %v6297_v52  ;;  %v6794_v9 = vld [vmem:[#allocation4 + $0x214] sm:$0xf]  ;;  %v6557_v30 = vld [vmem:[#allocation4 + $0x234] sm:$0xf0] }
 0x7ef   :  { %4785 = vmatpush.bf16.msra.mxu0 %v6520_v51  ;;  %v9897_v53 = vpop.permute.xlu2 %3131  ;;  %v4047_v11 = vpop.permute.xlu1 %4046 }
 0x7f0   :  { %4739 = vmatpush.bf16.msrb.mxu3 %v6296_v12  ;;  %4765 = vmatpush.bf16.msrb.mxu2 %v6300_v54  ;;  %v4045_v63 = vpop.permute.xlu0 %4044  ;;  %v4051_v18 = vsel %vm11587_vm7, %v4047_v11, %v9757_v3  ;;  %v6560_v54 = vor.u32 %v6794_v9, %v6557_v30  ;;  %v6790_v30 = vld [vmem:[#allocation4 + $0x1f0] sm:$0xf0] }
 0x7f1   :  { %v4050_v8 = vsel %vm11582_vm10, %v4045_v63, %v4047_v11  ;;  %v4079_v24 = vsel %vm11583_vm6, %v4035_v60, %v4045_v63  ;;  %v6762_v60 = vld [vmem:[#allocation4 + $0x110] sm:$0xf0]  ;;  %v6785_v63 = vld [vmem:[#allocation4 + $0x1cc] sm:$0xf]  ;;  %vm11595_vm10 = vmmov %vm11590_vm2 }
 0x7f2   :  { %v4090_v61 = vunpack.c.l.b16 %v4079_v24  ;;  %v4091_v14 = vunpack.c.l.b16 %v4050_v8  ;;  %v6521_v8 = vld [vmem:[#allocation4 + $0x1ec] sm:$0xf0]  ;;  %vm11596_vm6 = vmmov %vm11590_vm2 }
 0x7f3   :  { %4740 = vmatmul.bf16.vlgmr.msrb.gmra.mxu3 %v9767_v13  ;;  %4766 = vmatmul.bf16.vlgmr.msrb.gmra.mxu2 %v9767_v13 }
 0x7f4   :  { %v4097_v40 = vpack.c.b16 %v4091_v14, %v4090_v61  ;;  %v6483_v46 = vld [vmem:[#allocation4 + $0x180] sm:$0xf]  ;;  %v6524_v14 = vor.u32 %v6785_v63, %v6521_v8 }
 0x7f5   :  { %v6484_v32 = vor.u32 %v6780_v20, %v6483_v46  ;;  %v6753_v20 = vld [vmem:[#allocation4 + $0xc8] sm:$0xf0]  ;;  %v6375_v46 = vld [vmem:[#allocation4 + $0xa8] sm:$0xf] }
 0x7f6   :  { %4107 = vst [vmem:[#allocation4 + $0x250] sm:$0xff] %v4097_v40 }
 0x7f7   :  { %v3134_v45 = vpop.permute.xlu2 %3133  ;;  %v3470_v56 = vpop.permute.xlu1 %3469  ;;  %4786 = vmatpush.bf16.msra.mxu0 %v6484_v32  ;;  %v6776_v32 = vld [vmem:[#allocation4 + $0x184] sm:$0xf] }
 0x7f8   :  { %v3137_v10 = vsel %vm11584_vm8, %v9897_v53, %v3134_v45  ;;  %v3475_v59 = vsel %vm11585_vm14, %v9673_v47, %v3470_v56  ;;  %v3476_v17 = vsel %vm11586_vm15, %v3470_v56, %v3472_v36  ;;  %v3828_v57 = vpop.permute.xlu0 %3827  ;;  %v6806_v47 = vld [vmem:[#allocation4 + $0x270] sm:$0xf0]  ;;  %vm11597_vm8 = vmmov %vm11590_vm2  ;;  %vm11740_vm14 = vcmask 31744  }
 0x7f9   :  { %v3156_v1 = vunpack.c.l.b16 %v3137_v10  ;;  %v3496_v25 = vunpack.c.l.b16 %v3475_v59  ;;  %v3497_v29 = vunpack.c.l.b16 %v3476_v17  ;;  %v3832_v2 = vsel %vm3829_vm12, %v9824_v41, %v3828_v57  ;;  %vm11588_vm12 = vmmov %vm11579_vm5 }
 0x7fa   :  { %v3853_v5 = vunpack.c.l.b16 %v3832_v2  ;;  %v4082_v41 = vsel %vm11588_vm12, %v4051_v18, %v4071_v21  ;;  %v6376_v57 = vor.u32 %v6753_v20, %v6375_v46  ;;  %v6339_v2 = vld [vmem:[#allocation4 + $0x60] sm:$0xf]  ;;  %v6341_v46 = vld [vmem:[#allocation4 + $0x84] sm:$0xf0]  ;;  %vm11741_vm15 = vcmask 64512  }
 0x7fb   :  { %v3161_v27 = vpack.c.b16 %v3156_v1, %v3156_v1  ;;  %v3501_v7 = vpack.c.b16 %v3496_v25, %v3495_v26  ;;  %v3502_v28 = vpack.c.b16 %v3497_v29, %v3497_v29  ;;  %4787 = vmatpush.bf16.msra.mxu0 %v6448_v35  ;;  %v4092_v52 = vunpack.c.l.b16 %v4082_v41  ;;  %v6807_v35 = vld [vmem:[#allocation4 + $0x278] sm:$0xf0]  ;;  %v6593_v1 = vld [vmem:[#allocation4 + $0x27c] sm:$0xf0]  ;;  %v6413_v41 = vld [vmem:[#allocation4 + $0x114] sm:$0xf0] }
 0x7fc   :  { %v3858_v36 = vpack.c.b16 %v3853_v5, %v3853_v5  ;;  %v6799_v25 = vld [vmem:[#allocation4 + $0x238] sm:$0xf0]  ;;  %v6449_v5 = vld [vmem:[#allocation4 + $0x15c] sm:$0xf0] }
 0x7fd   :  { %3171 = vst [vmem:[#allocation4 + $0x20] sm:$0xf] %v3161_v27  ;;  %v6583_v51 = vld [vmem:[#allocation4 + $0x250] sm:$0xf]  ;;  %v6802_v62 = vld [vmem:[#allocation4 + $0x254] sm:$0xf] }
 0x7fe   :  { %3511 = vst [vmem:[#allocation4 + $0xf0] sm:$0xff] %v3501_v7  ;;  %v6584_v19 = vor.u32 %v6806_v47, %v6583_v51  ;;  %v6588_v48 = vor.u32 %v6802_v62, %v6585_v31 }
 0x7ff   :  { %3512 = vst [vmem:[#allocation4 + $0xf8] sm:$0xf] %v3502_v28  ;;  %v9919_v3 = vpop.permute.xlu1 %4066  ;;  %v6563_v28 = vld [vmem:[#allocation4 + $0x218] sm:$0xf] }
 0x800   :  { %3868 = vst [vmem:[#allocation4 + $0x1d0] sm:$0xf] %v3858_v36  ;;  %v4072_v55 = vsel %vm4070_vm1, %v9703_v58, %v9919_v3  ;;  %4752 = vmatpush.bf16.msrb.mxu1 %v6584_v19  ;;  %v3589_v15 = vpop.permute.xlu0 %3588  ;;  %v6564_v51 = vor.u32 %v6799_v25, %v6563_v28  ;;  %v10010_v28 = vld [vmem:[%s11152_s5 + $0x38] sm:$0xff] }
 0x801   :  { %v4093_v4 = vunpack.c.l.b16 %v4072_v55  ;;  %v3593_v44 = vsel %vm11589_vm9, %v9868_v23, %v3589_v15  ;;  %v3120_v23 = vsel %vm3118_vm0, %v9880_v49, %v9723_v43  ;;  %v6488_v43 = vor.u32 %v6776_v32, %v6485_v38  ;;  %v6744_v49 = vld [vmem:[#allocation4 + $0x80] sm:$0xf0]  ;;  %vm11747_vm9 = vmmov %vm11740_vm14 }
 0x802   :  { %v3614_v12 = vunpack.c.l.b16 %v3593_v44  ;;  %v6340_v31 = vor.u32 %v6744_v49, %v6339_v2  ;;  %vm11593_vm0 = vcmask 105472   ;;  %v9967_v32 = vld [vmem:[%s11152_s5 + $0x60] sm:$0xff]  ;;  %v6763_v49 = vld [vmem:[#allocation4 + $0x118] sm:$0xf0] }
 0x803   :  { %v4098_v11 = vpack.c.b16 %v4093_v4, %v4092_v52  ;;  %6605 = vmatmul.msk.bf16.vlgmr.msrb.gmra.mxu1 %vm11590_vm2, %v9765_v22  ;;  %v9943_v52 = vld [vmem:[%s11152_s5 + $0x78] sm:$0xff]  ;;  %vm11748_vm2 = vmmov %vm11747_vm9 }
 0x804   :  { %4778 = vmatpush.bf16.msra.mxu1 %v6588_v48  ;;  %v3619_v24 = vpack.c.b16 %v3614_v12, %v3614_v12 }
 0x805   :  { %4108 = vst [vmem:[#allocation4 + $0x258] sm:$0xff] %v4098_v11  ;;  %v6411_v58 = vld [vmem:[#allocation4 + $0xf0] sm:$0xf]  ;;  %v6758_v62 = vld [vmem:[#allocation4 + $0xf4] sm:$0xf] }
 0x806   :  { %3629 = vst [vmem:[#allocation4 + $0x140] sm:$0xf] %v3619_v24  ;;  %v6412_v61 = vor.u32 %v6762_v60, %v6411_v58  ;;  %v6416_v44 = vor.u32 %v6758_v62, %v6413_v41  ;;  %v6377_v11 = vld [vmem:[#allocation4 + $0xcc] sm:$0xf0]  ;;  %v9955_v60 = vld [vmem:[%s11152_s5 + $0x70] sm:$0xff] }
 0x807   :  { %v3130_v40 = vpop.permute.xlu1 %3129  ;;  %v6527_v9 = vld [vmem:[#allocation4 + $0x1d0] sm:$0xf]  ;;  %v6491_v24 = vld [vmem:[#allocation4 + $0x188] sm:$0xf]  ;;  %v6781_v58 = vld [vmem:[#allocation4 + $0x1a8] sm:$0xf0] }
 0x808   :  { %4810 = vmatpush.bf16.msrb.mxu1 %v6560_v54  ;;  %v3136_v0 = vsel %vm11591_vm11, %v3130_v40, %v9897_v53  ;;  %v3146_v26 = vsel %vm11579_vm5, %v3120_v23, %v3130_v40  ;;  %4788 = vmatpush.bf16.msra.mxu0 %v6412_v61  ;;  %v3356_v45 = vpop.permute.xlu0 %3355  ;;  %v6767_v53 = vld [vmem:[#allocation4 + $0x13c] sm:$0xf]  ;;  %v6749_v54 = vld [vmem:[#allocation4 + $0xac] sm:$0xf]  ;;  %v6492_v23 = vor.u32 %v6781_v58, %v6491_v24  ;;  %v6740_v40 = vld [vmem:[#allocation4 + $0x64] sm:$0xf] }
 0x809   :  { %v3154_v56 = vunpack.c.l.b16 %v3146_v26  ;;  %v3155_v10 = vunpack.c.l.b16 %v3136_v0  ;;  %v3359_v59 = vsel %vm11592_vm4, %v9721_v42, %v3356_v45  ;;  %v6452_v36 = vor.u32 %v6767_v53, %v6449_v5  ;;  %v6772_v0 = vld [vmem:[#allocation4 + $0x160] sm:$0xf0]  ;;  %v9973_v26 = vld [vmem:[%s11152_s5 + $0x58] sm:$0xff]  ;;  %v10035_v62 = vld [vmem:[%s11152_s5 + $0xe8] sm:$0xff] }
 0x80a   :  { %v3380_v17 = vunpack.c.l.b16 %v3359_v59  ;;  %v6380_v20 = vor.u32 %v6749_v54, %v6377_v11  ;;  %v6344_v45 = vor.u32 %v6740_v40, %v6341_v46  ;;  %v6305_v59 = vld [vmem:[#allocation4 + $0x3c] sm:$0xf0]  ;;  %v9992_v53 = vld [vmem:[%s11152_s5 + $0x40] sm:$0xff]  ;;  %v10041_v41 = vld [vmem:[%s11152_s5 + $0x168] sm:$0xff] }
 0x80b   :  { %v3160_v29 = vpack.c.b16 %v3155_v10, %v3154_v56  ;;  %v10113_v24 = vld [vmem:[%s11152_s5 + $0x1f8] sm:$0xff]  ;;  %v10119_v58 = vld [vmem:[%s11152_s5 + $0x148] sm:$0xff]  ;;  %v10144_v40 = vld [vmem:[%s11152_s5 + $0x140] sm:$0xff] }
 0x80c   :  { %4811 = vmatpush.bf16.msrb.mxu1 %v6524_v14  ;;  %v3385_v18 = vpack.c.b16 %v3380_v17, %v3380_v17  ;;  %4789 = vmatpush.bf16.msra.mxu0 %v6376_v57  ;;  %v6591_v27 = vld [vmem:[#allocation4 + $0x258] sm:$0xf]  ;;  %v6803_v7 = vld [vmem:[#allocation4 + $0x25c] sm:$0xf]  ;;  %v9961_v14 = vld [vmem:[%s11152_s5 + $0x68] sm:$0xff] }
 0x80d   :  { %3170 = vst [vmem:[#allocation4 + $0x18] sm:$0xff] %v3160_v29  ;;  %v6592_v47 = vor.u32 %v6807_v35, %v6591_v27  ;;  %v6596_v42 = vor.u32 %v6803_v7, %v6593_v1  ;;  %v6455_v38 = vld [vmem:[#allocation4 + $0x140] sm:$0xf]  ;;  %v6808_v17 = vld [vmem:[#allocation4 + $0x280] sm:$0xf0]  ;;  %v9980_v57 = vld [vmem:[%s11152_s5 + $0x50] sm:$0xff] }
 0x80e   :  { %3395 = vst [vmem:[#allocation4 + $0xb0] sm:$0xf] %v3385_v18  ;;  %v6456_v56 = vor.u32 %v6772_v0, %v6455_v38  ;;  %v9986_v1 = vld [vmem:[%s11152_s5 + $0x48] sm:$0xff]  ;;  %v6754_v18 = vld [vmem:[#allocation4 + $0xd0] sm:$0xf0]  ;;  %v9998_v27 = vld [vmem:[%s11152_s5 + $0xf8] sm:$0xff] }
 0x80f   :  { %v3244_v21 = vpop.permute.xlu1 %3243  ;;  %4804 = vmatpush.bf16.msra.mxu3 %v6592_v47  ;;  %4830 = vmatpush.bf16.msra.mxu2 %v6596_v42  ;;  %v10004_v7 = vld [vmem:[%s11152_s5 + $0x178] sm:$0xff]  ;;  %v10156_v46 = vld [vmem:[%s11152_s5 + $0x8] sm:$0xff]  ;;  %vm11749_vm11 = vmmov %vm11748_vm2 }
 0x810   :  { %4812 = vmatpush.bf16.msrb.mxu1 %v6488_v43  ;;  %v3247_v19 = vsel %vm11593_vm0, %v9788_v6, %v3244_v21  ;;  %4790 = vmatpush.bf16.msra.mxu0 %v6340_v31  ;;  %v4069_v48 = vpop.permute.xlu0 %4068  ;;  %v6735_v6 = vld [vmem:[#allocation4 + $0x38] sm:$0xf0]  ;;  %v6419_v43 = vld [vmem:[#allocation4 + $0xf8] sm:$0xf]  ;;  %v6745_v31 = vld [vmem:[#allocation4 + $0x88] sm:$0xf0] }
 0x811   :  { %v3268_v55 = vunpack.c.l.b16 %v3247_v19  ;;  %v4073_v15 = vsel %vm4070_vm1, %v9919_v3, %v4069_v48  ;;  %v6528_v3 = vor.u32 %v6790_v30, %v6527_v9  ;;  %v6420_v2 = vor.u32 %v6763_v49, %v6419_v43  ;;  %v10023_v21 = vld [vmem:[%s11152_s5 + $0x170] sm:$0xff]  ;;  %v10047_v48 = vld [vmem:[%s11152_s5 + $0x28] sm:$0xff]  ;;  %v6311_v9 = vld [vmem:[#allocation4 + $0x20] sm:$0xf] }
 0x812   :  { %v4094_v4 = vunpack.c.l.b16 %v4073_v15  ;;  %6607 = vmatmul.msk.bf16.vlgmr.msra.gmra.mxu3 %vm11594_vm3, %v9765_v22  ;;  %6608 = vmatmul.msk.bf16.vlgmr.msra.gmra.mxu2 %vm11595_vm10, %v9765_v22  ;;  %v6736_v30 = vld [vmem:[#allocation4 + $0x40] sm:$0xf0]  ;;  %v10162_v38 = vld [vmem:[%s11152_s5 + $0x1e8] sm:$0xff]  ;;  %v10168_v0 = vld [vmem:[%s11152_s5 + $0x138] sm:$0xff] }
 0x813   :  { %4836 = vmatpush.bf16.msrb.mxu3 %v6564_v51  ;;  %4862 = vmatpush.msrb.mxu2 %v9943_v52  ;;  %v3273_v12 = vpack.c.b16 %v3268_v55, %v3268_v55  ;;  %v10029_v51 = vld [vmem:[%s11152_s5 + $0x30] sm:$0xff]  ;;  %v10053_v55 = vld [vmem:[%s11152_s5 + $0xe0] sm:$0xff]  ;;  %vm11750_vm5 = vmmov %vm11748_vm2 }
 0x814   :  { %4813 = vmatpush.bf16.msrb.mxu1 %v6452_v36  ;;  %v4099_v63 = vpack.c.b16 %v4094_v4, %v4094_v4  ;;  %v6303_v8 = vld [vmem:[#allocation4 + $0x18] sm:$0xf]  ;;  %v6731_v10 = vld [vmem:[#allocation4 + $0x1c] sm:$0xf]  ;;  %v10059_v15 = vld [vmem:[%s11152_s5 + $0x160] sm:$0xff] }
 0x815   :  { %6606 = vmatmul.msk.bf16.vlgmr.msra.gmra.mxu1 %vm11596_vm6, %v9765_v22  ;;  %4863 = vmatpush.msrb.mxu2 %v9955_v60  ;;  %3283 = vst [vmem:[#allocation4 + $0x68] sm:$0xf] %v3273_v12  ;;  %v6304_v61 = vor.u32 %v6735_v6, %v6303_v8  ;;  %v6308_v25 = vor.u32 %v6731_v10, %v6305_v59  ;;  %v6383_v5 = vld [vmem:[#allocation4 + $0xb0] sm:$0xf]  ;;  %v10017_v36 = vld [vmem:[%s11152_s5 + $0xf0] sm:$0xff]  ;;  %v10065_v4 = vld [vmem:[%s11152_s5 + $0x20] sm:$0xff] }
 0x816   :  { %4109 = vst [vmem:[#allocation4 + $0x260] sm:$0xf] %v4099_v63  ;;  %v6384_v47 = vor.u32 %v6754_v18, %v6383_v5  ;;  %v6312_v6 = vor.u32 %v6736_v30, %v6311_v9  ;;  %v10079_v12 = vld [vmem:[%s11152_s5 + $0x158] sm:$0xff]  ;;  %v10101_v63 = vld [vmem:[%s11152_s5 + $0x150] sm:$0xff]  ;;  %v10107_v8 = vld [vmem:[%s11152_s5 + $0xc8] sm:$0xff] }
 0x817   :  { %4837 = vmatpush.bf16.msrb.mxu3 %v6528_v3  ;;  %4864 = vmatpush.msrb.mxu2 %v9961_v14  ;;  %v10085_v3 = vld [vmem:[%s11152_s5 + $0x18] sm:$0xff]  ;;  %v10182_v59 = vld [vmem:[%s11152_s5] sm:$0xff]  ;;  %v10194_v49 = vld [vmem:[%s11152_s5 + $0x130] sm:$0xff] }
 0x818   :  { %4814 = vmatpush.bf16.msrb.mxu1 %v6416_v44  ;;  %4791 = vmatpush.bf16.msra.mxu0 %v6304_v61  ;;  %v10073_v44 = vld [vmem:[%s11152_s5 + $0xd8] sm:$0xff]  ;;  %v10125_v61 = vld [vmem:[%s11152_s5 + $0x10] sm:$0xff]  ;;  %v10188_v43 = vld [vmem:[%s11152_s5 + $0x1e0] sm:$0xff] }
 0x819   :  { %4865 = vmatpush.msrb.mxu2 %v9967_v32  ;;  %v10224_v5 = vld [vmem:[%s11152_s5 + $0xa0] sm:$0xff]  ;;  %v10230_v18 = vld [vmem:[%s11152_s5 + $0x270] sm:$0xff]  ;;  %v10260_v9 = vld [vmem:[%s11152_s5 + $0x1c8] sm:$0xff] }
 0x81a   :  { %11599 = vst [vmem:[#allocation13_spill] sm:$0xff] %v10230_v18  ;;  %v10266_v30 = vld [vmem:[%s11152_s5 + $0x118] sm:$0xff]  ;;  %vm11751_vm4 = vmmov %vm11748_vm2 }
 0x81b   :  { %4838 = vmatpush.bf16.msrb.mxu3 %v6492_v23  ;;  %4866 = vmatpush.msrb.mxu2 %v9973_v26  ;;  %v10138_v23 = vld [vmem:[%s11152_s5 + $0x1f0] sm:$0xff]  ;;  %11601 = vst [vmem:[#allocation18_spill] sm:$0xff] %v10260_v9  ;;  %vm11752_vm0 = vmmov %vm11748_vm2 }
 0x81c   :  { %4815 = vmatpush.bf16.msrb.mxu1 %v6380_v20  ;;  %4792 = vmatmul.bf16.vlgmr.msra.gmra.mxu0 %v9767_v13  ;;  %v6347_v42 = vld [vmem:[#allocation4 + $0x68] sm:$0xf]  ;;  %vm11753_vm3 = vmmov %vm11752_vm0 }
 0x81d   :  { %4867 = vmatpush.msrb.mxu2 %v9980_v57  ;;  %v6599_v35 = vld [vmem:[#allocation4 + $0x260] sm:$0xf]  ;;  %v6348_v19 = vor.u32 %v6745_v31, %v6347_v42  ;;  %v10132_v20 = vld [vmem:[%s11152_s5 + $0xc0] sm:$0xff]  ;;  %vm11754_vm10 = vmmov %vm11752_vm0 }
 0x81e   :  { %v6600_v29 = vor.u32 %v6808_v17, %v6599_v35  ;;  %v10200_v35 = vld [vmem:[%s11152_s5 + $0xa8] sm:$0xff]  ;;  %v10242_v42 = vld [vmem:[%s11152_s5 + $0x120] sm:$0xff]  ;;  %v10248_v31 = vld [vmem:[%s11152_s5 + $0x98] sm:$0xff] }
 0x81f   :  { %4839 = vmatpush.bf16.msrb.mxu3 %v6456_v56  ;;  %4868 = vmatpush.msrb.mxu2 %v9986_v1  ;;  %v10176_v56 = vld [vmem:[%s11152_s5 + $0xb0] sm:$0xff]  ;;  %vm11755_vm6 = vmmov %vm11752_vm0 }
 0x820   :  { %4816 = vmatpush.bf16.msrb.mxu1 %v6344_v45  ;;  %4856 = vmatpush.bf16.msrb.mxu0 %v6600_v29  ;;  %v10212_v29 = vld [vmem:[%s11152_s5 + $0x1d8] sm:$0xff] }
 0x821   :  { %4869 = vmatpush.msrb.mxu2 %v9992_v53 }
 0x823   :  { %4840 = vmatpush.bf16.msrb.mxu3 %v6420_v2  ;;  %4870 = vmatpush.msrb.mxu2 %v10010_v28  ;;  %v10094_v54 = vpop.f32.mrf.mxu0  ;;  %v10096_v11 = vpop.f32.mrf.mxu1  ;;  %v10218_v2 = vld [vmem:[%s11152_s5 + $0x128] sm:$0xff] }
 0x824   :  { %4817 = vmatpush.bf16.msrb.mxu1 %v6308_v25  ;;  %4902 = vmatpush.msra.mxu0 %v10004_v7  ;;  %v10206_v25 = vld [vmem:[%s11152_s5 + $0x278] sm:$0xff] }
 0x825   :  { %4871 = vmatpush.msrb.mxu2 %v10029_v51  ;;  %11598 = vst [vmem:[#allocation25_spill] sm:$0xff] %v10206_v25 }
 0x826   :  { %4903 = vmatpush.msra.mxu0 %v10023_v21 }
 0x827   :  { %4818 = vmatmul.bf16.vlgmr.msrb.gmra.mxu1 %v9767_v13  ;;  %4841 = vmatpush.bf16.msrb.mxu3 %v6384_v47  ;;  %v10236_v47 = vld [vmem:[%s11152_s5 + $0x1d0] sm:$0xff] }
 0x828   :  { %4882 = vmatpush.msra.mxu1 %v9998_v27  ;;  %4904 = vmatpush.msra.mxu0 %v10041_v41 }
 0x829   :  { %4872 = vmatpush.msrb.mxu2 %v10047_v48 }
 0x82a   :  { %4883 = vmatpush.msra.mxu1 %v10017_v36  ;;  %4905 = vmatpush.msra.mxu0 %v10059_v15  ;;  %v10171_v45 = vpop.f32.mrf.mxu2 }
 0x82b   :  { %4842 = vmatpush.bf16.msrb.mxu3 %v6348_v19  ;;  %4873 = vmatpush.msrb.mxu2 %v10065_v4  ;;  %v4678_v10 = vpop.f32.mrf.mxu0  ;;  %v4652_v17 = vpop.f32.mrf.mxu1  ;;  %v10254_v19 = vld [vmem:[%s11152_s5 + $0x268] sm:$0xff] }
 0x82c   :  { %4884 = vmatpush.msra.mxu1 %v10035_v62  ;;  %6609 = vmatmul.msk.bf16.vlgmr.msrb.gmra.mxu0 %vm11597_vm8, %v9765_v22  ;;  %v10091_v22 = vld [vmem:[%s11152_s5 + $0xd0] sm:$0xff]  ;;  %11600 = vst [vmem:[#allocation23_spill] sm:$0xff] %v10254_v19  ;;  %v10278_v17 = vld [vmem:[%s11152_s5 + $0x260] sm:$0xff]  ;;  %vm11756_vm8 = vmmov %vm11752_vm0 }
 0x82d   :  { %4906 = vmatpush.msra.mxu0 %v10079_v12  ;;  %4874 = vmatpush.msrb.mxu2 %v10085_v3  ;;  %v10272_v10 = vld [vmem:[%s11152_s5 + $0x90] sm:$0xff]  ;;  %11602 = vst [vmem:[#allocation16_spill] sm:$0xff] %v10278_v17 }
 0x82e   :  { %4885 = vmatpush.msra.mxu1 %v10053_v55 }
 0x82f   :  { %4843 = vmatpush.bf16.msrb.mxu3 %v6312_v6  ;;  %4907 = vmatpush.msra.mxu0 %v10101_v63 }
 0x830   :  { %4886 = vmatpush.msra.mxu1 %v10073_v44  ;;  %4875 = vmatpush.msrb.mxu2 %v10125_v61 }
 0x831   :  { %4908 = vmatpush.msra.mxu0 %v10119_v58 }
 0x832   :  { %4887 = vmatpush.msra.mxu1 %v10091_v22  ;;  %4844 = vmatmul.bf16.vlgmr.msrb.gmra.mxu3 %v9767_v13  ;;  %v10150_v13 = vld [vmem:[%s11152_s5 + $0xb8] sm:$0xff]  ;;  %v4639_v6 = vpop.f32.mrf.mxu2 }
 0x833   :  { %4922 = vmatpush.msra.mxu3 %v10113_v24  ;;  %4909 = vmatpush.msra.mxu0 %v10144_v40  ;;  %v10290_v6 = vld [vmem:[%s11152_s5 + $0x110] sm:$0xff] }
 0x834   :  { %4888 = vmatpush.msra.mxu1 %v10107_v8  ;;  %4876 = vmatpush.msrb.mxu2 %v10156_v46 }
 0x835   :  { %4923 = vmatpush.msra.mxu3 %v10138_v23  ;;  %4910 = vmatpush.msra.mxu0 %v10168_v0 }
 0x836   :  { %4889 = vmatpush.msra.mxu1 %v10132_v20  ;;  %4877 = vmatpush.msrb.mxu2 %v10182_v59 }
 0x837   :  { %4924 = vmatpush.msra.mxu3 %v10162_v38  ;;  %4911 = vmatpush.msra.mxu0 %v10194_v49 }
 0x838   :  { %4890 = vmatpush.msra.mxu1 %v10150_v13  ;;  %4942 = vmatpush.msra.mxu2 %v10206_v25  ;;  %v4663_v25 = vpop.f32.mrf.mxu3 }
 0x839   :  { %4925 = vmatpush.msra.mxu3 %v10188_v43  ;;  %4912 = vmatpush.msra.mxu0 %v10218_v2 }
 0x83a   :  { %4891 = vmatpush.msra.mxu1 %v10176_v56  ;;  %4943 = vmatpush.msra.mxu2 %v10230_v18  ;;  %v10344_v18 = vld [vmem:[%s11152_s5 + $0x100] sm:$0xff] }
 0x83b   :  { %4926 = vmatpush.msra.mxu3 %v10212_v29  ;;  %4913 = vmatpush.msra.mxu0 %v10242_v42 }
 0x83c   :  { %4892 = vmatpush.msra.mxu1 %v10200_v35  ;;  %4944 = vmatpush.msra.mxu2 %v10254_v19  ;;  %v10338_v19 = vld [vmem:[%s11152_s5 + $0x1b0] sm:$0xff] }
 0x83d   :  { %4927 = vmatpush.msra.mxu3 %v10236_v47  ;;  %4914 = vmatpush.msra.mxu0 %v10266_v30  ;;  %11608 = vst [vmem:[#allocation30_spill] sm:$0xff] %v10338_v19 }
 0x83e   :  { %4893 = vmatpush.msra.mxu1 %v10224_v5  ;;  %4945 = vmatpush.msra.mxu2 %v10278_v17  ;;  %v10332_v17 = vld [vmem:[%s11152_s5 + $0x2f8] sm:$0xff] }
 0x83f   :  { %4928 = vmatpush.msra.mxu3 %v10260_v9  ;;  %4915 = vmatpush.msra.mxu0 %v10290_v6  ;;  %11607 = vst [vmem:[#allocation33_spill] sm:$0xff] %v10332_v17  ;;  %v10407_v9 = vld [vmem:[%s11152_s5 + $0x2e0] sm:$0xff] }
 0x840   :  { %4894 = vmatpush.msra.mxu1 %v10248_v31  ;;  %4946 = vmatpush.msra.mxu2 %v10302_v37  ;;  %v10326_v37 = vld [vmem:[%s11152_s5 + $0x250] sm:$0xff]  ;;  %11618 = vst [vmem:[#allocation36_spill] sm:$0xff] %v10407_v9 }
 0x841   :  { %4929 = vmatpush.msra.mxu3 %v10284_v16  ;;  %4916 = vmatpush.msra.mxu0 %v10314_v39  ;;  %11606 = vst [vmem:[#allocation19_spill] sm:$0xff] %v10326_v37 }
 0x842   :  { %4895 = vmatpush.msra.mxu1 %v10272_v10  ;;  %4947 = vmatpush.msra.mxu2 %v10326_v37  ;;  %v10350_v37 = vld [vmem:[%s11152_s5 + $0x248] sm:$0xff] }
 0x843   :  { %4930 = vmatpush.msra.mxu3 %v10308_v33  ;;  %4917 = vmatpush.msra.mxu0 %v10344_v18  ;;  %11609 = vst [vmem:[#allocation24_spill] sm:$0xff] %v10350_v37  ;;  %v10368_v33 = vld [vmem:[%s11152_s5 + $0x378] sm:$0xff] }
 0x844   :  { %4896 = vmatpush.msra.mxu1 %v10296_v50  ;;  %4948 = vmatpush.msra.mxu2 %v10350_v37  ;;  %11612 = vst [vmem:[#allocation28_spill] sm:$0xff] %v10368_v33  ;;  %v10374_v37 = vld [vmem:[%s11152_s5 + $0x240] sm:$0xff] }
 0x845   :  { %4931 = vmatpush.msra.mxu3 %v10338_v19  ;;  %v10362_v19 = vld [vmem:[%s11152_s5 + $0x1a8] sm:$0xff]  ;;  %4982 = vmatpush.msrb.mxu0 %v10368_v33  ;;  %11613 = vst [vmem:[#allocation26_spill] sm:$0xff] %v10374_v37  ;;  %v10389_v33 = vpop.permute.xlu1 %4202 }
 0x846   :  { %4897 = vmatpush.msra.mxu1 %v10320_v34  ;;  %11611 = vst [vmem:[#allocation35_spill] sm:$0xff] %v10362_v19  ;;  %4949 = vmatpush.msra.mxu2 %v10374_v37  ;;  %v10394_v37 = vld [vmem:[%s11152_s5 + $0x370] sm:$0xff]  ;;  %v4664_v16 = vadd.f32 %v4663_v25, %v10389_v33  ;;  %v10419_v25 = vld [vmem:[%s11152_s5 + $0x368] sm:$0xff] }
 0x847   :  { %4932 = vmatpush.msra.mxu3 %v10362_v19  ;;  %v10386_v19 = vld [vmem:[%s11152_s5 + $0x1a0] sm:$0xff]  ;;  %11616 = vst [vmem:[#allocation31_spill] sm:$0xff] %v10394_v37  ;;  %4983 = vmatpush.msrb.mxu0 %v10394_v37  ;;  %v10413_v37 = vld [vmem:[%s11152_s5 + $0x198] sm:$0xff] }
 0x848   :  { %4962 = vmatpush.msrb.mxu1 %v10332_v17  ;;  %v10356_v17 = vld [vmem:[%s11152_s5 + $0x2f0] sm:$0xff]  ;;  %11615 = vst [vmem:[#allocation32_spill] sm:$0xff] %v10386_v19 }
 0x849   :  { %11610 = vst [vmem:[#allocation37_spill] sm:$0xff] %v10356_v17  ;;  %4933 = vmatpush.msra.mxu3 %v10386_v19  ;;  %v4702_v19 = vpop.f32.mrf.mxu0  ;;  %4984 = vmatpush.msrb.mxu0 %v10419_v25 }
 0x84a   :  { %4963 = vmatpush.msrb.mxu1 %v10356_v17  ;;  %v10380_v17 = vld [vmem:[%s11152_s5 + $0x2e8] sm:$0xff]  ;;  %11619 = vst [vmem:[#allocation34_spill] sm:$0xff] %v10413_v37 }
 0x84b   :  { %11614 = vst [vmem:[#allocation39_spill] sm:$0xff] %v10380_v17  ;;  %4934 = vmatpush.msra.mxu3 %v10413_v37  ;;  %v10434_v37 = vld [vmem:[%s11152_s5 + $0x2d8] sm:$0xff] }
 0x84c   :  { %4964 = vmatpush.msrb.mxu1 %v10380_v17  ;;  %v10401_v17 = vld [vmem:[%s11152_s5 + $0x238] sm:$0xff]  ;;  %11620 = vst [vmem:[#allocation47_spill] sm:$0xff] %v10419_v25  ;;  %v10440_v25 = vld [vmem:[%s11152_s5 + $0x190] sm:$0xff] }
 0x84d   :  { %11617 = vst [vmem:[#allocation43_spill] sm:$0xff] %v10401_v17  ;;  %4950 = vmatpush.msra.mxu2 %v10401_v17  ;;  %v10423_v17 = vadd.f32 %v10094_v54, %v4664_v16  ;;  %4935 = vmatpush.msra.mxu3 %v10440_v25  ;;  %v4638_v16 = vadd.f32 %v10171_v45, %v10389_v33  ;;  %v4689_v54 = vpop.f32.mrf.mxu1  ;;  %v10461_v45 = vld [vmem:[%s11152_s5 + $0x188] sm:$0xff] }
 0x84e   :  { %4965 = vmatpush.msrb.mxu1 %v10407_v9  ;;  %v10428_v9 = vld [vmem:[%s11152_s5 + $0x230] sm:$0xff]  ;;  %11623 = vst [vmem:[#allocation51_spill] sm:$0xff] %v10434_v37 }
 0x84f   :  { %11621 = vst [vmem:[#allocation40_spill] sm:$0xff] %v10423_v17  ;;  %4951 = vmatpush.msra.mxu2 %v10428_v9  ;;  %4898 = vmatmul.f32.vlgmr.msra.gmra.mxu1 %v10423_v17  ;;  %v4690_v17 = vadd.f32 %v4689_v54, %v10389_v33  ;;  %v10492_v54 = vld [vmem:[%s11152_s5 + $0x180] sm:$0xff] }
 0x850   :  { %11622 = vst [vmem:[#allocation38_spill] sm:$0xff] %v10428_v9  ;;  %4966 = vmatpush.msrb.mxu1 %v10434_v37  ;;  %v10448_v9 = vld [vmem:[%s11152_s5 + $0x360] sm:$0xff]  ;;  %v10455_v37 = vld [vmem:[%s11152_s5 + $0x2d0] sm:$0xff]  ;;  %4936 = vmatpush.msra.mxu3 %v10461_v45 }
 0x851   :  { %11624 = vst [vmem:[#allocation41_spill] sm:$0xff] %v10440_v25  ;;  %4985 = vmatpush.msrb.mxu0 %v10448_v9  ;;  %v10465_v25 = vadd.f32 %v10096_v11, %v4638_v16  ;;  %v10483_v11 = vld [vmem:[%s11152_s5 + $0x2c8] sm:$0xff]  ;;  %v10486_v16 = vpop.f32.mrf.mxu2 }
 0x852   :  { %11625 = vst [vmem:[#allocation44_spill] sm:$0xff] %v10448_v9  ;;  %4967 = vmatpush.msrb.mxu1 %v10455_v37  ;;  %v10470_v9 = vld [vmem:[%s11152_s5 + $0x358] sm:$0xff]  ;;  %4937 = vmatpush.msra.mxu3 %v10492_v54 }
 0x853   :  { %11626 = vst [vmem:[#allocation42_spill] sm:$0xff] %v10455_v37  ;;  %4986 = vmatpush.msrb.mxu0 %v10470_v9  ;;  %v10477_v37 = vld [vmem:[%s11152_s5 + $0x228] sm:$0xff]  ;;  %4878 = vmatmul.f32.vlgmr.msrb.gmra.mxu2 %v10465_v25 }
 0x854   :  { %11627 = vst [vmem:[#allocation55_spill] sm:$0xff] %v10461_v45  ;;  %4952 = vmatpush.msra.mxu2 %v10477_v37  ;;  %4968 = vmatpush.msrb.mxu1 %v10483_v11  ;;  %v10504_v45 = vld [vmem:[%s11152_s5 + $0x2c0] sm:$0xff] }
 0x855   :  { %11628 = vst [vmem:[#allocation45_spill] sm:$0xff] %v10470_v9  ;;  %v4665_v9 = vpop.f32.mrf.mxu3 }
 0x856   :  { %11629 = vst [vmem:[#allocation48_spill] sm:$0xff] %v10477_v37  ;;  %v10498_v37 = vld [vmem:[%s11152_s5 + $0x350] sm:$0xff]  ;;  %4969 = vmatpush.msrb.mxu1 %v10504_v45  ;;  %v10510_v9 = vld [vmem:[%s11152_s5 + $0x3f8] sm:$0xff] }
 0x857   :  { %11630 = vst [vmem:[#allocation46_spill] sm:$0xff] %v10483_v11  ;;  %4987 = vmatpush.msrb.mxu0 %v10498_v37  ;;  %v4704_v11 = vpop.f32.mrf.mxu0  ;;  %5002 = vmatpush.msrb.mxu3 %v10510_v9 }
 0x858   :  { %11631 = vst [vmem:[#allocation57_spill] sm:$0xff] %v10492_v54  ;;  %v10513_v54 = vadd.f32 %v4702_v19, %v4690_v17  ;;  %v10518_v11 = vld [vmem:[%s11152_s5 + $0x348] sm:$0xff]  ;;  %v10536_v19 = vld [vmem:[%s11152_s5 + $0x3f0] sm:$0xff]  ;;  %v4691_v17 = vpop.f32.mrf.mxu1 }
 0x859   :  { %11632 = vst [vmem:[#allocation49_spill] sm:$0xff] %v10498_v37  ;;  %4988 = vmatpush.msrb.mxu0 %v10518_v11  ;;  %v10524_v37 = vld [vmem:[%s11152_s5 + $0x220] sm:$0xff]  ;;  %5003 = vmatpush.msrb.mxu3 %v10536_v19  ;;  %v10560_v17 = vld [vmem:[%s11152_s5 + $0x3e8] sm:$0xff] }
 0x85a   :  { %11633 = vst [vmem:[#allocation52_spill] sm:$0xff] %v10504_v45  ;;  %4953 = vmatpush.msra.mxu2 %v10524_v37  ;;  %v10548_v45 = vld [vmem:[%s11152_s5 + $0x218] sm:$0xff]  ;;  %4918 = vmatmul.f32.vlgmr.msra.gmra.mxu0 %v10513_v54 }
 0x85b   :  { %11634 = vst [vmem:[#allocation50_spill] sm:$0xff] %v10510_v9  ;;  %v10530_v9 = vld [vmem:[%s11152_s5 + $0x2b8] sm:$0xff]  ;;  %5004 = vmatpush.msrb.mxu3 %v10560_v17 }
 0x85c   :  { %11635 = vst [vmem:[#allocation60_spill] sm:$0xff] %v10518_v11  ;;  %4970 = vmatpush.msrb.mxu1 %v10530_v9  ;;  %v10542_v11 = vld [vmem:[%s11152_s5 + $0x340] sm:$0xff]  ;;  %4954 = vmatpush.msra.mxu2 %v10548_v45 }
 0x85d   :  { %11636 = vst [vmem:[#allocation53_spill] sm:$0xff] %v10530_v9  ;;  %4989 = vmatpush.msrb.mxu0 %v10542_v11  ;;  %v10554_v9 = vld [vmem:[%s11152_s5 + $0x2b0] sm:$0xff] }
 0x85e   :  { %11637 = vst [vmem:[#allocation65_spill] sm:$0xff] %v10536_v19  ;;  %4971 = vmatpush.msrb.mxu1 %v10554_v9  ;;  %v10567_v19 = vld [vmem:[%s11152_s5 + $0x210] sm:$0xff] }
 0x85f   :  { %11638 = vst [vmem:[#allocation54_spill] sm:$0xff] %v10542_v11  ;;  %4955 = vmatpush.msra.mxu2 %v10567_v19  ;;  %v10573_v11 = vld [vmem:[%s11152_s5 + $0x2a8] sm:$0xff] }
 0x860   :  { %11639 = vst [vmem:[#allocation64_spill] sm:$0xff] %v10548_v45  ;;  %4972 = vmatpush.msrb.mxu1 %v10573_v11  ;;  %v10585_v45 = vld [vmem:[%s11152_s5 + $0x338] sm:$0xff] }
 0x861   :  { %11640 = vst [vmem:[#allocation56_spill] sm:$0xff] %v10554_v9  ;;  %v4730_v9 = vpop.f32.mrf.mxu2  ;;  %4990 = vmatpush.msrb.mxu0 %v10585_v45 }
 0x862   :  { %11641 = vst [vmem:[#allocation58_spill] sm:$0xff] %v10560_v17  ;;  %v10579_v17 = vld [vmem:[%s11152_s5 + $0x3e0] sm:$0xff]  ;;  %v10603_v9 = vld [vmem:[%s11152_s5 + $0x3d8] sm:$0xff] }
 0x863   :  { %11642 = vst [vmem:[#allocation68_spill] sm:$0xff] %v10567_v19  ;;  %5005 = vmatpush.msrb.mxu3 %v10579_v17  ;;  %v10591_v19 = vld [vmem:[%s11152_s5 + $0x208] sm:$0xff] }
 0x864   :  { %11643 = vst [vmem:[#allocation59_spill] sm:$0xff] %v10573_v11  ;;  %4956 = vmatpush.msra.mxu2 %v10591_v19  ;;  %v10597_v11 = vld [vmem:[%s11152_s5 + $0x2a0] sm:$0xff] }
 0x865   :  { %11644 = vst [vmem:[#allocation61_spill] sm:$0xff] %v10579_v17  ;;  %4973 = vmatpush.msrb.mxu1 %v10597_v11  ;;  %5006 = vmatpush.msrb.mxu3 %v10603_v9  ;;  %v10609_v17 = vld [vmem:[%s11152_s5 + $0x330] sm:$0xff] }
 0x866   :  { %11645 = vst [vmem:[#allocation71_spill] sm:$0xff] %v10585_v45  ;;  %4991 = vmatpush.msrb.mxu0 %v10609_v17  ;;  %v10615_v45 = vld [vmem:[%s11152_s5 + $0x200] sm:$0xff] }
 0x867   :  { %11646 = vst [vmem:[#allocation62_spill] sm:$0xff] %v10597_v11  ;;  %4957 = vmatpush.msra.mxu2 %v10615_v45  ;;  %v10621_v11 = vld [vmem:[%s11152_s5 + $0x298] sm:$0xff] }
 0x868   :  { %11647 = vst [vmem:[#allocation66_spill] sm:$0xff] %v10603_v9  ;;  %4974 = vmatpush.msrb.mxu1 %v10621_v11  ;;  %v10627_v9 = vld [vmem:[%s11152_s5 + $0x3d0] sm:$0xff] }
 0x869   :  { %11648 = vst [vmem:[#allocation73_spill] sm:$0xff] %v10609_v17  ;;  %5007 = vmatpush.msrb.mxu3 %v10627_v9  ;;  %v10633_v17 = vld [vmem:[%s11152_s5 + $0x328] sm:$0xff] }
 0x86a   :  { %11649 = vst [vmem:[#allocation67_spill] sm:$0xff] %v10615_v45  ;;  %4992 = vmatpush.msrb.mxu0 %v10633_v17  ;;  %v10639_v45 = vld [vmem:[%s11152_s5 + $0x478] sm:$0xff] }
 0x86b   :  { %11650 = vst [vmem:[#allocation77_spill] sm:$0xff] %v10621_v11  ;;  %5022 = vmatpush.msrb.mxu2 %v10639_v45  ;;  %v10645_v11 = vld [vmem:[%s11152_s5 + $0x290] sm:$0xff] }
 0x86c   :  { %11651 = vst [vmem:[#allocation69_spill] sm:$0xff] %v10627_v9  ;;  %4975 = vmatpush.msrb.mxu1 %v10645_v11  ;;  %v10651_v9 = vld [vmem:[%s11152_s5 + $0x3c8] sm:$0xff] }
 0x86d   :  { %11652 = vst [vmem:[#allocation76_spill] sm:$0xff] %v10633_v17  ;;  %5008 = vmatpush.msrb.mxu3 %v10651_v9  ;;  %v10657_v17 = vld [vmem:[%s11152_s5 + $0x320] sm:$0xff] }
 0x86e   :  { %11653 = vst [vmem:[#allocation70_spill] sm:$0xff] %v10639_v45  ;;  %4993 = vmatpush.msrb.mxu0 %v10657_v17  ;;  %v10663_v45 = vld [vmem:[%s11152_s5 + $0x470] sm:$0xff] }
 0x86f   :  { %11654 = vst [vmem:[#allocation72_spill] sm:$0xff] %v10645_v11  ;;  %5023 = vmatpush.msrb.mxu2 %v10663_v45  ;;  %v10669_v11 = vld [vmem:[%s11152_s5 + $0x288] sm:$0xff] }
 0x870   :  { %11655 = vst [vmem:[#allocation74_spill] sm:$0xff] %v10651_v9  ;;  %4976 = vmatpush.msrb.mxu1 %v10669_v11  ;;  %v10675_v9 = vld [vmem:[%s11152_s5 + $0x3c0] sm:$0xff] }
 0x871   :  { %11656 = vst [vmem:[#allocation75_spill] sm:$0xff] %v10657_v17  ;;  %5009 = vmatpush.msrb.mxu3 %v10675_v9  ;;  %v10681_v17 = vld [vmem:[%s11152_s5 + $0x318] sm:$0xff] }
 0x872   :  { %11657 = vst [vmem:[#allocation78_spill] sm:$0xff] %v10663_v45  ;;  %4994 = vmatpush.msrb.mxu0 %v10681_v17  ;;  %v10687_v45 = vld [vmem:[%s11152_s5 + $0x468] sm:$0xff] }
 0x873   :  { %11658 = vst [vmem:[#allocation79_spill] sm:$0xff] %v10669_v11  ;;  %5024 = vmatpush.msrb.mxu2 %v10687_v45  ;;  %v10693_v11 = vld [vmem:[%s11152_s5 + $0x280] sm:$0xff] }
 0x874   :  { %11659 = vst [vmem:[#allocation80_spill] sm:$0xff] %v10675_v9  ;;  %4977 = vmatpush.msrb.mxu1 %v10693_v11  ;;  %v10699_v9 = vld [vmem:[%s11152_s5 + $0x3b8] sm:$0xff] }
 0x875   :  { %11660 = vst [vmem:[#allocation81_spill] sm:$0xff] %v10681_v17  ;;  %5010 = vmatpush.msrb.mxu3 %v10699_v9  ;;  %v10706_v17 = vld [vmem:[%s11152_s5 + $0x310] sm:$0xff] }
 0x876   :  { %11661 = vst [vmem:[#allocation82_spill] sm:$0xff] %v10693_v11  ;;  %5051 = vmatpush.msra.mxu1 %v9943_v52  ;;  %4995 = vmatpush.msrb.mxu0 %v10706_v17  ;;  %v10712_v11 = vld [vmem:[%s11152_s5 + $0x3b0] sm:$0xff]  ;;  %v10725_v52 = vld [vmem:[%s11152_s5 + $0x308] sm:$0xff] }
 0x877   :  { %11662 = vst [vmem:[#allocation83_spill] sm:$0xff] %v10699_v9  ;;  %5011 = vmatpush.msrb.mxu3 %v10712_v11  ;;  %v10718_v9 = vld [vmem:[%s11152_s5 + $0x460] sm:$0xff] }
 0x878   :  { %11663 = vst [vmem:[#allocation85_spill] sm:$0xff] %v10706_v17  ;;  %5025 = vmatpush.msrb.mxu2 %v10718_v9  ;;  %5052 = vmatpush.msra.mxu1 %v9955_v60  ;;  %v10737_v17 = vld [vmem:[%s11152_s5 + $0x458] sm:$0xff]  ;;  %v4715_v60 = vpop.f32.mrf.mxu0 }
 0x879   :  { %11664 = vst [vmem:[#allocation84_spill] sm:$0xff] %v10712_v11  ;;  %4996 = vmatpush.msrb.mxu0 %v10725_v52  ;;  %v10731_v11 = vld [vmem:[%s11152_s5 + $0x3a8] sm:$0xff] }
 0x87a   :  { %11665 = vst [vmem:[#allocation86_spill] sm:$0xff] %v10718_v9  ;;  %5012 = vmatpush.msrb.mxu3 %v10731_v11  ;;  %5026 = vmatpush.msrb.mxu2 %v10737_v17  ;;  %v4716_v9 = vadd.f32 %v4715_v60, %v10389_v33 }
 0x87b   :  { %11666 = vst [vmem:[#allocation87_spill] sm:$0xff] %v10725_v52  ;;  %5053 = vmatpush.msra.mxu1 %v9961_v14  ;;  %v10744_v52 = vld [vmem:[%s11152_s5 + $0x300] sm:$0xff]  ;;  %v10759_v14 = vld [vmem:[%s11152_s5 + $0x450] sm:$0xff] }
 0x87c   :  { %11667 = vst [vmem:[#allocation88_spill] sm:$0xff] %v10731_v11  ;;  %4997 = vmatpush.msrb.mxu0 %v10744_v52  ;;  %v10751_v11 = vld [vmem:[%s11152_s5 + $0x3a0] sm:$0xff]  ;;  %5027 = vmatpush.msrb.mxu2 %v10759_v14  ;;  %v10763_v60 = vadd.f32 %v10486_v16, %v4716_v9 }
 0x87d   :  { %11668 = vst [vmem:[#allocation89_spill] sm:$0xff] %v10744_v52  ;;  %5013 = vmatpush.msrb.mxu3 %v10751_v11  ;;  %5054 = vmatpush.msra.mxu1 %v9967_v32  ;;  %v10768_v52 = vld [vmem:[%s11152_s5 + $0x398] sm:$0xff]  ;;  %v10776_v32 = vld [vmem:[%s11152_s5 + $0x448] sm:$0xff] }
 0x87e   :  { %5071 = vmatpush.msra.mxu0 %v9998_v27  ;;  %5028 = vmatpush.msrb.mxu2 %v10776_v32  ;;  %v10785_v27 = vld [vmem:[%s11152_s5 + $0x390] sm:$0xff]  ;;  %v11685_v16 = vld [vmem:[#allocation24_spill] sm:$0xff] }
 0x87f   :  { %5014 = vmatpush.msrb.mxu3 %v10768_v52  ;;  %5055 = vmatpush.msra.mxu1 %v9973_v26  ;;  %v10792_v26 = vld [vmem:[%s11152_s5 + $0x440] sm:$0xff] }
 0x880   :  { %5072 = vmatpush.msra.mxu0 %v10017_v36  ;;  %4938 = vmatmul.f32.vlgmr.msra.gmra.mxu3 %v10763_v60  ;;  %v4717_v36 = vpop.f32.mrf.mxu0 }
 0x881   :  { %5056 = vmatpush.msra.mxu1 %v9980_v57  ;;  %5015 = vmatpush.msrb.mxu3 %v10785_v27  ;;  %v10799_v57 = vld [vmem:[%s11152_s5 + $0x388] sm:$0xff] }
 0x882   :  { %5073 = vmatpush.msra.mxu0 %v10035_v62  ;;  %5029 = vmatpush.msrb.mxu2 %v10792_v26  ;;  %v10806_v62 = vld [vmem:[%s11152_s5 + $0x438] sm:$0xff] }
 0x883   :  { %5057 = vmatpush.msra.mxu1 %v9986_v1  ;;  %5016 = vmatpush.msrb.mxu3 %v10799_v57  ;;  %v10813_v1 = vld [vmem:[%s11152_s5 + $0x380] sm:$0xff] }
 0x884   :  { %5074 = vmatpush.msra.mxu0 %v10053_v55  ;;  %5030 = vmatpush.msrb.mxu2 %v10806_v62  ;;  %v10822_v55 = vld [vmem:[%s11152_s5 + $0x430] sm:$0xff] }
 0x885   :  { %5058 = vmatpush.msra.mxu1 %v9992_v53  ;;  %5017 = vmatpush.msrb.mxu3 %v10813_v1  ;;  %v10831_v53 = vld [vmem:[%s11152_s5 + $0x428] sm:$0xff] }
 0x886   :  { %5075 = vmatpush.msra.mxu0 %v10073_v44  ;;  %5031 = vmatpush.msrb.mxu2 %v10822_v55 }
 0x887   :  { %5091 = vmatpush.msra.mxu3 %v10004_v7  ;;  %5059 = vmatpush.msra.mxu1 %v10010_v28  ;;  %v10840_v7 = vld [vmem:[%s11152_s5 + $0x420] sm:$0xff]  ;;  %v4741_v28 = vpop.f32.mrf.mxu3 }
 0x888   :  { %5076 = vmatpush.msra.mxu0 %v10091_v22  ;;  %5032 = vmatpush.msrb.mxu2 %v10831_v53 }
 0x889   :  { %5092 = vmatpush.msra.mxu3 %v10023_v21  ;;  %5060 = vmatpush.msra.mxu1 %v10029_v51  ;;  %v4767_v21 = vpop.f32.mrf.mxu2  ;;  %v10849_v51 = vld [vmem:[%s11152_s5 + $0x418] sm:$0xff] }
 0x88a   :  { %5077 = vmatpush.msra.mxu0 %v10107_v8  ;;  %5033 = vmatpush.msrb.mxu2 %v10840_v7  ;;  %v11669_v8 = vld [vmem:[#allocation18_spill] sm:$0xff] }
 0x88b   :  { %5093 = vmatpush.msra.mxu3 %v10041_v41  ;;  %5061 = vmatpush.msra.mxu1 %v10047_v48  ;;  %v10858_v41 = vld [vmem:[%s11152_s5 + $0x410] sm:$0xff]  ;;  %v10867_v48 = vld [vmem:[%s11152_s5 + $0x408] sm:$0xff] }
 0x88c   :  { %5078 = vmatpush.msra.mxu0 %v10132_v20  ;;  %5034 = vmatpush.msrb.mxu2 %v10849_v51 }
 0x88d   :  { %5094 = vmatpush.msra.mxu3 %v10059_v15  ;;  %5062 = vmatpush.msra.mxu1 %v10065_v4  ;;  %v10876_v15 = vld [vmem:[%s11152_s5 + $0x400] sm:$0xff] }
 0x88e   :  { %5079 = vmatpush.msra.mxu0 %v10150_v13  ;;  %5035 = vmatpush.msrb.mxu2 %v10858_v41  ;;  %v11674_v13 = vld [vmem:[#allocation30_spill] sm:$0xff] }
 0x88f   :  { %5095 = vmatpush.msra.mxu3 %v10079_v12  ;;  %5063 = vmatpush.msra.mxu1 %v10085_v3  ;;  %v4743_v4 = vpop.f32.mrf.mxu3  ;;  %v4742_v12 = vadd.f32 %v4741_v28, %v10389_v33  ;;  %v4754_v3 = vpop.f32.mrf.mxu1  ;;  %v11686_v28 = vld [vmem:[#allocation39_spill] sm:$0xff] }
 0x890   :  { %5080 = vmatpush.msra.mxu0 %v10176_v56  ;;  %5036 = vmatpush.msrb.mxu2 %v10867_v48  ;;  %v11688_v4 = vld [vmem:[#allocation40_spill] sm:$0xff] }
 0x891   :  { %5096 = vmatpush.msra.mxu3 %v10101_v63  ;;  %5064 = vmatpush.msra.mxu1 %v10125_v61  ;;  %v4769_v44 = vpop.f32.mrf.mxu2  ;;  %v10885_v22 = vadd.f32 %v4754_v3, %v4742_v12  ;;  %v11671_v61 = vld [vmem:[#allocation25_spill] sm:$0xff]  ;;  %v11689_v12 = vld [vmem:[#allocation26_spill] sm:$0xff] }
 0x892   :  { %5081 = vmatpush.msra.mxu0 %v10200_v35  ;;  %5037 = vmatpush.msrb.mxu2 %v10876_v15  ;;  %v5043_v44 = vmul.f32 %v11688_v4, %v11688_v4 }
 0x893   :  { %5097 = vmatpush.msra.mxu3 %v10119_v58  ;;  %5065 = vmatpush.msra.mxu1 %v10156_v46  ;;  %v11670_v58 = vld [vmem:[#allocation29_spill] sm:$0xff] }
 0x894   :  { %5082 = vmatpush.msra.mxu0 %v10224_v5  ;;  %4958 = vmatmul.f32.vlgmr.msra.gmra.mxu2 %v10885_v22  ;;  %v11680_v5 = vld [vmem:[#allocation33_spill] sm:$0xff] }
 0x895   :  { %5098 = vmatpush.msra.mxu3 %v10144_v40  ;;  %5066 = vmatpush.msra.mxu1 %v10182_v59  ;;  %v11673_v40 = vld [vmem:[#allocation13_spill] sm:$0xff]  ;;  %v11676_v59 = vld [vmem:[#allocation35_spill] sm:$0xff] }
 0x896   :  { %5083 = vmatpush.msra.mxu0 %v10248_v31  ;;  %5111 = vmatpush.msra.mxu2 %v10113_v24  ;;  %v11682_v31 = vld [vmem:[#allocation19_spill] sm:$0xff] }
 0x897   :  { %5099 = vmatpush.msra.mxu3 %v10168_v0  ;;  %v4756_v63 = vpop.f32.mrf.mxu1  ;;  %v4806_v20 = vpop.f32.mrf.mxu3 }
 0x898   :  { %5084 = vmatpush.msra.mxu0 %v10272_v10  ;;  %5112 = vmatpush.msra.mxu2 %v10138_v23  ;;  %v11690_v63 = vld [vmem:[#allocation36_spill] sm:$0xff] }
 0x899   :  { %5100 = vmatpush.msra.mxu3 %v10194_v49  ;;  %v4832_v23 = vpop.f32.mrf.mxu2  ;;  %v4793_v46 = vpop.f32.mrf.mxu0  ;;  %v11677_v49 = vld [vmem:[#allocation16_spill] sm:$0xff] }
 0x89a   :  { %5085 = vmatpush.msra.mxu0 %v10296_v50  ;;  %5113 = vmatpush.msra.mxu2 %v10162_v38  ;;  %v4768_v50 = vadd.f32 %v4767_v21, %v10389_v33  ;;  %v11675_v38 = vld [vmem:[#allocation23_spill] sm:$0xff]  ;;  %v4794_v56 = vadd.f32 %v4793_v46, %v10389_v33  ;;  %v11699_v46 = vld [vmem:[#allocation46_spill] sm:$0xff] }
 0x89b   :  { %5101 = vmatpush.msra.mxu3 %v10218_v2  ;;  %v11679_v2 = vld [vmem:[#allocation27_spill] sm:$0xff] }
 0x89c   :  { %5086 = vmatpush.msra.mxu0 %v10320_v34  ;;  %5114 = vmatpush.msra.mxu2 %v10188_v43  ;;  %v5042_v43 = vmul.f32 %v10465_v25, %v10465_v25  ;;  %v10919_v35 = vadd.f32 %v4806_v20, %v4794_v56  ;;  %v11687_v21 = vld [vmem:[#allocation55_spill] sm:$0xff]  ;;  %v11701_v56 = vld [vmem:[#allocation52_spill] sm:$0xff] }
 0x89d   :  { %5102 = vmatpush.msra.mxu3 %v10242_v42 }
 0x89e   :  { %5115 = vmatpush.msra.mxu2 %v10212_v29  ;;  %v11678_v29 = vld [vmem:[#allocation32_spill] sm:$0xff]  ;;  %4998 = vmatmul.f32.vlgmr.msrb.gmra.mxu0 %v10919_v35 }
 0x89f   :  { %5103 = vmatpush.msra.mxu3 %v10266_v30  ;;  %v4780_v34 = vpop.f32.mrf.mxu1  ;;  %5151 = vmatpush.msrb.mxu0 %v11680_v5  ;;  %v11683_v30 = vld [vmem:[#allocation37_spill] sm:$0xff]  ;;  %v11707_v5 = vld [vmem:[#allocation56_spill] sm:$0xff] }
 0x8a0   :  { %5116 = vmatpush.msra.mxu2 %v10236_v47  ;;  %v10905_v24 = vadd.f32 %v4780_v34, %v4768_v50  ;;  %v11681_v47 = vld [vmem:[#allocation34_spill] sm:$0xff]  ;;  %v11691_v50 = vld [vmem:[#allocation57_spill] sm:$0xff]  ;;  %v11692_v34 = vld [vmem:[#allocation43_spill] sm:$0xff] }
 0x8a1   :  { %5104 = vmatpush.msra.mxu3 %v10290_v6  ;;  %v4834_v42 = vpop.f32.mrf.mxu2  ;;  %5152 = vmatpush.msrb.mxu0 %v11683_v30  ;;  %v4795_v10 = vpop.f32.mrf.mxu0  ;;  %v11684_v6 = vld [vmem:[#allocation41_spill] sm:$0xff]  ;;  %v11711_v30 = vld [vmem:[#allocation60_spill] sm:$0xff] }
 0x8a2   :  { %5117 = vmatpush.msra.mxu2 %v11669_v8  ;;  %4978 = vmatmul.f32.vlgmr.msrb.gmra.mxu1 %v10905_v24  ;;  %v11693_v8 = vld [vmem:[#allocation51_spill] sm:$0xff] }
 0x8a3   :  { %5105 = vmatpush.msra.mxu3 %v10314_v39  ;;  %5131 = vmatpush.msrb.mxu1 %v11671_v61  ;;  %v11672_v39 = vld [vmem:[#allocation22_spill] sm:$0xff]  ;;  %v11695_v61 = vld [vmem:[#allocation28_spill] sm:$0xff]  ;;  %v11709_v42 = vld [vmem:[#allocation59_spill] sm:$0xff] }
 0x8a4   :  { %5118 = vmatpush.msra.mxu2 %v11670_v58  ;;  %5153 = vmatpush.msrb.mxu0 %v11686_v28  ;;  %v11694_v58 = vld [vmem:[#allocation38_spill] sm:$0xff] }
 0x8a5   :  { %5106 = vmatpush.msra.mxu3 %v10344_v18  ;;  %5132 = vmatpush.msrb.mxu1 %v11673_v40  ;;  %v4808_v18 = vpop.f32.mrf.mxu3  ;;  %v11698_v40 = vld [vmem:[#allocation31_spill] sm:$0xff] }
 0x8a6   :  { %5119 = vmatpush.msra.mxu2 %v11672_v39  ;;  %5154 = vmatpush.msrb.mxu0 %v11690_v63  ;;  %v11696_v39 = vld [vmem:[#allocation42_spill] sm:$0xff]  ;;  %v11708_v18 = vld [vmem:[#allocation49_spill] sm:$0xff] }
 0x8a7   :  { %5133 = vmatpush.msrb.mxu1 %v11675_v38  ;;  %v4782_v0 = vpop.f32.mrf.mxu1  ;;  %5087 = vmatmul.f32.vlgmr.msra.gmra.mxu0 %v5043_v44  ;;  %v11700_v38 = vld [vmem:[#allocation47_spill] sm:$0xff]  ;;  %v11719_v63 = vld [vmem:[#allocation73_spill] sm:$0xff] }
 0x8a8   :  { %5120 = vmatpush.msra.mxu2 %v11674_v13  ;;  %5155 = vmatpush.msrb.mxu0 %v11693_v8  ;;  %v5044_v0 = vmul.f32 %v10513_v54, %v10513_v54  ;;  %v11717_v44 = vld [vmem:[#allocation71_spill] sm:$0xff]  ;;  %v5047_v8 = vmul.f32 %v10905_v24, %v10905_v24 }
 0x8a9   :  { %5134 = vmatpush.msrb.mxu1 %v11677_v49  ;;  %v4858_v20 = vpop.f32.mrf.mxu0  ;;  %v11704_v49 = vld [vmem:[#allocation53_spill] sm:$0xff] }
 0x8aa   :  { %5121 = vmatpush.msra.mxu2 %v11676_v59  ;;  %5067 = vmatmul.f32.vlgmr.msra.gmra.mxu1 %v5042_v43  ;;  %v11702_v59 = vld [vmem:[#allocation64_spill] sm:$0xff] }
 0x8ab   :  { %5135 = vmatpush.msrb.mxu1 %v11679_v2  ;;  %5156 = vmatpush.msrb.mxu0 %v11696_v39  ;;  %v11703_v43 = vld [vmem:[#allocation44_spill] sm:$0xff]  ;;  %v11706_v2 = vld [vmem:[#allocation45_spill] sm:$0xff]  ;;  %v11724_v39 = vld [vmem:[#allocation82_spill] sm:$0xff] }
 0x8ac   :  { %5122 = vmatpush.msra.mxu2 %v11678_v29  ;;  %v11705_v29 = vld [vmem:[#allocation68_spill] sm:$0xff] }
 0x8ad   :  { %5136 = vmatpush.msrb.mxu1 %v11682_v31  ;;  %5157 = vmatpush.msrb.mxu0 %v11699_v46  ;;  %v11710_v31 = vld [vmem:[#allocation67_spill] sm:$0xff]  ;;  %v11729_v46 = vld [vmem:[#allocation61_spill] sm:$0xff] }
 0x8ae   :  { %5123 = vmatpush.msra.mxu2 %v11681_v47  ;;  %v5046_v47 = vmul.f32 %v10885_v22, %v10885_v22 }
 0x8af   :  { %5137 = vmatpush.msrb.mxu1 %v11685_v16  ;;  %v4819_v9 = vpop.f32.mrf.mxu1  ;;  %5158 = vmatpush.msrb.mxu0 %v11701_v56  ;;  %v11713_v16 = vld [vmem:[#allocation70_spill] sm:$0xff]  ;;  %v11733_v56 = vld [vmem:[#allocation69_spill] sm:$0xff] }
 0x8b0   :  { %5124 = vmatpush.msra.mxu2 %v11684_v6  ;;  %v4820_v36 = vadd.f32 %v4819_v9, %v10389_v33  ;;  %v11712_v6 = vld [vmem:[#allocation62_spill] sm:$0xff] }
 0x8b1   :  { %5138 = vmatpush.msrb.mxu1 %v11689_v12  ;;  %5159 = vmatpush.msrb.mxu0 %v11704_v49  ;;  %v11718_v12 = vld [vmem:[#allocation72_spill] sm:$0xff] }
 0x8b2   :  { %5125 = vmatpush.msra.mxu2 %v11687_v21  ;;  %v10936_v3 = vadd.f32 %v4832_v23, %v4820_v36  ;;  %v11697_v23 = vld [vmem:[#allocation48_spill] sm:$0xff]  ;;  %v11715_v36 = vld [vmem:[#allocation77_spill] sm:$0xff]  ;;  %v11716_v21 = vld [vmem:[#allocation78_spill] sm:$0xff] }
 0x8b3   :  { %5139 = vmatpush.msrb.mxu1 %v11692_v34  ;;  %5160 = vmatpush.msrb.mxu0 %v11707_v5  ;;  %v11722_v34 = vld [vmem:[#allocation86_spill] sm:$0xff]  ;;  %v11738_v49 = vld [vmem:[#allocation84_spill] sm:$0xff] }
 0x8b4   :  { %5126 = vmatpush.msra.mxu2 %v11691_v50  ;;  %5018 = vmatmul.f32.vlgmr.msrb.gmra.mxu3 %v10936_v3  ;;  %v11720_v50 = vld [vmem:[#allocation79_spill] sm:$0xff] }
 0x8b5   :  { %5140 = vmatpush.msrb.mxu1 %v11694_v58  ;;  %5171 = vmatpush.msrb.mxu3 %v11695_v61  ;;  %v4845_v10 = vpop.f32.mrf.mxu3  ;;  %v11723_v58 = vld [vmem:[#allocation76_spill] sm:$0xff] }
 0x8b6   :  { %5161 = vmatpush.msrb.mxu0 %v11709_v42  ;;  %v4846_v9 = vadd.f32 %v4845_v10, %v10389_v33  ;;  %v11721_v33 = vld [vmem:[#allocation50_spill] sm:$0xff] }
 0x8b7   :  { %5141 = vmatpush.msrb.mxu1 %v11697_v23  ;;  %5172 = vmatpush.msrb.mxu3 %v11698_v40  ;;  %v4821_v13 = vpop.f32.mrf.mxu1  ;;  %v11727_v23 = vld [vmem:[#allocation58_spill] sm:$0xff]  ;;  %v5045_v40 = vmul.f32 %v10763_v60, %v10763_v60 }
 0x8b8   :  { %5162 = vmatpush.msrb.mxu0 %v11712_v6  ;;  %v10972_v28 = vadd.f32 %v4858_v20, %v4846_v9  ;;  %v11725_v20 = vld [vmem:[#allocation65_spill] sm:$0xff] }
 0x8b9   :  { %5142 = vmatpush.msrb.mxu1 %v10524_v37  ;;  %5173 = vmatpush.msrb.mxu3 %v11700_v38  ;;  %v4860_v37 = vpop.f32.mrf.mxu0  ;;  %v11728_v13 = vld [vmem:[#allocation81_spill] sm:$0xff] }
 0x8ba   :  { %5163 = vmatpush.msrb.mxu0 %v11715_v36  ;;  %5038 = vmatmul.f32.vlgmr.msrb.gmra.mxu2 %v10972_v28  ;;  %v11730_v38 = vld [vmem:[#allocation85_spill] sm:$0xff] }
 0x8bb   :  { %5143 = vmatpush.msrb.mxu1 %v11702_v59  ;;  %5174 = vmatpush.msrb.mxu3 %v11703_v43  ;;  %v11734_v59 = vld [vmem:[#allocation89_spill] sm:$0xff]  ;;  %v11736_v43 = vld [vmem:[#allocation80_spill] sm:$0xff] }
 0x8bc   :  { %5107 = vmatmul.f32.vlgmr.msra.gmra.mxu3 %v5044_v0  ;;  %5164 = vmatpush.msrb.mxu0 %v11718_v12  ;;  %v11732_v0 = vld [vmem:[#allocation87_spill] sm:$0xff] }
 0x8bd   :  { %5144 = vmatpush.msrb.mxu1 %v11705_v29  ;;  %5175 = vmatpush.msrb.mxu3 %v11706_v2  ;;  %v4847_v61 = vpop.f32.mrf.mxu3 }
 0x8be   :  { %5165 = vmatpush.msrb.mxu0 %v11720_v50  ;;  %5191 = vmatpush.msrb.mxu2 %v11721_v33 }
 0x8bf   :  { %5145 = vmatpush.msrb.mxu1 %v10591_v19  ;;  %5176 = vmatpush.msrb.mxu3 %v11708_v18  ;;  %v11714_v19 = vld [vmem:[#allocation54_spill] sm:$0xff] }
 0x8c0   :  { %5166 = vmatpush.msrb.mxu0 %v11724_v39  ;;  %5192 = vmatpush.msrb.mxu2 %v11725_v20  ;;  %v7239_v20 = vld [vmem:[%s11153_s4] sm:$0xff] }
 0x8c1   :  { %5146 = vmatpush.msrb.mxu1 %v11710_v31  ;;  %5177 = vmatpush.msrb.mxu3 %v11711_v30 }
 0x8c2   :  { %5147 = vmatmul.f32.vlgmr.msrb.gmra.mxu1 %v5046_v47  ;;  %5167 = vmatmul.f32.vlgmr.msrb.gmra.mxu0 %v5047_v8 }
 0x8c3   :  { %5211 = vmatpush.msra.mxu1 %v11713_v16  ;;  %5178 = vmatpush.msrb.mxu3 %v11714_v19 }
 0x8c4   :  { %5193 = vmatpush.msrb.mxu2 %v11727_v23  ;;  %v7240_v23 = vld [vmem:[%s11151_s3] sm:$0xff] }
 0x8c5   :  { %5212 = vmatpush.msra.mxu1 %v11716_v21  ;;  %5179 = vmatpush.msrb.mxu3 %v11717_v44 }
 0x8c6   :  { %5194 = vmatpush.msrb.mxu2 %v11729_v46  ;;  %v7302_v46 = vmov 5  }
 0x8c7   :  { %5213 = vmatpush.msra.mxu1 %v10687_v45  ;;  %5180 = vmatpush.msrb.mxu3 %v11719_v63  ;;  %v11726_v45 = vld [vmem:[#allocation75_spill] sm:$0xff] }
 0x8c8   :  { %5127 = vmatmul.f32.vlgmr.msra.gmra.mxu2 %v5045_v40  ;;  %7051 = vset.pattern.permute.xlu0 %v7302_v46 }
 0x8c9   :  { %5214 = vmatpush.msra.mxu1 %v11722_v34  ;;  %5181 = vmatpush.msrb.mxu3 %v11723_v58 }
 0x8cb   :  { %5215 = vmatpush.msra.mxu1 %v10737_v17  ;;  %5182 = vmatpush.msrb.mxu3 %v11726_v45  ;;  %v11731_v17 = vld [vmem:[#allocation66_spill] sm:$0xff]  ;;  %v7301_v45 = vmov 4  }
 0x8cc   :  { %5195 = vmatpush.msrb.mxu2 %v11731_v17  ;;  %v4899_v29 = vpop.f32.mrf.mxu1  ;;  %7050 = vset.pattern.permute.xlu1 %v7301_v45  ;;  %v5296_v17 = vld.sshfl [vmem:[#allocation1 + $0x8] sm:$0xff pattern:$0x75316420] }
 0x8cd   :  { %5216 = vmatpush.msra.mxu1 %v10759_v14  ;;  %5183 = vmatpush.msrb.mxu3 %v11728_v13  ;;  %v5048_v14 = vmul.f32 %v10919_v35, %v10919_v35 }
 0x8ce   :  { %5196 = vmatpush.msrb.mxu2 %v11733_v56  ;;  %5274 = vperm.xlu1 %7050, %v7240_v23  }
 0x8cf   :  { %5217 = vmatpush.msra.mxu1 %v10776_v32  ;;  %5184 = vmatpush.msrb.mxu3 %v11730_v38  ;;  %v11735_v32 = vld [vmem:[#allocation74_spill] sm:$0xff]  ;;  %v5295_v38 = vld.sshfl [vmem:[#allocation1] sm:$0xff pattern:$0x75316420] }
 0x8d0   :  { %5197 = vmatpush.msrb.mxu2 %v11735_v32 }
 0x8d1   :  { %5218 = vmatpush.msra.mxu1 %v10792_v26  ;;  %5185 = vmatpush.msrb.mxu3 %v11732_v0  ;;  %v11737_v26 = vld [vmem:[#allocation83_spill] sm:$0xff]  ;;  %v11742_v0 = vld [vmem:[#allocation14_spill] sm:$0xff] }
 0x8d2   :  { %5198 = vmatpush.msrb.mxu2 %v11736_v43  ;;  %5303 = vst [vmem:[#allocation1] ss:$2 sm:$0xff] %v11742_v0  ;;  %v11743_v43 = vld [vmem:[#allocation21_spill] sm:$0xff] }
 0x8d3   :  { %5219 = vmatpush.msra.mxu1 %v10806_v62  ;;  %5186 = vmatpush.msrb.mxu3 %v11734_v59  ;;  %v11739_v62 = vld [vmem:[#allocation88_spill] sm:$0xff] }
 0x8d4   :  { %5187 = vmatmul.f32.vlgmr.msrb.gmra.mxu3 %v5048_v14  ;;  %5199 = vmatpush.msrb.mxu2 %v11737_v26  ;;  %v5299_v14 = vld.sshfl [vmem:[#allocation1 + $0x20] sm:$0xff pattern:$0x75316420] }
 0x8d5   :  { %5220 = vmatpush.msra.mxu1 %v10822_v55  ;;  %6611 = vmatpush.msk.msra.mxu3 %vm2481_vm13, %v5295_v38 }
 0x8d6   :  { %5200 = vmatpush.msrb.mxu2 %v11738_v49  ;;  %v4879_v55 = vpop.f32.mrf.mxu2 }
 0x8d7   :  { %5221 = vmatpush.msra.mxu1 %v10831_v53  ;;  %v4900_v2 = vadd.f32 %v4899_v29, %v4879_v55  ;;  %v5050_v53 = vmul.f32 %v10972_v28, %v10972_v28 }
 0x8d8   :  { %5201 = vmatpush.msrb.mxu2 %v11739_v62 }
 0x8d9   :  { %5222 = vmatpush.msra.mxu1 %v10840_v7  ;;  %v5049_v7 = vmul.f32 %v10936_v3, %v10936_v3  ;;  %v5304_v32 = vld.sshfl [vmem:[#allocation1] sm:$0xff pattern:$0x75316420] }
 0x8da   :  { %5202 = vmatpush.msrb.mxu2 %v10751_v11  ;;  %v4919_v11 = vpop.f32.mrf.mxu0  ;;  %5505 = vst [vmem:[#allocation1] ss:$2 sm:$0xff] %v11743_v43 }
 0x8db   :  { %5223 = vmatpush.msra.mxu1 %v10849_v51  ;;  %v4920_v51 = vadd.f32 %v4919_v11, %v4900_v2 }
 0x8dc   :  { %5203 = vmatpush.msrb.mxu2 %v10768_v52 }
 0x8dd   :  { %5224 = vmatpush.msra.mxu1 %v10858_v41 }
 0x8de   :  { %5204 = vmatpush.msrb.mxu2 %v10785_v27 }
 0x8df   :  { %5225 = vmatpush.msra.mxu1 %v10867_v48 }
 0x8e0   :  { %5205 = vmatpush.msrb.mxu2 %v10799_v57 }
 0x8e1   :  { %5226 = vmatpush.msra.mxu1 %v10876_v15 }
 0x8e2   :  { %5227 = vmatmul.f32.vlgmr.msra.gmra.mxu1 %v5050_v53  ;;  %5206 = vmatpush.msrb.mxu2 %v10813_v1 }
 0x8e3   :  { %5207 = vmatmul.f32.vlgmr.msrb.gmra.mxu2 %v5049_v7  ;;  %6627 = vmatpush.msk.msrb.mxu1 %vm2481_vm13, %v5304_v32 }
 0x8e4   :  { %6619 = vmatpush.msk.msra.mxu2 %vm2481_vm13, %v5299_v14 }
 0x903   :  { %v4939_v41 = vpop.f32.mrf.mxu3 }
 0x904   :  { %v4940_v48 = vadd.f32 %v4939_v41, %v4920_v51  ;;  %v5297_v41 = vld.sshfl [vmem:[#allocation1 + $0x10] sm:$0xff pattern:$0x75316420] }
 0x905   :  { %6615 = vmatpush.msk.msrb.mxu3 %vm2481_vm13, %v5297_v41 }
 0x917   :  { %v4959_v5 = vpop.f32.mrf.mxu2 }
 0x918   :  { %v4960_v37 = vadd.f32 %v4959_v5, %v4940_v48  ;;  %v5298_v48 = vld.sshfl [vmem:[#allocation1 + $0x18] sm:$0xff pattern:$0x75316420] }
 0x919   :  { %v11744_v5 = vld [vmem:[#allocation11_spill] sm:$0xff] }
 0x91a   :  { %5507 = vst [vmem:[#allocation1 + $0x10] ss:$2 sm:$0xff] %v11744_v5 }
 0x91b   :  { %v4999_v15 = vpop.f32.mrf.mxu0 }
 0x91f   :  { %v4979_v52 = vpop.f32.mrf.mxu1 }
 0x920   :  { %v4980_v18 = vadd.f32 %v4979_v52, %v4960_v37  ;;  %v5302_v37 = vld.sshfl [vmem:[#allocation1 + $0x38] sm:$0xff pattern:$0x75316420]  ;;  %v5300_v52 = vld.sshfl [vmem:[#allocation1 + $0x28] sm:$0xff pattern:$0x75316420] }
 0x921   :  { %6625 = vmatpush.msk.msrb.mxu2 %vm2481_vm13, %v5302_v37 }
 0x922   :  { %v5000_v47 = vadd.f32 %v4999_v15, %v4980_v18  ;;  %v5301_v18 = vld.sshfl [vmem:[#allocation1 + $0x30] sm:$0xff pattern:$0x75316420]  ;;  %v5515_v15 = vld.sshfl [vmem:[#allocation1 + $0x18] sm:$0xff pattern:$0x75316420] }
 0x923   :  { %6635 = vmatpush.msk.msra.mxu1 %vm2481_vm13, %v5515_v15 }
 0x924   :  { %v5088_v30 = vpop.f32.mrf.mxu0 }
 0x927   :  { %v5068_v10 = vpop.f32.mrf.mxu1 }
 0x928   :  { %v5089_v16 = vadd.f32 %v5088_v30, %v5068_v10  ;;  %v5514_v30 = vld.sshfl [vmem:[#allocation1 + $0x10] sm:$0xff pattern:$0x75316420] }
 0x937   :  { %v5019_v42 = vpop.f32.mrf.mxu3 }
 0x938   :  { %v5020_v27 = vadd.f32 %v5019_v42, %v5000_v47  ;;  %v11745_v47 = vld [vmem:[#allocation5_spill] sm:$0xff]  ;;  %v11746_v42 = vld [vmem:[#allocation7_spill] sm:$0xff] }
 0x939   :  { %5509 = vst [vmem:[#allocation1 + $0x20] ss:$2 sm:$0xff] %v11745_v47 }
 0x93a   :  { %5511 = vst [vmem:[#allocation1 + $0x30] ss:$2 sm:$0xff] %v11746_v42 }
 0x93d   :  { %v5039_v31 = vpop.f32.mrf.mxu2 }
 0x93e   :  { %v5040_v57 = vadd.f32 %v5039_v31, %v5020_v27  ;;  %v5512_v27 = vld.sshfl [vmem:[#allocation1] sm:$0xff pattern:$0x75316420]  ;;  %v5513_v31 = vld.sshfl [vmem:[#allocation1 + $0x8] sm:$0xff pattern:$0x75316420] }
 0x93f   :  { %v5108_v6 = vpop.f32.mrf.mxu3  ;;  %v5148_v36 = vpop.f32.mrf.mxu1  ;;  %5520 = vst [vmem:[#allocation1] ss:$2 sm:$0xff] %v11742_v0 }
 0x940   :  { %v5109_v9 = vadd.f32 %v5108_v6, %v5089_v16  ;;  %v5168_v44 = vpop.f32.mrf.mxu0  ;;  %v5275_v53 = vpop.permute.xlu1 %5274 }
 0x941   :  { %v5519_v10 = vld.sshfl [vmem:[#allocation1 + $0x38] sm:$0xff pattern:$0x75316420] }
 0x94b   :  { %v5128_v1 = vpop.f32.mrf.mxu2 }
 0x94c   :  { %v5129_v19 = vadd.f32 %v5128_v1, %v5109_v9  ;;  %v5518_v9 = vld.sshfl [vmem:[#allocation1 + $0x30] sm:$0xff pattern:$0x75316420] }
 0x94e   :  { %v5149_v21 = vadd.f32 %v5148_v36, %v5129_v19  ;;  %v5516_v19 = vld.sshfl [vmem:[#allocation1 + $0x20] sm:$0xff pattern:$0x75316420]  ;;  %v5517_v36 = vld.sshfl [vmem:[#allocation1 + $0x28] sm:$0xff pattern:$0x75316420] }
 0x950   :  { %v5169_v12 = vadd.f32 %v5168_v44, %v5149_v21  ;;  %v5521_v21 = vld.sshfl [vmem:[#allocation1] sm:$0xff pattern:$0x75316420] }
 0x957   :  { %v5188_v63 = vpop.f32.mrf.mxu3 }
 0x958   :  { %v5189_v50 = vadd.f32 %v5188_v63, %v5169_v12 }
 0x95f   :  { %v5228_v8 = vpop.f32.mrf.mxu1 }
 0x966   :  { %v5208_v33 = vpop.f32.mrf.mxu2 }
 0x967   :  { %v5209_v34 = vadd.f32 %v5208_v33, %v5189_v50 }
 0x969   :  { %v5229_v58 = vadd.f32 %v5228_v8, %v5209_v34 }
 0x96b   :  { %5232 = vrot.lane.b32.xlu2 %v5229_v58, %s7277_s21 }
 0x9c5   :  { %v5233_v61 = vpop.permute.xlu2 %5232 }
 0x9c6   :  { %v5235_v39 = vsel %vm11740_vm14, %v5040_v57, %v5233_v61  ;;  %vm11757_vm14 = vmmov %vm11752_vm0 }
 0x9c7   :  { %5251 = vmatpush.msra.mxu0 %v5235_v39 }
 0x9c8   :  { %6610 = vmatmul.msk.f32.vlgmr.msra.gmra.mxu0 %vm11741_vm15, %v7239_v20  ;;  %vm11758_vm15 = vmmov %vm11752_vm0 }
 0x9c9   :  { %6613 = vmatpush.msk.msrb.mxu0 %vm2481_vm13, %v5296_v17 }
 0x9cb   :  { %6617 = vmatpush.msk.msra.mxu0 %vm2481_vm13, %v5298_v48 }
 0xa45   :  { %v5253_v40 = vpop.f32.mrf.mxu0 }
 0xa46   :  { %v5256_v13 = vmul.f32 %v5253_v40, %v5253_v40 }
 0xa48   :  { %5258 = vrot.lane.b32.xlu0 %v5256_v13, %s7277_s21 }
 0xa50   :  { %5284 = vperm.xlu0 %7051, %v7240_v23  }
 0xaba   :  { %v5259_v56 = vpop.permute.xlu0 %5258 }
 0xabb   :  { %v5261_v59 = vsub.f32 %v5253_v40, %v5259_v56 }
 0xabd   :  { %v5262_v26 = vadd.f32 1e-05, %v5261_v59 }
 0xabf   :  { %7072 = vrsqrt.f32 %v5262_v26  ;;  %vm5269_vm7 = vweird.f32 %v5262_v26 }
 0xac2   :  { %v5285_v16 = vpop.permute.xlu0 %5284 }
 0xac5   :  { %v7073_v49 = vpop.eup %7072 }
 0xac6   :  { %v5264_v62 = vmul.f32 %v7073_v49, %v5262_v26  ;;  %vm5270_vm1 = vweird.f32 %v7073_v49 }
 0xac7   :  { %vm5271_vm12 = vmor %vm5269_vm7, %vm5270_vm1 }
 0xac8   :  { %v5265_v29 = vmul.f32 %v7073_v49, %v5264_v62  ;;  %vm11759_vm1 = vmmov %vm11752_vm0 }
 0xac9   :  { %vm11760_vm7 = vmmov %vm11752_vm0 }
 0xaca   :  { %v5266_v55 = vmul.f32 0.5, %v5265_v29 }
 0xacc   :  { %v5267_v2 = vsub.f32 1.5, %v5266_v55 }
 0xace   :  { %v5268_v7 = vmul.f32 %v7073_v49, %v5267_v2 }
 0xad0   :  { %v5272_v11 = vsel %vm5271_vm12, %v7073_v49, %v5268_v7  ;;  %vm11761_vm12 = vmmov %vm11752_vm0 }
 0xad1   :  { %v5277_v51 = vmul.f32 %v5275_v53, %v5272_v11 }
 0xad3   :  { %5279 = vrot.lane.b32.xlu2 %v5277_v51, %s7260_s16 }
 0xb2d   :  { %v5280_v57 = vpop.permute.xlu2 %5279 }
 0xb2e   :  { %6612 = vmatmul.msk.f32.vlgmr.msra.gmra.mxu3 %vm11747_vm9, %v5280_v57  ;;  %6614 = vmatmul.msk.f32.vlgmr.msrb.gmra.mxu0 %vm11748_vm2, %v5280_v57  ;;  %v5282_v6 = vmul.f32 %v5280_v57, %v5253_v40  ;;  %vm11762_vm9 = vmmov %vm11752_vm0 }
 0xb2f   :  { %6620 = vmatmul.msk.f32.vlgmr.msra.gmra.mxu2 %vm11749_vm11, %v5280_v57  ;;  %6628 = vmatmul.msk.f32.vlgmr.msrb.gmra.mxu1 %vm11750_vm5, %v5280_v57  ;;  %vm11763_vm2 = vmmov %vm11752_vm0 }
 0xb30   :  { %6621 = vmatpush.msk.msra.mxu3 %vm2481_vm13, %v5300_v52  ;;  %6623 = vmatpush.msk.msrb.mxu0 %vm2481_vm13, %v5301_v18  ;;  %v5287_v1 = vsub.f32 %v5285_v16, %v5282_v6  ;;  %vm11764_vm11 = vmmov %vm11752_vm0 }
 0xb31   :  { %6633 = vmatpush.msk.msra.mxu2 %vm2481_vm13, %v5514_v30  ;;  %6643 = vmatpush.msk.msrb.mxu1 %vm2481_vm13, %v5519_v10 }
 0xb36   :  { %6616 = vmatmul.msk.f32.vlgmr.msrb.gmra.mxu3 %vm11751_vm4, %v5280_v57  ;;  %6618 = vmatmul.msk.f32.vlgmr.msra.gmra.mxu0 %vm11752_vm0, %v5280_v57 }
 0xb37   :  { %6626 = vmatmul.msk.f32.vlgmr.msrb.gmra.mxu2 %vm11753_vm3, %v5280_v57  ;;  %6636 = vmatmul.msk.f32.vlgmr.msra.gmra.mxu1 %vm11754_vm10, %v5287_v1 }
 0xb38   :  { %6629 = vmatpush.msk.msrb.mxu3 %vm2481_vm13, %v5512_v27  ;;  %6631 = vmatpush.msk.msra.mxu0 %vm2481_vm13, %v5513_v31 }
 0xb39   :  { %6641 = vmatpush.msk.msrb.mxu2 %vm2481_vm13, %v5518_v9 }
 0xb3e   :  { %6622 = vmatmul.msk.f32.vlgmr.msra.gmra.mxu3 %vm11755_vm6, %v5280_v57  ;;  %6624 = vmatmul.msk.f32.vlgmr.msrb.gmra.mxu0 %vm11756_vm8, %v5280_v57 }
 0xb3f   :  { %6634 = vmatmul.msk.f32.vlgmr.msra.gmra.mxu2 %vm11757_vm14, %v5287_v1  ;;  %6644 = vmatmul.msk.f32.vlgmr.msrb.gmra.mxu1 %vm11758_vm15, %v5287_v1 }
 0xb40   :  { %6637 = vmatpush.msk.msra.mxu3 %vm2481_vm13, %v5516_v19  ;;  %6639 = vmatpush.msk.msrb.mxu0 %vm2481_vm13, %v5517_v36 }
 0xb46   :  { %6630 = vmatmul.msk.f32.vlgmr.msrb.gmra.mxu3 %vm11759_vm1, %v5287_v1  ;;  %6632 = vmatmul.msk.f32.vlgmr.msra.gmra.mxu0 %vm11760_vm7, %v5287_v1 }
 0xb47   :  { %6642 = vmatmul.msk.f32.vlgmr.msrb.gmra.mxu2 %vm11761_vm12, %v5287_v1  ;;  %6645 = vmatpush.msk.msrb.mxu3 %vm2481_vm13, %v5521_v21 }
 0xb4e   :  { %6638 = vmatmul.msk.f32.vlgmr.msra.gmra.mxu3 %vm11762_vm9, %v5287_v1  ;;  %6640 = vmatmul.msk.f32.vlgmr.msrb.gmra.mxu0 %vm11763_vm2, %v5287_v1 }
 0xb56   :  { %6646 = vmatmul.msk.f32.vlgmr.msrb.gmra.mxu3 %vm11764_vm11, %v5287_v1 }
 0xbab   :  { %v5362_v44 = vpop.f32.mrf.mxu0 }
 0xbac   :  { %v11080_v12 = vpop.f32.mrf.mxu1 }
 0xbb1   :  { %v5342_v63 = vpop.f32.mrf.mxu3 }
 0xbb2   :  { %v5422_v50 = vpop.f32.mrf.mxu2  ;;  %v5723_v51 = vmul.f32 %v5342_v63, %v10465_v25 }
 0xbb3   :  { %v5402_v33 = vpop.f32.mrf.mxu0 }
 0xbb4   :  { %v5726_v34 = vmul.f32 %v5402_v33, %v10763_v60  ;;  %v5620_v8 = vpop.f32.mrf.mxu1  ;;  %v5724_v60 = vmul.f32 %v5362_v44, %v11688_v4 }
 0xbb6   :  { %v5735_v58 = vadd.f32 %v5726_v34, %v5620_v8 }
 0xbb8   :  { %v5753_v61 = vmul.f32 0.044715, %v5735_v58  ;;  %v5744_v41 = vmul.f32 0.5, %v5735_v58 }
 0xbb9   :  { %v5382_v39 = vpop.f32.mrf.mxu3 }
 0xbba   :  { %v5762_v20 = vmul.f32 %v5753_v61, %v5735_v58  ;;  %v5482_v45 = vpop.f32.mrf.mxu2  ;;  %v5725_v56 = vmul.f32 %v5382_v39, %v10513_v54 }
 0xbbb   :  { %v5730_v23 = vmul.f32 %v5482_v45, %v10936_v3  ;;  %v5462_v40 = vpop.f32.mrf.mxu0 }
 0xbbc   :  { %v5771_v13 = vmul.f32 %v5762_v20, %v5735_v58  ;;  %v5700_v46 = vpop.f32.mrf.mxu1  ;;  %v5729_v5 = vmul.f32 %v5462_v40, %v10919_v35  ;;  %v11765_v35 = vld [vmem:[#allocation8_spill] sm:$0xff]  ;;  %v11766_v40 = vld [vmem:[#allocation15_spill] sm:$0xff] }
 0xbbd   :  { %v5739_v38 = vadd.f32 %v5730_v23, %v5700_v46 }
 0xbbe   :  { %v5780_v17 = vadd.f32 %v5771_v13, %v5735_v58 }
 0xbbf   :  { %v5757_v0 = vmul.f32 0.044715, %v5739_v38  ;;  %v5748_v63 = vmul.f32 0.5, %v5739_v38 }
 0xbc0   :  { %v5789_v14 = vmul.f32 0.7978846, %v5780_v17 }
 0xbc1   :  { %v5766_v59 = vmul.f32 %v5757_v0, %v5739_v38  ;;  %v5442_v32 = vpop.f32.mrf.mxu3 }
 0xbc2   :  { %7074 = vtanh.f32 %v5789_v14  ;;  %v5600_v43 = vpop.f32.mrf.mxu2  ;;  %v5728_v52 = vmul.f32 %v5442_v32, %v10905_v24  ;;  %v5727_v24 = vmul.f32 %v5422_v50, %v10885_v22 }
 0xbc3   :  { %v5775_v26 = vmul.f32 %v5766_v59, %v5739_v38  ;;  %v5734_v49 = vadd.f32 %v5725_v56, %v5600_v43  ;;  %v5580_v62 = vpop.f32.mrf.mxu0 }
 0xbc4   :  { %v5733_v29 = vadd.f32 %v5724_v60, %v5580_v62 }
 0xbc5   :  { %v5784_v3 = vadd.f32 %v5775_v26, %v5739_v38  ;;  %v5752_v55 = vmul.f32 0.044715, %v5734_v49  ;;  %v5743_v0 = vmul.f32 0.5, %v5734_v49 }
 0xbc6   :  { %v5751_v2 = vmul.f32 0.044715, %v5733_v29  ;;  %v5742_v26 = vmul.f32 0.5, %v5733_v29 }
 0xbc7   :  { %v5793_v53 = vmul.f32 0.7978846, %v5784_v3  ;;  %v5761_v7 = vmul.f32 %v5752_v55, %v5734_v49  ;;  %v5731_v55 = vmul.f32 %v11080_v12, %v10972_v28 }
 0xbc8   :  { %v7075_v11 = vpop.eup %7074  ;;  %v5760_v54 = vmul.f32 %v5751_v2, %v5733_v29 }
 0xbc9   :  { %v5807_v48 = vadd.f32 1.0, %v7075_v11  ;;  %7076 = vtanh.f32 %v5793_v53  ;;  %v5770_v4 = vmul.f32 %v5761_v7, %v5734_v49  ;;  %v5560_v37 = vpop.f32.mrf.mxu3  ;;  %v11767_v11 = vld [vmem:[#allocation17_spill] sm:$0xff] }
 0xbca   :  { %v5769_v18 = vmul.f32 %v5760_v54, %v5733_v29  ;;  %v11089_v15 = vadd.f32 %v5723_v51, %v5560_v37  ;;  %v5680_v47 = vpop.f32.mrf.mxu2  ;;  %v11768_v54 = vld [vmem:[#allocation9_spill] sm:$0xff] }
 0xbcb   :  { %v5816_v42 = vmul.f32 %v5807_v48, %v5744_v41  ;;  %v5779_v27 = vadd.f32 %v5770_v4, %v5734_v49  ;;  %v11091_v31 = vadd.f32 %v5729_v5, %v5680_v47  ;;  %v5660_v57 = vpop.f32.mrf.mxu0 }
 0xbcc   :  { %v5778_v25 = vadd.f32 %v5769_v18, %v5733_v29  ;;  %v5750_v30 = vmul.f32 0.044715, %v11089_v15  ;;  %v11094_v10 = vadd.f32 %v5728_v52, %v5660_v57  ;;  %v5741_v12 = vmul.f32 0.5, %v11089_v15 }
 0xbcd   :  { %v5825_v6 = vadd.f32 %v5816_v42, %v11765_v35  ;;  %v5788_v16 = vmul.f32 0.7978846, %v5779_v27  ;;  %v5756_v1 = vmul.f32 0.044715, %v11091_v31  ;;  %v5747_v27 = vmul.f32 0.5, %v11091_v31 }
 0xbce   :  { %v5787_v9 = vmul.f32 0.7978846, %v5778_v25  ;;  %v5759_v19 = vmul.f32 %v5750_v30, %v11089_v15  ;;  %v5755_v36 = vmul.f32 0.044715, %v11094_v10  ;;  %v5746_v35 = vmul.f32 0.5, %v11094_v10 }
 0xbcf   :  { %v7077_v21 = vpop.eup %7076  ;;  %v5834_v44 = vmul.f32 0.7072136, %v5825_v6  ;;  %7078 = vtanh.f32 %v5788_v16  ;;  %v5765_v33 = vmul.f32 %v5756_v1, %v11091_v31  ;;  %v11769_v1 = vld [vmem:[#allocation6_spill] sm:$0xff] }
 0xbd0   :  { %v5811_v34 = vadd.f32 1.0, %v7077_v21  ;;  %7080 = vtanh.f32 %v5787_v9  ;;  %v5768_v8 = vmul.f32 %v5759_v19, %v11089_v15  ;;  %v5764_v58 = vmul.f32 %v5755_v36, %v11094_v10  ;;  %v11770_v19 = vld [vmem:[#allocation10_spill] sm:$0xff] }
 0xbd1   :  { %5843 = vst [vmem:[%s11156_s7 + $0x18] sm:$0xff] %v5834_v44  ;;  %v5774_v22 = vmul.f32 %v5765_v33, %v11091_v31  ;;  %v5640_v50 = vpop.f32.mrf.mxu3  ;;  %v11771_v44 = vld [vmem:[#allocation12_spill] sm:$0xff] }
 0xbd2   :  { %v5820_v61 = vmul.f32 %v5811_v34, %v5748_v63  ;;  %v5777_v39 = vadd.f32 %v5768_v8, %v11089_v15  ;;  %v5773_v20 = vmul.f32 %v5764_v58, %v11094_v10  ;;  %v5736_v45 = vadd.f32 %v5727_v24, %v5640_v50 }
 0xbd3   :  { %v5783_v23 = vadd.f32 %v5774_v22, %v11091_v31 }
 0xbd4   :  { %v5829_v13 = vadd.f32 %v5820_v61, %v11766_v40  ;;  %v5786_v46 = vmul.f32 0.7978846, %v5777_v39  ;;  %v5782_v38 = vadd.f32 %v5773_v20, %v11094_v10  ;;  %v5754_v56 = vmul.f32 0.044715, %v5736_v45  ;;  %v11772_v61 = vld [vmem:[#allocation20_spill] sm:$0xff] }
 0xbd5   :  { %v7079_v17 = vpop.eup %7078  ;;  %v5792_v14 = vmul.f32 0.7978846, %v5783_v23  ;;  %v5745_v58 = vmul.f32 0.5, %v5736_v45 }
 0xbd6   :  { %v7081_v59 = vpop.eup %7080  ;;  %v5838_v32 = vmul.f32 0.7072136, %v5829_v13  ;;  %v5806_v60 = vadd.f32 1.0, %v7079_v17  ;;  %7082 = vtanh.f32 %v5786_v46  ;;  %v5791_v43 = vmul.f32 0.7978846, %v5782_v38  ;;  %v11773_v38 = vld [vmem:[#allocation63_spill] sm:$0xff] }
 0xbd7   :  { %v5805_v62 = vadd.f32 1.0, %v7081_v59  ;;  %7084 = vtanh.f32 %v5792_v14  ;;  %v5763_v3 = vmul.f32 %v5754_v56, %v5736_v45 }
 0xbd8   :  { %5847 = vst [vmem:[%s11156_s7 + $0x38] sm:$0xff] %v5838_v32  ;;  %v5815_v2 = vmul.f32 %v5806_v60, %v5743_v0  ;;  %7086 = vtanh.f32 %v5791_v43 }
 0xbd9   :  { %v5814_v49 = vmul.f32 %v5805_v62, %v5742_v26  ;;  %v5772_v53 = vmul.f32 %v5763_v3, %v5736_v45  ;;  %v5720_v7 = vpop.f32.mrf.mxu3 }
 0xbda   :  { %v5824_v51 = vadd.f32 %v5815_v2, %v11767_v11  ;;  %v5740_v41 = vadd.f32 %v5731_v55, %v5720_v7 }
 0xbdb   :  { %v5823_v29 = vadd.f32 %v5814_v49, %v11768_v54  ;;  %v5781_v48 = vadd.f32 %v5772_v53, %v5736_v45 }
 0xbdc   :  { %v7083_v5 = vpop.eup %7082  ;;  %v5833_v4 = vmul.f32 0.7072136, %v5824_v51  ;;  %v5758_v37 = vmul.f32 0.044715, %v5740_v41  ;;  %v5749_v40 = vmul.f32 0.5, %v5740_v41 }
 0xbdd   :  { %v7085_v52 = vpop.eup %7084  ;;  %v5832_v28 = vmul.f32 0.7072136, %v5823_v29  ;;  %v5804_v18 = vadd.f32 1.0, %v7083_v5  ;;  %v5790_v47 = vmul.f32 0.7978846, %v5781_v48 }
 0xbde   :  { %v7087_v42 = vpop.eup %7086  ;;  %5842 = vst [vmem:[%s11156_s7 + $0x10] sm:$0xff] %v5833_v4  ;;  %v5810_v57 = vadd.f32 1.0, %v7085_v52  ;;  %v5767_v25 = vmul.f32 %v5758_v37, %v5740_v41 }
 0xbdf   :  { %5841 = vst [vmem:[%s11156_s7 + $0x8] sm:$0xff] %v5832_v28  ;;  %v5813_v30 = vmul.f32 %v5804_v18, %v5741_v12  ;;  %v5809_v6 = vadd.f32 1.0, %v7087_v42  ;;  %7088 = vtanh.f32 %v5790_v47 }
 0xbe0   :  { %v5819_v15 = vmul.f32 %v5810_v57, %v5747_v27  ;;  %v5776_v16 = vmul.f32 %v5767_v25, %v5740_v41 }
 0xbe1   :  { %v5822_v24 = vadd.f32 %v5813_v30, %v11769_v1  ;;  %v5818_v9 = vmul.f32 %v5809_v6, %v5746_v35 }
 0xbe2   :  { %v5828_v36 = vadd.f32 %v5819_v15, %v11770_v19  ;;  %v5785_v21 = vadd.f32 %v5776_v16, %v5740_v41 }
 0xbe3   :  { %v5831_v31 = vmul.f32 0.7072136, %v5822_v24  ;;  %v5827_v63 = vadd.f32 %v5818_v9, %v11771_v44 }
 0xbe4   :  { %v5837_v33 = vmul.f32 0.7072136, %v5828_v36  ;;  %v5794_v34 = vmul.f32 0.7978846, %v5785_v21 }
 0xbe5   :  { %v7089_v8 = vpop.eup %7088  ;;  %5840 = vst [vmem:[%s11156_s7] sm:$0xff] %v5831_v31  ;;  %v5836_v10 = vmul.f32 0.7072136, %v5827_v63 }
 0xbe6   :  { %5846 = vst [vmem:[%s11156_s7 + $0x30] sm:$0xff] %v5837_v33  ;;  %v5808_v22 = vadd.f32 1.0, %v7089_v8  ;;  %7090 = vtanh.f32 %v5794_v34 }
 0xbe7   :  { %5845 = vst [vmem:[%s11156_s7 + $0x28] sm:$0xff] %v5836_v10 }
 0xbe8   :  { %v5817_v50 = vmul.f32 %v5808_v22, %v5745_v58 }
 0xbea   :  { %v5826_v39 = vadd.f32 %v5817_v50, %v11772_v61 }
 0xbec   :  { %v7091_v20 = vpop.eup %7090  ;;  %v5835_v23 = vmul.f32 0.7072136, %v5826_v39 }
 0xbed   :  { %v5812_v13 = vadd.f32 1.0, %v7091_v20 }
 0xbee   :  { %5844 = vst [vmem:[%s11156_s7 + $0x20] sm:$0xff] %v5835_v23 }
 0xbef   :  { %v5821_v46 = vmul.f32 %v5812_v13, %v5749_v40 }
 0xbf1   :  { %v5830_v45 = vadd.f32 %v5821_v46, %v11773_v38 }
 0xbf3   :  { %v5839_v17 = vmul.f32 0.7072136, %v5830_v45 }
 0xbf5   :  { %5848 = vst [vmem:[%s11156_s7 + $0x40] sm:$0xff] %v5839_v17 }

</bundles_post_ra>
